<compile_context>
chip_gen: v5e
topology: v5e:2x2
jax: 0.10.0
libtpu: 0.0.40
codegen_flags: <defaults>
</compile_context>

<pallas_src>
import math
import functools

import jax
import jax.numpy as jnp
from jax.experimental import pallas as pl
from jax.experimental.pallas import tpu as pltpu


def _round_up(x, m):
    return ((x + m - 1) // m) * m


def _make_gvp_kernel(use_cp: bool):
    """Build the GVP kernel body (n_cp_feats > 0 toggles the cross-product branch)."""

    def kernel(*refs):
        if use_cp:
            (feats_ref, vec_ref,
             wh_ref, wcp_src_ref, wcp_dst_ref,
             wu_h_ref, wu_cp_ref,
             w1_f_ref, w1_h_ref, w1_cp_ref, b1_ref,
             wg_ref, bg_ref,
             fo_ref, vo_ref) = refs
        else:
            (feats_ref, vec_ref,
             wh_ref,
             wu_h_ref,
             w1_f_ref, w1_h_ref, b1_ref,
             wg_ref, bg_ref,
             fo_ref, vo_ref) = refs

        eps = 1e-8
        cd = wh_ref.dtype                        # matmul operand dtype (f32 or bf16)

        _, tb, V = vec_ref.shape
        v = vec_ref[...]                          # (3, tb, V) in cd
        v3 = v.reshape(3 * tb, V)                 # fuse the 3 coords into one MXU panel

        # Vh = einsum('b v c, v h -> b h c') as one (3*tb, V) @ (V, H) matmul.
        vh3 = jnp.dot(v3, wh_ref[...], preferred_element_type=jnp.float32)       # (3tb, H)
        # Vu (Wh part) = einsum('b h c, h u -> b u c') as one (3*tb, H) @ (H, U).
        vu3 = jnp.dot(vh3.astype(cd), wu_h_ref[...],
                      preferred_element_type=jnp.float32)                         # (3tb, U)

        vh = vh3.reshape(3, tb, vh3.shape[1])
        # sh = _norm_no_nan(Vh) over the coordinate axis (f32).
        sh_h = jnp.sqrt(jnp.maximum(vh[0] * vh[0] + vh[1] * vh[1] + vh[2] * vh[2], eps))

        # s = cat(feats, sh [, sh_cp]); Linear is split per input block (no in-kernel concat).
        s_lin = (jnp.dot(feats_ref[...], w1_f_ref[...], preferred_element_type=jnp.float32)
                 + jnp.dot(sh_h.astype(cd), w1_h_ref[...], preferred_element_type=jnp.float32)
                 + b1_ref[...])

        if use_cp:
            src3 = jnp.dot(v3, wcp_src_ref[...], preferred_element_type=jnp.float32)  # (3tb, P)
            dst3 = jnp.dot(v3, wcp_dst_ref[...], preferred_element_type=jnp.float32)  # (3tb, P)
            P = src3.shape[1]
            src = src3.reshape(3, tb, P)
            dst = dst3.reshape(3, tb, P)
            # cross product along the coordinate axis (elementwise, f32 on the VPU).
            cp0 = src[1] * dst[2] - src[2] * dst[1]
            cp1 = src[2] * dst[0] - src[0] * dst[2]
            cp2 = src[0] * dst[1] - src[1] * dst[0]
            cp3 = jnp.concatenate([cp0, cp1, cp2], axis=0)                        # (3tb, P)
            vu3 = vu3 + jnp.dot(cp3.astype(cd), wu_cp_ref[...],
                                preferred_element_type=jnp.float32)
            sh_cp = jnp.sqrt(jnp.maximum(cp0 * cp0 + cp1 * cp1 + cp2 * cp2, eps))
            s_lin = s_lin + jnp.dot(sh_cp.astype(cd), w1_cp_ref[...],
                                    preferred_element_type=jnp.float32)

        # feats_out = SiLU(Linear(s))   (f32)
        feats_out = s_lin * jax.nn.sigmoid(s_lin)

        # vector gating: sigmoid(Linear(feats_out)), broadcast over the 3 coords.
        gate = jax.nn.sigmoid(
            jnp.dot(feats_out.astype(cd), wg_ref[...], preferred_element_type=jnp.float32)
            + bg_ref[...])                                                         # (tb, U)

        U = gate.shape[1]
        vu = vu3.reshape(3, tb, U)

        fo_ref[...] = feats_out.astype(fo_ref.dtype)
        # Lane-dense (tb, 3*U) output slab: one contiguous HBM block per grid step.
        vo_ref[:, 0 * U:1 * U] = (gate * vu[0]).astype(vo_ref.dtype)
        vo_ref[:, 1 * U:2 * U] = (gate * vu[1]).astype(vo_ref.dtype)
        vo_ref[:, 2 * U:3 * U] = (gate * vu[2]).astype(vo_ref.dtype)

    return kernel


def gvp_forward(feats, vectors_cf, params, *, n_cp_feats,
                tile_b=256, matmul_dtype=jnp.float32):
    """GVP forward.

    feats      : (B, N) f32
    vectors_cf : (3, B, V) f32 (coords-first; perf-preferred layout)
    Returns (feats_out (B, F_out) f32, vectors_out (B, 3, U) f32).
    """
    B, N = feats.shape
    C, Bv, V = vectors_cf.shape
    assert C == 3 and Bv == B
    use_cp = n_cp_feats > 0
    P = n_cp_feats

    Wh = params["Wh"]                              # (V, H)
    H = Wh.shape[1]
    Wu = params["Wu"]                              # (H + P, U)
    U = Wu.shape[1]
    W1 = params["W1"]                              # (N + H + P, F_out)
    b1 = params["b1"]                              # (F_out,)
    Wg = params["Wg"]                              # (F_out, U)
    bg = params["bg"]                              # (U,)
    F_out = W1.shape[1]

    cd = matmul_dtype

    # split weights so the kernel never concatenates its matmul inputs
    Wu_h, Wu_cp = Wu[:H], Wu[H:]
    W1_f, W1_h, W1_cp = W1[:N], W1[N:N + H], W1[N + H:]
    b1_2d = b1.reshape(1, F_out).astype(jnp.float32)   # biases stay f32 (added to f32 acc)
    bg_2d = bg.reshape(1, U).astype(jnp.float32)

    # matmul operands in the compute dtype (bf16 halves DMA bytes on v6e/v7x)
    feats_c = feats.astype(cd)
    vec_c = vectors_cf.astype(cd)
    Wh_c, Wu_h_c = Wh.astype(cd), Wu_h.astype(cd)
    W1_f_c, W1_h_c, Wg_c = W1_f.astype(cd), W1_h.astype(cd), Wg.astype(cd)

    # ---- tiling: big batch tiles, pl.cdiv grid, zero-pad tail ----
    tile_b = max(8, min(int(tile_b), _round_up(B, 8)))
    tile_b = _round_up(tile_b, 8)
    B_pad = _round_up(B, tile_b)
    if B_pad != B:
        feats_c = jnp.pad(feats_c, ((0, B_pad - B), (0, 0)))
        vec_c = jnp.pad(vec_c, ((0, 0), (0, B_pad - B), (0, 0)))
    grid = (pl.cdiv(B_pad, tile_b),)

    def full(arr):
        nd = arr.ndim
        return pl.BlockSpec(arr.shape, lambda i, _nd=nd: (0,) * _nd)
    # TODO(synk): weight/bias specs could use pipeline_mode=pl.Buffered(1) (constant index_map)
    # to halve their VMEM footprint once dims grow; negligible at these sizes.

    in_arrays = [feats_c, vec_c, Wh_c]
    in_specs = [
        pl.BlockSpec((tile_b, N), lambda i: (i, 0)),
        pl.BlockSpec((3, tile_b, V), lambda i: (0, i, 0)),
        full(Wh_c),
    ]
    if use_cp:
        Wcp = params["Wcp"]                        # (V, 2P)
        Wcp_src, Wcp_dst = Wcp[:, :P].astype(cd), Wcp[:, P:].astype(cd)
        Wu_cp_c, W1_cp_c = Wu_cp.astype(cd), W1_cp.astype(cd)
        in_arrays += [Wcp_src, Wcp_dst, Wu_h_c, Wu_cp_c,
                      W1_f_c, W1_h_c, W1_cp_c, b1_2d, Wg_c, bg_2d]
        in_specs += [full(Wcp_src), full(Wcp_dst), full(Wu_h_c), full(Wu_cp_c),
                     full(W1_f_c), full(W1_h_c), full(W1_cp_c),
                     full(b1_2d), full(Wg_c), full(bg_2d)]
    else:
        in_arrays += [Wu_h_c, W1_f_c, W1_h_c, b1_2d, Wg_c, bg_2d]
        in_specs += [full(Wu_h_c), full(W1_f_c), full(W1_h_c),
                     full(b1_2d), full(Wg_c), full(bg_2d)]

    out_shapes = (jax.ShapeDtypeStruct((B_pad, F_out), jnp.float32),
                  jax.ShapeDtypeStruct((B_pad, 3 * U), jnp.float32))
    out_specs = (pl.BlockSpec((tile_b, F_out), lambda i: (i, 0)),
                 pl.BlockSpec((tile_b, 3 * U), lambda i: (i, 0)))

    feats_out, vec_out_flat = pl.pallas_call(
        _make_gvp_kernel(use_cp),
        out_shape=out_shapes,
        grid_spec=pltpu.PrefetchScalarGridSpec(
            num_scalar_prefetch=0,
            grid=grid,
            in_specs=in_specs,
            out_specs=out_specs,
        ),
        compiler_params=pltpu.CompilerParams(
            dimension_semantics=("parallel",)),
    )(*in_arrays)

    if B_pad != B:
        feats_out = feats_out[:B]
        vec_out_flat = vec_out_flat[:B]

    # (B, 3*U) -> (B, 3, U): contiguous reshape, no data movement.
    vectors_out = vec_out_flat.reshape(B, 3, U)
    return feats_out, vectors_out


def gvp_reference(feats, vectors, params, n_cp_feats):
    """Pure-JAX replica of the PyTorch forward (torch layout: vectors (B, V, 3))."""
    eps = 1e-8
    Wh, Wu, W1, b1, Wg, bg = (params["Wh"], params["Wu"], params["W1"],
                              params["b1"], params["Wg"], params["bg"])
    Vh = jnp.einsum('bvc,vh->bhc', vectors, Wh)
    if n_cp_feats > 0:
        Wcp = params["Wcp"]
        Vcp = jnp.einsum('bvc,vp->bpc', vectors, Wcp)
        cp_src, cp_dst = Vcp[:, :n_cp_feats], Vcp[:, n_cp_feats:]
        cp = jnp.cross(cp_src, cp_dst, axis=-1)
        Vh = jnp.concatenate([Vh, cp], axis=1)
    Vu = jnp.einsum('bhc,hu->buc', Vh, Wu)
    sh = jnp.sqrt(jnp.maximum(jnp.sum(Vh * Vh, axis=-1), eps))
    s = jnp.concatenate([feats, sh], axis=1)
    fo = jax.nn.silu(s @ W1 + b1)
    gating = fo @ Wg + bg
    vo = jax.nn.sigmoid(gating)[..., None] * Vu           # (B, U, 3)
    return fo, vo


def init_params(key, *, dim_vectors_in, dim_vectors_out, dim_feats_in, dim_feats_out,
                n_cp_feats=0, hidden_vectors=None):
    """Deterministic synthetic init matching the shapes/ranges of GVP.__init__."""
    V, U, N, F = dim_vectors_in, dim_vectors_out, dim_feats_in, dim_feats_out
    H = max(V, U) if hidden_vectors is None else hidden_vectors
    P = n_cp_feats
    ks = jax.random.split(key, 8)
    u = lambda k, shape, b: jax.random.uniform(k, shape, jnp.float32, -b, b)

    params = {}
    params["Wh"] = u(ks[0], (V, H), 1.0 / math.sqrt(V))
    if P > 0:
        params["Wcp"] = u(ks[1], (V, 2 * P), 1.0 / math.sqrt(V))
    wu_in = H + P
    params["Wu"] = u(ks[2], (wu_in, U), 1.0 / math.sqrt(wu_in))
    lin_in = H + P + N
    k1 = 1.0 / math.sqrt(lin_in)
    params["W1"] = u(ks[3], (lin_in, F), k1)        # stored (in, out)
    params["b1"] = u(ks[4], (F,), k1)
    kg = 1.0 / math.sqrt(F)
    params["Wg"] = u(ks[5], (F, U), kg)             # stored (in, out)
    params["bg"] = u(ks[6], (U,), kg)
    return params, H


if __name__ == "__main__":
    # small shapes consistent with the module; B=512 / tile_b=256 -> grid of 2 (even, so the
    # "parallel" axis shards cleanly across both TensorCores on v7x).
    B = 512
    dim_vectors_in = 16    # V
    dim_vectors_out = 16   # U
    dim_feats_in = 32      # N
    dim_feats_out = 32     # F_out
    n_cp_feats = 4         # P (exercise the cross-product branch)

    key = jax.random.PRNGKey(0)
    kp, kf, kv = jax.random.split(key, 3)
    params, H = init_params(
        kp,
        dim_vectors_in=dim_vectors_in, dim_vectors_out=dim_vectors_out,
        dim_feats_in=dim_feats_in, dim_feats_out=dim_feats_out,
        n_cp_feats=n_cp_feats)

    feats = jax.random.normal(kf, (B, dim_feats_in), jnp.float32)
    vectors_cf = jax.random.normal(kv, (3, B, dim_vectors_in), jnp.float32)  # coords-first

    # f32-operand path (exact check on all generations, incl. v5e).
    run_f32 = jax.jit(functools.partial(
        gvp_forward, n_cp_feats=n_cp_feats, tile_b=256, matmul_dtype=jnp.float32))
    fo32, vo32 = run_f32(feats, vectors_cf, params)
    jax.block_until_ready((fo32, vo32))

    # bf16 matmul-operand path (MXU-native on v6e/v7x; accumulation stays f32).
    run_bf16 = jax.jit(functools.partial(
        gvp_forward, n_cp_feats=n_cp_feats, tile_b=256, matmul_dtype=jnp.bfloat16))
    fo16, vo16 = run_bf16(feats, vectors_cf, params)
    jax.block_until_ready((fo16, vo16))

    # verify against a pure-JAX reference of the PyTorch forward (transposes are test-only).
    vectors_torch = jnp.transpose(vectors_cf, (1, 2, 0))          # (B, V, 3)
    fo_ref, vo_ref = gvp_reference(feats, vectors_torch, params, n_cp_feats)
    vo_ref_cm = jnp.transpose(vo_ref, (0, 2, 1))                  # (B, 3, U)

    assert fo32.shape == (B, dim_feats_out)
    assert vo32.shape == (B, 3, dim_vectors_out)
    assert jnp.allclose(fo32, fo_ref, atol=1e-4, rtol=1e-4)
    assert jnp.allclose(vo32, vo_ref_cm, atol=1e-4, rtol=1e-4)
    # bf16 operands lose mantissa -> looser tolerance vs. the f32 reference.
    assert jnp.allclose(fo16, fo_ref, atol=5e-2, rtol=5e-2)
    assert jnp.allclose(vo16, vo_ref_cm, atol=5e-2, rtol=5e-2)

    print("KERNEL_OK")
</pallas_src>

<mosaic_0001>
module attributes {stable_mosaic.version = 11 : i64} {
  func.func @kernel(%arg0: i32, %arg1: memref<256x32xf32, #tpu.memory_space<vmem>>, %arg2: memref<3x256x16xf32, #tpu.memory_space<vmem>>, %arg3: memref<16x16xf32, #tpu.memory_space<vmem>>, %arg4: memref<16x4xf32, #tpu.memory_space<vmem>>, %arg5: memref<16x4xf32, #tpu.memory_space<vmem>>, %arg6: memref<16x16xf32, #tpu.memory_space<vmem>>, %arg7: memref<4x16xf32, #tpu.memory_space<vmem>>, %arg8: memref<32x32xf32, #tpu.memory_space<vmem>>, %arg9: memref<16x32xf32, #tpu.memory_space<vmem>>, %arg10: memref<4x32xf32, #tpu.memory_space<vmem>>, %arg11: memref<1x32xf32, #tpu.memory_space<vmem>>, %arg12: memref<32x16xf32, #tpu.memory_space<vmem>>, %arg13: memref<1x16xf32, #tpu.memory_space<vmem>>, %arg14: memref<256x32xf32, #tpu.memory_space<vmem>>, %arg15: memref<256x48xf32, #tpu.memory_space<vmem>>) attributes {dimension_semantics = [#tpu.dimension_semantics<parallel>], iteration_bounds = array<i64: 2>, scalar_prefetch = 0 : i64, scratch_operands = 0 : i64, tpu.core_type = #tpu.core_type<tc>, window_params = [{transform_indices = @transform_0, window_bounds = array<i64: 256, 32>}, {transform_indices = @transform_1, window_bounds = array<i64: 3, 256, 16>}, {pipeline_mode = #tpu.pipeline_mode<synchronous>, transform_indices = @transform_2, window_bounds = array<i64: 16, 16>}, {pipeline_mode = #tpu.pipeline_mode<synchronous>, transform_indices = @transform_3, window_bounds = array<i64: 16, 4>}, {pipeline_mode = #tpu.pipeline_mode<synchronous>, transform_indices = @transform_4, window_bounds = array<i64: 16, 4>}, {pipeline_mode = #tpu.pipeline_mode<synchronous>, transform_indices = @transform_5, window_bounds = array<i64: 16, 16>}, {pipeline_mode = #tpu.pipeline_mode<synchronous>, transform_indices = @transform_6, window_bounds = array<i64: 4, 16>}, {pipeline_mode = #tpu.pipeline_mode<synchronous>, transform_indices = @transform_7, window_bounds = array<i64: 32, 32>}, {pipeline_mode = #tpu.pipeline_mode<synchronous>, transform_indices = @transform_8, window_bounds = array<i64: 16, 32>}, {pipeline_mode = #tpu.pipeline_mode<synchronous>, transform_indices = @transform_9, window_bounds = array<i64: 4, 32>}, {pipeline_mode = #tpu.pipeline_mode<synchronous>, transform_indices = @transform_10, window_bounds = array<i64: 1, 32>}, {pipeline_mode = #tpu.pipeline_mode<synchronous>, transform_indices = @transform_11, window_bounds = array<i64: 32, 16>}, {pipeline_mode = #tpu.pipeline_mode<synchronous>, transform_indices = @transform_12, window_bounds = array<i64: 1, 16>}, {transform_indices = @transform_13, window_bounds = array<i64: 256, 32>}, {transform_indices = @transform_14, window_bounds = array<i64: 256, 48>}]} {
    %c0 = arith.constant 0 : index
    %c0_0 = arith.constant 0 : index
    %c0_1 = arith.constant 0 : index
    %0 = vector.load %arg2[%c0, %c0_0, %c0_1] : memref<3x256x16xf32, #tpu.memory_space<vmem>>, vector<3x256x16xf32>
    %1 = vector.shape_cast %0 : vector<3x256x16xf32> to vector<768x16xf32>
    %c0_2 = arith.constant 0 : index
    %c0_3 = arith.constant 0 : index
    %2 = vector.load %arg3[%c0_2, %c0_3] : memref<16x16xf32, #tpu.memory_space<vmem>>, vector<16x16xf32>
    %cst = arith.constant dense<0.000000e+00> : vector<768x16xf32>
    %3 = tpu.matmul %1, %2, %cst {dimension_numbers = #tpu.dot_dimension_numbers<[1], [0], [0], [1], [0, 0, 1, 1], [], []>} : vector<768x16xf32>, vector<16x16xf32>, vector<768x16xf32> -> vector<768x16xf32>
    %c0_4 = arith.constant 0 : index
    %c0_5 = arith.constant 0 : index
    %4 = vector.load %arg6[%c0_4, %c0_5] : memref<16x16xf32, #tpu.memory_space<vmem>>, vector<16x16xf32>
    %cst_6 = arith.constant dense<0.000000e+00> : vector<768x16xf32>
    %5 = tpu.matmul %3, %4, %cst_6 {dimension_numbers = #tpu.dot_dimension_numbers<[1], [0], [0], [1], [0, 0, 1, 1], [], []>} : vector<768x16xf32>, vector<16x16xf32>, vector<768x16xf32> -> vector<768x16xf32>
    %6 = vector.shape_cast %3 : vector<768x16xf32> to vector<3x256x16xf32>
    %7 = vector.extract_strided_slice %6 {offsets = [0, 0, 0], sizes = [1, 256, 16], strides = [1, 1, 1]} : vector<3x256x16xf32> to vector<1x256x16xf32>
    %8 = vector.shape_cast %7 : vector<1x256x16xf32> to vector<256x16xf32>
    %9 = vector.extract_strided_slice %6 {offsets = [0, 0, 0], sizes = [1, 256, 16], strides = [1, 1, 1]} : vector<3x256x16xf32> to vector<1x256x16xf32>
    %10 = vector.shape_cast %9 : vector<1x256x16xf32> to vector<256x16xf32>
    %11 = arith.mulf %8, %10 : vector<256x16xf32>
    %12 = vector.extract_strided_slice %6 {offsets = [1, 0, 0], sizes = [1, 256, 16], strides = [1, 1, 1]} : vector<3x256x16xf32> to vector<1x256x16xf32>
    %13 = vector.shape_cast %12 : vector<1x256x16xf32> to vector<256x16xf32>
    %14 = vector.extract_strided_slice %6 {offsets = [1, 0, 0], sizes = [1, 256, 16], strides = [1, 1, 1]} : vector<3x256x16xf32> to vector<1x256x16xf32>
    %15 = vector.shape_cast %14 : vector<1x256x16xf32> to vector<256x16xf32>
    %16 = arith.mulf %13, %15 : vector<256x16xf32>
    %17 = arith.addf %11, %16 : vector<256x16xf32>
    %18 = vector.extract_strided_slice %6 {offsets = [2, 0, 0], sizes = [1, 256, 16], strides = [1, 1, 1]} : vector<3x256x16xf32> to vector<1x256x16xf32>
    %19 = vector.shape_cast %18 : vector<1x256x16xf32> to vector<256x16xf32>
    %20 = vector.extract_strided_slice %6 {offsets = [2, 0, 0], sizes = [1, 256, 16], strides = [1, 1, 1]} : vector<3x256x16xf32> to vector<1x256x16xf32>
    %21 = vector.shape_cast %20 : vector<1x256x16xf32> to vector<256x16xf32>
    %22 = arith.mulf %19, %21 : vector<256x16xf32>
    %23 = arith.addf %17, %22 : vector<256x16xf32>
    %cst_7 = arith.constant 9.99999993E-9 : f32
    %24 = vector.broadcast %cst_7 : f32 to vector<256x16xf32>
    %25 = arith.maximumf %23, %24 : vector<256x16xf32>
    %26 = math.sqrt %25 : vector<256x16xf32>
    %c0_8 = arith.constant 0 : index
    %c0_9 = arith.constant 0 : index
    %27 = vector.load %arg1[%c0_8, %c0_9] : memref<256x32xf32, #tpu.memory_space<vmem>>, vector<256x32xf32>
    %c0_10 = arith.constant 0 : index
    %c0_11 = arith.constant 0 : index
    %28 = vector.load %arg8[%c0_10, %c0_11] : memref<32x32xf32, #tpu.memory_space<vmem>>, vector<32x32xf32>
    %cst_12 = arith.constant dense<0.000000e+00> : vector<256x32xf32>
    %29 = tpu.matmul %27, %28, %cst_12 {dimension_numbers = #tpu.dot_dimension_numbers<[1], [0], [0], [1], [0, 0, 1, 1], [], []>} : vector<256x32xf32>, vector<32x32xf32>, vector<256x32xf32> -> vector<256x32xf32>
    %c0_13 = arith.constant 0 : index
    %c0_14 = arith.constant 0 : index
    %30 = vector.load %arg9[%c0_13, %c0_14] : memref<16x32xf32, #tpu.memory_space<vmem>>, vector<16x32xf32>
    %cst_15 = arith.constant dense<0.000000e+00> : vector<256x32xf32>
    %31 = tpu.matmul %26, %30, %cst_15 {dimension_numbers = #tpu.dot_dimension_numbers<[1], [0], [0], [1], [0, 0, 1, 1], [], []>} : vector<256x16xf32>, vector<16x32xf32>, vector<256x32xf32> -> vector<256x32xf32>
    %32 = arith.addf %29, %31 : vector<256x32xf32>
    %c0_16 = arith.constant 0 : index
    %c0_17 = arith.constant 0 : index
    %33 = vector.load %arg11[%c0_16, %c0_17] : memref<1x32xf32, #tpu.memory_space<vmem>>, vector<1x32xf32>
    %34 = vector.broadcast %33 : vector<1x32xf32> to vector<256x32xf32>
    %35 = arith.addf %32, %34 : vector<256x32xf32>
    %c0_18 = arith.constant 0 : index
    %c0_19 = arith.constant 0 : index
    %36 = vector.load %arg4[%c0_18, %c0_19] : memref<16x4xf32, #tpu.memory_space<vmem>>, vector<16x4xf32>
    %cst_20 = arith.constant dense<0.000000e+00> : vector<768x4xf32>
    %37 = tpu.matmul %1, %36, %cst_20 {dimension_numbers = #tpu.dot_dimension_numbers<[1], [0], [0], [1], [0, 0, 1, 1], [], []>} : vector<768x16xf32>, vector<16x4xf32>, vector<768x4xf32> -> vector<768x4xf32>
    %c0_21 = arith.constant 0 : index
    %c0_22 = arith.constant 0 : index
    %38 = vector.load %arg5[%c0_21, %c0_22] : memref<16x4xf32, #tpu.memory_space<vmem>>, vector<16x4xf32>
    %cst_23 = arith.constant dense<0.000000e+00> : vector<768x4xf32>
    %39 = tpu.matmul %1, %38, %cst_23 {dimension_numbers = #tpu.dot_dimension_numbers<[1], [0], [0], [1], [0, 0, 1, 1], [], []>} : vector<768x16xf32>, vector<16x4xf32>, vector<768x4xf32> -> vector<768x4xf32>
    %40 = vector.shape_cast %37 : vector<768x4xf32> to vector<3x256x4xf32>
    %41 = vector.shape_cast %39 : vector<768x4xf32> to vector<3x256x4xf32>
    %42 = vector.extract_strided_slice %40 {offsets = [1, 0, 0], sizes = [1, 256, 4], strides = [1, 1, 1]} : vector<3x256x4xf32> to vector<1x256x4xf32>
    %43 = vector.shape_cast %42 : vector<1x256x4xf32> to vector<256x4xf32>
    %44 = vector.extract_strided_slice %41 {offsets = [2, 0, 0], sizes = [1, 256, 4], strides = [1, 1, 1]} : vector<3x256x4xf32> to vector<1x256x4xf32>
    %45 = vector.shape_cast %44 : vector<1x256x4xf32> to vector<256x4xf32>
    %46 = arith.mulf %43, %45 : vector<256x4xf32>
    %47 = vector.extract_strided_slice %40 {offsets = [2, 0, 0], sizes = [1, 256, 4], strides = [1, 1, 1]} : vector<3x256x4xf32> to vector<1x256x4xf32>
    %48 = vector.shape_cast %47 : vector<1x256x4xf32> to vector<256x4xf32>
    %49 = vector.extract_strided_slice %41 {offsets = [1, 0, 0], sizes = [1, 256, 4], strides = [1, 1, 1]} : vector<3x256x4xf32> to vector<1x256x4xf32>
    %50 = vector.shape_cast %49 : vector<1x256x4xf32> to vector<256x4xf32>
    %51 = arith.mulf %48, %50 : vector<256x4xf32>
    %52 = arith.subf %46, %51 : vector<256x4xf32>
    %53 = vector.extract_strided_slice %40 {offsets = [2, 0, 0], sizes = [1, 256, 4], strides = [1, 1, 1]} : vector<3x256x4xf32> to vector<1x256x4xf32>
    %54 = vector.shape_cast %53 : vector<1x256x4xf32> to vector<256x4xf32>
    %55 = vector.extract_strided_slice %41 {offsets = [0, 0, 0], sizes = [1, 256, 4], strides = [1, 1, 1]} : vector<3x256x4xf32> to vector<1x256x4xf32>
    %56 = vector.shape_cast %55 : vector<1x256x4xf32> to vector<256x4xf32>
    %57 = arith.mulf %54, %56 : vector<256x4xf32>
    %58 = vector.extract_strided_slice %40 {offsets = [0, 0, 0], sizes = [1, 256, 4], strides = [1, 1, 1]} : vector<3x256x4xf32> to vector<1x256x4xf32>
    %59 = vector.shape_cast %58 : vector<1x256x4xf32> to vector<256x4xf32>
    %60 = vector.extract_strided_slice %41 {offsets = [2, 0, 0], sizes = [1, 256, 4], strides = [1, 1, 1]} : vector<3x256x4xf32> to vector<1x256x4xf32>
    %61 = vector.shape_cast %60 : vector<1x256x4xf32> to vector<256x4xf32>
    %62 = arith.mulf %59, %61 : vector<256x4xf32>
    %63 = arith.subf %57, %62 : vector<256x4xf32>
    %64 = vector.extract_strided_slice %40 {offsets = [0, 0, 0], sizes = [1, 256, 4], strides = [1, 1, 1]} : vector<3x256x4xf32> to vector<1x256x4xf32>
    %65 = vector.shape_cast %64 : vector<1x256x4xf32> to vector<256x4xf32>
    %66 = vector.extract_strided_slice %41 {offsets = [1, 0, 0], sizes = [1, 256, 4], strides = [1, 1, 1]} : vector<3x256x4xf32> to vector<1x256x4xf32>
    %67 = vector.shape_cast %66 : vector<1x256x4xf32> to vector<256x4xf32>
    %68 = arith.mulf %65, %67 : vector<256x4xf32>
    %69 = vector.extract_strided_slice %40 {offsets = [1, 0, 0], sizes = [1, 256, 4], strides = [1, 1, 1]} : vector<3x256x4xf32> to vector<1x256x4xf32>
    %70 = vector.shape_cast %69 : vector<1x256x4xf32> to vector<256x4xf32>
    %71 = vector.extract_strided_slice %41 {offsets = [0, 0, 0], sizes = [1, 256, 4], strides = [1, 1, 1]} : vector<3x256x4xf32> to vector<1x256x4xf32>
    %72 = vector.shape_cast %71 : vector<1x256x4xf32> to vector<256x4xf32>
    %73 = arith.mulf %70, %72 : vector<256x4xf32>
    %74 = arith.subf %68, %73 : vector<256x4xf32>
    %75 = tpu.concatenate %52, %63, %74 in 0 : vector<256x4xf32>, vector<256x4xf32>, vector<256x4xf32> -> vector<768x4xf32>
    %c0_24 = arith.constant 0 : index
    %c0_25 = arith.constant 0 : index
    %76 = vector.load %arg7[%c0_24, %c0_25] : memref<4x16xf32, #tpu.memory_space<vmem>>, vector<4x16xf32>
    %cst_26 = arith.constant dense<0.000000e+00> : vector<768x16xf32>
    %77 = tpu.matmul %75, %76, %cst_26 {dimension_numbers = #tpu.dot_dimension_numbers<[1], [0], [0], [1], [0, 0, 1, 1], [], []>} : vector<768x4xf32>, vector<4x16xf32>, vector<768x16xf32> -> vector<768x16xf32>
    %78 = arith.addf %5, %77 : vector<768x16xf32>
    %79 = arith.mulf %52, %52 : vector<256x4xf32>
    %80 = arith.mulf %63, %63 : vector<256x4xf32>
    %81 = arith.addf %79, %80 : vector<256x4xf32>
    %82 = arith.mulf %74, %74 : vector<256x4xf32>
    %83 = arith.addf %81, %82 : vector<256x4xf32>
    %cst_27 = arith.constant 9.99999993E-9 : f32
    %84 = vector.broadcast %cst_27 : f32 to vector<256x4xf32>
    %85 = arith.maximumf %83, %84 : vector<256x4xf32>
    %86 = math.sqrt %85 : vector<256x4xf32>
    %c0_28 = arith.constant 0 : index
    %c0_29 = arith.constant 0 : index
    %87 = vector.load %arg10[%c0_28, %c0_29] : memref<4x32xf32, #tpu.memory_space<vmem>>, vector<4x32xf32>
    %cst_30 = arith.constant dense<0.000000e+00> : vector<256x32xf32>
    %88 = tpu.matmul %86, %87, %cst_30 {dimension_numbers = #tpu.dot_dimension_numbers<[1], [0], [0], [1], [0, 0, 1, 1], [], []>} : vector<256x4xf32>, vector<4x32xf32>, vector<256x32xf32> -> vector<256x32xf32>
    %89 = arith.addf %35, %88 : vector<256x32xf32>
    %90 = arith.negf %89 : vector<256x32xf32>
    %91 = math.exp %90 : vector<256x32xf32>
    %cst_31 = arith.constant 1.000000e+00 : f32
    %92 = vector.broadcast %cst_31 : f32 to vector<256x32xf32>
    %93 = arith.addf %92, %91 : vector<256x32xf32>
    %94 = arith.divf %92, %93 : vector<256x32xf32>
    %95 = arith.mulf %89, %94 : vector<256x32xf32>
    %c0_32 = arith.constant 0 : index
    %c0_33 = arith.constant 0 : index
    %96 = vector.load %arg12[%c0_32, %c0_33] : memref<32x16xf32, #tpu.memory_space<vmem>>, vector<32x16xf32>
    %cst_34 = arith.constant dense<0.000000e+00> : vector<256x16xf32>
    %97 = tpu.matmul %95, %96, %cst_34 {dimension_numbers = #tpu.dot_dimension_numbers<[1], [0], [0], [1], [0, 0, 1, 1], [], []>} : vector<256x32xf32>, vector<32x16xf32>, vector<256x16xf32> -> vector<256x16xf32>
    %c0_35 = arith.constant 0 : index
    %c0_36 = arith.constant 0 : index
    %98 = vector.load %arg13[%c0_35, %c0_36] : memref<1x16xf32, #tpu.memory_space<vmem>>, vector<1x16xf32>
    %99 = vector.broadcast %98 : vector<1x16xf32> to vector<256x16xf32>
    %100 = arith.addf %97, %99 : vector<256x16xf32>
    %101 = arith.negf %100 : vector<256x16xf32>
    %102 = math.exp %101 : vector<256x16xf32>
    %cst_37 = arith.constant 1.000000e+00 : f32
    %103 = vector.broadcast %cst_37 : f32 to vector<256x16xf32>
    %104 = arith.addf %103, %102 : vector<256x16xf32>
    %105 = arith.divf %103, %104 : vector<256x16xf32>
    %106 = vector.shape_cast %78 : vector<768x16xf32> to vector<3x256x16xf32>
    %c0_38 = arith.constant 0 : index
    %c0_39 = arith.constant 0 : index
    %107 = vector.load %arg14[%c0_38, %c0_39] : memref<256x32xf32, #tpu.memory_space<vmem>>, vector<256x32xf32>
    tpu.vector_store %arg14[%c0_38, %c0_39], %95 {strides = array<i32>} : memref<256x32xf32, #tpu.memory_space<vmem>>, vector<256x32xf32>,
    %108 = vector.extract_strided_slice %106 {offsets = [0, 0, 0], sizes = [1, 256, 16], strides = [1, 1, 1]} : vector<3x256x16xf32> to vector<1x256x16xf32>
    %109 = vector.shape_cast %108 : vector<1x256x16xf32> to vector<256x16xf32>
    %110 = arith.mulf %105, %109 : vector<256x16xf32>
    %c0_40 = arith.constant 0 : index
    %c0_41 = arith.constant 0 : index
    %111 = vector.load %arg15[%c0_40, %c0_41] : memref<256x48xf32, #tpu.memory_space<vmem>>, vector<256x16xf32>
    tpu.vector_store %arg15[%c0_40, %c0_41], %110 {strides = array<i32>} : memref<256x48xf32, #tpu.memory_space<vmem>>, vector<256x16xf32>,
    %112 = vector.extract_strided_slice %106 {offsets = [1, 0, 0], sizes = [1, 256, 16], strides = [1, 1, 1]} : vector<3x256x16xf32> to vector<1x256x16xf32>
    %113 = vector.shape_cast %112 : vector<1x256x16xf32> to vector<256x16xf32>
    %114 = arith.mulf %105, %113 : vector<256x16xf32>
    %c0_42 = arith.constant 0 : index
    %c16 = arith.constant 16 : index
    %115 = vector.load %arg15[%c0_42, %c16] : memref<256x48xf32, #tpu.memory_space<vmem>>, vector<256x16xf32>
    tpu.vector_store %arg15[%c0_42, %c16], %114 {strides = array<i32>} : memref<256x48xf32, #tpu.memory_space<vmem>>, vector<256x16xf32>,
    %116 = vector.extract_strided_slice %106 {offsets = [2, 0, 0], sizes = [1, 256, 16], strides = [1, 1, 1]} : vector<3x256x16xf32> to vector<1x256x16xf32>
    %117 = vector.shape_cast %116 : vector<1x256x16xf32> to vector<256x16xf32>
    %118 = arith.mulf %105, %117 : vector<256x16xf32>
    %c0_43 = arith.constant 0 : index
    %c32 = arith.constant 32 : index
    %119 = vector.load %arg15[%c0_43, %c32] : memref<256x48xf32, #tpu.memory_space<vmem>>, vector<256x16xf32>
    tpu.vector_store %arg15[%c0_43, %c32], %118 {strides = array<i32>} : memref<256x48xf32, #tpu.memory_space<vmem>>, vector<256x16xf32>,
    return
  }
  func.func @transform_0(%arg0: i32) -> (i32, i32) {
    %c0_i32 = arith.constant 0 : i32
    %c0_i32_0 = arith.constant 0 : i32
    return %arg0, %c0_i32 : i32, i32
  }
  func.func @transform_1(%arg0: i32) -> (i32, i32, i32) {
    %c0_i32 = arith.constant 0 : i32
    %c0_i32_0 = arith.constant 0 : i32
    %c0_i32_1 = arith.constant 0 : i32
    return %c0_i32, %arg0, %c0_i32_0 : i32, i32, i32
  }
  func.func @transform_2(%arg0: i32) -> (i32, i32) {
    %c0_i32 = arith.constant 0 : i32
    %c0_i32_0 = arith.constant 0 : i32
    %c0_i32_1 = arith.constant 0 : i32
    return %c0_i32, %c0_i32_0 : i32, i32
  }
  func.func @transform_3(%arg0: i32) -> (i32, i32) {
    %c0_i32 = arith.constant 0 : i32
    %c0_i32_0 = arith.constant 0 : i32
    %c0_i32_1 = arith.constant 0 : i32
    return %c0_i32, %c0_i32_0 : i32, i32
  }
  func.func @transform_4(%arg0: i32) -> (i32, i32) {
    %c0_i32 = arith.constant 0 : i32
    %c0_i32_0 = arith.constant 0 : i32
    %c0_i32_1 = arith.constant 0 : i32
    return %c0_i32, %c0_i32_0 : i32, i32
  }
  func.func @transform_5(%arg0: i32) -> (i32, i32) {
    %c0_i32 = arith.constant 0 : i32
    %c0_i32_0 = arith.constant 0 : i32
    %c0_i32_1 = arith.constant 0 : i32
    return %c0_i32, %c0_i32_0 : i32, i32
  }
  func.func @transform_6(%arg0: i32) -> (i32, i32) {
    %c0_i32 = arith.constant 0 : i32
    %c0_i32_0 = arith.constant 0 : i32
    %c0_i32_1 = arith.constant 0 : i32
    return %c0_i32, %c0_i32_0 : i32, i32
  }
  func.func @transform_7(%arg0: i32) -> (i32, i32) {
    %c0_i32 = arith.constant 0 : i32
    %c0_i32_0 = arith.constant 0 : i32
    %c0_i32_1 = arith.constant 0 : i32
    return %c0_i32, %c0_i32_0 : i32, i32
  }
  func.func @transform_8(%arg0: i32) -> (i32, i32) {
    %c0_i32 = arith.constant 0 : i32
    %c0_i32_0 = arith.constant 0 : i32
    %c0_i32_1 = arith.constant 0 : i32
    return %c0_i32, %c0_i32_0 : i32, i32
  }
  func.func @transform_9(%arg0: i32) -> (i32, i32) {
    %c0_i32 = arith.constant 0 : i32
    %c0_i32_0 = arith.constant 0 : i32
    %c0_i32_1 = arith.constant 0 : i32
    return %c0_i32, %c0_i32_0 : i32, i32
  }
  func.func @transform_10(%arg0: i32) -> (i32, i32) {
    %c0_i32 = arith.constant 0 : i32
    %c0_i32_0 = arith.constant 0 : i32
    %c0_i32_1 = arith.constant 0 : i32
    return %c0_i32, %c0_i32_0 : i32, i32
  }
  func.func @transform_11(%arg0: i32) -> (i32, i32) {
    %c0_i32 = arith.constant 0 : i32
    %c0_i32_0 = arith.constant 0 : i32
    %c0_i32_1 = arith.constant 0 : i32
    return %c0_i32, %c0_i32_0 : i32, i32
  }
  func.func @transform_12(%arg0: i32) -> (i32, i32) {
    %c0_i32 = arith.constant 0 : i32
    %c0_i32_0 = arith.constant 0 : i32
    %c0_i32_1 = arith.constant 0 : i32
    return %c0_i32, %c0_i32_0 : i32, i32
  }
  func.func @transform_13(%arg0: i32) -> (i32, i32) {
    %c0_i32 = arith.constant 0 : i32
    %c0_i32_0 = arith.constant 0 : i32
    return %arg0, %c0_i32 : i32, i32
  }
  func.func @transform_14(%arg0: i32) -> (i32, i32) {
    %c0_i32 = arith.constant 0 : i32
    %c0_i32_0 = arith.constant 0 : i32
    return %arg0, %c0_i32 : i32, i32
  }
}

</mosaic_0001>

<bundles_post_ra>
// kernel: gvp_forward.1
= control target key start
LH: loop header
LB: loop body
LE: loop exit
PB: predicated region body
PF: predicated region fallthrough
CT: control target
= control target key end

     0   :  { %s8978_s29 = smov 0   ;;  %s8980_s30 = smov 0   ;;  %s14771_s0 = inlined_call_operand.vmem [shape: f32[512,32], index: 0, kind: input, shape index: {}]   ;;  %s14772_s1 = inlined_call_operand.vmem [shape: f32[3,512,16], index: 1, kind: input, shape index: {}]   ;;  %s14773_s2 = inlined_call_operand.vmem [shape: f32[16,16], index: 2, kind: input, shape index: {}]   ;;  %s14774_s3 = inlined_call_operand.vmem [shape: f32[16,4], index: 3, kind: input, shape index: {}]   ;;  %s14775_s4 = inlined_call_operand.vmem [shape: f32[16,4], index: 4, kind: input, shape index: {}]   ;;  %s14776_s5 = inlined_call_operand.vmem [shape: f32[16,16], index: 5, kind: input, shape index: {}]   ;;  %s14777_s6 = inlined_call_operand.vmem [shape: f32[4,16], index: 6, kind: input, shape index: {}]   ;;  %s14778_s7 = inlined_call_operand.vmem [shape: f32[32,32], index: 7, kind: input, shape index: {}]   ;;  %s14779_s8 = inlined_call_operand.vmem [shape: f32[16,32], index: 8, kind: input, shape index: {}]   ;;  %s14780_s9 = inlined_call_operand.vmem [shape: f32[4,32], index: 9, kind: input, shape index: {}]   ;;  %s14781_s10 = inlined_call_operand.vmem [shape: f32[1,32], index: 10, kind: input, shape index: {}]   ;;  %s14782_s11 = inlined_call_operand.vmem [shape: f32[32,16], index: 11, kind: input, shape index: {}]   ;;  %s14783_s12 = inlined_call_operand.vmem [shape: f32[1,16], index: 12, kind: input, shape index: {}]   ;;  %s14784_s13 = inlined_call_operand.vmem [shape: f32[512,32], index: 13, kind: output, shape index: {0}]   ;;  %s14785_s14 = inlined_call_operand.vmem [shape: f32[512,48], index: 14, kind: output, shape index: {1}]  }
   0x1   :  { %s8982_s15 = smov 0  }
   0x2 LB: > { %s7655_s16 = sadd.s32 4294967295, %s8899_s15   ;;  %s8995_s17 = sadd.s32 1, %s8899_s15   ;;  %s8899_s15 = sphi %s8982_s15, %s15863_s15   ;;  %s8895_s30 = sphi %s8980_s30, %s15862_s30   ;;  %s8891_s29 = sphi %s8978_s29, %s15861_s29  }
   0x3   : > { %s55_s18 = ssub.s32 %s8899_s15, %s8995_s17  ;;  %s58_s19 = sadd.s32 1, %s8895_s30 }
   0x4   : > { %p56_p0 = scmp.eq.s32.totalorder %s55_s18, 0  ;;  %p65_p1 = scmp.ne.s32.totalorder %s8895_s30, %s8891_s29 }
   0x5   : > { %p66_p2 = scmp.eq.s32.totalorder %s8899_s15, 0  ;;  %p7658_p4 = scmp.ge.s32.totalorder %s8899_s15, 2 }
   0x6   : > { %s9004_s20 = scalar_select %p56_p0, %s8895_s30, %s58_s19  }
   0x7   : > { %p67_p3 = por %p66_p2, %p65_p1  ;;  %407 = sbr.rel (%p7658_p4) target bundleno = 112 (0x70), region = 60 }
   0xc   : > { %419 = sbr.rel (!%p67_p3) target bundleno = 112 (0x70), region = 68  ;;  %s421_s21 = sand.u32 (%p67_p3), 1, %s8895_s30  }
   0xd   : > { %s8344_s22 = sshll.u32 (%p67_p3), %s8899_s15, 8  ;;  %s8351_s23 = smul.u32 (%p67_p3), 768, %s421_s21 }
   0xe   : > { %s9012_s26 = scalar_lea.vmem (%p67_p3), %s14772_s1, %s8344_s22 }
   0xf   : > { %v645_v0 = vld [vmem:[%s9012_s26] sm:$0xff] (%p67_p3)  ;;  %v647_v1 = vld [vmem:[%s9012_s26 + $0x8] sm:$0xff] (%p67_p3)  ;;  %v649_v2 = vld [vmem:[%s9012_s26 + $0x10] sm:$0xff] (%p67_p3)  ;;  %s9017_s27 = scalar_lea.vmem (%p67_p3), [#allocation2], %s8351_s23 }
  0x10   : > { %646 = vst [vmem:[%s9017_s27] sm:$0xff] (%p67_p3), %v645_v0  ;;  %v651_v3 = vld [vmem:[%s9012_s26 + $0x18] sm:$0xff] (%p67_p3)  ;;  %v653_v4 = vld [vmem:[%s9012_s26 + $0x20] sm:$0xff] (%p67_p3)  ;;  %v655_v5 = vld [vmem:[%s9012_s26 + $0x28] sm:$0xff] (%p67_p3) }
  0x11   : > { %648 = vst [vmem:[%s9017_s27 + $0x8] sm:$0xff] %v647_v1  ;;  %v657_v6 = vld [vmem:[%s9012_s26 + $0x30] sm:$0xff]  ;;  %v659_v7 = vld [vmem:[%s9012_s26 + $0x38] sm:$0xff]  ;;  %v661_v8 = vld [vmem:[%s9012_s26 + $0x40] sm:$0xff] }
  0x12   : > { %650 = vst [vmem:[%s9017_s27 + $0x10] sm:$0xff] %v649_v2  ;;  %v663_v9 = vld [vmem:[%s9012_s26 + $0x48] sm:$0xff]  ;;  %v665_v10 = vld [vmem:[%s9012_s26 + $0x50] sm:$0xff]  ;;  %v667_v11 = vld [vmem:[%s9012_s26 + $0x58] sm:$0xff] }
  0x13   : > { %652 = vst [vmem:[%s9017_s27 + $0x18] sm:$0xff] %v651_v3  ;;  %v669_v12 = vld [vmem:[%s9012_s26 + $0x60] sm:$0xff]  ;;  %v671_v13 = vld [vmem:[%s9012_s26 + $0x68] sm:$0xff]  ;;  %v673_v14 = vld [vmem:[%s9012_s26 + $0x70] sm:$0xff] }
  0x14   : > { %654 = vst [vmem:[%s9017_s27 + $0x20] sm:$0xff] %v653_v4  ;;  %v675_v15 = vld [vmem:[%s9012_s26 + $0x78] sm:$0xff]  ;;  %v677_v16 = vld [vmem:[%s9012_s26 + $0x80] sm:$0xff]  ;;  %v679_v17 = vld [vmem:[%s9012_s26 + $0x88] sm:$0xff] }
  0x15   : > { %656 = vst [vmem:[%s9017_s27 + $0x28] sm:$0xff] %v655_v5  ;;  %v681_v18 = vld [vmem:[%s9012_s26 + $0x90] sm:$0xff]  ;;  %v683_v19 = vld [vmem:[%s9012_s26 + $0x98] sm:$0xff]  ;;  %v685_v20 = vld [vmem:[%s9012_s26 + $0xa0] sm:$0xff] }
  0x16   : > { %658 = vst [vmem:[%s9017_s27 + $0x30] sm:$0xff] %v657_v6  ;;  %v687_v21 = vld [vmem:[%s9012_s26 + $0xa8] sm:$0xff]  ;;  %v689_v22 = vld [vmem:[%s9012_s26 + $0xb0] sm:$0xff]  ;;  %v691_v23 = vld [vmem:[%s9012_s26 + $0xb8] sm:$0xff] }
  0x17   : > { %660 = vst [vmem:[%s9017_s27 + $0x38] sm:$0xff] %v659_v7  ;;  %v693_v24 = vld [vmem:[%s9012_s26 + $0xc0] sm:$0xff]  ;;  %v695_v25 = vld [vmem:[%s9012_s26 + $0xc8] sm:$0xff]  ;;  %v697_v26 = vld [vmem:[%s9012_s26 + $0xd0] sm:$0xff] }
  0x18   : > { %662 = vst [vmem:[%s9017_s27 + $0x40] sm:$0xff] %v661_v8  ;;  %v699_v27 = vld [vmem:[%s9012_s26 + $0xd8] sm:$0xff]  ;;  %v701_v28 = vld [vmem:[%s9012_s26 + $0xe0] sm:$0xff]  ;;  %v703_v29 = vld [vmem:[%s9012_s26 + $0xe8] sm:$0xff] }
  0x19   : > { %664 = vst [vmem:[%s9017_s27 + $0x48] sm:$0xff] %v663_v9  ;;  %v705_v30 = vld [vmem:[%s9012_s26 + $0xf0] sm:$0xff]  ;;  %v707_v31 = vld [vmem:[%s9012_s26 + $0xf8] sm:$0xff]  ;;  %v709_v32 = vld [vmem:[%s9012_s26 + $0x200] sm:$0xff] }
  0x1a   : > { %666 = vst [vmem:[%s9017_s27 + $0x50] sm:$0xff] %v665_v10  ;;  %v711_v33 = vld [vmem:[%s9012_s26 + $0x208] sm:$0xff]  ;;  %v713_v34 = vld [vmem:[%s9012_s26 + $0x210] sm:$0xff]  ;;  %v715_v35 = vld [vmem:[%s9012_s26 + $0x218] sm:$0xff] }
  0x1b   : > { %668 = vst [vmem:[%s9017_s27 + $0x58] sm:$0xff] %v667_v11  ;;  %v717_v36 = vld [vmem:[%s9012_s26 + $0x220] sm:$0xff]  ;;  %v719_v37 = vld [vmem:[%s9012_s26 + $0x228] sm:$0xff]  ;;  %v721_v38 = vld [vmem:[%s9012_s26 + $0x230] sm:$0xff] }
  0x1c   : > { %670 = vst [vmem:[%s9017_s27 + $0x60] sm:$0xff] %v669_v12  ;;  %v723_v39 = vld [vmem:[%s9012_s26 + $0x238] sm:$0xff]  ;;  %v725_v40 = vld [vmem:[%s9012_s26 + $0x240] sm:$0xff]  ;;  %v727_v41 = vld [vmem:[%s9012_s26 + $0x248] sm:$0xff] }
  0x1d   : > { %672 = vst [vmem:[%s9017_s27 + $0x68] sm:$0xff] %v671_v13  ;;  %v729_v42 = vld [vmem:[%s9012_s26 + $0x250] sm:$0xff]  ;;  %v731_v43 = vld [vmem:[%s9012_s26 + $0x258] sm:$0xff]  ;;  %v733_v44 = vld [vmem:[%s9012_s26 + $0x260] sm:$0xff] }
  0x1e   : > { %674 = vst [vmem:[%s9017_s27 + $0x70] sm:$0xff] %v673_v14  ;;  %v735_v45 = vld [vmem:[%s9012_s26 + $0x268] sm:$0xff]  ;;  %v737_v46 = vld [vmem:[%s9012_s26 + $0x270] sm:$0xff]  ;;  %v739_v47 = vld [vmem:[%s9012_s26 + $0x278] sm:$0xff] }
  0x1f   : > { %676 = vst [vmem:[%s9017_s27 + $0x78] sm:$0xff] %v675_v15  ;;  %v741_v48 = vld [vmem:[%s9012_s26 + $0x280] sm:$0xff]  ;;  %v743_v49 = vld [vmem:[%s9012_s26 + $0x288] sm:$0xff]  ;;  %v745_v50 = vld [vmem:[%s9012_s26 + $0x290] sm:$0xff] }
  0x20   : > { %678 = vst [vmem:[%s9017_s27 + $0x80] sm:$0xff] %v677_v16  ;;  %v747_v51 = vld [vmem:[%s9012_s26 + $0x298] sm:$0xff]  ;;  %v749_v52 = vld [vmem:[%s9012_s26 + $0x2a0] sm:$0xff]  ;;  %v751_v53 = vld [vmem:[%s9012_s26 + $0x2a8] sm:$0xff] }
  0x21   : > { %680 = vst [vmem:[%s9017_s27 + $0x88] sm:$0xff] %v679_v17  ;;  %v753_v54 = vld [vmem:[%s9012_s26 + $0x2b0] sm:$0xff]  ;;  %v755_v55 = vld [vmem:[%s9012_s26 + $0x2b8] sm:$0xff]  ;;  %v757_v56 = vld [vmem:[%s9012_s26 + $0x2c0] sm:$0xff] }
  0x22   : > { %682 = vst [vmem:[%s9017_s27 + $0x90] sm:$0xff] %v681_v18  ;;  %v759_v57 = vld [vmem:[%s9012_s26 + $0x2c8] sm:$0xff]  ;;  %v761_v58 = vld [vmem:[%s9012_s26 + $0x2d0] sm:$0xff]  ;;  %v763_v59 = vld [vmem:[%s9012_s26 + $0x2d8] sm:$0xff] }
  0x23   : > { %684 = vst [vmem:[%s9017_s27 + $0x98] sm:$0xff] %v683_v19  ;;  %v765_v60 = vld [vmem:[%s9012_s26 + $0x2e0] sm:$0xff]  ;;  %v767_v61 = vld [vmem:[%s9012_s26 + $0x2e8] sm:$0xff]  ;;  %v769_v62 = vld [vmem:[%s9012_s26 + $0x2f0] sm:$0xff] }
  0x24   : > { %686 = vst [vmem:[%s9017_s27 + $0xa0] sm:$0xff] %v685_v20  ;;  %v771_v63 = vld [vmem:[%s9012_s26 + $0x2f8] sm:$0xff]  ;;  %v773_v0 = vld [vmem:[%s9012_s26 + $0x400] sm:$0xff]  ;;  %v775_v1 = vld [vmem:[%s9012_s26 + $0x408] sm:$0xff] }
  0x25   : > { %688 = vst [vmem:[%s9017_s27 + $0xa8] sm:$0xff] %v687_v21  ;;  %v777_v2 = vld [vmem:[%s9012_s26 + $0x410] sm:$0xff]  ;;  %v779_v3 = vld [vmem:[%s9012_s26 + $0x418] sm:$0xff]  ;;  %v781_v4 = vld [vmem:[%s9012_s26 + $0x420] sm:$0xff] }
  0x26   : > { %690 = vst [vmem:[%s9017_s27 + $0xb0] sm:$0xff] %v689_v22  ;;  %v783_v5 = vld [vmem:[%s9012_s26 + $0x428] sm:$0xff]  ;;  %v785_v6 = vld [vmem:[%s9012_s26 + $0x430] sm:$0xff]  ;;  %v787_v7 = vld [vmem:[%s9012_s26 + $0x438] sm:$0xff] }
  0x27   : > { %692 = vst [vmem:[%s9017_s27 + $0xb8] sm:$0xff] %v691_v23  ;;  %v789_v8 = vld [vmem:[%s9012_s26 + $0x440] sm:$0xff]  ;;  %v791_v9 = vld [vmem:[%s9012_s26 + $0x448] sm:$0xff]  ;;  %v793_v10 = vld [vmem:[%s9012_s26 + $0x450] sm:$0xff] }
  0x28   : > { %694 = vst [vmem:[%s9017_s27 + $0xc0] sm:$0xff] %v693_v24  ;;  %v795_v11 = vld [vmem:[%s9012_s26 + $0x458] sm:$0xff]  ;;  %v797_v12 = vld [vmem:[%s9012_s26 + $0x460] sm:$0xff]  ;;  %v799_v13 = vld [vmem:[%s9012_s26 + $0x468] sm:$0xff] }
  0x29   : > { %696 = vst [vmem:[%s9017_s27 + $0xc8] sm:$0xff] %v695_v25  ;;  %v801_v14 = vld [vmem:[%s9012_s26 + $0x470] sm:$0xff]  ;;  %v803_v15 = vld [vmem:[%s9012_s26 + $0x478] sm:$0xff]  ;;  %v805_v16 = vld [vmem:[%s9012_s26 + $0x480] sm:$0xff] }
  0x2a   : > { %698 = vst [vmem:[%s9017_s27 + $0xd0] sm:$0xff] %v697_v26  ;;  %v807_v17 = vld [vmem:[%s9012_s26 + $0x488] sm:$0xff]  ;;  %v809_v18 = vld [vmem:[%s9012_s26 + $0x490] sm:$0xff]  ;;  %v811_v19 = vld [vmem:[%s9012_s26 + $0x498] sm:$0xff] }
  0x2b   : > { %700 = vst [vmem:[%s9017_s27 + $0xd8] sm:$0xff] %v699_v27  ;;  %v813_v20 = vld [vmem:[%s9012_s26 + $0x4a0] sm:$0xff]  ;;  %v815_v21 = vld [vmem:[%s9012_s26 + $0x4a8] sm:$0xff]  ;;  %v817_v22 = vld [vmem:[%s9012_s26 + $0x4b0] sm:$0xff] }
  0x2c   : > { %702 = vst [vmem:[%s9017_s27 + $0xe0] sm:$0xff] %v701_v28  ;;  %v819_v23 = vld [vmem:[%s9012_s26 + $0x4b8] sm:$0xff]  ;;  %v821_v24 = vld [vmem:[%s9012_s26 + $0x4c0] sm:$0xff]  ;;  %v823_v25 = vld [vmem:[%s9012_s26 + $0x4c8] sm:$0xff] }
  0x2d   : > { %704 = vst [vmem:[%s9017_s27 + $0xe8] sm:$0xff] %v703_v29  ;;  %v825_v26 = vld [vmem:[%s9012_s26 + $0x4d0] sm:$0xff]  ;;  %v827_v27 = vld [vmem:[%s9012_s26 + $0x4d8] sm:$0xff]  ;;  %v829_v28 = vld [vmem:[%s9012_s26 + $0x4e0] sm:$0xff] }
  0x2e   : > { %706 = vst [vmem:[%s9017_s27 + $0xf0] sm:$0xff] %v705_v30  ;;  %v831_v29 = vld [vmem:[%s9012_s26 + $0x4e8] sm:$0xff]  ;;  %v833_v30 = vld [vmem:[%s9012_s26 + $0x4f0] sm:$0xff] }
  0x2f   : > { %708 = vst [vmem:[%s9017_s27 + $0xf8] sm:$0xff] %v707_v31  ;;  %v835_v31 = vld [vmem:[%s9012_s26 + $0x4f8] sm:$0xff] }
  0x30   : > { %710 = vst [vmem:[%s9017_s27 + $0x100] sm:$0xff] %v709_v32 }
  0x31   : > { %712 = vst [vmem:[%s9017_s27 + $0x108] sm:$0xff] %v711_v33 }
  0x32   : > { %714 = vst [vmem:[%s9017_s27 + $0x110] sm:$0xff] %v713_v34 }
  0x33   : > { %716 = vst [vmem:[%s9017_s27 + $0x118] sm:$0xff] %v715_v35 }
  0x34   : > { %718 = vst [vmem:[%s9017_s27 + $0x120] sm:$0xff] %v717_v36 }
  0x35   : > { %720 = vst [vmem:[%s9017_s27 + $0x128] sm:$0xff] %v719_v37 }
  0x36   : > { %722 = vst [vmem:[%s9017_s27 + $0x130] sm:$0xff] %v721_v38 }
  0x37   : > { %724 = vst [vmem:[%s9017_s27 + $0x138] sm:$0xff] %v723_v39 }
  0x38   : > { %726 = vst [vmem:[%s9017_s27 + $0x140] sm:$0xff] %v725_v40 }
  0x39   : > { %728 = vst [vmem:[%s9017_s27 + $0x148] sm:$0xff] %v727_v41 }
  0x3a   : > { %730 = vst [vmem:[%s9017_s27 + $0x150] sm:$0xff] %v729_v42 }
  0x3b   : > { %732 = vst [vmem:[%s9017_s27 + $0x158] sm:$0xff] %v731_v43 }
  0x3c   : > { %734 = vst [vmem:[%s9017_s27 + $0x160] sm:$0xff] %v733_v44 }
  0x3d   : > { %736 = vst [vmem:[%s9017_s27 + $0x168] sm:$0xff] %v735_v45 }
  0x3e   : > { %738 = vst [vmem:[%s9017_s27 + $0x170] sm:$0xff] %v737_v46 }
  0x3f   : > { %740 = vst [vmem:[%s9017_s27 + $0x178] sm:$0xff] %v739_v47 }
  0x40   : > { %742 = vst [vmem:[%s9017_s27 + $0x180] sm:$0xff] %v741_v48 }
  0x41   : > { %744 = vst [vmem:[%s9017_s27 + $0x188] sm:$0xff] %v743_v49 }
  0x42   : > { %746 = vst [vmem:[%s9017_s27 + $0x190] sm:$0xff] %v745_v50 }
  0x43   : > { %748 = vst [vmem:[%s9017_s27 + $0x198] sm:$0xff] %v747_v51 }
  0x44   : > { %750 = vst [vmem:[%s9017_s27 + $0x1a0] sm:$0xff] %v749_v52 }
  0x45   : > { %752 = vst [vmem:[%s9017_s27 + $0x1a8] sm:$0xff] %v751_v53 }
  0x46   : > { %754 = vst [vmem:[%s9017_s27 + $0x1b0] sm:$0xff] %v753_v54 }
  0x47   : > { %756 = vst [vmem:[%s9017_s27 + $0x1b8] sm:$0xff] %v755_v55 }
  0x48   : > { %758 = vst [vmem:[%s9017_s27 + $0x1c0] sm:$0xff] %v757_v56 }
  0x49   : > { %760 = vst [vmem:[%s9017_s27 + $0x1c8] sm:$0xff] %v759_v57 }
  0x4a   : > { %762 = vst [vmem:[%s9017_s27 + $0x1d0] sm:$0xff] %v761_v58 }
  0x4b   : > { %764 = vst [vmem:[%s9017_s27 + $0x1d8] sm:$0xff] %v763_v59 }
  0x4c   : > { %766 = vst [vmem:[%s9017_s27 + $0x1e0] sm:$0xff] %v765_v60 }
  0x4d   : > { %768 = vst [vmem:[%s9017_s27 + $0x1e8] sm:$0xff] %v767_v61 }
  0x4e   : > { %770 = vst [vmem:[%s9017_s27 + $0x1f0] sm:$0xff] %v769_v62 }
  0x4f   : > { %772 = vst [vmem:[%s9017_s27 + $0x1f8] sm:$0xff] %v771_v63 }
  0x50   : > { %774 = vst [vmem:[%s9017_s27 + $0x200] sm:$0xff] %v773_v0 }
  0x51   : > { %776 = vst [vmem:[%s9017_s27 + $0x208] sm:$0xff] %v775_v1 }
  0x52   : > { %778 = vst [vmem:[%s9017_s27 + $0x210] sm:$0xff] %v777_v2 }
  0x53   : > { %780 = vst [vmem:[%s9017_s27 + $0x218] sm:$0xff] %v779_v3 }
  0x54   : > { %782 = vst [vmem:[%s9017_s27 + $0x220] sm:$0xff] %v781_v4 }
  0x55   : > { %784 = vst [vmem:[%s9017_s27 + $0x228] sm:$0xff] %v783_v5 }
  0x56   : > { %786 = vst [vmem:[%s9017_s27 + $0x230] sm:$0xff] %v785_v6 }
  0x57   : > { %788 = vst [vmem:[%s9017_s27 + $0x238] sm:$0xff] %v787_v7 }
  0x58   : > { %790 = vst [vmem:[%s9017_s27 + $0x240] sm:$0xff] %v789_v8 }
  0x59   : > { %792 = vst [vmem:[%s9017_s27 + $0x248] sm:$0xff] %v791_v9 }
  0x5a   : > { %794 = vst [vmem:[%s9017_s27 + $0x250] sm:$0xff] %v793_v10 }
  0x5b   : > { %796 = vst [vmem:[%s9017_s27 + $0x258] sm:$0xff] %v795_v11 }
  0x5c   : > { %798 = vst [vmem:[%s9017_s27 + $0x260] sm:$0xff] %v797_v12 }
  0x5d   : > { %800 = vst [vmem:[%s9017_s27 + $0x268] sm:$0xff] %v799_v13 }
  0x5e   : > { %802 = vst [vmem:[%s9017_s27 + $0x270] sm:$0xff] %v801_v14 }
  0x5f   : > { %804 = vst [vmem:[%s9017_s27 + $0x278] sm:$0xff] %v803_v15 }
  0x60   : > { %806 = vst [vmem:[%s9017_s27 + $0x280] sm:$0xff] %v805_v16 }
  0x61   : > { %808 = vst [vmem:[%s9017_s27 + $0x288] sm:$0xff] %v807_v17 }
  0x62   : > { %810 = vst [vmem:[%s9017_s27 + $0x290] sm:$0xff] %v809_v18 }
  0x63   : > { %812 = vst [vmem:[%s9017_s27 + $0x298] sm:$0xff] %v811_v19 }
  0x64   : > { %814 = vst [vmem:[%s9017_s27 + $0x2a0] sm:$0xff] %v813_v20 }
  0x65   : > { %816 = vst [vmem:[%s9017_s27 + $0x2a8] sm:$0xff] %v815_v21 }
  0x66   : > { %818 = vst [vmem:[%s9017_s27 + $0x2b0] sm:$0xff] %v817_v22 }
  0x67   : > { %820 = vst [vmem:[%s9017_s27 + $0x2b8] sm:$0xff] %v819_v23 }
  0x68   : > { %822 = vst [vmem:[%s9017_s27 + $0x2c0] sm:$0xff] %v821_v24 }
  0x69   : > { %824 = vst [vmem:[%s9017_s27 + $0x2c8] sm:$0xff] %v823_v25 }
  0x6a   : > { %826 = vst [vmem:[%s9017_s27 + $0x2d0] sm:$0xff] %v825_v26 }
  0x6b   : > { %828 = vst [vmem:[%s9017_s27 + $0x2d8] sm:$0xff] %v827_v27 }
  0x6c   : > { %830 = vst [vmem:[%s9017_s27 + $0x2e0] sm:$0xff] %v829_v28 }
  0x6d   : > { %832 = vst [vmem:[%s9017_s27 + $0x2e8] sm:$0xff] %v831_v29 }
  0x6e   : > { %834 = vst [vmem:[%s9017_s27 + $0x2f0] sm:$0xff] %v833_v30 }
  0x6f   : > { %836 = vst [vmem:[%s9017_s27 + $0x2f8] sm:$0xff] %v835_v31 }
  0x70 PF: > { %p7661_p5 = scmp.ge.s32.totalorder %s8899_s15, 1  ;;  %p841_p6 = scmp.lt.s32.totalorder %s8899_s15, 3 }
  0x72   : > { %p842_p7 = pnand %p7661_p5, %p841_p6 }
  0x74   : > { %845 = sbr.rel (%p842_p7) target bundleno = 2391 (0x957), region = 106 }
  0x79   : > { %v1019_v32 = vld [vmem:[%s14773_s2 + $0x8] sm:$0xff]  ;;  %v1018_v33 = vld [vmem:[%s14773_s2] sm:$0xff]  ;;  %s848_s22 = sand.u32 1, %s8891_s29   ;;  %vm1020_vm0 = vcmask 130048   ;;  %s8902_s26 = smov 32  }
  0x7a   : > { %1323 = vmatpush.msra.mxu0 %v1019_v32  ;;  %8346 = vmatpush.msra.mxu3 %v1019_v32  ;;  %s8352_s23 = smul.u32 768, %s848_s22  ;;  %v2686_v19 = vld [vmem:[%s14774_s3 + $0x8] sm:$0xff]  ;;  %v2685_v23 = vld [vmem:[%s14774_s3] sm:$0xff]  ;;  %s7662_s22 = sshll.u32 %s7655_s16, 5 }
  0x7b   : > { %8345 = vmatpush.msra.mxu2 %v1019_v32  ;;  %p904_p8 = scmp.lt.s32.totalorder %s7662_s22, 63 }
  0x7c   : > { %1324 = vmatpush.msra.mxu0 %v1018_v33  ;;  %8348 = vmatpush.msra.mxu3 %v1018_v33  ;;  %s9217_s24 = scalar_lea.vmem [#allocation2], %s8352_s23 }
  0x7d   : > { %v9220_v34 = vld [vmem:[%s9217_s24] sm:$0xff]  ;;  %8347 = vmatpush.msra.mxu2 %v1018_v33  ;;  %v9227_v36 = vld [vmem:[%s9217_s24 + $0x8] sm:$0xff]  ;;  %v9234_v38 = vld [vmem:[%s9217_s24 + $0x10] sm:$0xff]  ;;  %s15865_s22 = smov (!%p904_p8, %s7662_s22), 63 }
  0x7e   : > { %v994_v35 = vld [vmem:[%s9217_s24 + $0x240] sm:$0xff]  ;;  %7668 = vmatmul.msk.f32.vlgmr.msra.gmra.mxu0 %vm1020_vm0, %v9220_v34  ;;  %v995_v37 = vld [vmem:[%s9217_s24 + $0x248] sm:$0xff]  ;;  %v996_v39 = vld [vmem:[%s9217_s24 + $0x250] sm:$0xff]  ;;  %2701 = vmatpush.msrb.mxu3 %v2686_v19  ;;  %s9895_s15 = sshll.u32 %s15865_s22, 3  ;;  %s8901_s22 = smov 16  }
  0x7f   : > { %7740 = vmatmul.msk.f32.vlgmr.msra.gmra.mxu3 %vm1020_vm0, %v994_v35  ;;  %v9241_v40 = vld [vmem:[%s9217_s24 + $0x18] sm:$0xff]  ;;  %v9248_v42 = vld [vmem:[%s9217_s24 + $0x20] sm:$0xff]  ;;  %v9255_v44 = vld [vmem:[%s9217_s24 + $0x28] sm:$0xff]  ;;  %s9909_s29 = scalar_lea.vmem %s14771_s0, %s9895_s15  ;;  %s13429_s21 = scalar_lea.vmem %s14785_s14, %s9895_s15 }
  0x80   : > { %v997_v41 = vld [vmem:[%s9217_s24 + $0x258] sm:$0xff]  ;;  %v998_v43 = vld [vmem:[%s9217_s24 + $0x260] sm:$0xff]  ;;  %v999_v45 = vld [vmem:[%s9217_s24 + $0x268] sm:$0xff]  ;;  %2702 = vmatpush.msrb.mxu3 %v2685_v23 }
  0x81   : > { %v9262_v46 = vld [vmem:[%s9217_s24 + $0x30] sm:$0xff]  ;;  %v9269_v48 = vld [vmem:[%s9217_s24 + $0x38] sm:$0xff]  ;;  %v9276_v50 = vld [vmem:[%s9217_s24 + $0x40] sm:$0xff] }
  0x82   : > { %v1000_v47 = vld [vmem:[%s9217_s24 + $0x270] sm:$0xff]  ;;  %v1001_v49 = vld [vmem:[%s9217_s24 + $0x278] sm:$0xff]  ;;  %v1002_v51 = vld [vmem:[%s9217_s24 + $0x280] sm:$0xff] }
  0x83   : > { %v9283_v52 = vld [vmem:[%s9217_s24 + $0x48] sm:$0xff]  ;;  %v9290_v54 = vld [vmem:[%s9217_s24 + $0x50] sm:$0xff]  ;;  %v9297_v56 = vld [vmem:[%s9217_s24 + $0x58] sm:$0xff] }
  0x84   : > { %v1003_v53 = vld [vmem:[%s9217_s24 + $0x288] sm:$0xff]  ;;  %v1004_v55 = vld [vmem:[%s9217_s24 + $0x290] sm:$0xff]  ;;  %v1005_v57 = vld [vmem:[%s9217_s24 + $0x298] sm:$0xff] }
  0x85   : > { %v9304_v58 = vld [vmem:[%s9217_s24 + $0x60] sm:$0xff]  ;;  %v9311_v60 = vld [vmem:[%s9217_s24 + $0x68] sm:$0xff]  ;;  %v9318_v62 = vld [vmem:[%s9217_s24 + $0x70] sm:$0xff] }
  0x86   : > { %7669 = vmatmul.msk.f32.gmra.mxu0 %vm1020_vm0, %v9227_v36  ;;  %v1006_v59 = vld [vmem:[%s9217_s24 + $0x2a0] sm:$0xff]  ;;  %v1007_v61 = vld [vmem:[%s9217_s24 + $0x2a8] sm:$0xff]  ;;  %v1008_v63 = vld [vmem:[%s9217_s24 + $0x2b0] sm:$0xff] }
  0x87   : > { %7741 = vmatmul.msk.f32.gmra.mxu3 %vm1020_vm0, %v995_v37  ;;  %v9325_v0 = vld [vmem:[%s9217_s24 + $0x78] sm:$0xff]  ;;  %v9334_v3 = vld [vmem:[%s9217_s24 + $0x80] sm:$0xff]  ;;  %v9345_v7 = vld [vmem:[%s9217_s24 + $0x88] sm:$0xff] }
  0x88   : > { %v1009_v1 = vld [vmem:[%s9217_s24 + $0x2b8] sm:$0xff]  ;;  %v1010_v4 = vld [vmem:[%s9217_s24 + $0x2c0] sm:$0xff]  ;;  %v1011_v8 = vld [vmem:[%s9217_s24 + $0x2c8] sm:$0xff] }
  0x89   : > { %v9356_v11 = vld [vmem:[%s9217_s24 + $0x90] sm:$0xff]  ;;  %v9367_v15 = vld [vmem:[%s9217_s24 + $0x98] sm:$0xff]  ;;  %v978_v17 = vld [vmem:[%s9217_s24 + $0x1c0] sm:$0xff] }
  0x8a   : > { %v1012_v12 = vld [vmem:[%s9217_s24 + $0x2d0] sm:$0xff]  ;;  %v1013_v16 = vld [vmem:[%s9217_s24 + $0x2d8] sm:$0xff]  ;;  %7724 = vmatmul.msk.f32.vlgmr.msra.gmra.mxu2 %vm1020_vm0, %v978_v17  ;;  %v9383_v21 = vld [vmem:[%s9217_s24 + $0xa0] sm:$0xff] }
  0x8b   : > { %v1014_v22 = vld [vmem:[%s9217_s24 + $0x2e0] sm:$0xff]  ;;  %v979_v24 = vld [vmem:[%s9217_s24 + $0x1c8] sm:$0xff]  ;;  %v980_v29 = vld [vmem:[%s9217_s24 + $0x1d0] sm:$0xff] }
  0x8c   : > { %v9399_v27 = vld [vmem:[%s9217_s24 + $0xa8] sm:$0xff]  ;;  %v9412_v32 = vld [vmem:[%s9217_s24 + $0xb0] sm:$0xff]  ;;  %v981_v35 = vld [vmem:[%s9217_s24 + $0x1d8] sm:$0xff] }
  0x8d   : > { %v1015_v28 = vld [vmem:[%s9217_s24 + $0x2e8] sm:$0xff]  ;;  %v1016_v33 = vld [vmem:[%s9217_s24 + $0x2f0] sm:$0xff]  ;;  %v9490_v19 = vld [vmem:[%s9217_s24 + $0xe0] sm:$0xff] }
  0x8e   : > { %7670 = vmatmul.msk.f32.gmra.mxu0 %vm1020_vm0, %v9234_v38 }
  0x8f   : > { %7742 = vmatmul.msk.f32.gmra.mxu3 %vm1020_vm0, %v996_v39 }
  0x92   : > { %7725 = vmatmul.msk.f32.gmra.mxu2 %vm1020_vm0, %v979_v24  ;;  %v9503_v24 = vld [vmem:[%s9217_s24 + $0xe8] sm:$0xff] }
  0x96   : > { %7671 = vmatmul.msk.f32.gmra.mxu0 %vm1020_vm0, %v9241_v40 }
  0x97   : > { %7743 = vmatmul.msk.f32.gmra.mxu3 %vm1020_vm0, %v997_v41  ;;  %v9425_v41 = vld [vmem:[%s9217_s24 + $0xb8] sm:$0xff] }
  0x9a   : > { %7726 = vmatmul.msk.f32.gmra.mxu2 %vm1020_vm0, %v980_v29 }
  0x9e   : > { %7672 = vmatmul.msk.f32.gmra.mxu0 %vm1020_vm0, %v9248_v42 }
  0x9f   : > { %7744 = vmatmul.msk.f32.gmra.mxu3 %vm1020_vm0, %v998_v43  ;;  %v1017_v43 = vld [vmem:[%s9217_s24 + $0x2f8] sm:$0xff] }
  0xa2   : > { %7727 = vmatmul.msk.f32.gmra.mxu2 %vm1020_vm0, %v981_v35 }
  0xa6   : > { %7673 = vmatmul.msk.f32.gmra.mxu0 %vm1020_vm0, %v9255_v44 }
  0xa7   : > { %7745 = vmatmul.msk.f32.gmra.mxu3 %vm1020_vm0, %v999_v45  ;;  %v982_v45 = vld [vmem:[%s9217_s24 + $0x1e0] sm:$0xff] }
  0xaa   : > { %7728 = vmatmul.msk.f32.gmra.mxu2 %vm1020_vm0, %v982_v45  ;;  %v9529_v45 = vld [vmem:[%s9217_s24 + $0xf8] sm:$0xff] }
  0xae   : > { %7674 = vmatmul.msk.f32.gmra.mxu0 %vm1020_vm0, %v9262_v46 }
  0xaf   : > { %7746 = vmatmul.msk.f32.gmra.mxu3 %vm1020_vm0, %v1000_v47 }
  0xb6   : > { %7675 = vmatmul.msk.f32.gmra.mxu0 %vm1020_vm0, %v9269_v48 }
  0xb7   : > { %7747 = vmatmul.msk.f32.gmra.mxu3 %vm1020_vm0, %v1001_v49 }
  0xbe   : > { %7676 = vmatmul.msk.f32.gmra.mxu0 %vm1020_vm0, %v9276_v50 }
  0xbf   : > { %7748 = vmatmul.msk.f32.gmra.mxu3 %vm1020_vm0, %v1002_v51  ;;  %v9438_v51 = vld [vmem:[%s9217_s24 + $0xc0] sm:$0xff] }
  0xc6   : > { %7677 = vmatmul.msk.f32.gmra.mxu0 %vm1020_vm0, %v9283_v52 }
  0xc7   : > { %7749 = vmatmul.msk.f32.gmra.mxu3 %vm1020_vm0, %v1003_v53  ;;  %v983_v53 = vld [vmem:[%s9217_s24 + $0x1e8] sm:$0xff] }
  0xc8   : > { %7729 = vmatmul.msk.f32.gmra.mxu2 %vm1020_vm0, %v983_v53 }
  0xce   : > { %7678 = vmatmul.msk.f32.gmra.mxu0 %vm1020_vm0, %v9290_v54 }
  0xcf   : > { %7750 = vmatmul.msk.f32.gmra.mxu3 %vm1020_vm0, %v1004_v55 }
  0xd6   : > { %7679 = vmatmul.msk.f32.gmra.mxu0 %vm1020_vm0, %v9297_v56 }
  0xd7   : > { %7751 = vmatmul.msk.f32.gmra.mxu3 %vm1020_vm0, %v1005_v57 }
  0xde   : > { %7680 = vmatmul.msk.f32.gmra.mxu0 %vm1020_vm0, %v9304_v58 }
  0xdf   : > { %7752 = vmatmul.msk.f32.gmra.mxu3 %vm1020_vm0, %v1006_v59  ;;  %v9451_v59 = vld [vmem:[%s9217_s24 + $0xc8] sm:$0xff] }
  0xe6   : > { %7681 = vmatmul.msk.f32.gmra.mxu0 %vm1020_vm0, %v9311_v60 }
  0xe7   : > { %7753 = vmatmul.msk.f32.gmra.mxu3 %vm1020_vm0, %v1007_v61  ;;  %v984_v61 = vld [vmem:[%s9217_s24 + $0x1f0] sm:$0xff] }
  0xe8   : > { %7730 = vmatmul.msk.f32.gmra.mxu2 %vm1020_vm0, %v984_v61 }
  0xee   : > { %7682 = vmatmul.msk.f32.gmra.mxu0 %vm1020_vm0, %v9318_v62 }
  0xef   : > { %7754 = vmatmul.msk.f32.gmra.mxu3 %vm1020_vm0, %v1008_v63 }
  0xf6   : > { %7683 = vmatmul.msk.f32.gmra.mxu0 %vm1020_vm0, %v9325_v0 }
  0xf7   : > { %7755 = vmatmul.msk.f32.gmra.mxu3 %vm1020_vm0, %v1009_v1  ;;  %v9464_v1 = vld [vmem:[%s9217_s24 + $0xd0] sm:$0xff] }
  0xfb   : > { %v9331_v2 = vpop.f32.mrf.mxu0 }
  0xfe   : > { %7684 = vmatmul.msk.f32.gmra.mxu0 %vm1020_vm0, %v9334_v3 }
  0xff   : > { %7756 = vmatmul.msk.f32.gmra.mxu3 %vm1020_vm0, %v1010_v4  ;;  %v985_v4 = vld [vmem:[%s9217_s24 + $0x1f8] sm:$0xff] }
 0x100   : > { %7731 = vmatmul.msk.f32.gmra.mxu2 %vm1020_vm0, %v985_v4  ;;  %v9542_v4 = vld [vmem:[%s9217_s24 + $0x100] sm:$0xff] }
 0x102   : > { %v9340_v5 = vpop.f32.mrf.mxu3 }
 0x103   : > { %15009 = vst [vmem:[#allocation3_spill] sm:$0xff] %v9340_v5  ;;  %v9342_v6 = vpop.f32.mrf.mxu0 }
 0x106   : > { %7685 = vmatmul.msk.f32.gmra.mxu0 %vm1020_vm0, %v9345_v7 }
 0x107   : > { %7757 = vmatmul.msk.f32.gmra.mxu3 %vm1020_vm0, %v1011_v8 }
 0x10a   : > { %v9351_v9 = vpop.f32.mrf.mxu3 }
 0x10b   : > { %15010 = vst [vmem:[#allocation4_spill] sm:$0xff] %v9351_v9  ;;  %v9353_v10 = vpop.f32.mrf.mxu0 }
 0x10e   : > { %7686 = vmatmul.msk.f32.gmra.mxu0 %vm1020_vm0, %v9356_v11 }
 0x10f   : > { %7758 = vmatmul.msk.f32.gmra.mxu3 %vm1020_vm0, %v1012_v12  ;;  %v9477_v12 = vld [vmem:[%s9217_s24 + $0xd8] sm:$0xff] }
 0x112   : > { %v9362_v13 = vpop.f32.mrf.mxu3 }
 0x113   : > { %15011 = vst [vmem:[#allocation5_spill] sm:$0xff] %v9362_v13  ;;  %v9364_v14 = vpop.f32.mrf.mxu0 }
 0x116   : > { %7687 = vmatmul.msk.f32.gmra.mxu0 %vm1020_vm0, %v9367_v15 }
 0x117   : > { %7759 = vmatmul.msk.f32.gmra.mxu3 %vm1020_vm0, %v1013_v16 }
 0x11a   : > { %v9375_v18 = vpop.f32.mrf.mxu3 }
 0x11b   : > { %15012 = vst [vmem:[#allocation6_spill] sm:$0xff] %v9375_v18  ;;  %v9380_v20 = vpop.f32.mrf.mxu0 }
 0x11e   : > { %7688 = vmatmul.msk.f32.gmra.mxu0 %vm1020_vm0, %v9383_v21 }
 0x11f   : > { %7760 = vmatmul.msk.f32.gmra.mxu3 %vm1020_vm0, %v1014_v22 }
 0x122   : > { %v9394_v25 = vpop.f32.mrf.mxu3 }
 0x123   : > { %15013 = vst [vmem:[#allocation7_spill] sm:$0xff] %v9394_v25  ;;  %v9396_v26 = vpop.f32.mrf.mxu0 }
 0x126   : > { %7689 = vmatmul.msk.f32.gmra.mxu0 %vm1020_vm0, %v9399_v27 }
 0x127   : > { %7761 = vmatmul.msk.f32.gmra.mxu3 %vm1020_vm0, %v1015_v28 }
 0x12a   : > { %v9407_v30 = vpop.f32.mrf.mxu3 }
 0x12b   : > { %15014 = vst [vmem:[#allocation8_spill] sm:$0xff] %v9407_v30  ;;  %v9409_v31 = vpop.f32.mrf.mxu0 }
 0x12e   : > { %7690 = vmatmul.msk.f32.gmra.mxu0 %vm1020_vm0, %v9412_v32 }
 0x12f   : > { %7762 = vmatmul.msk.f32.gmra.mxu3 %vm1020_vm0, %v1016_v33  ;;  %v9516_v33 = vld [vmem:[%s9217_s24 + $0xf0] sm:$0xff] }
 0x132   : > { %v9420_v37 = vpop.f32.mrf.mxu3 }
 0x133   : > { %15015 = vst [vmem:[#allocation9_spill] sm:$0xff] %v9420_v37  ;;  %v9422_v39 = vpop.f32.mrf.mxu0 }
 0x136   : > { %7691 = vmatmul.msk.f32.gmra.mxu0 %vm1020_vm0, %v9425_v41 }
 0x137   : > { %7763 = vmatmul.msk.f32.gmra.mxu3 %vm1020_vm0, %v1017_v43 }
 0x13a   : > { %v9433_v47 = vpop.f32.mrf.mxu3 }
 0x13b   : > { %15016 = vst [vmem:[#allocation10_spill] sm:$0xff] %v9433_v47  ;;  %v9435_v49 = vpop.f32.mrf.mxu0 }
 0x13e   : > { %7692 = vmatmul.msk.f32.gmra.mxu0 %vm1020_vm0, %v9438_v51 }
 0x13f   : > { %7828 = vmatmul.msk.f32.vlgmr.msrb.gmra.mxu3 %vm1020_vm0, %v9220_v34 }
 0x142   : > { %v9446_v55 = vpop.f32.mrf.mxu3 }
 0x143   : > { %15017 = vst [vmem:[#allocation11_spill] sm:$0xff] %v9446_v55  ;;  %v9448_v57 = vpop.f32.mrf.mxu0 }
 0x146   : > { %7693 = vmatmul.msk.f32.gmra.mxu0 %vm1020_vm0, %v9451_v59 }
 0x147   : > { %7829 = vmatmul.msk.f32.gmra.mxu3 %vm1020_vm0, %v9227_v36 }
 0x14a   : > { %v9459_v34 = vpop.f32.mrf.mxu3 }
 0x14b   : > { %15018 = vst [vmem:[#allocation12_spill] sm:$0xff] %v9459_v34  ;;  %v9461_v63 = vpop.f32.mrf.mxu0 }
 0x14e   : > { %7694 = vmatmul.msk.f32.gmra.mxu0 %vm1020_vm0, %v9464_v1 }
 0x14f   : > { %7830 = vmatmul.msk.f32.gmra.mxu3 %vm1020_vm0, %v9234_v38  ;;  %v986_v38 = vld [vmem:[%s9217_s24 + $0x200] sm:$0xff] }
 0x150   : > { %7732 = vmatmul.msk.f32.gmra.mxu2 %vm1020_vm0, %v986_v38 }
 0x152   : > { %v9472_v36 = vpop.f32.mrf.mxu3 }
 0x153   : > { %15019 = vst [vmem:[#allocation13_spill] sm:$0xff] %v9472_v36  ;;  %v9474_v8 = vpop.f32.mrf.mxu0  ;;  %v2229_v36 = vld [vmem:[%s14779_s8 + $0x8] sm:$0xff] }
 0x154   : > { %8349 = vmatpush.msrb.mxu2 %v2229_v36  ;;  %2340 = vmatpush.msra.mxu1 %v2229_v36 }
 0x156   : > { %7695 = vmatmul.msk.f32.gmra.mxu0 %vm1020_vm0, %v9477_v12 }
 0x157   : > { %7831 = vmatmul.msk.f32.gmra.mxu3 %vm1020_vm0, %v9241_v40  ;;  %v987_v40 = vld [vmem:[%s9217_s24 + $0x208] sm:$0xff] }
 0x158   : > { %7733 = vmatmul.msk.f32.gmra.mxu2 %vm1020_vm0, %v987_v40 }
 0x15a   : > { %v9483_v16 = vpop.f32.mrf.mxu3 }
 0x15b   : > { %15020 = vst [vmem:[#allocation14_spill] sm:$0xff] %v9483_v16  ;;  %v9487_v17 = vpop.f32.mrf.mxu0  ;;  %v9589_v16 = vpop.f32.mrf.mxu2 }
 0x15c   : > { %15035 = vst [vmem:[#allocation29_spill] sm:$0xff] %v9589_v16 }
 0x15e   : > { %7696 = vmatmul.msk.f32.gmra.mxu0 %vm1020_vm0, %v9490_v19 }
 0x15f   : > { %7832 = vmatmul.msk.f32.gmra.mxu3 %vm1020_vm0, %v9248_v42  ;;  %v988_v42 = vld [vmem:[%s9217_s24 + $0x210] sm:$0xff] }
 0x160   : > { %7734 = vmatmul.msk.f32.gmra.mxu2 %vm1020_vm0, %v988_v42  ;;  %v9555_v42 = vld [vmem:[%s9217_s24 + $0x108] sm:$0xff] }
 0x162   : > { %v9496_v22 = vpop.f32.mrf.mxu3 }
 0x163   : > { %15021 = vst [vmem:[#allocation15_spill] sm:$0xff] %v9496_v22  ;;  %v9500_v23 = vpop.f32.mrf.mxu0 }
 0x166   : > { %7697 = vmatmul.msk.f32.gmra.mxu0 %vm1020_vm0, %v9503_v24 }
 0x167   : > { %7833 = vmatmul.msk.f32.gmra.mxu3 %vm1020_vm0, %v9255_v44  ;;  %v989_v44 = vld [vmem:[%s9217_s24 + $0x218] sm:$0xff] }
 0x168   : > { %7735 = vmatmul.msk.f32.gmra.mxu2 %vm1020_vm0, %v989_v44 }
 0x16a   : > { %v9509_v28 = vpop.f32.mrf.mxu3 }
 0x16b   : > { %15022 = vst [vmem:[#allocation16_spill] sm:$0xff] %v9509_v28  ;;  %v9513_v29 = vpop.f32.mrf.mxu0  ;;  %v957_v28 = vld [vmem:[%s9217_s24 + $0x118] sm:$0xff] }
 0x16e   : > { %7698 = vmatmul.msk.f32.gmra.mxu0 %vm1020_vm0, %v9516_v33 }
 0x16f   : > { %7834 = vmatmul.msk.f32.gmra.mxu3 %vm1020_vm0, %v9262_v46  ;;  %v990_v46 = vld [vmem:[%s9217_s24 + $0x220] sm:$0xff] }
 0x170   : > { %7736 = vmatmul.msk.f32.gmra.mxu2 %vm1020_vm0, %v990_v46 }
 0x172   : > { %v9522_v35 = vpop.f32.mrf.mxu3 }
 0x173   : > { %15023 = vst [vmem:[#allocation17_spill] sm:$0xff] %v9522_v35  ;;  %v9526_v43 = vpop.f32.mrf.mxu0 }
 0x174   : > { %15024 = vst [vmem:[#allocation18_spill] sm:$0xff] %v9526_v43 }
 0x176   : > { %7699 = vmatmul.msk.f32.gmra.mxu0 %vm1020_vm0, %v9529_v45 }
 0x177   : > { %7835 = vmatmul.msk.f32.gmra.mxu3 %vm1020_vm0, %v9269_v48  ;;  %v991_v48 = vld [vmem:[%s9217_s24 + $0x228] sm:$0xff] }
 0x178   : > { %7737 = vmatmul.msk.f32.gmra.mxu2 %vm1020_vm0, %v991_v48  ;;  %v9568_v48 = vld [vmem:[%s9217_s24 + $0x110] sm:$0xff] }
 0x17a   : > { %v9535_v53 = vpop.f32.mrf.mxu3 }
 0x17b   : > { %15025 = vst [vmem:[#allocation19_spill] sm:$0xff] %v9535_v53  ;;  %v9539_v61 = vpop.f32.mrf.mxu0 }
 0x17c   : > { %15026 = vst [vmem:[#allocation20_spill] sm:$0xff] %v9539_v61 }
 0x17e   : > { %7700 = vmatmul.msk.f32.gmra.mxu0 %vm1020_vm0, %v9542_v4 }
 0x17f   : > { %7836 = vmatmul.msk.f32.gmra.mxu3 %vm1020_vm0, %v9276_v50  ;;  %v992_v50 = vld [vmem:[%s9217_s24 + $0x230] sm:$0xff] }
 0x180   : > { %7738 = vmatmul.msk.f32.gmra.mxu2 %vm1020_vm0, %v992_v50 }
 0x182   : > { %v9548_v38 = vpop.f32.mrf.mxu3 }
 0x183   : > { %15027 = vst [vmem:[#allocation21_spill] sm:$0xff] %v9548_v38  ;;  %v9552_v40 = vpop.f32.mrf.mxu0 }
 0x184   : > { %15028 = vst [vmem:[#allocation22_spill] sm:$0xff] %v9552_v40 }
 0x186   : > { %7701 = vmatmul.msk.f32.gmra.mxu0 %vm1020_vm0, %v9555_v42 }
 0x187   : > { %7837 = vmatmul.msk.f32.gmra.mxu3 %vm1020_vm0, %v9283_v52  ;;  %v993_v52 = vld [vmem:[%s9217_s24 + $0x238] sm:$0xff] }
 0x188   : > { %7739 = vmatmul.msk.f32.gmra.mxu2 %vm1020_vm0, %v993_v52 }
 0x18a   : > { %v9561_v44 = vpop.f32.mrf.mxu3 }
 0x18b   : > { %15029 = vst [vmem:[#allocation23_spill] sm:$0xff] %v9561_v44  ;;  %v9565_v46 = vpop.f32.mrf.mxu0 }
 0x18c   : > { %15030 = vst [vmem:[#allocation24_spill] sm:$0xff] %v9565_v46 }
 0x18e   : > { %7702 = vmatmul.msk.f32.gmra.mxu0 %vm1020_vm0, %v9568_v48 }
 0x18f   : > { %7838 = vmatmul.msk.f32.gmra.mxu3 %vm1020_vm0, %v9290_v54  ;;  %v958_v54 = vld [vmem:[%s9217_s24 + $0x120] sm:$0xff] }
 0x192   : > { %v9574_v53 = vpop.f32.mrf.mxu3 }
 0x193   : > { %15031 = vst [vmem:[#allocation25_spill] sm:$0xff] %v9574_v53  ;;  %v9578_v35 = vpop.f32.mrf.mxu0 }
 0x194   : > { %15032 = vst [vmem:[#allocation26_spill] sm:$0xff] %v9578_v35  ;;  %v959_v35 = vld [vmem:[%s9217_s24 + $0x128] sm:$0xff] }
 0x196   : > { %7703 = vmatmul.msk.f32.gmra.mxu0 %vm1020_vm0, %v957_v28 }
 0x197   : > { %7839 = vmatmul.msk.f32.gmra.mxu3 %vm1020_vm0, %v9297_v56  ;;  %v9602_v56 = vpop.f32.mrf.mxu2 }
 0x198   : > { %15038 = vst [vmem:[#allocation32_spill] sm:$0xff] %v9602_v56  ;;  %v1673_v55 = vmul.f32 %v9602_v56, %v9602_v56  ;;  %v964_v56 = vld [vmem:[%s9217_s24 + $0x150] sm:$0xff] }
 0x19a   : > { %v9584_v50 = vpop.f32.mrf.mxu3 }
 0x19b   : > { %15033 = vst [vmem:[#allocation27_spill] sm:$0xff] %v9584_v50  ;;  %v9586_v22 = vpop.f32.mrf.mxu0 }
 0x19c   : > { %15034 = vst [vmem:[#allocation28_spill] sm:$0xff] %v9586_v22 }
 0x19e   : > { %7704 = vmatmul.msk.f32.gmra.mxu0 %vm1020_vm0, %v958_v54  ;;  %v960_v54 = vld [vmem:[%s9217_s24 + $0x130] sm:$0xff] }
 0x19f   : > { %7840 = vmatmul.msk.f32.gmra.mxu3 %vm1020_vm0, %v9304_v58 }
 0x1a2   : > { %v9594_v52 = vpop.f32.mrf.mxu3 }
 0x1a3   : > { %15036 = vst [vmem:[#allocation30_spill] sm:$0xff] %v9594_v52  ;;  %v9596_v28 = vpop.f32.mrf.mxu0 }
 0x1a4   : > { %15037 = vst [vmem:[#allocation31_spill] sm:$0xff] %v9596_v28  ;;  %v9614_v28 = vpop.f32.mrf.mxu2 }
 0x1a5   : > { %15042 = vst [vmem:[#allocation36_spill] sm:$0xff] %v9614_v28 }
 0x1a6   : > { %7705 = vmatmul.msk.f32.gmra.mxu0 %vm1020_vm0, %v959_v35 }
 0x1a7   : > { %7841 = vmatmul.msk.f32.gmra.mxu3 %vm1020_vm0, %v9311_v60  ;;  %v961_v60 = vld [vmem:[%s9217_s24 + $0x138] sm:$0xff] }
 0x1aa   : > { %v9604_v22 = vpop.f32.mrf.mxu3 }
 0x1ab   : > { %15039 = vst [vmem:[#allocation33_spill] sm:$0xff] %v9604_v22  ;;  %v9606_v46 = vpop.f32.mrf.mxu0 }
 0x1ac   : > { %15040 = vst [vmem:[#allocation34_spill] sm:$0xff] %v9606_v46  ;;  %v9635_v40 = vpop.f32.mrf.mxu2 }
 0x1ad   : > { %15046 = vst [vmem:[#allocation40_spill] sm:$0xff] %v9635_v40 }
 0x1ae   : > { %7706 = vmatmul.msk.f32.gmra.mxu0 %vm1020_vm0, %v960_v54 }
 0x1af   : > { %7842 = vmatmul.msk.f32.gmra.mxu3 %vm1020_vm0, %v9318_v62  ;;  %v2228_v62 = vld [vmem:[%s14779_s8] sm:$0xff] }
 0x1b0   : > { %8350 = vmatpush.msrb.mxu2 %v2228_v62  ;;  %2341 = vmatpush.msra.mxu1 %v2228_v62 }
 0x1b2   : > { %v9612_v58 = vpop.f32.mrf.mxu3 }
 0x1b3   : > { %15041 = vst [vmem:[#allocation35_spill] sm:$0xff] %v9612_v58  ;;  %v9616_v35 = vpop.f32.mrf.mxu0 }
 0x1b4   : > { %15043 = vst [vmem:[#allocation37_spill] sm:$0xff] %v9616_v35  ;;  %v1672_v35 = vmul.f32 %v9589_v16, %v9589_v16 }
 0x1b6   : > { %7707 = vmatmul.msk.f32.gmra.mxu0 %vm1020_vm0, %v961_v60  ;;  %v962_v60 = vld [vmem:[%s9217_s24 + $0x140] sm:$0xff] }
 0x1b7   : > { %7843 = vmatmul.msk.f32.gmra.mxu3 %vm1020_vm0, %v9325_v0  ;;  %v1736_v0 = vmul.f32 %v9548_v38, %v9548_v38  ;;  %v963_v38 = vld [vmem:[%s9217_s24 + $0x148] sm:$0xff] }
 0x1ba   : > { %v9628_v54 = vpop.f32.mrf.mxu3 }
 0x1bb   : > { %15044 = vst [vmem:[#allocation38_spill] sm:$0xff] %v9628_v54  ;;  %v9632_v46 = vpop.f32.mrf.mxu0 }
 0x1bc   : > { %15045 = vst [vmem:[#allocation39_spill] sm:$0xff] %v9632_v46  ;;  %v1640_v34 = vmul.f32 %v9632_v46, %v9632_v46  ;;  %v1737_v46 = vmul.f32 %v9561_v44, %v9561_v44 }
 0x1be   : > { %v1704_v36 = vadd.f32 %v1672_v35, %v1640_v34  ;;  %7708 = vmatmul.msk.f32.gmra.mxu0 %vm1020_vm0, %v962_v60  ;;  %v9655_v35 = vpop.f32.mrf.mxu2 }
 0x1bf   : > { %7844 = vmatmul.msk.f32.gmra.mxu3 %vm1020_vm0, %v9334_v3 }
 0x1c0   : > { %v1768_v62 = vadd.f32 %v1736_v0, %v1704_v36 }
 0x1c2   : > { %v9644_v61 = vpop.f32.mrf.mxu3  ;;  %v1800_v16 = vmax.f32 %v1768_v62, 1e-08 }
 0x1c3   : > { %15047 = vst [vmem:[#allocation41_spill] sm:$0xff] %v9644_v61  ;;  %v9648_v43 = vpop.f32.mrf.mxu0  ;;  %v1674_v61 = vmul.f32 %v9614_v28, %v9614_v28 }
 0x1c4   : > { %15048 = vst [vmem:[#allocation42_spill] sm:$0xff] %v9648_v43  ;;  %v1641_v34 = vmul.f32 %v9648_v43, %v9648_v43  ;;  %8381 = vrsqrt.f32 %v1800_v16  ;;  %vm2103_vm1 = vcmp.eq.f32.partialorder %v1800_v16, inf  ;;  %vm2105_vm2 = vcmp.eq.f32.partialorder %v1800_v16, 0.0 }
 0x1c6   : > { %v1705_v3 = vadd.f32 %v1673_v55, %v1641_v34  ;;  %7709 = vmatmul.msk.f32.gmra.mxu0 %vm1020_vm0, %v963_v38  ;;  %v1738_v55 = vmul.f32 %v9574_v53, %v9574_v53 }
 0x1c7   : > { %7845 = vmatmul.msk.f32.gmra.mxu3 %vm1020_vm0, %v9345_v7 }
 0x1c8   : > { %v1769_v60 = vadd.f32 %v1737_v46, %v1705_v3  ;;  %v9677_v3 = vpop.f32.mrf.mxu2 }
 0x1ca   : > { %v9660_v0 = vpop.f32.mrf.mxu3  ;;  %v8382_v36 = vpop.eup %8381  ;;  %v9662_v62 = vmax.f32 %v1769_v60, 1e-08 }
 0x1cb   : > { %15049 = vst [vmem:[#allocation43_spill] sm:$0xff] %v9660_v0  ;;  %v9666_v44 = vpop.f32.mrf.mxu0  ;;  %v2097_v43 = vmul.f32 %v8382_v36, %v1800_v16 }
 0x1cc   : > { %15050 = vst [vmem:[#allocation44_spill] sm:$0xff] %v9666_v44  ;;  %v1642_v7 = vmul.f32 %v9666_v44, %v9666_v44  ;;  %8383 = vrsqrt.f32 %v9662_v62  ;;  %v1675_v44 = vmul.f32 %v9635_v40, %v9635_v40  ;;  %vm2115_vm3 = vcmp.eq.f32.partialorder %v9662_v62, inf }
 0x1cd   : > { %v2098_v38 = vmul.f32 %v8382_v36, %v2097_v43  ;;  %vm2117_vm4 = vcmp.eq.f32.partialorder %v9662_v62, 0.0 }
 0x1ce   : > { %v1706_v46 = vadd.f32 %v1674_v61, %v1642_v7  ;;  %7710 = vmatmul.msk.f32.gmra.mxu0 %vm1020_vm0, %v964_v56  ;;  %v965_v61 = vld [vmem:[%s9217_s24 + $0x158] sm:$0xff] }
 0x1cf   : > { %7846 = vmatmul.msk.f32.gmra.mxu3 %vm1020_vm0, %v9356_v11  ;;  %v2099_v34 = vmul.f32 0.5, %v2098_v38  ;;  %v1739_v11 = vmul.f32 %v9584_v50, %v9584_v50 }
 0x1d0   : > { %v1770_v60 = vadd.f32 %v1738_v55, %v1706_v46 }
 0x1d1   : > { %v2100_v53 = vsub.f32 1.5, %v2099_v34 }
 0x1d2   : > { %v9679_v0 = vpop.f32.mrf.mxu3  ;;  %v8384_v28 = vpop.eup %8383  ;;  %v9681_v47 = vmax.f32 %v1770_v60, 1e-08 }
 0x1d3   : > { %15051 = vst [vmem:[#allocation45_spill] sm:$0xff] %v9679_v0  ;;  %v9685_v43 = vpop.f32.mrf.mxu0  ;;  %v2101_v56 = vmul.f32 %v8382_v36, %v2100_v53  ;;  %v2109_v7 = vmul.f32 %v8384_v28, %v9662_v62  ;;  %v2106_v53 = vand.u32 2147483648, %v1800_v16 }
 0x1d4   : > { %v1643_v55 = vmul.f32 %v9685_v43, %v9685_v43  ;;  %8385 = vrsqrt.f32 %v9681_v47  ;;  %vm2127_vm5 = vcmp.eq.f32.partialorder %v9681_v47, inf  ;;  %vm2129_vm6 = vcmp.eq.f32.partialorder %v9681_v47, 0.0 }
 0x1d5   : > { %v2102_v38 = vmul.f32 %v2101_v56, %v1800_v16  ;;  %v2110_v46 = vmul.f32 %v8384_v28, %v2109_v7  ;;  %v9700_v7 = vpop.f32.mrf.mxu2 }
 0x1d6   : > { %v1707_v34 = vadd.f32 %v1675_v44, %v1643_v55  ;;  %7711 = vmatmul.msk.f32.gmra.mxu0 %vm1020_vm0, %v965_v61 }
 0x1d7   : > { %7847 = vmatmul.msk.f32.gmra.mxu3 %vm1020_vm0, %v9367_v15  ;;  %v2104_v36 = vsel %vm2103_vm1, %v1800_v16, %v2102_v38  ;;  %v2111_v60 = vmul.f32 0.5, %v2110_v46  ;;  %v1676_v15 = vmul.f32 %v9655_v35, %v9655_v35  ;;  %v966_v38 = vld [vmem:[%s9217_s24 + $0x160] sm:$0xff] }
 0x1d8   : > { %v1771_v0 = vadd.f32 %v1739_v11, %v1707_v34  ;;  %v2107_v50 = vsel %vm2105_vm2, %v2106_v53, %v2104_v36 }
 0x1d9   : > { %7788 = vmatmul.msk.f32.vlgmr.msrb.gmra.mxu2 %vm1020_vm0, %v2107_v50  ;;  %v2112_v56 = vsub.f32 1.5, %v2111_v60  ;;  %v1740_v50 = vmul.f32 %v9594_v52, %v9594_v52  ;;  %v967_v52 = vld [vmem:[%s9217_s24 + $0x168] sm:$0xff] }
 0x1da   : > { %v9698_v40 = vpop.f32.mrf.mxu3  ;;  %v8386_v44 = vpop.eup %8385  ;;  %v9702_v61 = vmax.f32 %v1771_v0, 1e-08 }
 0x1db   : > { %15052 = vst [vmem:[#allocation46_spill] sm:$0xff] %v9698_v40  ;;  %v9706_v55 = vpop.f32.mrf.mxu0  ;;  %v2113_v16 = vmul.f32 %v8384_v28, %v2112_v56  ;;  %v2121_v11 = vmul.f32 %v8386_v44, %v9681_v47  ;;  %v2118_v28 = vand.u32 2147483648, %v9662_v62 }
 0x1dc   : > { %v1644_v46 = vmul.f32 %v9706_v55, %v9706_v55  ;;  %8387 = vrsqrt.f32 %v9702_v61  ;;  %vm2139_vm7 = vcmp.eq.f32.partialorder %v9702_v61, inf  ;;  %vm2141_vm8 = vcmp.eq.f32.partialorder %v9702_v61, 0.0 }
 0x1dd   : > { %v2114_v0 = vmul.f32 %v2113_v16, %v9662_v62  ;;  %v2122_v34 = vmul.f32 %v8386_v44, %v2121_v11 }
 0x1de   : > { %v1708_v53 = vadd.f32 %v1676_v15, %v1644_v46  ;;  %7712 = vmatmul.msk.f32.gmra.mxu0 %vm1020_vm0, %v966_v38 }
 0x1df   : > { %7848 = vmatmul.msk.f32.gmra.mxu3 %vm1020_vm0, %v9383_v21  ;;  %v2116_v36 = vsel %vm2115_vm3, %v9662_v62, %v2114_v0  ;;  %v2123_v60 = vmul.f32 0.5, %v2122_v34  ;;  %v1677_v21 = vmul.f32 %v9677_v3, %v9677_v3  ;;  %v9734_v34 = vpop.f32.mrf.mxu2  ;;  %vm2439_vm3 = vcmask 261120  }
 0x1e0   : > { %v1772_v56 = vadd.f32 %v1740_v50, %v1708_v53  ;;  %v2119_v40 = vsel %vm2117_vm4, %v2118_v28, %v2116_v36 }
 0x1e1   : > { %7789 = vmatmul.msk.f32.gmra.mxu2 %vm1020_vm0, %v2119_v40  ;;  %v2124_v38 = vsub.f32 1.5, %v2123_v60  ;;  %v1741_v40 = vmul.f32 %v9604_v22, %v9604_v22  ;;  %v968_v22 = vld [vmem:[%s9217_s24 + $0x170] sm:$0xff] }
 0x1e2   : > { %v9724_v15 = vpop.f32.mrf.mxu3  ;;  %v8388_v16 = vpop.eup %8387  ;;  %v9726_v11 = vmax.f32 %v1772_v56, 1e-08 }
 0x1e3   : > { %15053 = vst [vmem:[#allocation47_spill] sm:$0xff] %v9724_v15  ;;  %v9730_v46 = vpop.f32.mrf.mxu0  ;;  %v2125_v0 = vmul.f32 %v8386_v44, %v2124_v38  ;;  %v2133_v62 = vmul.f32 %v8388_v16, %v9702_v61  ;;  %v2130_v44 = vand.u32 2147483648, %v9681_v47 }
 0x1e4   : > { %v1645_v50 = vmul.f32 %v9730_v46, %v9730_v46  ;;  %8389 = vrsqrt.f32 %v9726_v11  ;;  %vm2151_vm9 = vcmp.eq.f32.partialorder %v9726_v11, inf  ;;  %vm2153_vm10 = vcmp.eq.f32.partialorder %v9726_v11, 0.0 }
 0x1e5   : > { %v2126_v53 = vmul.f32 %v2125_v0, %v9681_v47  ;;  %v2134_v28 = vmul.f32 %v8388_v16, %v2133_v62 }
 0x1e6   : > { %v1709_v36 = vadd.f32 %v1677_v21, %v1645_v50  ;;  %7713 = vmatmul.msk.f32.gmra.mxu0 %vm1020_vm0, %v967_v52 }
 0x1e7   : > { %7849 = vmatmul.msk.f32.gmra.mxu3 %vm1020_vm0, %v9399_v27  ;;  %v2128_v60 = vsel %vm2127_vm5, %v9681_v47, %v2126_v53  ;;  %v2135_v56 = vmul.f32 0.5, %v2134_v28  ;;  %v1678_v27 = vmul.f32 %v9700_v7, %v9700_v7  ;;  %v9760_v28 = vpop.f32.mrf.mxu2 }
 0x1e8   : > { %v1773_v38 = vadd.f32 %v1741_v40, %v1709_v36  ;;  %v2131_v15 = vsel %vm2129_vm6, %v2130_v44, %v2128_v60  ;;  %15055 = vst [vmem:[#allocation49_spill] sm:$0xff] %v9760_v28 }
 0x1e9   : > { %7790 = vmatmul.msk.f32.gmra.mxu2 %vm1020_vm0, %v2131_v15  ;;  %v2136_v52 = vsub.f32 1.5, %v2135_v56  ;;  %v1742_v15 = vmul.f32 %v9612_v58, %v9612_v58  ;;  %v971_v58 = vld [vmem:[%s9217_s24 + $0x188] sm:$0xff] }
 0x1ea   : > { %v9750_v21 = vpop.f32.mrf.mxu3  ;;  %v8390_v0 = vpop.eup %8389  ;;  %v9752_v62 = vmax.f32 %v1773_v38, 1e-08 }
 0x1eb   : > { %15054 = vst [vmem:[#allocation48_spill] sm:$0xff] %v9750_v21  ;;  %v9756_v50 = vpop.f32.mrf.mxu0  ;;  %v2137_v53 = vmul.f32 %v8388_v16, %v2136_v52  ;;  %v2145_v47 = vmul.f32 %v8390_v0, %v9726_v11  ;;  %v2142_v16 = vand.u32 2147483648, %v9702_v61 }
 0x1ec   : > { %v1646_v40 = vmul.f32 %v9756_v50, %v9756_v50  ;;  %8391 = vrsqrt.f32 %v9752_v62  ;;  %vm2163_vm11 = vcmp.eq.f32.partialorder %v9752_v62, inf  ;;  %vm2165_vm12 = vcmp.eq.f32.partialorder %v9752_v62, 0.0 }
 0x1ed   : > { %v2138_v36 = vmul.f32 %v2137_v53, %v9702_v61  ;;  %v2146_v44 = vmul.f32 %v8390_v0, %v2145_v47 }
 0x1ee   : > { %v1710_v60 = vadd.f32 %v1678_v27, %v1646_v40  ;;  %7714 = vmatmul.msk.f32.gmra.mxu0 %vm1020_vm0, %v968_v22  ;;  %v2227_v40 = vld [vmem:[%s14778_s7 + $0x18] sm:$0xff] }
 0x1ef   : > { %7850 = vmatmul.msk.f32.gmra.mxu3 %vm1020_vm0, %v9412_v32  ;;  %v2140_v56 = vsel %vm2139_vm7, %v9702_v61, %v2138_v36  ;;  %v2147_v38 = vmul.f32 0.5, %v2146_v44  ;;  %v1679_v32 = vmul.f32 %v9734_v34, %v9734_v34  ;;  %v969_v61 = vld [vmem:[%s9217_s24 + $0x178] sm:$0xff]  ;;  %2548 = vmatpush.msra.mxu2 %v2227_v40  ;;  %v2225_v40 = vld [vmem:[%s14778_s7 + $0x8] sm:$0xff] }
 0x1f0   : > { %v1774_v52 = vadd.f32 %v1742_v15, %v1710_v60  ;;  %v2143_v21 = vsel %vm2141_vm8, %v2142_v16, %v2140_v56  ;;  %v2226_v16 = vld [vmem:[%s14778_s7 + $0x10] sm:$0xff] }
 0x1f1   : > { %7791 = vmatmul.msk.f32.gmra.mxu2 %vm1020_vm0, %v2143_v21  ;;  %v2148_v22 = vsub.f32 1.5, %v2147_v38  ;;  %v1743_v21 = vmul.f32 %v9628_v54, %v9628_v54 }
 0x1f2   : > { %v9776_v27 = vpop.f32.mrf.mxu3  ;;  %v8392_v53 = vpop.eup %8391  ;;  %v9778_v47 = vmax.f32 %v1774_v52, 1e-08  ;;  %2549 = vmatpush.msra.mxu2 %v2226_v16 }
 0x1f3   : > { %15056 = vst [vmem:[#allocation50_spill] sm:$0xff] %v9776_v27  ;;  %v9785_v36 = vpop.f32.mrf.mxu0  ;;  %v2149_v15 = vmul.f32 %v8390_v0, %v2148_v22  ;;  %v2157_v44 = vmul.f32 %v8392_v53, %v9752_v62  ;;  %v9798_v52 = vpop.f32.mrf.mxu2  ;;  %v2154_v22 = vand.u32 2147483648, %v9726_v11 }
 0x1f4   : > { %v1647_v60 = vmul.f32 %v9785_v36, %v9785_v36  ;;  %8393 = vrsqrt.f32 %v9778_v47  ;;  %15057 = vst [vmem:[#allocation51_spill] sm:$0xff] %v9798_v52  ;;  %2550 = vmatpush.msra.mxu2 %v2225_v40  ;;  %vm2175_vm13 = vcmp.eq.f32.partialorder %v9778_v47, inf  ;;  %vm2177_vm14 = vcmp.eq.f32.partialorder %v9778_v47, 0.0 }
 0x1f5   : > { %v2150_v56 = vmul.f32 %v2149_v15, %v9726_v11  ;;  %v2158_v38 = vmul.f32 %v8392_v53, %v2157_v44 }
 0x1f6   : > { %v1711_v0 = vadd.f32 %v1679_v32, %v1647_v60  ;;  %7715 = vmatmul.msk.f32.gmra.mxu0 %vm1020_vm0, %v969_v61 }
 0x1f7   : > { %7851 = vmatmul.msk.f32.gmra.mxu3 %vm1020_vm0, %v9425_v41  ;;  %v2152_v15 = vsel %vm2151_vm9, %v9726_v11, %v2150_v56  ;;  %v2159_v44 = vmul.f32 0.5, %v2158_v38  ;;  %v2224_v41 = vld [vmem:[%s14778_s7] sm:$0xff]  ;;  %v2993_v11 = vld [vmem:[%s14775_s4 + $0x8] sm:$0xff] }
 0x1f8   : > { %v1775_v32 = vadd.f32 %v1743_v21, %v1711_v0  ;;  %v2155_v61 = vsel %vm2153_vm10, %v2154_v22, %v2152_v15  ;;  %2551 = vmatpush.msra.mxu2 %v2224_v41  ;;  %v970_v21 = vld [vmem:[%s9217_s24 + $0x180] sm:$0xff]  ;;  %3008 = vmatpush.msrb.mxu1 %v2993_v11  ;;  %v1616_v22 = vmul.f32 %v9331_v2, %v9331_v2 }
 0x1f9   : > { %7792 = vmatmul.msk.f32.gmra.mxu2 %vm1020_vm0, %v2155_v61  ;;  %v2160_v16 = vsub.f32 1.5, %v2159_v44  ;;  %v1712_v15 = vmul.f32 %v9760_v28, %v9760_v28 }
 0x1fa   : > { %v9814_v60 = vpop.f32.mrf.mxu3  ;;  %v8394_v27 = vpop.eup %8393  ;;  %v9816_v54 = vmax.f32 %v1775_v32, 1e-08 }
 0x1fb   : > { %15058 = vst [vmem:[#allocation52_spill] sm:$0xff] %v9814_v60  ;;  %v9821_v56 = vpop.f32.mrf.mxu0  ;;  %v2161_v38 = vmul.f32 %v8392_v53, %v2160_v16  ;;  %v2169_v0 = vmul.f32 %v8394_v27, %v9778_v47  ;;  %v2166_v53 = vand.u32 2147483648, %v9752_v62  ;;  %v9840_v11 = vpop.f32.mrf.mxu2 }
 0x1fc   : > { %v1648_v40 = vmul.f32 %v9821_v56, %v9821_v56  ;;  %8395 = vrsqrt.f32 %v9816_v54  ;;  %15059 = vst [vmem:[#allocation53_spill] sm:$0xff] %v9840_v11  ;;  %vm2187_vm15 = vcmp.eq.f32.partialorder %v9816_v54, inf  ;;  %vm2189_vm1 = vcmp.eq.f32.partialorder %v9816_v54, 0.0 }
 0x1fd   : > { %v2162_v44 = vmul.f32 %v2161_v38, %v9752_v62  ;;  %v2170_v32 = vmul.f32 %v8394_v27, %v2169_v0 }
 0x1fe   : > { %v1680_v61 = vadd.f32 %v1648_v40, %v1616_v22  ;;  %7716 = vmatmul.msk.f32.gmra.mxu0 %vm1020_vm0, %v970_v21 }
 0x1ff   : > { %7852 = vmatmul.msk.f32.gmra.mxu3 %vm1020_vm0, %v9438_v51  ;;  %v2164_v41 = vsel %vm2163_vm11, %v9752_v62, %v2162_v44  ;;  %v2171_v16 = vmul.f32 0.5, %v2170_v32  ;;  %v1617_v32 = vmul.f32 %v9342_v6, %v9342_v6 }
 0x200   : > { %v1744_v38 = vadd.f32 %v1712_v15, %v1680_v61  ;;  %v2167_v0 = vsel %vm2165_vm12, %v2166_v53, %v2164_v41  ;;  %v1713_v61 = vmul.f32 %v9798_v52, %v9798_v52  ;;  %v972_v52 = vld [vmem:[%s9217_s24 + $0x190] sm:$0xff] }
 0x201   : > { %7793 = vmatmul.msk.f32.gmra.mxu2 %vm1020_vm0, %v2167_v0  ;;  %v2172_v22 = vsub.f32 1.5, %v2171_v16 }
 0x202   : > { %v9843_v21 = vpop.f32.mrf.mxu3  ;;  %v8396_v51 = vpop.eup %8395  ;;  %v9845_v40 = vmax.f32 %v1744_v38, 1e-08 }
 0x203   : > { %15060 = vst [vmem:[#allocation54_spill] sm:$0xff] %v9843_v21  ;;  %v9847_v60 = vpop.f32.mrf.mxu0  ;;  %v2173_v44 = vmul.f32 %v8394_v27, %v2172_v22  ;;  %v2181_v62 = vmul.f32 %v8396_v51, %v9816_v54  ;;  %v2178_v27 = vand.u32 2147483648, %v9778_v47 }
 0x204   : > { %v1649_v15 = vmul.f32 %v9847_v60, %v9847_v60  ;;  %8397 = vrsqrt.f32 %v9845_v40  ;;  %vm1815_vm2 = vcmp.eq.f32.partialorder %v9845_v40, inf  ;;  %vm1817_vm4 = vcmp.eq.f32.partialorder %v9845_v40, 0.0 }
 0x205   : > { %v2174_v53 = vmul.f32 %v2173_v44, %v9778_v47  ;;  %v2182_v41 = vmul.f32 %v8396_v51, %v2181_v62 }
 0x206   : > { %v1681_v16 = vadd.f32 %v1649_v15, %v1617_v32  ;;  %7717 = vmatmul.msk.f32.gmra.mxu0 %vm1020_vm0, %v971_v58  ;;  %v9871_v32 = vpop.f32.mrf.mxu2 }
 0x207   : > { %7853 = vmatmul.msk.f32.gmra.mxu3 %vm1020_vm0, %v9451_v59  ;;  %v2176_v38 = vsel %vm2175_vm13, %v9778_v47, %v2174_v53  ;;  %v2183_v0 = vmul.f32 0.5, %v2182_v41  ;;  %15062 = vst [vmem:[#allocation56_spill] sm:$0xff] %v9871_v32 }
 0x208   : > { %v1745_v22 = vadd.f32 %v1713_v61, %v1681_v16  ;;  %v2179_v44 = vsel %vm2177_vm14, %v2178_v27, %v2176_v38  ;;  %v1618_v61 = vmul.f32 %v9353_v10, %v9353_v10  ;;  %v1714_v16 = vmul.f32 %v9840_v11, %v9840_v11  ;;  %v974_v11 = vld [vmem:[%s9217_s24 + $0x1a0] sm:$0xff] }
 0x209   : > { %7794 = vmatmul.msk.f32.gmra.mxu2 %vm1020_vm0, %v2179_v44  ;;  %v2184_v58 = vsub.f32 1.5, %v2183_v0 }
 0x20a   : > { %v9869_v62 = vpop.f32.mrf.mxu3  ;;  %v8398_v59 = vpop.eup %8397  ;;  %v9873_v15 = vmax.f32 %v1745_v22, 1e-08 }
 0x20b   : > { %15061 = vst [vmem:[#allocation55_spill] sm:$0xff] %v9869_v62  ;;  %v9875_v21 = vpop.f32.mrf.mxu0  ;;  %v2185_v53 = vmul.f32 %v8396_v51, %v2184_v58  ;;  %v1809_v47 = vmul.f32 %v8398_v59, %v9845_v40  ;;  %v2190_v51 = vand.u32 2147483648, %v9816_v54 }
 0x20c   : > { %v1650_v41 = vmul.f32 %v9875_v21, %v9875_v21  ;;  %8399 = vrsqrt.f32 %v9873_v15  ;;  %vm1827_vm5 = vcmp.eq.f32.partialorder %v9873_v15, inf  ;;  %vm1829_vm6 = vcmp.eq.f32.partialorder %v9873_v15, 0.0 }
 0x20d   : > { %v2186_v27 = vmul.f32 %v2185_v53, %v9816_v54  ;;  %v1810_v38 = vmul.f32 %v8398_v59, %v1809_v47 }
 0x20e   : > { %v1682_v0 = vadd.f32 %v1650_v41, %v1618_v61  ;;  %7718 = vmatmul.msk.f32.gmra.mxu0 %vm1020_vm0, %v972_v52  ;;  %v973_v41 = vld [vmem:[%s9217_s24 + $0x198] sm:$0xff] }
 0x20f   : > { %7854 = vmatmul.msk.f32.gmra.mxu3 %vm1020_vm0, %v9464_v1  ;;  %v2188_v22 = vsel %vm2187_vm15, %v9816_v54, %v2186_v27  ;;  %v1811_v44 = vmul.f32 0.5, %v1810_v38  ;;  %v9911_v54 = vpop.f32.mrf.mxu2 }
 0x210   : > { %v1746_v58 = vadd.f32 %v1714_v16, %v1682_v0  ;;  %v2191_v62 = vsel %vm2189_vm1, %v2190_v51, %v2188_v22  ;;  %15064 = vst [vmem:[#allocation58_spill] sm:$0xff] %v9911_v54  ;;  %v1619_v16 = vmul.f32 %v9364_v14, %v9364_v14  ;;  %v1715_v0 = vmul.f32 %v9871_v32, %v9871_v32 }
 0x211   : > { %7795 = vmatmul.msk.f32.gmra.mxu2 %vm1020_vm0, %v2191_v62  ;;  %v1812_v53 = vsub.f32 1.5, %v1811_v44  ;;  %v1818_v44 = vand.u32 2147483648, %v9845_v40 }
 0x212   : > { %v9898_v52 = vpop.f32.mrf.mxu3  ;;  %v8400_v1 = vpop.eup %8399  ;;  %v9900_v47 = vmax.f32 %v1746_v58, 1e-08  ;;  %v2192_v58 = vld [vmem:[%s9909_s29] sm:$0xff] }
 0x213   : > { %15063 = vst [vmem:[#allocation57_spill] sm:$0xff] %v9898_v52  ;;  %v9902_v61 = vpop.f32.mrf.mxu0  ;;  %v1813_v27 = vmul.f32 %v8398_v59, %v1812_v53  ;;  %v1821_v62 = vmul.f32 %v8400_v1, %v9873_v15 }
 0x214   : > { %v1651_v38 = vmul.f32 %v9902_v61, %v9902_v61  ;;  %8401 = vrsqrt.f32 %v9900_v47  ;;  %vm1839_vm7 = vcmp.eq.f32.partialorder %v9900_v47, inf  ;;  %vm1841_vm8 = vcmp.eq.f32.partialorder %v9900_v47, 0.0 }
 0x215   : > { %v1814_v59 = vmul.f32 %v1813_v27, %v9845_v40  ;;  %v1822_v51 = vmul.f32 %v8400_v1, %v1821_v62 }
 0x216   : > { %v1683_v22 = vadd.f32 %v1651_v38, %v1619_v16  ;;  %7719 = vmatmul.msk.f32.gmra.mxu0 %vm1020_vm0, %v973_v41 }
 0x217   : > { %7855 = vmatmul.msk.f32.gmra.mxu3 %vm1020_vm0, %v9477_v12  ;;  %v1816_v53 = vsel %vm1815_vm2, %v9845_v40, %v1814_v59  ;;  %v1823_v52 = vmul.f32 0.5, %v1822_v51  ;;  %v1615_v40 = vld [vmem:[%s14776_s5 + $0x8] sm:$0xff]  ;;  %v1716_v51 = vmul.f32 %v9911_v54, %v9911_v54 }
 0x218   : > { %v1747_v27 = vadd.f32 %v1715_v0, %v1683_v22  ;;  %v1819_v62 = vsel %vm1817_vm4, %v1818_v44, %v1816_v53  ;;  %v1620_v0 = vmul.f32 %v9380_v20, %v9380_v20  ;;  %4488 = vmatpush.msrb.mxu0 %v1615_v40  ;;  %v9951_v22 = vpop.f32.mrf.mxu2 }
 0x219   : > { %7764 = vmatmul.msk.f32.vlgmr.msra.gmra.mxu1 %vm1020_vm0, %v1819_v62  ;;  %7796 = vmatmul.msk.f32.vlgmr.msra.gmra.mxu2 %vm2439_vm3, %v2192_v58  ;;  %v1824_v12 = vsub.f32 1.5, %v1823_v52  ;;  %15066 = vst [vmem:[#allocation60_spill] sm:$0xff] %v9951_v22  ;;  %v1614_v58 = vld [vmem:[%s14776_s5] sm:$0xff]  ;;  %v2193_v62 = vld [vmem:[%s9909_s29 + $0x8] sm:$0xff] }
 0x21a   : > { %v9932_v41 = vpop.f32.mrf.mxu3  ;;  %v8402_v16 = vpop.eup %8401  ;;  %v9934_v38 = vmax.f32 %v1747_v27, 1e-08  ;;  %v1830_v27 = vand.u32 2147483648, %v9873_v15  ;;  %4489 = vmatpush.msrb.mxu0 %v1614_v58  ;;  %v1717_v58 = vmul.f32 %v9951_v22, %v9951_v22 }
 0x21b   : > { %15065 = vst [vmem:[#allocation59_spill] sm:$0xff] %v9932_v41  ;;  %v9936_v32 = vpop.f32.mrf.mxu0  ;;  %v1825_v28 = vmul.f32 %v8400_v1, %v1824_v12  ;;  %v1833_v59 = vmul.f32 %v8402_v16, %v9900_v47 }
 0x21c   : > { %v1652_v52 = vmul.f32 %v9936_v32, %v9936_v32  ;;  %8403 = vrsqrt.f32 %v9934_v38  ;;  %vm1851_vm9 = vcmp.eq.f32.partialorder %v9934_v38, inf  ;;  %vm1853_vm10 = vcmp.eq.f32.partialorder %v9934_v38, 0.0 }
 0x21d   : > { %v1826_v1 = vmul.f32 %v1825_v28, %v9873_v15  ;;  %v1834_v44 = vmul.f32 %v8402_v16, %v1833_v59 }
 0x21e   : > { %v1684_v53 = vadd.f32 %v1652_v52, %v1620_v0  ;;  %7720 = vmatmul.msk.f32.gmra.mxu0 %vm1020_vm0, %v974_v11 }
 0x21f   : > { %7856 = vmatmul.msk.f32.gmra.mxu3 %vm1020_vm0, %v9490_v19  ;;  %v1828_v28 = vsel %vm1827_vm5, %v9873_v15, %v1826_v1  ;;  %v1835_v12 = vmul.f32 0.5, %v1834_v44  ;;  %v975_v1 = vld [vmem:[%s9217_s24 + $0x1a8] sm:$0xff] }
 0x220   : > { %v1748_v59 = vadd.f32 %v1716_v51, %v1684_v53  ;;  %v1831_v40 = vsel %vm1829_vm6, %v1830_v27, %v1828_v28  ;;  %v1621_v51 = vmul.f32 %v9396_v26, %v9396_v26  ;;  %v2194_v28 = vld [vmem:[%s9909_s29 + $0x10] sm:$0xff] }
 0x221   : > { %7765 = vmatmul.msk.f32.gmra.mxu1 %vm1020_vm0, %v1831_v40  ;;  %7797 = vmatmul.msk.f32.gmra.mxu2 %vm2439_vm3, %v2193_v62  ;;  %v1836_v19 = vsub.f32 1.5, %v1835_v12 }
 0x222   : > { %v9966_v11 = vpop.f32.mrf.mxu3  ;;  %v8404_v0 = vpop.eup %8403  ;;  %v9968_v52 = vmax.f32 %v1748_v59, 1e-08 }
 0x223   : > { %15067 = vst [vmem:[#allocation61_spill] sm:$0xff] %v9966_v11  ;;  %v9970_v41 = vpop.f32.mrf.mxu0  ;;  %v1837_v54 = vmul.f32 %v8402_v16, %v1836_v19  ;;  %v1845_v15 = vmul.f32 %v8404_v0, %v9934_v38  ;;  %v1842_v16 = vand.u32 2147483648, %v9900_v47  ;;  %v9990_v59 = vpop.f32.mrf.mxu2 }
 0x224   : > { %v1653_v44 = vmul.f32 %v9970_v41, %v9970_v41  ;;  %8405 = vrsqrt.f32 %v9968_v52  ;;  %15068 = vst [vmem:[#allocation62_spill] sm:$0xff] %v9990_v59  ;;  %vm1863_vm11 = vcmp.eq.f32.partialorder %v9968_v52, inf  ;;  %vm1865_vm12 = vcmp.eq.f32.partialorder %v9968_v52, 0.0 }
 0x225   : > { %v1838_v53 = vmul.f32 %v1837_v54, %v9900_v47  ;;  %v1846_v27 = vmul.f32 %v8404_v0, %v1845_v15 }
 0x226   : > { %v1685_v62 = vadd.f32 %v1653_v44, %v1621_v51  ;;  %7721 = vmatmul.msk.f32.gmra.mxu0 %vm1020_vm0, %v975_v1 }
 0x227   : > { %7857 = vmatmul.msk.f32.gmra.mxu3 %vm1020_vm0, %v9503_v24  ;;  %v1840_v12 = vsel %vm1839_vm7, %v9900_v47, %v1838_v53  ;;  %v1847_v54 = vmul.f32 0.5, %v1846_v27  ;;  %v976_v53 = vld [vmem:[%s9217_s24 + $0x1b0] sm:$0xff] }
 0x228   : > { %v1749_v40 = vadd.f32 %v1717_v58, %v1685_v62  ;;  %v1843_v19 = vsel %vm1841_vm8, %v1842_v16, %v1840_v12  ;;  %v1622_v58 = vmul.f32 %v9409_v31, %v9409_v31  ;;  %v1718_v62 = vmul.f32 %v9990_v59, %v9990_v59 }
 0x229   : > { %7766 = vmatmul.msk.f32.gmra.mxu1 %vm1020_vm0, %v1843_v19  ;;  %7798 = vmatmul.msk.f32.gmra.mxu2 %vm2439_vm3, %v2194_v28  ;;  %v1848_v1 = vsub.f32 1.5, %v1847_v54  ;;  %v2195_v54 = vld [vmem:[%s9909_s29 + $0x18] sm:$0xff] }
 0x22a   : > { %v9994_v24 = vpop.f32.mrf.mxu3  ;;  %v8406_v15 = vpop.eup %8405  ;;  %v9996_v51 = vmax.f32 %v1749_v40, 1e-08 }
 0x22b   : > { %15069 = vst [vmem:[#allocation63_spill] sm:$0xff] %v9994_v24  ;;  %v9998_v44 = vpop.f32.mrf.mxu0  ;;  %v1849_v47 = vmul.f32 %v8404_v0, %v1848_v1  ;;  %v1857_v11 = vmul.f32 %v8406_v15, %v9968_v52  ;;  %v1854_v0 = vand.u32 2147483648, %v9934_v38 }
 0x22c   : > { %v1654_v27 = vmul.f32 %v9998_v44, %v9998_v44  ;;  %8407 = vrsqrt.f32 %v9996_v51  ;;  %vm1875_vm13 = vcmp.eq.f32.partialorder %v9996_v51, inf  ;;  %vm1877_vm14 = vcmp.eq.f32.partialorder %v9996_v51, 0.0 }
 0x22d   : > { %v1850_v16 = vmul.f32 %v1849_v47, %v9934_v38  ;;  %v1858_v28 = vmul.f32 %v8406_v15, %v1857_v11 }
 0x22e   : > { %v1686_v12 = vadd.f32 %v1654_v27, %v1622_v58  ;;  %7722 = vmatmul.msk.f32.gmra.mxu0 %vm1020_vm0, %v976_v53 }
 0x22f   : > { %7858 = vmatmul.msk.f32.gmra.mxu3 %vm1020_vm0, %v9516_v33  ;;  %v1852_v40 = vsel %vm1851_vm9, %v9934_v38, %v1850_v16  ;;  %v1859_v19 = vmul.f32 0.5, %v1858_v28  ;;  %v10022_v33 = vpop.f32.mrf.mxu2  ;;  %v977_v16 = vld [vmem:[%s9217_s24 + $0x1b8] sm:$0xff]  ;;  %v1623_v28 = vmul.f32 %v9422_v39, %v9422_v39 }
 0x230   : > { %v1750_v1 = vadd.f32 %v1718_v62, %v1686_v12  ;;  %v1855_v47 = vsel %vm1853_vm10, %v1854_v0, %v1852_v40  ;;  %15071 = vst [vmem:[#allocation65_spill] sm:$0xff] %v10022_v33  ;;  %v1719_v0 = vmul.f32 %v10022_v33, %v10022_v33 }
 0x231   : > { %7767 = vmatmul.msk.f32.gmra.mxu1 %vm1020_vm0, %v1855_v47  ;;  %7799 = vmatmul.msk.f32.gmra.mxu2 %vm2439_vm3, %v2195_v54  ;;  %v1860_v53 = vsub.f32 1.5, %v1859_v19 }
 0x232   : > { %v10020_v11 = vpop.f32.mrf.mxu3  ;;  %v8408_v58 = vpop.eup %8407  ;;  %v10024_v27 = vmax.f32 %v1750_v1, 1e-08  ;;  %v2196_v1 = vld [vmem:[%s9909_s29 + $0x20] sm:$0xff] }
 0x233   : > { %15070 = vst [vmem:[#allocation64_spill] sm:$0xff] %v10020_v11  ;;  %v10026_v24 = vpop.f32.mrf.mxu0  ;;  %v1861_v38 = vmul.f32 %v8406_v15, %v1860_v53  ;;  %v1869_v62 = vmul.f32 %v8408_v58, %v9996_v51  ;;  %v1866_v15 = vand.u32 2147483648, %v9968_v52 }
 0x234   : > { %v1655_v12 = vmul.f32 %v10026_v24, %v10026_v24  ;;  %8409 = vrsqrt.f32 %v10024_v27  ;;  %vm1887_vm15 = vcmp.eq.f32.partialorder %v10024_v27, inf  ;;  %vm1889_vm1 = vcmp.eq.f32.partialorder %v10024_v27, 0.0 }
 0x235   : > { %v1862_v54 = vmul.f32 %v1861_v38, %v9968_v52  ;;  %v1870_v40 = vmul.f32 %v8408_v58, %v1869_v62 }
 0x236   : > { %v1687_v19 = vadd.f32 %v1655_v12, %v1623_v28  ;;  %7723 = vmatmul.msk.f32.gmra.mxu0 %vm1020_vm0, %v977_v16 }
 0x237   : > { %7859 = vmatmul.msk.f32.gmra.mxu3 %vm1020_vm0, %v9529_v45  ;;  %v1864_v47 = vsel %vm1863_vm11, %v9968_v52, %v1862_v54  ;;  %v1871_v53 = vmul.f32 0.5, %v1870_v40  ;;  %v1720_v52 = vmul.f32 %v9340_v5, %v9340_v5 }
 0x238   : > { %v1751_v11 = vadd.f32 %v1719_v0, %v1687_v19  ;;  %v1867_v33 = vsel %vm1865_vm12, %v1866_v15, %v1864_v47  ;;  %v2197_v15 = vld [vmem:[%s9909_s29 + $0x28] sm:$0xff] }
 0x239   : > { %7768 = vmatmul.msk.f32.gmra.mxu1 %vm1020_vm0, %v1867_v33  ;;  %7800 = vmatmul.msk.f32.gmra.mxu2 %vm2439_vm3, %v2196_v1  ;;  %v1872_v38 = vsub.f32 1.5, %v1871_v53  ;;  %v1624_v33 = vmul.f32 %v9435_v49, %v9435_v49 }
 0x23a   : > { %v10048_v16 = vpop.f32.mrf.mxu3  ;;  %v8410_v45 = vpop.eup %8409  ;;  %v10050_v62 = vmax.f32 %v1751_v11, 1e-08 }
 0x23b   : > { %15072 = vst [vmem:[#allocation66_spill] sm:$0xff] %v10048_v16  ;;  %v10052_v28 = vpop.f32.mrf.mxu0  ;;  %v1873_v12 = vmul.f32 %v8408_v58, %v1872_v38  ;;  %v1881_v54 = vmul.f32 %v8410_v45, %v10024_v27  ;;  %v1878_v58 = vand.u32 2147483648, %v9996_v51 }
 0x23c   : > { %v1656_v0 = vmul.f32 %v10052_v28, %v10052_v28  ;;  %8411 = vrsqrt.f32 %v10050_v62  ;;  %vm1899_vm2 = vcmp.eq.f32.partialorder %v10050_v62, inf  ;;  %vm1901_vm4 = vcmp.eq.f32.partialorder %v10050_v62, 0.0 }
 0x23d   : > { %v1874_v40 = vmul.f32 %v1873_v12, %v9996_v51  ;;  %v1882_v11 = vmul.f32 %v8410_v45, %v1881_v54 }
 0x23e   : > { %v1688_v19 = vadd.f32 %v1656_v0, %v1624_v33  ;;  %8117 = vmatmul.msk.f32.vlgmr.msrb.gmra.mxu0 %vm1020_vm0, %v9331_v2 }
 0x23f   : > { %7860 = vmatmul.msk.f32.gmra.mxu3 %vm1020_vm0, %v9542_v4  ;;  %v1876_v1 = vsel %vm1875_vm13, %v9996_v51, %v1874_v40  ;;  %v1883_v47 = vmul.f32 0.5, %v1882_v11  ;;  %v1721_v51 = vmul.f32 %v9351_v9, %v9351_v9 }
 0x240   : > { %v1752_v53 = vadd.f32 %v1720_v52, %v1688_v19  ;;  %v1879_v38 = vsel %vm1877_vm14, %v1878_v58, %v1876_v1  ;;  %v1625_v52 = vmul.f32 %v9448_v57, %v9448_v57  ;;  %v2198_v1 = vld [vmem:[%s9909_s29 + $0x30] sm:$0xff] }
 0x241   : > { %7769 = vmatmul.msk.f32.gmra.mxu1 %vm1020_vm0, %v1879_v38  ;;  %7801 = vmatmul.msk.f32.gmra.mxu2 %vm2439_vm3, %v2197_v15  ;;  %v1884_v12 = vsub.f32 1.5, %v1883_v47 }
 0x242   : > { %v10074_v4 = vpop.f32.mrf.mxu3  ;;  %v8412_v2 = vpop.eup %8411  ;;  %v10076_v54 = vmax.f32 %v1752_v53, 1e-08 }
 0x243   : > { %15073 = vst [vmem:[#allocation67_spill] sm:$0xff] %v10074_v4  ;;  %v10078_v33 = vpop.f32.mrf.mxu0  ;;  %v1885_v0 = vmul.f32 %v8410_v45, %v1884_v12  ;;  %v1893_v40 = vmul.f32 %v8412_v2, %v10050_v62  ;;  %v1890_v45 = vand.u32 2147483648, %v10024_v27 }
 0x244   : > { %v1657_v11 = vmul.f32 %v10078_v33, %v10078_v33  ;;  %8413 = vrsqrt.f32 %v10076_v54  ;;  %vm1911_vm5 = vcmp.eq.f32.partialorder %v10076_v54, inf  ;;  %vm1913_vm6 = vcmp.eq.f32.partialorder %v10076_v54, 0.0 }
 0x245   : > { %v1886_v19 = vmul.f32 %v1885_v0, %v10024_v27  ;;  %v1894_v58 = vmul.f32 %v8412_v2, %v1893_v40 }
 0x246   : > { %v1689_v15 = vadd.f32 %v1657_v11, %v1625_v52  ;;  %8118 = vmatmul.msk.f32.gmra.mxu0 %vm1020_vm0, %v9342_v6 }
 0x247   : > { %7861 = vmatmul.msk.f32.gmra.mxu3 %vm1020_vm0, %v9555_v42  ;;  %v1888_v47 = vsel %vm1887_vm15, %v10024_v27, %v1886_v19  ;;  %v1895_v53 = vmul.f32 0.5, %v1894_v58  ;;  %v1722_v27 = vmul.f32 %v9362_v13, %v9362_v13 }
 0x248   : > { %v1753_v38 = vadd.f32 %v1721_v51, %v1689_v15  ;;  %v1891_v12 = vsel %vm1889_vm1, %v1890_v45, %v1888_v47  ;;  %v1626_v51 = vmul.f32 %v9461_v63, %v9461_v63  ;;  %v2199_v47 = vld [vmem:[%s9909_s29 + $0x38] sm:$0xff] }
 0x249   : > { %7770 = vmatmul.msk.f32.gmra.mxu1 %vm1020_vm0, %v1891_v12  ;;  %7802 = vmatmul.msk.f32.gmra.mxu2 %vm2439_vm3, %v2198_v1  ;;  %v1896_v0 = vsub.f32 1.5, %v1895_v53 }
 0x24a   : > { %v10100_v42 = vpop.f32.mrf.mxu3  ;;  %v8414_v6 = vpop.eup %8413  ;;  %v10102_v40 = vmax.f32 %v1753_v38, 1e-08 }
 0x24b   : > { %15074 = vst [vmem:[#allocation68_spill] sm:$0xff] %v10100_v42  ;;  %v10104_v52 = vpop.f32.mrf.mxu0  ;;  %v1897_v11 = vmul.f32 %v8412_v2, %v1896_v0  ;;  %v1905_v19 = vmul.f32 %v8414_v6, %v10076_v54  ;;  %v1902_v2 = vand.u32 2147483648, %v10050_v62 }
 0x24c   : > { %v1658_v58 = vmul.f32 %v10104_v52, %v10104_v52  ;;  %8415 = vrsqrt.f32 %v10102_v40  ;;  %vm1923_vm7 = vcmp.eq.f32.partialorder %v10102_v40, inf  ;;  %vm1925_vm8 = vcmp.eq.f32.partialorder %v10102_v40, 0.0 }
 0x24d   : > { %v1898_v15 = vmul.f32 %v1897_v11, %v10050_v62  ;;  %v1906_v45 = vmul.f32 %v8414_v6, %v1905_v19 }
 0x24e   : > { %v1690_v1 = vadd.f32 %v1658_v58, %v1626_v51  ;;  %8119 = vmatmul.msk.f32.gmra.mxu0 %vm1020_vm0, %v9353_v10 }
 0x24f   : > { %7862 = vmatmul.msk.f32.gmra.mxu3 %vm1020_vm0, %v9568_v48  ;;  %v1900_v53 = vsel %vm1899_vm2, %v10050_v62, %v1898_v15  ;;  %v1907_v38 = vmul.f32 0.5, %v1906_v45  ;;  %v1627_v15 = vmul.f32 %v9474_v8, %v9474_v8 }
 0x250   : > { %v1754_v12 = vadd.f32 %v1722_v27, %v1690_v1  ;;  %v1903_v0 = vsel %vm1901_vm4, %v1902_v2, %v1900_v53  ;;  %v1723_v27 = vmul.f32 %v9375_v18, %v9375_v18  ;;  %v8765_v53 = vld [vmem:[%s9217_s24 + $0x118] sm:$0xff] }
 0x251   : > { %7771 = vmatmul.msk.f32.gmra.mxu1 %vm1020_vm0, %v1903_v0  ;;  %7803 = vmatmul.msk.f32.gmra.mxu2 %vm2439_vm3, %v2199_v47  ;;  %v1908_v10 = vsub.f32 1.5, %v1907_v38  ;;  %v2200_v38 = vld [vmem:[%s9909_s29 + $0x40] sm:$0xff] }
 0x252   : > { %v10126_v48 = vpop.f32.mrf.mxu3  ;;  %v8416_v11 = vpop.eup %8415  ;;  %v10128_v19 = vmax.f32 %v1754_v12, 1e-08 }
 0x253   : > { %15075 = vst [vmem:[#allocation69_spill] sm:$0xff] %v10126_v48  ;;  %v10130_v51 = vpop.f32.mrf.mxu0  ;;  %v1909_v58 = vmul.f32 %v8414_v6, %v1908_v10  ;;  %v1917_v62 = vmul.f32 %v8416_v11, %v10102_v40  ;;  %v1914_v6 = vand.u32 2147483648, %v10076_v54 }
 0x254   : > { %v1659_v45 = vmul.f32 %v10130_v51, %v10130_v51  ;;  %8417 = vrsqrt.f32 %v10128_v19  ;;  %vm1935_vm9 = vcmp.eq.f32.partialorder %v10128_v19, inf  ;;  %vm1937_vm10 = vcmp.eq.f32.partialorder %v10128_v19, 0.0 }
 0x255   : > { %v1910_v1 = vmul.f32 %v1909_v58, %v10076_v54  ;;  %v1918_v2 = vmul.f32 %v8416_v11, %v1917_v62 }
 0x256   : > { %v1691_v47 = vadd.f32 %v1659_v45, %v1627_v15  ;;  %8120 = vmatmul.msk.f32.gmra.mxu0 %vm1020_vm0, %v9364_v14 }
 0x257   : > { %7863 = vmatmul.msk.f32.gmra.mxu3 %vm1020_vm0, %v8765_v53  ;;  %v1912_v12 = vsel %vm1911_vm5, %v10076_v54, %v1910_v1  ;;  %v1919_v0 = vmul.f32 0.5, %v1918_v2  ;;  %v2992_v1 = vld [vmem:[%s14775_s4] sm:$0xff]  ;;  %v1724_v2 = vmul.f32 %v9394_v25, %v9394_v25 }
 0x258   : > { %v1755_v10 = vadd.f32 %v1723_v27, %v1691_v47  ;;  %v1915_v58 = vsel %vm1913_vm6, %v1914_v6, %v1912_v12  ;;  %3009 = vmatpush.msrb.mxu1 %v2992_v1  ;;  %v1628_v47 = vmul.f32 %v9487_v17, %v9487_v17 }
 0x259   : > { %7772 = vmatmul.msk.f32.gmra.mxu1 %vm1020_vm0, %v1915_v58  ;;  %7804 = vmatmul.msk.f32.gmra.mxu2 %vm2439_vm3, %v2200_v38  ;;  %v1920_v15 = vsub.f32 1.5, %v1919_v0  ;;  %v1926_v58 = vand.u32 2147483648, %v10102_v40 }
 0x25a   : > { %v10152_v62 = vpop.f32.mrf.mxu3  ;;  %v8418_v14 = vpop.eup %8417  ;;  %v10154_v45 = vmax.f32 %v1755_v10, 1e-08  ;;  %v8766_v10 = vld [vmem:[%s9217_s24 + $0x120] sm:$0xff] }
 0x25b   : > { %15076 = vst [vmem:[#allocation70_spill] sm:$0xff] %v10152_v62  ;;  %v10159_v53 = vpop.f32.mrf.mxu0  ;;  %v1921_v54 = vmul.f32 %v8416_v11, %v1920_v15  ;;  %v1929_v27 = vmul.f32 %v8418_v14, %v10128_v19  ;;  %v2201_v15 = vld [vmem:[%s9909_s29 + $0x48] sm:$0xff] }
 0x25c   : > { %v1660_v6 = vmul.f32 %v10159_v53, %v10159_v53  ;;  %v10168_v38 = vpop.f32.mrf.mxu2  ;;  %8419 = vrsqrt.f32 %v10154_v45  ;;  %vm1947_vm11 = vcmp.eq.f32.partialorder %v10154_v45, inf  ;;  %vm1949_vm12 = vcmp.eq.f32.partialorder %v10154_v45, 0.0 }
 0x25d   : > { %15077 = vst [vmem:[#allocation71_spill] sm:$0xff] %v10168_v38  ;;  %v1922_v12 = vmul.f32 %v1921_v54, %v10102_v40  ;;  %v1930_v11 = vmul.f32 %v8418_v14, %v1929_v27 }
 0x25e   : > { %v1692_v0 = vadd.f32 %v1660_v6, %v1628_v47  ;;  %8121 = vmatmul.msk.f32.gmra.mxu0 %vm1020_vm0, %v9380_v20 }
 0x25f   : > { %7864 = vmatmul.msk.f32.gmra.mxu3 %vm1020_vm0, %v8766_v10  ;;  %v1924_v1 = vsel %vm1923_vm7, %v10102_v40, %v1922_v12  ;;  %v1931_v38 = vmul.f32 0.5, %v1930_v11  ;;  %v1629_v11 = vmul.f32 %v9500_v23, %v9500_v23 }
 0x260   : > { %v1756_v62 = vadd.f32 %v1724_v2, %v1692_v0  ;;  %v1927_v54 = vsel %vm1925_vm8, %v1926_v58, %v1924_v1  ;;  %v1725_v2 = vmul.f32 %v9407_v30, %v9407_v30  ;;  %v1938_v1 = vand.u32 2147483648, %v10128_v19 }
 0x261   : > { %7773 = vmatmul.msk.f32.gmra.mxu1 %vm1020_vm0, %v1927_v54  ;;  %7805 = vmatmul.msk.f32.gmra.mxu2 %vm2439_vm3, %v2201_v15  ;;  %v1932_v20 = vsub.f32 1.5, %v1931_v38  ;;  %v2202_v54 = vld [vmem:[%s9909_s29 + $0x50] sm:$0xff] }
 0x262   : > { %v10183_v27 = vpop.f32.mrf.mxu3  ;;  %v8420_v47 = vpop.eup %8419  ;;  %v10185_v6 = vmax.f32 %v1756_v62, 1e-08 }
 0x263   : > { %15078 = vst [vmem:[#allocation72_spill] sm:$0xff] %v10183_v27  ;;  %v10187_v10 = vpop.f32.mrf.mxu0  ;;  %v1933_v12 = vmul.f32 %v8418_v14, %v1932_v20  ;;  %v1941_v40 = vmul.f32 %v8420_v47, %v10154_v45  ;;  %v8767_v14 = vld [vmem:[%s9217_s24 + $0x128] sm:$0xff] }
 0x264   : > { %v1661_v0 = vmul.f32 %v10187_v10, %v10187_v10  ;;  %v10196_v58 = vpop.f32.mrf.mxu2  ;;  %8421 = vrsqrt.f32 %v10185_v6  ;;  %vm1959_vm13 = vcmp.eq.f32.partialorder %v10185_v6, inf  ;;  %vm1961_vm14 = vcmp.eq.f32.partialorder %v10185_v6, 0.0 }
 0x265   : > { %15079 = vst [vmem:[#allocation73_spill] sm:$0xff] %v10196_v58  ;;  %v1934_v62 = vmul.f32 %v1933_v12, %v10128_v19  ;;  %v1942_v38 = vmul.f32 %v8420_v47, %v1941_v40 }
 0x266   : > { %v1693_v15 = vadd.f32 %v1661_v0, %v1629_v11  ;;  %8122 = vmatmul.msk.f32.gmra.mxu0 %vm1020_vm0, %v9396_v26 }
 0x267   : > { %7865 = vmatmul.msk.f32.gmra.mxu3 %vm1020_vm0, %v8767_v14  ;;  %v1936_v20 = vsel %vm1935_vm9, %v10128_v19, %v1934_v62  ;;  %v1943_v58 = vmul.f32 0.5, %v1942_v38  ;;  %v1630_v38 = vmul.f32 %v9513_v29, %v9513_v29 }
 0x268   : > { %v1757_v27 = vadd.f32 %v1725_v2, %v1693_v15  ;;  %v1939_v12 = vsel %vm1937_vm10, %v1938_v1, %v1936_v20  ;;  %v1726_v2 = vmul.f32 %v9420_v37, %v9420_v37  ;;  %v1950_v20 = vand.u32 2147483648, %v10154_v45 }
 0x269   : > { %7774 = vmatmul.msk.f32.gmra.mxu1 %vm1020_vm0, %v1939_v12  ;;  %7806 = vmatmul.msk.f32.gmra.mxu2 %vm2439_vm3, %v2202_v54  ;;  %v1944_v26 = vsub.f32 1.5, %v1943_v58  ;;  %v2203_v12 = vld [vmem:[%s9909_s29 + $0x58] sm:$0xff] }
 0x26a   : > { %v10211_v40 = vpop.f32.mrf.mxu3  ;;  %v8422_v11 = vpop.eup %8421  ;;  %v10213_v0 = vmax.f32 %v1757_v27, 1e-08 }
 0x26b   : > { %15080 = vst [vmem:[#allocation74_spill] sm:$0xff] %v10211_v40  ;;  %v10215_v14 = vpop.f32.mrf.mxu0  ;;  %v1945_v62 = vmul.f32 %v8420_v47, %v1944_v26  ;;  %v1953_v19 = vmul.f32 %v8422_v11, %v10185_v6  ;;  %v8768_v47 = vld [vmem:[%s9217_s24 + $0x130] sm:$0xff] }
 0x26c   : > { %v1662_v15 = vmul.f32 %v10215_v14, %v10215_v14  ;;  %v10224_v1 = vpop.f32.mrf.mxu2  ;;  %8423 = vrsqrt.f32 %v10213_v0  ;;  %vm1971_vm15 = vcmp.eq.f32.partialorder %v10213_v0, inf  ;;  %vm1973_vm1 = vcmp.eq.f32.partialorder %v10213_v0, 0.0 }
 0x26d   : > { %15081 = vst [vmem:[#allocation75_spill] sm:$0xff] %v10224_v1  ;;  %v1946_v27 = vmul.f32 %v1945_v62, %v10154_v45  ;;  %v1954_v58 = vmul.f32 %v8422_v11, %v1953_v19 }
 0x26e   : > { %v1694_v54 = vadd.f32 %v1662_v15, %v1630_v38  ;;  %8123 = vmatmul.msk.f32.gmra.mxu0 %vm1020_vm0, %v9409_v31 }
 0x26f   : > { %7866 = vmatmul.msk.f32.gmra.mxu3 %vm1020_vm0, %v8768_v47  ;;  %v1948_v26 = vsel %vm1947_vm11, %v10154_v45, %v1946_v27  ;;  %v1955_v1 = vmul.f32 0.5, %v1954_v58  ;;  %v15083_v58 = vld [vmem:[#allocation10_spill] sm:$0xff] }
 0x270   : > { %v1758_v40 = vadd.f32 %v1726_v2, %v1694_v54  ;;  %v1951_v62 = vsel %vm1949_vm12, %v1950_v20, %v1948_v26  ;;  %v1727_v2 = vmul.f32 %v15083_v58, %v15083_v58  ;;  %v15084_v54 = vld [vmem:[#allocation18_spill] sm:$0xff] }
 0x271   : > { %7775 = vmatmul.msk.f32.gmra.mxu1 %vm1020_vm0, %v1951_v62  ;;  %7807 = vmatmul.msk.f32.gmra.mxu2 %vm2439_vm3, %v2203_v12  ;;  %v1956_v31 = vsub.f32 1.5, %v1955_v1  ;;  %v1631_v20 = vmul.f32 %v15084_v54, %v15084_v54 }
 0x272   : > { %v10239_v19 = vpop.f32.mrf.mxu3  ;;  %v8424_v38 = vpop.eup %8423  ;;  %v10241_v15 = vmax.f32 %v1758_v40, 1e-08 }
 0x273   : > { %15082 = vst [vmem:[#allocation76_spill] sm:$0xff] %v10239_v19  ;;  %v10243_v47 = vpop.f32.mrf.mxu0  ;;  %v1957_v27 = vmul.f32 %v8422_v11, %v1956_v31  ;;  %v1965_v45 = vmul.f32 %v8424_v38, %v10213_v0  ;;  %v8769_v11 = vld [vmem:[%s9217_s24 + $0x138] sm:$0xff]  ;;  %v1962_v31 = vand.u32 2147483648, %v10185_v6  ;;  %v2204_v19 = vld [vmem:[%s9909_s29 + $0x60] sm:$0xff] }
 0x274   : > { %v1663_v12 = vmul.f32 %v10243_v47, %v10243_v47  ;;  %v10252_v26 = vpop.f32.mrf.mxu2  ;;  %8425 = vrsqrt.f32 %v10241_v15  ;;  %vm1983_vm2 = vcmp.eq.f32.partialorder %v10241_v15, inf  ;;  %vm1985_vm4 = vcmp.eq.f32.partialorder %v10241_v15, 0.0 }
 0x275   : > { %15085 = vst [vmem:[#allocation18_spill] sm:$0xff] %v10252_v26  ;;  %v1958_v40 = vmul.f32 %v1957_v27, %v10185_v6  ;;  %v1966_v1 = vmul.f32 %v8424_v38, %v1965_v45 }
 0x276   : > { %v1695_v62 = vadd.f32 %v1663_v12, %v1631_v20  ;;  %8124 = vmatmul.msk.f32.gmra.mxu0 %vm1020_vm0, %v9422_v39 }
 0x277   : > { %7867 = vmatmul.msk.f32.gmra.mxu3 %vm1020_vm0, %v8769_v11  ;;  %v1960_v48 = vsel %vm1959_vm13, %v10185_v6, %v1958_v40  ;;  %v1967_v26 = vmul.f32 0.5, %v1966_v1  ;;  %v15087_v1 = vld [vmem:[#allocation11_spill] sm:$0xff] }
 0x278   : > { %v1759_v42 = vadd.f32 %v1727_v2, %v1695_v62  ;;  %v1963_v27 = vsel %vm1961_vm14, %v1962_v31, %v1960_v48  ;;  %v1728_v48 = vmul.f32 %v15087_v1, %v15087_v1  ;;  %v15088_v2 = vld [vmem:[#allocation20_spill] sm:$0xff] }
 0x279   : > { %7776 = vmatmul.msk.f32.gmra.mxu1 %vm1020_vm0, %v1963_v27  ;;  %7808 = vmatmul.msk.f32.gmra.mxu2 %vm2439_vm3, %v2204_v19  ;;  %v1968_v39 = vsub.f32 1.5, %v1967_v26  ;;  %v1632_v62 = vmul.f32 %v15088_v2, %v15088_v2 }
 0x27a   : > { %v10267_v45 = vpop.f32.mrf.mxu3  ;;  %v8426_v20 = vpop.eup %8425  ;;  %v10269_v12 = vmax.f32 %v1759_v42, 1e-08 }
 0x27b   : > { %15086 = vst [vmem:[#allocation77_spill] sm:$0xff] %v10267_v45  ;;  %v10271_v11 = vpop.f32.mrf.mxu0  ;;  %v1969_v40 = vmul.f32 %v8424_v38, %v1968_v39  ;;  %v1977_v6 = vmul.f32 %v8426_v20, %v10241_v15  ;;  %v8770_v38 = vld [vmem:[%s9217_s24 + $0x140] sm:$0xff]  ;;  %v1974_v39 = vand.u32 2147483648, %v10213_v0  ;;  %v2205_v45 = vld [vmem:[%s9909_s29 + $0x68] sm:$0xff] }
 0x27c   : > { %v1664_v19 = vmul.f32 %v10271_v11, %v10271_v11  ;;  %v10280_v31 = vpop.f32.mrf.mxu2  ;;  %8427 = vrsqrt.f32 %v10269_v12  ;;  %vm1995_vm5 = vcmp.eq.f32.partialorder %v10269_v12, inf  ;;  %vm1997_vm6 = vcmp.eq.f32.partialorder %v10269_v12, 0.0 }
 0x27d   : > { %15089 = vst [vmem:[#allocation20_spill] sm:$0xff] %v10280_v31  ;;  %v1970_v42 = vmul.f32 %v1969_v40, %v10213_v0  ;;  %v1978_v26 = vmul.f32 %v8426_v20, %v1977_v6 }
 0x27e   : > { %v1696_v27 = vadd.f32 %v1664_v19, %v1632_v62  ;;  %8125 = vmatmul.msk.f32.gmra.mxu0 %vm1020_vm0, %v9435_v49 }
 0x27f   : > { %7868 = vmatmul.msk.f32.gmra.mxu3 %vm1020_vm0, %v8770_v38  ;;  %v1972_v4 = vsel %vm1971_vm15, %v10213_v0, %v1970_v42  ;;  %v1979_v31 = vmul.f32 0.5, %v1978_v26  ;;  %v15091_v26 = vld [vmem:[#allocation12_spill] sm:$0xff] }
 0x280   : > { %v1760_v16 = vadd.f32 %v1728_v48, %v1696_v27  ;;  %v1975_v40 = vsel %vm1973_vm1, %v1974_v39, %v1972_v4  ;;  %v1729_v4 = vmul.f32 %v15091_v26, %v15091_v26  ;;  %v15092_v48 = vld [vmem:[#allocation22_spill] sm:$0xff] }
 0x281   : > { %7777 = vmatmul.msk.f32.gmra.mxu1 %vm1020_vm0, %v1975_v40  ;;  %7809 = vmatmul.msk.f32.gmra.mxu2 %vm2439_vm3, %v2205_v45  ;;  %v1980_v49 = vsub.f32 1.5, %v1979_v31  ;;  %v1633_v27 = vmul.f32 %v15092_v48, %v15092_v48 }
 0x282   : > { %v10295_v6 = vpop.f32.mrf.mxu3  ;;  %v8428_v62 = vpop.eup %8427  ;;  %v10297_v19 = vmax.f32 %v1760_v16, 1e-08 }
 0x283   : > { %15090 = vst [vmem:[#allocation78_spill] sm:$0xff] %v10295_v6  ;;  %v10299_v38 = vpop.f32.mrf.mxu0  ;;  %v1981_v42 = vmul.f32 %v8426_v20, %v1980_v49  ;;  %v1989_v0 = vmul.f32 %v8428_v62, %v10269_v12  ;;  %v8771_v20 = vld [vmem:[%s9217_s24 + $0x148] sm:$0xff]  ;;  %v1986_v49 = vand.u32 2147483648, %v10241_v15  ;;  %v2206_v6 = vld [vmem:[%s9909_s29 + $0x70] sm:$0xff] }
 0x284   : > { %v1665_v45 = vmul.f32 %v10299_v38, %v10299_v38  ;;  %v10308_v39 = vpop.f32.mrf.mxu2  ;;  %8429 = vrsqrt.f32 %v10297_v19  ;;  %vm2007_vm7 = vcmp.eq.f32.partialorder %v10297_v19, inf  ;;  %vm2009_vm8 = vcmp.eq.f32.partialorder %v10297_v19, 0.0 }
 0x285   : > { %15093 = vst [vmem:[#allocation22_spill] sm:$0xff] %v10308_v39  ;;  %v1982_v16 = vmul.f32 %v1981_v42, %v10241_v15  ;;  %v1990_v31 = vmul.f32 %v8428_v62, %v1989_v0 }
 0x286   : > { %v1697_v40 = vadd.f32 %v1665_v45, %v1633_v27  ;;  %8126 = vmatmul.msk.f32.gmra.mxu0 %vm1020_vm0, %v9448_v57 }
 0x287   : > { %7869 = vmatmul.msk.f32.gmra.mxu3 %vm1020_vm0, %v8771_v20  ;;  %v1984_v26 = vsel %vm1983_vm2, %v10241_v15, %v1982_v16  ;;  %v1991_v39 = vmul.f32 0.5, %v1990_v31  ;;  %v15095_v31 = vld [vmem:[#allocation13_spill] sm:$0xff] }
 0x288   : > { %v1761_v1 = vadd.f32 %v1729_v4, %v1697_v40  ;;  %v1987_v42 = vsel %vm1985_vm4, %v1986_v49, %v1984_v26  ;;  %v1730_v26 = vmul.f32 %v15095_v31, %v15095_v31  ;;  %v15096_v4 = vld [vmem:[#allocation24_spill] sm:$0xff] }
 0x289   : > { %7778 = vmatmul.msk.f32.gmra.mxu1 %vm1020_vm0, %v1987_v42  ;;  %7810 = vmatmul.msk.f32.gmra.mxu2 %vm2439_vm3, %v2206_v6  ;;  %v1992_v57 = vsub.f32 1.5, %v1991_v39  ;;  %v1634_v40 = vmul.f32 %v15096_v4, %v15096_v4 }
 0x28a   : > { %v10323_v0 = vpop.f32.mrf.mxu3  ;;  %v8430_v27 = vpop.eup %8429  ;;  %v10325_v45 = vmax.f32 %v1761_v1, 1e-08 }
 0x28b   : > { %15094 = vst [vmem:[#allocation79_spill] sm:$0xff] %v10323_v0  ;;  %v10327_v20 = vpop.f32.mrf.mxu0  ;;  %v1993_v16 = vmul.f32 %v8428_v62, %v1992_v57  ;;  %v2001_v15 = vmul.f32 %v8430_v27, %v10297_v19  ;;  %v10341_v62 = vld [vmem:[%s9217_s24 + $0x150] sm:$0xff]  ;;  %v1998_v57 = vand.u32 2147483648, %v10269_v12  ;;  %v2207_v0 = vld [vmem:[%s9909_s29 + $0x78] sm:$0xff] }
 0x28c   : > { %v1666_v6 = vmul.f32 %v10327_v20, %v10327_v20  ;;  %v10336_v49 = vpop.f32.mrf.mxu2  ;;  %8431 = vrsqrt.f32 %v10325_v45  ;;  %vm2019_vm9 = vcmp.eq.f32.partialorder %v10325_v45, inf  ;;  %vm2021_vm10 = vcmp.eq.f32.partialorder %v10325_v45, 0.0 }
 0x28d   : > { %15097 = vst [vmem:[#allocation24_spill] sm:$0xff] %v10336_v49  ;;  %v1994_v1 = vmul.f32 %v1993_v16, %v10269_v12  ;;  %v2002_v39 = vmul.f32 %v8430_v27, %v2001_v15 }
 0x28e   : > { %v1698_v42 = vadd.f32 %v1666_v6, %v1634_v40  ;;  %8127 = vmatmul.msk.f32.gmra.mxu0 %vm1020_vm0, %v9461_v63 }
 0x28f   : > { %7870 = vmatmul.msk.f32.gmra.mxu3 %vm1020_vm0, %v10341_v62  ;;  %v1996_v49 = vsel %vm1995_vm5, %v10269_v12, %v1994_v1  ;;  %v2003_v16 = vmul.f32 0.5, %v2002_v39  ;;  %v15099_v1 = vld [vmem:[#allocation14_spill] sm:$0xff] }
 0x290   : > { %v1762_v15 = vadd.f32 %v1730_v26, %v1698_v42  ;;  %v1999_v40 = vsel %vm1997_vm6, %v1998_v57, %v1996_v49  ;;  %v1731_v26 = vmul.f32 %v15099_v1, %v15099_v1  ;;  %v15100_v49 = vld [vmem:[#allocation26_spill] sm:$0xff] }
 0x291   : > { %7779 = vmatmul.msk.f32.gmra.mxu1 %vm1020_vm0, %v1999_v40  ;;  %7811 = vmatmul.msk.f32.gmra.mxu2 %vm2439_vm3, %v2207_v0  ;;  %v2004_v63 = vsub.f32 1.5, %v2003_v16  ;;  %v1635_v39 = vmul.f32 %v15100_v49, %v15100_v49  ;;  %v10372_v40 = vld [vmem:[%s9217_s24 + $0x158] sm:$0xff] }
 0x292   : > { %v10354_v6 = vpop.f32.mrf.mxu3  ;;  %v8432_v31 = vpop.eup %8431  ;;  %v10356_v58 = vmax.f32 %v1762_v15, 1e-08 }
 0x293   : > { %15098 = vst [vmem:[#allocation80_spill] sm:$0xff] %v10354_v6  ;;  %v10358_v37 = vpop.f32.mrf.mxu0  ;;  %v2005_v30 = vmul.f32 %v8430_v27, %v2004_v63  ;;  %v2013_v12 = vmul.f32 %v8432_v31, %v10325_v45  ;;  %v2010_v63 = vand.u32 2147483648, %v10297_v19 }
 0x294   : > { %v1667_v0 = vmul.f32 %v10358_v37, %v10358_v37  ;;  %v10367_v42 = vpop.f32.mrf.mxu2  ;;  %8433 = vrsqrt.f32 %v10356_v58  ;;  %vm2031_vm11 = vcmp.eq.f32.partialorder %v10356_v58, inf  ;;  %vm2033_vm12 = vcmp.eq.f32.partialorder %v10356_v58, 0.0 }
 0x295   : > { %15101 = vst [vmem:[#allocation26_spill] sm:$0xff] %v10367_v42  ;;  %v2006_v57 = vmul.f32 %v2005_v30, %v10297_v19  ;;  %v2014_v16 = vmul.f32 %v8432_v31, %v2013_v12  ;;  %v2208_v42 = vld [vmem:[%s9909_s29 + $0x80] sm:$0xff] }
 0x296   : > { %v1699_v27 = vadd.f32 %v1667_v0, %v1635_v39  ;;  %v2343_v15 = vpop.f32.mrf.mxu1  ;;  %8128 = vmatmul.msk.f32.gmra.mxu0 %vm1020_vm0, %v9474_v8 }
 0x297   : > { %7871 = vmatmul.msk.f32.gmra.mxu3 %vm1020_vm0, %v10372_v40  ;;  %v2008_v6 = vsel %vm2007_vm7, %v10297_v19, %v2006_v57  ;;  %v2015_v30 = vmul.f32 0.5, %v2014_v16  ;;  %v15103_v19 = vld [vmem:[#allocation15_spill] sm:$0xff] }
 0x298   : > { %v1763_v12 = vadd.f32 %v1731_v26, %v1699_v27  ;;  %v2011_v39 = vsel %vm2009_vm8, %v2010_v63, %v2008_v6  ;;  %v1732_v6 = vmul.f32 %v15103_v19, %v15103_v19  ;;  %v15104_v26 = vld [vmem:[#allocation28_spill] sm:$0xff] }
 0x299   : > { %7780 = vmatmul.msk.f32.gmra.mxu1 %vm1020_vm0, %v2011_v39  ;;  %7812 = vmatmul.msk.f32.gmra.mxu2 %vm2439_vm3, %v2208_v42  ;;  %v2016_v1 = vsub.f32 1.5, %v2015_v30  ;;  %v1636_v16 = vmul.f32 %v15104_v26, %v15104_v26  ;;  %v10403_v39 = vld [vmem:[%s9217_s24 + $0x160] sm:$0xff]  ;;  %v2209_v19 = vld [vmem:[%s9909_s29 + $0x88] sm:$0xff] }
 0x29a   : > { %v10385_v0 = vpop.f32.mrf.mxu3  ;;  %v8434_v8 = vpop.eup %8433  ;;  %v10387_v25 = vmax.f32 %v1763_v12, 1e-08 }
 0x29b   : > { %15102 = vst [vmem:[#allocation81_spill] sm:$0xff] %v10385_v0  ;;  %v10389_v18 = vpop.f32.mrf.mxu0  ;;  %v2017_v13 = vmul.f32 %v8432_v31, %v2016_v1  ;;  %v2025_v57 = vmul.f32 %v8434_v8, %v10356_v58  ;;  %v2022_v0 = vand.u32 2147483648, %v10325_v45 }
 0x29c   : > { %v1668_v42 = vmul.f32 %v10389_v18, %v10389_v18  ;;  %v2553_v27 = vpop.f32.mrf.mxu2  ;;  %8435 = vrsqrt.f32 %v10387_v25  ;;  %vm2043_vm13 = vcmp.eq.f32.partialorder %v10387_v25, inf  ;;  %vm2045_vm14 = vcmp.eq.f32.partialorder %v10387_v25, 0.0 }
 0x29d   : > { %v10399_v63 = vadd.f32 %v2553_v27, %v2343_v15  ;;  %v2018_v30 = vmul.f32 %v2017_v13, %v10325_v45  ;;  %v2026_v31 = vmul.f32 %v8434_v8, %v2025_v57 }
 0x29e   : > { %v1700_v1 = vadd.f32 %v1668_v42, %v1636_v16  ;;  %v2346_v12 = vpop.f32.mrf.mxu1  ;;  %8129 = vmatmul.msk.f32.gmra.mxu0 %vm1020_vm0, %v9487_v17 }
 0x29f   : > { %15105 = vst [vmem:[#allocation28_spill] sm:$0xff] %v10399_v63  ;;  %7872 = vmatmul.msk.f32.gmra.mxu3 %vm1020_vm0, %v10403_v39  ;;  %v2020_v15 = vsel %vm2019_vm9, %v10325_v45, %v2018_v30  ;;  %v2027_v13 = vmul.f32 0.5, %v2026_v31  ;;  %v15107_v45 = vld [vmem:[#allocation16_spill] sm:$0xff]  ;;  %vm3877_vm9 = vcmask 1043456  }
 0x2a0   : > { %v1764_v57 = vadd.f32 %v1732_v6, %v1700_v1  ;;  %v2023_v16 = vsel %vm2021_vm10, %v2022_v0, %v2020_v15  ;;  %v1733_v0 = vmul.f32 %v15107_v45, %v15107_v45  ;;  %v15108_v6 = vld [vmem:[#allocation31_spill] sm:$0xff]  ;;  %v2210_v45 = vld [vmem:[%s9909_s29 + $0x90] sm:$0xff]  ;;  %vm3588_vm10 = vcmask 31744  }
 0x2a1   : > { %7781 = vmatmul.msk.f32.gmra.mxu1 %vm1020_vm0, %v2023_v16  ;;  %7813 = vmatmul.msk.f32.gmra.mxu2 %vm2439_vm3, %v2209_v19  ;;  %v2028_v27 = vsub.f32 1.5, %v2027_v13  ;;  %v1637_v31 = vmul.f32 %v15108_v6, %v15108_v6 }
 0x2a2   : > { %v10416_v42 = vpop.f32.mrf.mxu3  ;;  %v8436_v17 = vpop.eup %8435  ;;  %v10418_v63 = vmax.f32 %v1764_v57, 1e-08 }
 0x2a3   : > { %15106 = vst [vmem:[#allocation82_spill] sm:$0xff] %v10416_v42  ;;  %v10420_v9 = vpop.f32.mrf.mxu0  ;;  %v2029_v5 = vmul.f32 %v8434_v8, %v2028_v27  ;;  %v2037_v30 = vmul.f32 %v8436_v17, %v10387_v25  ;;  %v10434_v27 = vld [vmem:[%s9217_s24 + $0x168] sm:$0xff]  ;;  %v2034_v42 = vand.u32 2147483648, %v10356_v58 }
 0x2a4   : > { %v1669_v19 = vmul.f32 %v10420_v9, %v10420_v9  ;;  %v2556_v1 = vpop.f32.mrf.mxu2  ;;  %8437 = vrsqrt.f32 %v10418_v63  ;;  %15110 = vst [vmem:[#allocation83_spill] sm:$0xff] %v10434_v27  ;;  %vm2055_vm15 = vcmp.eq.f32.partialorder %v10418_v63, inf  ;;  %vm2057_vm1 = vcmp.eq.f32.partialorder %v10418_v63, 0.0 }
 0x2a5   : > { %v10430_v15 = vadd.f32 %v2556_v1, %v2346_v12  ;;  %v2030_v13 = vmul.f32 %v2029_v5, %v10356_v58  ;;  %v2038_v8 = vmul.f32 %v8436_v17, %v2037_v30 }
 0x2a6   : > { %v1701_v57 = vadd.f32 %v1669_v19, %v1637_v31  ;;  %v2349_v16 = vpop.f32.mrf.mxu1  ;;  %8130 = vmatmul.msk.f32.gmra.mxu0 %vm1020_vm0, %v9500_v23 }
 0x2a7   : > { %15109 = vst [vmem:[#allocation31_spill] sm:$0xff] %v10430_v15  ;;  %7873 = vmatmul.msk.f32.gmra.mxu3 %vm1020_vm0, %v10434_v27  ;;  %v2032_v12 = vsel %vm2031_vm11, %v10356_v58, %v2030_v13  ;;  %v2039_v5 = vmul.f32 0.5, %v2038_v8  ;;  %v15112_v58 = vld [vmem:[#allocation17_spill] sm:$0xff] }
 0x2a8   : > { %v1765_v30 = vadd.f32 %v1733_v0, %v1701_v57  ;;  %v2035_v31 = vsel %vm2033_vm12, %v2034_v42, %v2032_v12  ;;  %v1734_v42 = vmul.f32 %v15112_v58, %v15112_v58  ;;  %v15113_v0 = vld [vmem:[#allocation34_spill] sm:$0xff] }
 0x2a9   : > { %7782 = vmatmul.msk.f32.gmra.mxu1 %vm1020_vm0, %v2035_v31  ;;  %7814 = vmatmul.msk.f32.gmra.mxu2 %vm2439_vm3, %v2210_v45  ;;  %v2040_v1 = vsub.f32 1.5, %v2039_v5  ;;  %v1638_v8 = vmul.f32 %v15113_v0, %v15113_v0  ;;  %v2211_v58 = vld [vmem:[%s9909_s29 + $0x98] sm:$0xff] }
 0x2aa   : > { %v10447_v19 = vpop.f32.mrf.mxu3  ;;  %v8438_v23 = vpop.eup %8437  ;;  %v10449_v15 = vmax.f32 %v1765_v30, 1e-08 }
 0x2ab   : > { %15111 = vst [vmem:[#allocation84_spill] sm:$0xff] %v10447_v19  ;;  %v10451_v59 = vpop.f32.mrf.mxu0  ;;  %v2041_v22 = vmul.f32 %v8436_v17, %v2040_v1  ;;  %v2049_v13 = vmul.f32 %v8438_v23, %v10418_v63  ;;  %v10465_v1 = vld [vmem:[%s9217_s24 + $0x170] sm:$0xff]  ;;  %v2046_v19 = vand.u32 2147483648, %v10387_v25 }
 0x2ac   : > { %v1670_v45 = vmul.f32 %v10451_v59, %v10451_v59  ;;  %v2559_v57 = vpop.f32.mrf.mxu2  ;;  %8439 = vrsqrt.f32 %v10449_v15  ;;  %15115 = vst [vmem:[#allocation85_spill] sm:$0xff] %v10465_v1  ;;  %vm2067_vm2 = vcmp.eq.f32.partialorder %v10449_v15, inf  ;;  %vm2069_vm4 = vcmp.eq.f32.partialorder %v10449_v15, 0.0 }
 0x2ad   : > { %v10461_v12 = vadd.f32 %v2559_v57, %v2349_v16  ;;  %v2042_v5 = vmul.f32 %v2041_v22, %v10387_v25  ;;  %v2050_v17 = vmul.f32 %v8438_v23, %v2049_v13 }
 0x2ae   : > { %v1702_v30 = vadd.f32 %v1670_v45, %v1638_v8  ;;  %v2352_v31 = vpop.f32.mrf.mxu1  ;;  %8131 = vmatmul.msk.f32.gmra.mxu0 %vm1020_vm0, %v9513_v29 }
 0x2af   : > { %15114 = vst [vmem:[#allocation34_spill] sm:$0xff] %v10461_v12  ;;  %7874 = vmatmul.msk.f32.gmra.mxu3 %vm1020_vm0, %v10465_v1  ;;  %v2044_v16 = vsel %vm2043_vm13, %v10387_v25, %v2042_v5  ;;  %v2051_v22 = vmul.f32 0.5, %v2050_v17  ;;  %v15117_v25 = vld [vmem:[#allocation19_spill] sm:$0xff] }
 0x2b0   : > { %v1766_v13 = vadd.f32 %v1734_v42, %v1702_v30  ;;  %v2047_v8 = vsel %vm2045_vm14, %v2046_v19, %v2044_v16  ;;  %v1735_v19 = vmul.f32 %v15117_v25, %v15117_v25  ;;  %v15118_v42 = vld [vmem:[#allocation37_spill] sm:$0xff]  ;;  %v2212_v25 = vld [vmem:[%s9909_s29 + $0xa0] sm:$0xff] }
 0x2b1   : > { %7783 = vmatmul.msk.f32.gmra.mxu1 %vm1020_vm0, %v2047_v8  ;;  %7815 = vmatmul.msk.f32.gmra.mxu2 %vm2439_vm3, %v2211_v58  ;;  %v2052_v57 = vsub.f32 1.5, %v2051_v22  ;;  %v1639_v17 = vmul.f32 %v15118_v42, %v15118_v42 }
 0x2b2   : > { %v10478_v45 = vpop.f32.mrf.mxu3  ;;  %v8440_v29 = vpop.eup %8439  ;;  %v10480_v12 = vmax.f32 %v1766_v13, 1e-08 }
 0x2b3   : > { %15116 = vst [vmem:[#allocation86_spill] sm:$0xff] %v10478_v45  ;;  %v10482_v1 = vpop.f32.mrf.mxu0  ;;  %v2053_v27 = vmul.f32 %v8438_v23, %v2052_v57  ;;  %v2061_v5 = vmul.f32 %v8440_v29, %v10449_v15  ;;  %v10496_v57 = vld [vmem:[%s9217_s24 + $0x178] sm:$0xff]  ;;  %v2058_v45 = vand.u32 2147483648, %v10418_v63 }
 0x2b4   : > { %v1671_v58 = vmul.f32 %v10482_v1, %v10482_v1  ;;  %v2562_v30 = vpop.f32.mrf.mxu2  ;;  %8441 = vrsqrt.f32 %v10480_v12  ;;  %15120 = vst [vmem:[#allocation87_spill] sm:$0xff] %v10496_v57  ;;  %vm2079_vm5 = vcmp.eq.f32.partialorder %v10480_v12, inf  ;;  %vm2081_vm6 = vcmp.eq.f32.partialorder %v10480_v12, 0.0 }
 0x2b5   : > { %v10492_v16 = vadd.f32 %v2562_v30, %v2352_v31  ;;  %v2054_v22 = vmul.f32 %v2053_v27, %v10418_v63  ;;  %v2062_v23 = vmul.f32 %v8440_v29, %v2061_v5 }
 0x2b6   : > { %v1703_v13 = vadd.f32 %v1671_v58, %v1639_v17  ;;  %v2355_v8 = vpop.f32.mrf.mxu1  ;;  %8132 = vmatmul.msk.f32.gmra.mxu0 %vm1020_vm0, %v15084_v54 }
 0x2b7   : > { %15119 = vst [vmem:[#allocation37_spill] sm:$0xff] %v10492_v16  ;;  %7875 = vmatmul.msk.f32.gmra.mxu3 %vm1020_vm0, %v10496_v57  ;;  %v2056_v31 = vsel %vm2055_vm15, %v10418_v63, %v2054_v22  ;;  %v2063_v27 = vmul.f32 0.5, %v2062_v23 }
 0x2b8   : > { %v1767_v5 = vadd.f32 %v1735_v19, %v1703_v13  ;;  %v2059_v17 = vsel %vm2057_vm1, %v2058_v45, %v2056_v31  ;;  %v10521_v31 = vld [vmem:[%s9217_s24 + $0x180] sm:$0xff] }
 0x2b9   : > { %7784 = vmatmul.msk.f32.gmra.mxu1 %vm1020_vm0, %v2059_v17  ;;  %7816 = vmatmul.msk.f32.gmra.mxu2 %vm2439_vm3, %v2212_v25  ;;  %v2064_v54 = vsub.f32 1.5, %v2063_v27  ;;  %v2213_v27 = vld [vmem:[%s9909_s29 + $0xa8] sm:$0xff] }
 0x2ba   : > { %v10509_v58 = vpop.f32.mrf.mxu3  ;;  %v8442_v30 = vpop.eup %8441  ;;  %v10511_v16 = vmax.f32 %v1767_v5, 1e-08 }
 0x2bb   : > { %15121 = vst [vmem:[#allocation88_spill] sm:$0xff] %v10509_v58  ;;  %v10513_v57 = vpop.f32.mrf.mxu0  ;;  %v2065_v22 = vmul.f32 %v8440_v29, %v2064_v54  ;;  %v2073_v63 = vmul.f32 %v8442_v30, %v10480_v12  ;;  %v2070_v29 = vand.u32 2147483648, %v10449_v15 }
 0x2bc   : > { %15122 = vst [vmem:[#allocation89_spill] sm:$0xff] %v10513_v57  ;;  %v2565_v23 = vpop.f32.mrf.mxu2  ;;  %8443 = vrsqrt.f32 %v10511_v16  ;;  %vm2091_vm7 = vcmp.eq.f32.partialorder %v10511_v16, inf  ;;  %vm2093_vm8 = vcmp.eq.f32.partialorder %v10511_v16, 0.0 }
 0x2bd   : > { %v10517_v45 = vadd.f32 %v2565_v23, %v2355_v8  ;;  %v2066_v19 = vmul.f32 %v2065_v22, %v10449_v15  ;;  %v2074_v25 = vmul.f32 %v8442_v30, %v2073_v63 }
 0x2be   : > { %v2358_v13 = vpop.f32.mrf.mxu1  ;;  %8133 = vmatmul.msk.f32.gmra.mxu0 %vm1020_vm0, %v15088_v2 }
 0x2bf   : > { %15123 = vst [vmem:[#allocation90_spill] sm:$0xff] %v10517_v45  ;;  %7876 = vmatmul.msk.f32.gmra.mxu3 %vm1020_vm0, %v10521_v31  ;;  %v2068_v8 = vsel %vm2067_vm2, %v10449_v15, %v2066_v19  ;;  %v2075_v5 = vmul.f32 0.5, %v2074_v25 }
 0x2c0   : > { %v2071_v17 = vsel %vm2069_vm4, %v2070_v29, %v2068_v8  ;;  %v10543_v8 = vld [vmem:[%s9217_s24 + $0x188] sm:$0xff] }
 0x2c1   : > { %7785 = vmatmul.msk.f32.gmra.mxu1 %vm1020_vm0, %v2071_v17  ;;  %7817 = vmatmul.msk.f32.gmra.mxu2 %vm2439_vm3, %v2213_v27  ;;  %v2076_v2 = vsub.f32 1.5, %v2075_v5  ;;  %v2214_v27 = vld [vmem:[%s9909_s29 + $0xb0] sm:$0xff] }
 0x2c2   : > { %v10534_v54 = vpop.f32.mrf.mxu3  ;;  %v8444_v22 = vpop.eup %8443 }
 0x2c3   : > { %v10536_v63 = vpop.f32.mrf.mxu0  ;;  %v2077_v23 = vmul.f32 %v8442_v30, %v2076_v2  ;;  %v2085_v57 = vmul.f32 %v8444_v22, %v10511_v16  ;;  %v2082_v30 = vand.u32 2147483648, %v10480_v12 }
 0x2c4   : > { %15124 = vst [vmem:[#allocation91_spill] sm:$0xff] %v10536_v63  ;;  %v2568_v19 = vpop.f32.mrf.mxu2 }
 0x2c5   : > { %v10539_v58 = vadd.f32 %v2568_v19, %v2358_v13  ;;  %v2078_v15 = vmul.f32 %v2077_v23, %v10480_v12  ;;  %v2086_v25 = vmul.f32 %v8444_v22, %v2085_v57 }
 0x2c6   : > { %v2361_v29 = vpop.f32.mrf.mxu1  ;;  %8134 = vmatmul.msk.f32.gmra.mxu0 %vm1020_vm0, %v15092_v48 }
 0x2c7   : > { %15125 = vst [vmem:[#allocation92_spill] sm:$0xff] %v10539_v58  ;;  %7877 = vmatmul.msk.f32.gmra.mxu3 %vm1020_vm0, %v10543_v8  ;;  %v2080_v13 = vsel %vm2079_vm5, %v10480_v12, %v2078_v15  ;;  %v2087_v57 = vmul.f32 0.5, %v2086_v25  ;;  %v10564_v12 = vld [vmem:[%s9217_s24 + $0x190] sm:$0xff]  ;;  %v2215_v25 = vld [vmem:[%s9909_s29 + $0xb8] sm:$0xff] }
 0x2c8   : > { %v2083_v5 = vsel %vm2081_vm6, %v2082_v30, %v2080_v13 }
 0x2c9   : > { %7786 = vmatmul.msk.f32.gmra.mxu1 %vm1020_vm0, %v2083_v5  ;;  %7818 = vmatmul.msk.f32.gmra.mxu2 %vm2439_vm3, %v2214_v27  ;;  %v2088_v48 = vsub.f32 1.5, %v2087_v57 }
 0x2ca   : > { %v10556_v17 = vpop.f32.mrf.mxu3 }
 0x2cb   : > { %v10558_v2 = vpop.f32.mrf.mxu0  ;;  %v2089_v23 = vmul.f32 %v8444_v22, %v2088_v48  ;;  %v2094_v22 = vand.u32 2147483648, %v10511_v16  ;;  %v10586_v48 = vld [vmem:[%s9217_s24 + $0x198] sm:$0xff] }
 0x2cc   : > { %15126 = vst [vmem:[#allocation93_spill] sm:$0xff] %v10558_v2  ;;  %v2571_v19 = vpop.f32.mrf.mxu2  ;;  %v10654_v2 = vld [vmem:[%s9217_s24 + $0x1b8] sm:$0xff] }
 0x2cd   : > { %v10560_v63 = vadd.f32 %v2571_v19, %v2361_v29  ;;  %v2090_v15 = vmul.f32 %v2089_v23, %v10511_v16  ;;  %v8782_v19 = vld [vmem:[%s9217_s24] sm:$0xff] }
 0x2ce   : > { %v2364_v58 = vpop.f32.mrf.mxu1  ;;  %8135 = vmatmul.msk.f32.gmra.mxu0 %vm1020_vm0, %v15096_v4 }
 0x2cf   : > { %15127 = vst [vmem:[#allocation94_spill] sm:$0xff] %v10560_v63  ;;  %7878 = vmatmul.msk.f32.gmra.mxu3 %vm1020_vm0, %v10564_v12  ;;  %v2092_v29 = vsel %vm2091_vm7, %v10511_v16, %v2090_v15  ;;  %v2216_v16 = vld [vmem:[%s9909_s29 + $0xc0] sm:$0xff]  ;;  %v10705_v63 = vld [vmem:[%s9217_s24 + $0x1d0] sm:$0xff] }
 0x2d0   : > { %v2095_v30 = vsel %vm2093_vm8, %v2094_v22, %v2092_v29  ;;  %v10603_v22 = vld [vmem:[%s9217_s24 + $0x1a0] sm:$0xff]  ;;  %v8784_v29 = vld [vmem:[%s9217_s24 + $0x8] sm:$0xff] }
 0x2d1   : > { %7787 = vmatmul.msk.f32.gmra.mxu1 %vm1020_vm0, %v2095_v30  ;;  %7819 = vmatmul.msk.f32.gmra.mxu2 %vm2439_vm3, %v2215_v25 }
 0x2d2   : > { %v10577_v27 = vpop.f32.mrf.mxu3 }
 0x2d3   : > { %v10579_v4 = vpop.f32.mrf.mxu0 }
 0x2d4   : > { %15128 = vst [vmem:[#allocation95_spill] sm:$0xff] %v10579_v4  ;;  %v2574_v13 = vpop.f32.mrf.mxu2 }
 0x2d5   : > { %v10581_v57 = vadd.f32 %v2574_v13, %v2364_v58 }
 0x2d6   : > { %v10583_v5 = vpop.f32.mrf.mxu1  ;;  %8136 = vmatmul.msk.f32.gmra.mxu0 %vm1020_vm0, %v15100_v49  ;;  %v2217_v49 = vld [vmem:[%s9909_s29 + $0xc8] sm:$0xff] }
 0x2d7   : > { %15129 = vst [vmem:[#allocation96_spill] sm:$0xff] %v10581_v57  ;;  %7879 = vmatmul.msk.f32.gmra.mxu3 %vm1020_vm0, %v10586_v48  ;;  %v8794_v57 = vld [vmem:[%s9217_s24 + $0x30] sm:$0xff] }
 0x2d8   : > { %15130 = vst [vmem:[#allocation97_spill] sm:$0xff] %v10583_v5  ;;  %v10722_v5 = vld [vmem:[%s9217_s24 + $0x1d8] sm:$0xff] }
 0x2d9   : > { %7820 = vmatmul.msk.f32.gmra.mxu2 %vm2439_vm3, %v2216_v16  ;;  %7924 = vmatmul.msk.f32.vlgmr.msrb.gmra.mxu1 %vm1020_vm0, %v8782_v19  ;;  %v10620_v16 = vld [vmem:[%s9217_s24 + $0x1a8] sm:$0xff] }
 0x2da   : > { %v10594_v23 = vpop.f32.mrf.mxu3 }
 0x2db   : > { %v10598_v58 = vpop.f32.mrf.mxu0 }
 0x2dc   : > { %15131 = vst [vmem:[#allocation98_spill] sm:$0xff] %v10598_v58  ;;  %v10637_v58 = vld [vmem:[%s9217_s24 + $0x1b0] sm:$0xff] }
 0x2de   : > { %v10600_v15 = vpop.f32.mrf.mxu1  ;;  %8137 = vmatmul.msk.f32.gmra.mxu0 %vm1020_vm0, %v15104_v26  ;;  %v2218_v26 = vld [vmem:[%s9909_s29 + $0xd0] sm:$0xff] }
 0x2df   : > { %15132 = vst [vmem:[#allocation99_spill] sm:$0xff] %v10600_v15  ;;  %7880 = vmatmul.msk.f32.gmra.mxu3 %vm1020_vm0, %v10603_v22  ;;  %v10688_v15 = vld [vmem:[%s9217_s24 + $0x1c8] sm:$0xff] }
 0x2e1   : > { %7821 = vmatmul.msk.f32.gmra.mxu2 %vm2439_vm3, %v2217_v49  ;;  %7925 = vmatmul.msk.f32.gmra.mxu1 %vm1020_vm0, %v8784_v29  ;;  %v8786_v49 = vld [vmem:[%s9217_s24 + $0x10] sm:$0xff] }
 0x2e2   : > { %v10611_v25 = vpop.f32.mrf.mxu3 }
 0x2e3   : > { %v10615_v30 = vpop.f32.mrf.mxu0 }
 0x2e4   : > { %15133 = vst [vmem:[#allocation100_spill] sm:$0xff] %v10615_v30 }
 0x2e6   : > { %v10617_v13 = vpop.f32.mrf.mxu1  ;;  %8138 = vmatmul.msk.f32.gmra.mxu0 %vm1020_vm0, %v15108_v6  ;;  %v2219_v6 = vld [vmem:[%s9909_s29 + $0xd8] sm:$0xff] }
 0x2e7   : > { %15134 = vst [vmem:[#allocation101_spill] sm:$0xff] %v10617_v13  ;;  %7881 = vmatmul.msk.f32.gmra.mxu3 %vm1020_vm0, %v10620_v16 }
 0x2e9   : > { %7822 = vmatmul.msk.f32.gmra.mxu2 %vm2439_vm3, %v2218_v26  ;;  %7926 = vmatmul.msk.f32.gmra.mxu1 %vm1020_vm0, %v8786_v49  ;;  %v8788_v49 = vld [vmem:[%s9217_s24 + $0x18] sm:$0xff] }
 0x2ea   : > { %v10628_v19 = vpop.f32.mrf.mxu3 }
 0x2eb   : > { %15135 = vst [vmem:[#allocation102_spill] sm:$0xff] %v10628_v19  ;;  %v10632_v29 = vpop.f32.mrf.mxu0 }
 0x2ec   : > { %15136 = vst [vmem:[#allocation103_spill] sm:$0xff] %v10632_v29 }
 0x2ee   : > { %v10634_v30 = vpop.f32.mrf.mxu1  ;;  %8139 = vmatmul.msk.f32.gmra.mxu0 %vm1020_vm0, %v15113_v0  ;;  %v2220_v0 = vld [vmem:[%s9909_s29 + $0xe0] sm:$0xff] }
 0x2ef   : > { %15137 = vst [vmem:[#allocation104_spill] sm:$0xff] %v10634_v30  ;;  %7882 = vmatmul.msk.f32.gmra.mxu3 %vm1020_vm0, %v10637_v58  ;;  %v10671_v30 = vld [vmem:[%s9217_s24 + $0x1c0] sm:$0xff] }
 0x2f1   : > { %7823 = vmatmul.msk.f32.gmra.mxu2 %vm2439_vm3, %v2219_v6  ;;  %7927 = vmatmul.msk.f32.gmra.mxu1 %vm1020_vm0, %v8788_v49  ;;  %v8790_v49 = vld [vmem:[%s9217_s24 + $0x20] sm:$0xff] }
 0x2f2   : > { %v10645_v26 = vpop.f32.mrf.mxu3 }
 0x2f3   : > { %15138 = vst [vmem:[#allocation105_spill] sm:$0xff] %v10645_v26  ;;  %v10649_v29 = vpop.f32.mrf.mxu0 }
 0x2f4   : > { %15139 = vst [vmem:[#allocation106_spill] sm:$0xff] %v10649_v29 }
 0x2f6   : > { %v10651_v4 = vpop.f32.mrf.mxu1  ;;  %8140 = vmatmul.msk.f32.gmra.mxu0 %vm1020_vm0, %v15118_v42  ;;  %v15144_v42 = vld [vmem:[#allocation39_spill] sm:$0xff] }
 0x2f7   : > { %15140 = vst [vmem:[#allocation107_spill] sm:$0xff] %v10651_v4  ;;  %7883 = vmatmul.msk.f32.gmra.mxu3 %vm1020_vm0, %v10654_v2 }
 0x2f9   : > { %7824 = vmatmul.msk.f32.gmra.mxu2 %vm2439_vm3, %v2220_v0  ;;  %7928 = vmatmul.msk.f32.gmra.mxu1 %vm1020_vm0, %v8790_v49  ;;  %v2221_v0 = vld [vmem:[%s9909_s29 + $0xe8] sm:$0xff] }
 0x2fa   : > { %v10662_v6 = vpop.f32.mrf.mxu3  ;;  %v8792_v49 = vld [vmem:[%s9217_s24 + $0x28] sm:$0xff] }
 0x2fb   : > { %15141 = vst [vmem:[#allocation108_spill] sm:$0xff] %v10662_v6  ;;  %v10666_v29 = vpop.f32.mrf.mxu0 }
 0x2fc   : > { %15142 = vst [vmem:[#allocation109_spill] sm:$0xff] %v10666_v29 }
 0x2fe   : > { %v10668_v4 = vpop.f32.mrf.mxu1  ;;  %8141 = vmatmul.msk.f32.gmra.mxu0 %vm1020_vm0, %v15144_v42  ;;  %v15148_v42 = vld [vmem:[#allocation42_spill] sm:$0xff] }
 0x2ff   : > { %15143 = vst [vmem:[#allocation110_spill] sm:$0xff] %v10668_v4  ;;  %7884 = vmatmul.msk.f32.gmra.mxu3 %vm1020_vm0, %v10671_v30 }
 0x301   : > { %7825 = vmatmul.msk.f32.gmra.mxu2 %vm2439_vm3, %v2221_v0  ;;  %7929 = vmatmul.msk.f32.gmra.mxu1 %vm1020_vm0, %v8792_v49  ;;  %v2222_v0 = vld [vmem:[%s9909_s29 + $0xf0] sm:$0xff] }
 0x302   : > { %v10679_v13 = vpop.f32.mrf.mxu3 }
 0x303   : > { %15145 = vst [vmem:[#allocation39_spill] sm:$0xff] %v10679_v13  ;;  %v10683_v29 = vpop.f32.mrf.mxu0 }
 0x304   : > { %15146 = vst [vmem:[#allocation111_spill] sm:$0xff] %v10683_v29 }
 0x306   : > { %v10685_v4 = vpop.f32.mrf.mxu1  ;;  %8142 = vmatmul.msk.f32.gmra.mxu0 %vm1020_vm0, %v15148_v42  ;;  %v15152_v42 = vld [vmem:[#allocation44_spill] sm:$0xff] }
 0x307   : > { %15147 = vst [vmem:[#allocation112_spill] sm:$0xff] %v10685_v4  ;;  %7885 = vmatmul.msk.f32.gmra.mxu3 %vm1020_vm0, %v10688_v15 }
 0x309   : > { %7826 = vmatmul.msk.f32.gmra.mxu2 %vm2439_vm3, %v2222_v0  ;;  %7930 = vmatmul.msk.f32.gmra.mxu1 %vm1020_vm0, %v8794_v57  ;;  %v2223_v0 = vld [vmem:[%s9909_s29 + $0xf8] sm:$0xff]  ;;  %s12647_s29 = scalar_lea.vmem %s14784_s13, %s9895_s15 }
 0x30a   : > { %v10698_v49 = vpop.f32.mrf.mxu3  ;;  %v8796_v57 = vld [vmem:[%s9217_s24 + $0x38] sm:$0xff] }
 0x30b   : > { %15149 = vst [vmem:[#allocation42_spill] sm:$0xff] %v10698_v49  ;;  %v10700_v29 = vpop.f32.mrf.mxu0 }
 0x30c   : > { %15150 = vst [vmem:[#allocation113_spill] sm:$0xff] %v10700_v29 }
 0x30e   : > { %v10702_v4 = vpop.f32.mrf.mxu1  ;;  %8143 = vmatmul.msk.f32.gmra.mxu0 %vm1020_vm0, %v15152_v42  ;;  %v8798_v42 = vld [vmem:[%s9217_s24 + $0x40] sm:$0xff] }
 0x30f   : > { %15151 = vst [vmem:[#allocation114_spill] sm:$0xff] %v10702_v4  ;;  %7886 = vmatmul.msk.f32.gmra.mxu3 %vm1020_vm0, %v10705_v63 }
 0x311   : > { %7827 = vmatmul.msk.f32.gmra.mxu2 %vm2439_vm3, %v2223_v0  ;;  %7931 = vmatmul.msk.f32.gmra.mxu1 %vm1020_vm0, %v8796_v57 }
 0x312   : > { %v10717_v29 = vpop.f32.mrf.mxu3 }
 0x313   : > { %v10715_v45 = vpop.f32.mrf.mxu0  ;;  %15154 = vst [vmem:[#allocation115_spill] sm:$0xff] %v10717_v29 }
 0x314   : > { %15153 = vst [vmem:[#allocation44_spill] sm:$0xff] %v10715_v45 }
 0x316   : > { %v10719_v4 = vpop.f32.mrf.mxu1  ;;  %8144 = vmatmul.msk.f32.gmra.mxu0 %vm1020_vm0, %v9685_v43  ;;  %v8800_v43 = vld [vmem:[%s9217_s24 + $0x48] sm:$0xff] }
 0x317   : > { %15155 = vst [vmem:[#allocation116_spill] sm:$0xff] %v10719_v4  ;;  %7887 = vmatmul.msk.f32.gmra.mxu3 %vm1020_vm0, %v10722_v5  ;;  %v10737_v4 = vld [vmem:[%s9217_s24 + $0x1e0] sm:$0xff] }
 0x319   : > { %7932 = vmatmul.msk.f32.gmra.mxu1 %vm1020_vm0, %v8798_v42 }
 0x31a   : > { %v10732_v57 = vpop.f32.mrf.mxu3 }
 0x31b   : > { %v10730_v0 = vpop.f32.mrf.mxu0  ;;  %15157 = vst [vmem:[#allocation118_spill] sm:$0xff] %v10732_v57  ;;  %v10750_v57 = vld [vmem:[%s9217_s24 + $0x1e8] sm:$0xff] }
 0x31c   : > { %15156 = vst [vmem:[#allocation117_spill] sm:$0xff] %v10730_v0 }
 0x31e   : > { %v10734_v45 = vpop.f32.mrf.mxu1  ;;  %8145 = vmatmul.msk.f32.gmra.mxu0 %vm1020_vm0, %v9706_v55  ;;  %v8802_v55 = vld [vmem:[%s9217_s24 + $0x50] sm:$0xff] }
 0x31f   : > { %15158 = vst [vmem:[#allocation119_spill] sm:$0xff] %v10734_v45  ;;  %7888 = vmatmul.msk.f32.gmra.mxu3 %vm1020_vm0, %v10737_v4 }
 0x321   : > { %7933 = vmatmul.msk.f32.gmra.mxu1 %vm1020_vm0, %v8800_v43 }
 0x322   : > { %v10756_v45 = vpop.f32.mrf.mxu3 }
 0x323   : > { %v10745_v42 = vpop.f32.mrf.mxu0  ;;  %15161 = vst [vmem:[#allocation122_spill] sm:$0xff] %v10756_v45  ;;  %v10784_v45 = vld [vmem:[%s9217_s24 + $0x1f8] sm:$0xff] }
 0x324   : > { %15159 = vst [vmem:[#allocation120_spill] sm:$0xff] %v10745_v42  ;;  %v10765_v42 = vld [vmem:[%s9217_s24 + $0x1f0] sm:$0xff] }
 0x326   : > { %v10747_v0 = vpop.f32.mrf.mxu1  ;;  %8146 = vmatmul.msk.f32.gmra.mxu0 %vm1020_vm0, %v9730_v46  ;;  %v8804_v46 = vld [vmem:[%s9217_s24 + $0x58] sm:$0xff] }
 0x327   : > { %15160 = vst [vmem:[#allocation121_spill] sm:$0xff] %v10747_v0  ;;  %7889 = vmatmul.msk.f32.gmra.mxu3 %vm1020_vm0, %v10750_v57 }
 0x329   : > { %7934 = vmatmul.msk.f32.gmra.mxu1 %vm1020_vm0, %v8802_v55  ;;  %v5355_v55 = vld [vmem:[%s14780_s9] sm:$0xf] }
 0x32a   : > { %8213 = vmatpush.msk.msra.mxu3 %vm3877_vm9, %v5355_v55 }
 0x32b   : > { %v10760_v29 = vpop.f32.mrf.mxu0 }
 0x32c   : > { %15162 = vst [vmem:[#allocation123_spill] sm:$0xff] %v10760_v29  ;;  %v10776_v29 = vpop.f32.mrf.mxu3 }
 0x32d   : > { %15164 = vst [vmem:[#allocation125_spill] sm:$0xff] %v10776_v29 }
 0x32e   : > { %v10762_v43 = vpop.f32.mrf.mxu1  ;;  %8147 = vmatmul.msk.f32.gmra.mxu0 %vm1020_vm0, %v9756_v50  ;;  %v8806_v50 = vld [vmem:[%s9217_s24 + $0x60] sm:$0xff] }
 0x32f   : > { %15163 = vst [vmem:[#allocation124_spill] sm:$0xff] %v10762_v43  ;;  %7890 = vmatmul.msk.f32.gmra.mxu3 %vm1020_vm0, %v10765_v42 }
 0x331   : > { %7935 = vmatmul.msk.f32.gmra.mxu1 %vm1020_vm0, %v8804_v46 }
 0x333   : > { %v10779_v43 = vpop.f32.mrf.mxu0 }
 0x334   : > { %15165 = vst [vmem:[#allocation126_spill] sm:$0xff] %v10779_v43  ;;  %v10794_v55 = vpop.f32.mrf.mxu3 }
 0x335   : > { %15168 = vst [vmem:[#allocation129_spill] sm:$0xff] %v10794_v55 }
 0x336   : > { %v10781_v0 = vpop.f32.mrf.mxu1  ;;  %8148 = vmatmul.msk.f32.gmra.mxu0 %vm1020_vm0, %v9785_v36  ;;  %v8808_v36 = vld [vmem:[%s9217_s24 + $0x68] sm:$0xff] }
 0x337   : > { %15166 = vst [vmem:[#allocation127_spill] sm:$0xff] %v10781_v0  ;;  %7891 = vmatmul.msk.f32.gmra.mxu3 %vm1020_vm0, %v10784_v45  ;;  %v10799_v0 = vld [vmem:[%s9217_s24 + $0x200] sm:$0xff] }
 0x339   : > { %7936 = vmatmul.msk.f32.gmra.mxu1 %vm1020_vm0, %v8806_v50 }
 0x33b   : > { %v10792_v46 = vpop.f32.mrf.mxu0 }
 0x33c   : > { %15167 = vst [vmem:[#allocation128_spill] sm:$0xff] %v10792_v46  ;;  %v10809_v46 = vpop.f32.mrf.mxu3 }
 0x33d   : > { %15171 = vst [vmem:[#allocation132_spill] sm:$0xff] %v10809_v46  ;;  %v10827_v46 = vld [vmem:[%s9217_s24 + $0x210] sm:$0xff] }
 0x33e   : > { %v10796_v43 = vpop.f32.mrf.mxu1  ;;  %8149 = vmatmul.msk.f32.gmra.mxu0 %vm1020_vm0, %v9821_v56  ;;  %v8810_v56 = vld [vmem:[%s9217_s24 + $0x70] sm:$0xff] }
 0x33f   : > { %15169 = vst [vmem:[#allocation130_spill] sm:$0xff] %v10796_v43  ;;  %7892 = vmatmul.msk.f32.gmra.mxu3 %vm1020_vm0, %v10799_v0  ;;  %v10814_v43 = vld [vmem:[%s9217_s24 + $0x208] sm:$0xff] }
 0x341   : > { %7937 = vmatmul.msk.f32.gmra.mxu1 %vm1020_vm0, %v8808_v36 }
 0x343   : > { %v10807_v50 = vpop.f32.mrf.mxu0 }
 0x344   : > { %15170 = vst [vmem:[#allocation131_spill] sm:$0xff] %v10807_v50 }
 0x346   : > { %v10811_v55 = vpop.f32.mrf.mxu1  ;;  %8150 = vmatmul.msk.f32.gmra.mxu0 %vm1020_vm0, %v9847_v60  ;;  %v8812_v60 = vld [vmem:[%s9217_s24 + $0x78] sm:$0xff] }
 0x347   : > { %15172 = vst [vmem:[#allocation133_spill] sm:$0xff] %v10811_v55  ;;  %7893 = vmatmul.msk.f32.gmra.mxu3 %vm1020_vm0, %v10814_v43  ;;  %v10833_v55 = vpop.f32.mrf.mxu3 }
 0x348   : > { %15175 = vst [vmem:[#allocation136_spill] sm:$0xff] %v10833_v55 }
 0x349   : > { %7938 = vmatmul.msk.f32.gmra.mxu1 %vm1020_vm0, %v8810_v56 }
 0x34b   : > { %v10822_v36 = vpop.f32.mrf.mxu0 }
 0x34c   : > { %15173 = vst [vmem:[#allocation134_spill] sm:$0xff] %v10822_v36  ;;  %v10840_v36 = vld [vmem:[%s9217_s24 + $0x218] sm:$0xff] }
 0x34e   : > { %v10824_v50 = vpop.f32.mrf.mxu1  ;;  %8151 = vmatmul.msk.f32.gmra.mxu0 %vm1020_vm0, %v9875_v21  ;;  %v8814_v21 = vld [vmem:[%s9217_s24 + $0x80] sm:$0xff] }
 0x34f   : > { %15174 = vst [vmem:[#allocation135_spill] sm:$0xff] %v10824_v50  ;;  %7894 = vmatmul.msk.f32.gmra.mxu3 %vm1020_vm0, %v10827_v46  ;;  %v10850_v55 = vpop.f32.mrf.mxu3 }
 0x350   : > { %15177 = vst [vmem:[#allocation138_spill] sm:$0xff] %v10850_v55 }
 0x351   : > { %7939 = vmatmul.msk.f32.gmra.mxu1 %vm1020_vm0, %v8812_v60 }
 0x353   : > { %v10837_v56 = vpop.f32.mrf.mxu0 }
 0x354   : > { %15176 = vst [vmem:[#allocation137_spill] sm:$0xff] %v10837_v56  ;;  %v10855_v56 = vld [vmem:[%s9217_s24 + $0x220] sm:$0xff] }
 0x356   : > { %v10844_v50 = vpop.f32.mrf.mxu1  ;;  %8152 = vmatmul.msk.f32.gmra.mxu0 %vm1020_vm0, %v9902_v61  ;;  %v8816_v61 = vld [vmem:[%s9217_s24 + $0x88] sm:$0xff] }
 0x357   : > { %7895 = vmatmul.msk.f32.gmra.mxu3 %vm1020_vm0, %v10840_v36  ;;  %v10867_v55 = vpop.f32.mrf.mxu3 }
 0x358   : > { %15180 = vst [vmem:[#allocation141_spill] sm:$0xff] %v10867_v55  ;;  %v10885_v55 = vld [vmem:[%s9217_s24 + $0x230] sm:$0xff] }
 0x359   : > { %7940 = vmatmul.msk.f32.gmra.mxu1 %vm1020_vm0, %v8814_v21 }
 0x35b   : > { %v10852_v60 = vpop.f32.mrf.mxu0 }
 0x35c   : > { %15178 = vst [vmem:[#allocation139_spill] sm:$0xff] %v10852_v60  ;;  %v10870_v60 = vld [vmem:[%s9217_s24 + $0x228] sm:$0xff] }
 0x35e   : > { %v10859_v29 = vpop.f32.mrf.mxu1  ;;  %8153 = vmatmul.msk.f32.gmra.mxu0 %vm1020_vm0, %v9936_v32  ;;  %v8818_v32 = vld [vmem:[%s9217_s24 + $0x90] sm:$0xff] }
 0x35f   : > { %7896 = vmatmul.msk.f32.gmra.mxu3 %vm1020_vm0, %v10855_v56 }
 0x361   : > { %7941 = vmatmul.msk.f32.gmra.mxu1 %vm1020_vm0, %v8816_v61 }
 0x363   : > { %v10865_v21 = vpop.f32.mrf.mxu0 }
 0x364   : > { %15179 = vst [vmem:[#allocation140_spill] sm:$0xff] %v10865_v21  ;;  %v10882_v21 = vpop.f32.mrf.mxu3 }
 0x365   : > { %15182 = vst [vmem:[#allocation143_spill] sm:$0xff] %v10882_v21 }
 0x366   : > { %v10874_v49 = vpop.f32.mrf.mxu1  ;;  %8154 = vmatmul.msk.f32.gmra.mxu0 %vm1020_vm0, %v9970_v41  ;;  %v8820_v41 = vld [vmem:[%s9217_s24 + $0x98] sm:$0xff] }
 0x367   : > { %7897 = vmatmul.msk.f32.gmra.mxu3 %vm1020_vm0, %v10870_v60 }
 0x369   : > { %7942 = vmatmul.msk.f32.gmra.mxu1 %vm1020_vm0, %v8818_v32 }
 0x36b   : > { %v10880_v61 = vpop.f32.mrf.mxu0 }
 0x36c   : > { %15181 = vst [vmem:[#allocation142_spill] sm:$0xff] %v10880_v61  ;;  %v10898_v61 = vld [vmem:[%s9217_s24 + $0x238] sm:$0xff]  ;;  %v10906_v6 = vpop.f32.mrf.mxu3 }
 0x36d   : > { %15185 = vst [vmem:[#allocation146_spill] sm:$0xff] %v10906_v6 }
 0x36e   : > { %v10889_v13 = vpop.f32.mrf.mxu1  ;;  %8155 = vmatmul.msk.f32.gmra.mxu0 %vm1020_vm0, %v9998_v44  ;;  %v8822_v44 = vld [vmem:[%s9217_s24 + $0xa0] sm:$0xff] }
 0x36f   : > { %7898 = vmatmul.msk.f32.gmra.mxu3 %vm1020_vm0, %v10885_v55 }
 0x371   : > { %7943 = vmatmul.msk.f32.gmra.mxu1 %vm1020_vm0, %v8820_v41 }
 0x373   : > { %v10895_v32 = vpop.f32.mrf.mxu0 }
 0x374   : > { %15183 = vst [vmem:[#allocation144_spill] sm:$0xff] %v10895_v32  ;;  %v10913_v32 = vld [vmem:[%s9217_s24 + $0x240] sm:$0xff]  ;;  %v10923_v6 = vpop.f32.mrf.mxu3 }
 0x375   : > { %15188 = vst [vmem:[#allocation149_spill] sm:$0xff] %v10923_v6 }
 0x376   : > { %v10902_v21 = vpop.f32.mrf.mxu1  ;;  %8156 = vmatmul.msk.f32.gmra.mxu0 %vm1020_vm0, %v10026_v24  ;;  %v8824_v24 = vld [vmem:[%s9217_s24 + $0xa8] sm:$0xff] }
 0x377   : > { %7899 = vmatmul.msk.f32.gmra.mxu3 %vm1020_vm0, %v10898_v61  ;;  %15184 = vst [vmem:[#allocation145_spill] sm:$0xff] %v10902_v21  ;;  %v15246_v21 = vld [vmem:[#allocation40_spill] sm:$0xff] }
 0x379   : > { %7944 = vmatmul.msk.f32.gmra.mxu1 %vm1020_vm0, %v8822_v44 }
 0x37b   : > { %v10910_v41 = vpop.f32.mrf.mxu0 }
 0x37c   : > { %15186 = vst [vmem:[#allocation147_spill] sm:$0xff] %v10910_v41  ;;  %v10928_v41 = vld [vmem:[%s9217_s24 + $0x248] sm:$0xff]  ;;  %v10940_v6 = vpop.f32.mrf.mxu3 }
 0x37d   : > { %15192 = vst [vmem:[#allocation153_spill] sm:$0xff] %v10940_v6  ;;  %v10958_v6 = vld [vmem:[%s9217_s24 + $0x258] sm:$0xff] }
 0x37e   : > { %v10917_v26 = vpop.f32.mrf.mxu1  ;;  %8157 = vmatmul.msk.f32.gmra.mxu0 %vm1020_vm0, %v10052_v28  ;;  %v8826_v28 = vld [vmem:[%s9217_s24 + $0xb0] sm:$0xff] }
 0x37f   : > { %7900 = vmatmul.msk.f32.gmra.mxu3 %vm1020_vm0, %v10913_v32  ;;  %15187 = vst [vmem:[#allocation148_spill] sm:$0xff] %v10917_v26 }
 0x381   : > { %7945 = vmatmul.msk.f32.gmra.mxu1 %vm1020_vm0, %v8824_v24 }
 0x383   : > { %v10925_v44 = vpop.f32.mrf.mxu0 }
 0x384   : > { %15189 = vst [vmem:[#allocation150_spill] sm:$0xff] %v10925_v44  ;;  %v10943_v44 = vld [vmem:[%s9217_s24 + $0x250] sm:$0xff] }
 0x386   : > { %v10932_v19 = vpop.f32.mrf.mxu1  ;;  %8158 = vmatmul.msk.f32.gmra.mxu0 %vm1020_vm0, %v10078_v33  ;;  %v8828_v33 = vld [vmem:[%s9217_s24 + $0xb8] sm:$0xff] }
 0x387   : > { %7901 = vmatmul.msk.f32.gmra.mxu3 %vm1020_vm0, %v10928_v41  ;;  %15190 = vst [vmem:[#allocation151_spill] sm:$0xff] %v10932_v19 }
 0x389   : > { %7946 = vmatmul.msk.f32.gmra.mxu1 %vm1020_vm0, %v8826_v28 }
 0x38b   : > { %v10938_v24 = vpop.f32.mrf.mxu0 }
 0x38c   : > { %15191 = vst [vmem:[#allocation152_spill] sm:$0xff] %v10938_v24  ;;  %v10955_v24 = vpop.f32.mrf.mxu3 }
 0x38d   : > { %15195 = vst [vmem:[#allocation156_spill] sm:$0xff] %v10955_v24 }
 0x38e   : > { %v10947_v26 = vpop.f32.mrf.mxu1  ;;  %8159 = vmatmul.msk.f32.gmra.mxu0 %vm1020_vm0, %v10104_v52  ;;  %v8830_v52 = vld [vmem:[%s9217_s24 + $0xc0] sm:$0xff] }
 0x38f   : > { %7902 = vmatmul.msk.f32.gmra.mxu3 %vm1020_vm0, %v10943_v44  ;;  %15193 = vst [vmem:[#allocation154_spill] sm:$0xff] %v10947_v26 }
 0x391   : > { %7947 = vmatmul.msk.f32.gmra.mxu1 %vm1020_vm0, %v8828_v33 }
 0x393   : > { %v10953_v28 = vpop.f32.mrf.mxu0 }
 0x394   : > { %15194 = vst [vmem:[#allocation155_spill] sm:$0xff] %v10953_v28  ;;  %v10971_v28 = vld [vmem:[%s9217_s24 + $0x260] sm:$0xff] }
 0x396   : > { %v10962_v19 = vpop.f32.mrf.mxu1  ;;  %8160 = vmatmul.msk.f32.gmra.mxu0 %vm1020_vm0, %v10130_v51  ;;  %v8832_v51 = vld [vmem:[%s9217_s24 + $0xc8] sm:$0xff] }
 0x397   : > { %7903 = vmatmul.msk.f32.gmra.mxu3 %vm1020_vm0, %v10958_v6  ;;  %15196 = vst [vmem:[#allocation157_spill] sm:$0xff] %v10962_v19  ;;  %v10979_v19 = vpop.f32.mrf.mxu3 }
 0x398   : > { %15199 = vst [vmem:[#allocation160_spill] sm:$0xff] %v10979_v19 }
 0x399   : > { %7948 = vmatmul.msk.f32.gmra.mxu1 %vm1020_vm0, %v8830_v52 }
 0x39b   : > { %v10968_v33 = vpop.f32.mrf.mxu0 }
 0x39c   : > { %15197 = vst [vmem:[#allocation158_spill] sm:$0xff] %v10968_v33  ;;  %v10986_v33 = vld [vmem:[%s9217_s24 + $0x268] sm:$0xff] }
 0x39e   : > { %v10975_v24 = vpop.f32.mrf.mxu1  ;;  %8161 = vmatmul.msk.f32.gmra.mxu0 %vm1020_vm0, %v10159_v53  ;;  %v8834_v53 = vld [vmem:[%s9217_s24 + $0xd0] sm:$0xff] }
 0x39f   : > { %7904 = vmatmul.msk.f32.gmra.mxu3 %vm1020_vm0, %v10971_v28  ;;  %15198 = vst [vmem:[#allocation159_spill] sm:$0xff] %v10975_v24  ;;  %v10996_v19 = vpop.f32.mrf.mxu3 }
 0x3a0   : > { %15202 = vst [vmem:[#allocation163_spill] sm:$0xff] %v10996_v19 }
 0x3a1   : > { %7949 = vmatmul.msk.f32.gmra.mxu1 %vm1020_vm0, %v8832_v51 }
 0x3a3   : > { %v10983_v52 = vpop.f32.mrf.mxu0 }
 0x3a4   : > { %15200 = vst [vmem:[#allocation161_spill] sm:$0xff] %v10983_v52  ;;  %v11001_v52 = vld [vmem:[%s9217_s24 + $0x270] sm:$0xff] }
 0x3a6   : > { %v10990_v26 = vpop.f32.mrf.mxu1  ;;  %8162 = vmatmul.msk.f32.gmra.mxu0 %vm1020_vm0, %v10187_v10  ;;  %v8836_v10 = vld [vmem:[%s9217_s24 + $0xd8] sm:$0xff] }
 0x3a7   : > { %7905 = vmatmul.msk.f32.gmra.mxu3 %vm1020_vm0, %v10986_v33  ;;  %15201 = vst [vmem:[#allocation162_spill] sm:$0xff] %v10990_v26  ;;  %v11013_v19 = vpop.f32.mrf.mxu3 }
 0x3a8   : > { %15206 = vst [vmem:[#allocation167_spill] sm:$0xff] %v11013_v19  ;;  %v11031_v19 = vld [vmem:[%s9217_s24 + $0x280] sm:$0xff] }
 0x3a9   : > { %7950 = vmatmul.msk.f32.gmra.mxu1 %vm1020_vm0, %v8834_v53 }
 0x3ab   : > { %v10998_v51 = vpop.f32.mrf.mxu0 }
 0x3ac   : > { %15203 = vst [vmem:[#allocation164_spill] sm:$0xff] %v10998_v51  ;;  %v11016_v51 = vld [vmem:[%s9217_s24 + $0x278] sm:$0xff] }
 0x3ae   : > { %v11005_v24 = vpop.f32.mrf.mxu1  ;;  %8163 = vmatmul.msk.f32.gmra.mxu0 %vm1020_vm0, %v10215_v14  ;;  %v8838_v14 = vld [vmem:[%s9217_s24 + $0xe0] sm:$0xff] }
 0x3af   : > { %7906 = vmatmul.msk.f32.gmra.mxu3 %vm1020_vm0, %v11001_v52  ;;  %15204 = vst [vmem:[#allocation165_spill] sm:$0xff] %v11005_v24 }
 0x3b1   : > { %7951 = vmatmul.msk.f32.gmra.mxu1 %vm1020_vm0, %v8836_v10 }
 0x3b3   : > { %v11011_v53 = vpop.f32.mrf.mxu0 }
 0x3b4   : > { %15205 = vst [vmem:[#allocation166_spill] sm:$0xff] %v11011_v53  ;;  %v11028_v53 = vpop.f32.mrf.mxu3 }
 0x3b5   : > { %15209 = vst [vmem:[#allocation170_spill] sm:$0xff] %v11028_v53 }
 0x3b6   : > { %v11020_v26 = vpop.f32.mrf.mxu1  ;;  %8164 = vmatmul.msk.f32.gmra.mxu0 %vm1020_vm0, %v10243_v47  ;;  %v8840_v47 = vld [vmem:[%s9217_s24 + $0xe8] sm:$0xff] }
 0x3b7   : > { %7907 = vmatmul.msk.f32.gmra.mxu3 %vm1020_vm0, %v11016_v51  ;;  %15207 = vst [vmem:[#allocation168_spill] sm:$0xff] %v11020_v26 }
 0x3b9   : > { %7952 = vmatmul.msk.f32.gmra.mxu1 %vm1020_vm0, %v8838_v14 }
 0x3bb   : > { %v11026_v10 = vpop.f32.mrf.mxu0 }
 0x3bc   : > { %15208 = vst [vmem:[#allocation169_spill] sm:$0xff] %v11026_v10  ;;  %v11044_v10 = vld [vmem:[%s9217_s24 + $0x288] sm:$0xff] }
 0x3be   : > { %v11035_v24 = vpop.f32.mrf.mxu1  ;;  %8165 = vmatmul.msk.f32.gmra.mxu0 %vm1020_vm0, %v10271_v11  ;;  %v8842_v11 = vld [vmem:[%s9217_s24 + $0xf0] sm:$0xff] }
 0x3bf   : > { %7908 = vmatmul.msk.f32.gmra.mxu3 %vm1020_vm0, %v11031_v19  ;;  %15210 = vst [vmem:[#allocation171_spill] sm:$0xff] %v11035_v24  ;;  %v11052_v24 = vpop.f32.mrf.mxu3 }
 0x3c0   : > { %15213 = vst [vmem:[#allocation174_spill] sm:$0xff] %v11052_v24 }
 0x3c1   : > { %7953 = vmatmul.msk.f32.gmra.mxu1 %vm1020_vm0, %v8840_v47 }
 0x3c3   : > { %v11041_v14 = vpop.f32.mrf.mxu0 }
 0x3c4   : > { %15211 = vst [vmem:[#allocation172_spill] sm:$0xff] %v11041_v14  ;;  %v11059_v14 = vld [vmem:[%s9217_s24 + $0x290] sm:$0xff] }
 0x3c6   : > { %v11048_v53 = vpop.f32.mrf.mxu1  ;;  %8166 = vmatmul.msk.f32.gmra.mxu0 %vm1020_vm0, %v10299_v38  ;;  %v8844_v38 = vld [vmem:[%s9217_s24 + $0xf8] sm:$0xff] }
 0x3c7   : > { %7909 = vmatmul.msk.f32.gmra.mxu3 %vm1020_vm0, %v11044_v10  ;;  %15212 = vst [vmem:[#allocation173_spill] sm:$0xff] %v11048_v53  ;;  %v11069_v24 = vpop.f32.mrf.mxu3  ;;  %v11077_v53 = vld [vmem:[%s9217_s24 + $0x298] sm:$0xff] }
 0x3c8   : > { %15216 = vst [vmem:[#allocation177_spill] sm:$0xff] %v11069_v24 }
 0x3c9   : > { %7954 = vmatmul.msk.f32.gmra.mxu1 %vm1020_vm0, %v8842_v11 }
 0x3cb   : > { %v11056_v47 = vpop.f32.mrf.mxu0 }
 0x3cc   : > { %15214 = vst [vmem:[#allocation175_spill] sm:$0xff] %v11056_v47  ;;  %v6243_v47 = vld [vmem:[%s14782_s11 + $0x18] sm:$0xff] }
 0x3cd   : > { %6356 = vmatpush.msra.mxu1 %v6243_v47  ;;  %v11092_v47 = vld [vmem:[%s9217_s24 + $0x2a0] sm:$0xff] }
 0x3ce   : > { %v11063_v26 = vpop.f32.mrf.mxu1  ;;  %8167 = vmatmul.msk.f32.gmra.mxu0 %vm1020_vm0, %v10327_v20  ;;  %15221 = vst [vmem:[#allocation182_spill] sm:$0xff] %v11092_v47 }
 0x3cf   : > { %7910 = vmatmul.msk.f32.gmra.mxu3 %vm1020_vm0, %v11059_v14  ;;  %15215 = vst [vmem:[#allocation176_spill] sm:$0xff] %v11063_v26  ;;  %v11089_v24 = vpop.f32.mrf.mxu3 }
 0x3d0   : > { %15220 = vst [vmem:[#allocation181_spill] sm:$0xff] %v11089_v24  ;;  %v11107_v24 = vld [vmem:[%s9217_s24 + $0x2a8] sm:$0xff] }
 0x3d1   : > { %7955 = vmatmul.msk.f32.gmra.mxu1 %vm1020_vm0, %v8844_v38  ;;  %v8846_v38 = vld [vmem:[%s9217_s24 + $0x100] sm:$0xff]  ;;  %15225 = vst [vmem:[#allocation186_spill] sm:$0xff] %v11107_v24 }
 0x3d3   : > { %v11071_v11 = vpop.f32.mrf.mxu0 }
 0x3d4   : > { %15217 = vst [vmem:[#allocation178_spill] sm:$0xff] %v11071_v11 }
 0x3d6   : > { %v11081_v20 = vpop.f32.mrf.mxu1  ;;  %8168 = vmatmul.msk.f32.gmra.mxu0 %vm1020_vm0, %v10358_v37  ;;  %v8848_v37 = vld [vmem:[%s9217_s24 + $0x108] sm:$0xff] }
 0x3d7   : > { %7911 = vmatmul.msk.f32.gmra.mxu3 %vm1020_vm0, %v11077_v53  ;;  %15218 = vst [vmem:[#allocation179_spill] sm:$0xff] %v11081_v20 }
 0x3d9   : > { %7956 = vmatmul.msk.f32.gmra.mxu1 %vm1020_vm0, %v8846_v38 }
 0x3db   : > { %v11087_v11 = vpop.f32.mrf.mxu0 }
 0x3dc   : > { %15219 = vst [vmem:[#allocation180_spill] sm:$0xff] %v11087_v11  ;;  %v11104_v11 = vpop.f32.mrf.mxu3 }
 0x3dd   : > { %15224 = vst [vmem:[#allocation185_spill] sm:$0xff] %v11104_v11 }
 0x3de   : > { %v11096_v26 = vpop.f32.mrf.mxu1  ;;  %8169 = vmatmul.msk.f32.gmra.mxu0 %vm1020_vm0, %v10389_v18  ;;  %v8850_v18 = vld [vmem:[%s9217_s24 + $0x110] sm:$0xff] }
 0x3df   : > { %7912 = vmatmul.msk.f32.gmra.mxu3 %vm1020_vm0, %v11092_v47  ;;  %15222 = vst [vmem:[#allocation183_spill] sm:$0xff] %v11096_v26 }
 0x3e1   : > { %7957 = vmatmul.msk.f32.gmra.mxu1 %vm1020_vm0, %v8848_v37 }
 0x3e3   : > { %v11102_v38 = vpop.f32.mrf.mxu0 }
 0x3e4   : > { %15223 = vst [vmem:[#allocation184_spill] sm:$0xff] %v11102_v38  ;;  %v11120_v38 = vld [vmem:[%s9217_s24 + $0x2b0] sm:$0xff] }
 0x3e5   : > { %15228 = vst [vmem:[#allocation189_spill] sm:$0xff] %v11120_v38 }
 0x3e6   : > { %v11111_v20 = vpop.f32.mrf.mxu1  ;;  %8170 = vmatmul.msk.f32.gmra.mxu0 %vm1020_vm0, %v10420_v9  ;;  %v8852_v9 = vld [vmem:[%s9217_s24 + $0x118] sm:$0xff] }
 0x3e7   : > { %7913 = vmatmul.msk.f32.gmra.mxu3 %vm1020_vm0, %v11107_v24  ;;  %15226 = vst [vmem:[#allocation187_spill] sm:$0xff] %v11111_v20  ;;  %v11128_v20 = vpop.f32.mrf.mxu3  ;;  %v11178_v24 = vld [vmem:[%s9217_s24 + $0x2d0] sm:$0xff] }
 0x3e8   : > { %15241 = vst [vmem:[#allocation198_spill] sm:$0xff] %v11178_v24 }
 0x3e9   : > { %7958 = vmatmul.msk.f32.gmra.mxu1 %vm1020_vm0, %v8850_v18 }
 0x3eb   : > { %v11117_v37 = vpop.f32.mrf.mxu0 }
 0x3ec   : > { %15227 = vst [vmem:[#allocation188_spill] sm:$0xff] %v11117_v37  ;;  %v11135_v37 = vld [vmem:[%s9217_s24 + $0x2b8] sm:$0xff] }
 0x3ed   : > { %15231 = vst [vmem:[#allocation192_spill] sm:$0xff] %v11135_v37 }
 0x3ee   : > { %v11124_v11 = vpop.f32.mrf.mxu1  ;;  %8171 = vmatmul.msk.f32.gmra.mxu0 %vm1020_vm0, %v10451_v59  ;;  %v8854_v59 = vld [vmem:[%s9217_s24 + $0x120] sm:$0xff] }
 0x3ef   : > { %7914 = vmatmul.msk.f32.gmra.mxu3 %vm1020_vm0, %v11120_v38  ;;  %15229 = vst [vmem:[#allocation190_spill] sm:$0xff] %v11124_v11  ;;  %v11145_v11 = vpop.f32.mrf.mxu3  ;;  %v11163_v38 = vld [vmem:[%s9217_s24 + $0x2c8] sm:$0xff] }
 0x3f0   : > { %15237 = vst [vmem:[#allocation196_spill] sm:$0xff] %v11163_v38 }
 0x3f1   : > { %7959 = vmatmul.msk.f32.gmra.mxu1 %vm1020_vm0, %v8852_v9  ;;  %v11148_v9 = vld [vmem:[%s9217_s24 + $0x2c0] sm:$0xff] }
 0x3f2   : > { %15233 = vst [vmem:[#allocation194_spill] sm:$0xff] %v11148_v9 }
 0x3f3   : > { %v11132_v18 = vpop.f32.mrf.mxu0 }
 0x3f4   : > { %15230 = vst [vmem:[#allocation191_spill] sm:$0xff] %v11132_v18 }
 0x3f6   : > { %v11139_v26 = vpop.f32.mrf.mxu1  ;;  %8172 = vmatmul.msk.f32.gmra.mxu0 %vm1020_vm0, %v10482_v1  ;;  %v8856_v1 = vld [vmem:[%s9217_s24 + $0x128] sm:$0xff] }
 0x3f7   : > { %7915 = vmatmul.msk.f32.gmra.mxu3 %vm1020_vm0, %v11135_v37  ;;  %15232 = vst [vmem:[#allocation193_spill] sm:$0xff] %v11139_v26  ;;  %v15235_v37 = vld [vmem:[#allocation29_spill] sm:$0xff] }
 0x3f9   : > { %7960 = vmatmul.msk.f32.gmra.mxu1 %vm1020_vm0, %v8854_v59  ;;  %v11160_v59 = vpop.f32.mrf.mxu3 }
 0x3fb   : > { %v11156_v26 = vpop.f32.mrf.mxu0 }
 0x3fc   : > { %15236 = vst [vmem:[#allocation29_spill] sm:$0xff] %v11156_v26 }
 0x3fe   : > { %v11152_v18 = vpop.f32.mrf.mxu1  ;;  %8173 = vmatmul.msk.f32.gmra.mxu0 %vm1020_vm0, %v15235_v37  ;;  %v8858_v37 = vld [vmem:[%s9217_s24 + $0x130] sm:$0xff] }
 0x3ff   : > { %7916 = vmatmul.msk.f32.gmra.mxu3 %vm1020_vm0, %v11148_v9  ;;  %15234 = vst [vmem:[#allocation195_spill] sm:$0xff] %v11152_v18  ;;  %v15239_v18 = vld [vmem:[#allocation32_spill] sm:$0xff] }
 0x401   : > { %7961 = vmatmul.msk.f32.gmra.mxu1 %vm1020_vm0, %v8856_v1  ;;  %v11175_v1 = vpop.f32.mrf.mxu3 }
 0x403   : > { %v11173_v26 = vpop.f32.mrf.mxu0 }
 0x404   : > { %15240 = vst [vmem:[#allocation32_spill] sm:$0xff] %v11173_v26  ;;  %v8861_v26 = vld [vmem:[%s9217_s24 + $0x2d8] sm:$0xff] }
 0x406   : > { %v11167_v9 = vpop.f32.mrf.mxu1  ;;  %8174 = vmatmul.msk.f32.gmra.mxu0 %vm1020_vm0, %v15239_v18  ;;  %v8860_v18 = vld [vmem:[%s9217_s24 + $0x138] sm:$0xff] }
 0x407   : > { %7917 = vmatmul.msk.f32.gmra.mxu3 %vm1020_vm0, %v11163_v38  ;;  %15238 = vst [vmem:[#allocation197_spill] sm:$0xff] %v11167_v9  ;;  %v15243_v9 = vld [vmem:[#allocation36_spill] sm:$0xff] }
 0x409   : > { %7962 = vmatmul.msk.f32.gmra.mxu1 %vm1020_vm0, %v8858_v37 }
 0x40b   : > { %v11188_v37 = vpop.f32.mrf.mxu0 }
 0x40c   : > { %15244 = vst [vmem:[#allocation36_spill] sm:$0xff] %v11188_v37 }
 0x40e   : > { %v11182_v38 = vpop.f32.mrf.mxu1  ;;  %8175 = vmatmul.msk.f32.gmra.mxu0 %vm1020_vm0, %v15243_v9 }
 0x40f   : > { %7918 = vmatmul.msk.f32.gmra.mxu3 %vm1020_vm0, %v11178_v24  ;;  %15242 = vst [vmem:[#allocation199_spill] sm:$0xff] %v11182_v38  ;;  %v11196_v24 = vpop.f32.mrf.mxu3  ;;  %v8862_v38 = vld [vmem:[%s9217_s24 + $0x140] sm:$0xff] }
 0x411   : > { %7963 = vmatmul.msk.f32.gmra.mxu1 %vm1020_vm0, %v8860_v18  ;;  %v8863_v18 = vld [vmem:[%s9217_s24 + $0x2e0] sm:$0xff] }
 0x413   : > { %v11200_v9 = vpop.f32.mrf.mxu0 }
 0x414   : > { %15247 = vst [vmem:[#allocation40_spill] sm:$0xff] %v11200_v9  ;;  %v8866_v9 = vld [vmem:[%s9217_s24 + $0x2f0] sm:$0xff] }
 0x416   : > { %v11192_v47 = vpop.f32.mrf.mxu1  ;;  %8176 = vmatmul.msk.f32.gmra.mxu0 %vm1020_vm0, %v15246_v21 }
 0x417   : > { %7919 = vmatmul.msk.f32.gmra.mxu3 %vm1020_vm0, %v8861_v26  ;;  %15245 = vst [vmem:[#allocation200_spill] sm:$0xff] %v11192_v47  ;;  %v8864_v26 = vld [vmem:[%s9217_s24 + $0x148] sm:$0xff]  ;;  %v11210_v21 = vpop.f32.mrf.mxu3 }
 0x418   : > { %v8865_v47 = vld [vmem:[%s9217_s24 + $0x2e8] sm:$0xff] }
 0x419   : > { %7964 = vmatmul.msk.f32.gmra.mxu1 %vm1020_vm0, %v8862_v38 }
 0x41e   : > { %v11204_v37 = vpop.f32.mrf.mxu1  ;;  %8177 = vmatmul.msk.f32.gmra.mxu0 %vm1020_vm0, %v9655_v35 }
 0x41f   : > { %7920 = vmatmul.msk.f32.gmra.mxu3 %vm1020_vm0, %v8863_v18  ;;  %15248 = vst [vmem:[#allocation201_spill] sm:$0xff] %v11204_v37  ;;  %v11218_v18 = vpop.f32.mrf.mxu0  ;;  %v11222_v35 = vpop.f32.mrf.mxu3 }
 0x420   : > { %15250 = vst [vmem:[#allocation203_spill] sm:$0xff] %v11218_v18  ;;  %v8867_v18 = vld [vmem:[%s9217_s24 + $0x2f8] sm:$0xff] }
 0x421   : > { %7965 = vmatmul.msk.f32.gmra.mxu1 %vm1020_vm0, %v8864_v26 }
 0x426   : > { %v11214_v38 = vpop.f32.mrf.mxu1  ;;  %8178 = vmatmul.msk.f32.gmra.mxu0 %vm1020_vm0, %v9677_v3 }
 0x427   : > { %7921 = vmatmul.msk.f32.gmra.mxu3 %vm1020_vm0, %v8865_v47  ;;  %15249 = vst [vmem:[#allocation202_spill] sm:$0xff] %v11214_v38  ;;  %v11232_v47 = vpop.f32.mrf.mxu0  ;;  %v11234_v3 = vpop.f32.mrf.mxu3  ;;  %v15338_v38 = vld [vmem:[#allocation41_spill] sm:$0xff] }
 0x428   : > { %15252 = vst [vmem:[#allocation205_spill] sm:$0xff] %v11232_v47  ;;  %v15256_v47 = vld [vmem:[#allocation49_spill] sm:$0xff] }
 0x429   : > { %7966 = vmatmul.msk.f32.gmra.mxu1 %vm1020_vm0, %v10341_v62 }
 0x42e   : > { %v11226_v26 = vpop.f32.mrf.mxu1  ;;  %8179 = vmatmul.msk.f32.gmra.mxu0 %vm1020_vm0, %v9700_v7  ;;  %v3587_v7 = vld [vmem:[%s14777_s6] sm:$0xf] }
 0x42f   : > { %7922 = vmatmul.msk.f32.gmra.mxu3 %vm1020_vm0, %v8866_v9  ;;  %15251 = vst [vmem:[#allocation204_spill] sm:$0xff] %v11226_v26  ;;  %8020 = vmatpush.msk.msrb.mxu2 %vm3877_vm9, %v3587_v7  ;;  %v15261_v26 = vld [vmem:[#allocation85_spill] sm:$0xff] }
 0x430   : > { %v15263_v7 = vld [vmem:[#allocation53_spill] sm:$0xff] }
 0x431   : > { %7967 = vmatmul.msk.f32.gmra.mxu1 %vm1020_vm0, %v10372_v40  ;;  %v11247_v40 = vpop.f32.mrf.mxu0 }
 0x432   : > { %15254 = vst [vmem:[#allocation207_spill] sm:$0xff] %v11247_v40 }
 0x436   : > { %v11238_v62 = vpop.f32.mrf.mxu1  ;;  %8180 = vmatmul.msk.f32.gmra.mxu0 %vm1020_vm0, %v9734_v34 }
 0x437   : > { %7923 = vmatmul.msk.f32.gmra.mxu3 %vm1020_vm0, %v8867_v18  ;;  %15253 = vst [vmem:[#allocation206_spill] sm:$0xff] %v11238_v62  ;;  %v15257_v18 = vld [vmem:[#allocation83_spill] sm:$0xff] }
 0x439   : > { %7968 = vmatmul.msk.f32.gmra.mxu1 %vm1020_vm0, %v10403_v39  ;;  %v11256_v34 = vpop.f32.mrf.mxu0  ;;  %v15260_v39 = vld [vmem:[#allocation51_spill] sm:$0xff] }
 0x43a   : > { %15258 = vst [vmem:[#allocation49_spill] sm:$0xff] %v11256_v34  ;;  %v15266_v34 = vld [vmem:[#allocation56_spill] sm:$0xff] }
 0x43e   : > { %v11250_v9 = vpop.f32.mrf.mxu1  ;;  %8181 = vmatmul.msk.f32.gmra.mxu0 %vm1020_vm0, %v15256_v47  ;;  %v15265_v47 = vld [vmem:[#allocation87_spill] sm:$0xff] }
 0x43f   : > { %15255 = vst [vmem:[#allocation208_spill] sm:$0xff] %v11250_v9 }
 0x441   : > { %7969 = vmatmul.msk.f32.gmra.mxu1 %vm1020_vm0, %v15257_v18  ;;  %v11268_v9 = vpop.f32.mrf.mxu0 }
 0x442   : > { %15264 = vst [vmem:[#allocation85_spill] sm:$0xff] %v11268_v9  ;;  %v15270_v9 = vld [vmem:[#allocation60_spill] sm:$0xff] }
 0x446   : > { %v11258_v62 = vpop.f32.mrf.mxu1  ;;  %8182 = vmatmul.msk.f32.gmra.mxu0 %vm1020_vm0, %v15260_v39 }
 0x447   : > { %15259 = vst [vmem:[#allocation83_spill] sm:$0xff] %v11258_v62  ;;  %v15328_v62 = vld [vmem:[#allocation35_spill] sm:$0xff] }
 0x449   : > { %7970 = vmatmul.msk.f32.gmra.mxu1 %vm1020_vm0, %v15261_v26  ;;  %v11278_v39 = vpop.f32.mrf.mxu0 }
 0x44a   : > { %15267 = vst [vmem:[#allocation53_spill] sm:$0xff] %v11278_v39  ;;  %v15272_v39 = vld [vmem:[#allocation62_spill] sm:$0xff] }
 0x44e   : > { %v11264_v40 = vpop.f32.mrf.mxu1  ;;  %8183 = vmatmul.msk.f32.gmra.mxu0 %vm1020_vm0, %v15263_v7 }
 0x44f   : > { %15262 = vst [vmem:[#allocation51_spill] sm:$0xff] %v11264_v40  ;;  %v15268_v40 = vld [vmem:[#allocation58_spill] sm:$0xff] }
 0x451   : > { %7971 = vmatmul.msk.f32.gmra.mxu1 %vm1020_vm0, %v15265_v47  ;;  %v11286_v7 = vpop.f32.mrf.mxu0 }
 0x452   : > { %15269 = vst [vmem:[#allocation87_spill] sm:$0xff] %v11286_v7 }
 0x456   : > { %v11272_v18 = vpop.f32.mrf.mxu1  ;;  %8184 = vmatmul.msk.f32.gmra.mxu0 %vm1020_vm0, %v15266_v34 }
 0x459   : > { %7972 = vmatmul.msk.f32.gmra.mxu1 %vm1020_vm0, %v10521_v31  ;;  %v11294_v31 = vpop.f32.mrf.mxu0 }
 0x45a   : > { %15271 = vst [vmem:[#allocation56_spill] sm:$0xff] %v11294_v31  ;;  %v15277_v31 = vld [vmem:[#allocation4_spill] sm:$0xff] }
 0x45e   : > { %v11280_v26 = vpop.f32.mrf.mxu1  ;;  %8185 = vmatmul.msk.f32.gmra.mxu0 %vm1020_vm0, %v15268_v40  ;;  %v15273_v40 = vld [vmem:[#allocation65_spill] sm:$0xff] }
 0x461   : > { %7973 = vmatmul.msk.f32.gmra.mxu1 %vm1020_vm0, %v10543_v8  ;;  %v11306_v7 = vpop.f32.mrf.mxu0 }
 0x462   : > { %15274 = vst [vmem:[#allocation58_spill] sm:$0xff] %v11306_v7  ;;  %v15279_v7 = vld [vmem:[#allocation5_spill] sm:$0xff] }
 0x466   : > { %v11288_v47 = vpop.f32.mrf.mxu1  ;;  %8186 = vmatmul.msk.f32.gmra.mxu0 %vm1020_vm0, %v15270_v9  ;;  %v15275_v9 = vld [vmem:[#allocation3_spill] sm:$0xff] }
 0x469   : > { %7974 = vmatmul.msk.f32.gmra.mxu1 %vm1020_vm0, %v10564_v12 }
 0x46e   : > { %v11296_v34 = vpop.f32.mrf.mxu1  ;;  %8187 = vmatmul.msk.f32.gmra.mxu0 %vm1020_vm0, %v15272_v39  ;;  %v11316_v39 = vpop.f32.mrf.mxu0 }
 0x46f   : > { %15276 = vst [vmem:[#allocation60_spill] sm:$0xff] %v11316_v39  ;;  %v15286_v39 = vld [vmem:[#allocation9_spill] sm:$0xff] }
 0x471   : > { %7975 = vmatmul.msk.f32.gmra.mxu1 %vm1020_vm0, %v10586_v48 }
 0x476   : > { %v11302_v8 = vpop.f32.mrf.mxu1  ;;  %8188 = vmatmul.msk.f32.gmra.mxu0 %vm1020_vm0, %v15273_v40  ;;  %v11324_v40 = vpop.f32.mrf.mxu0 }
 0x477   : > { %15278 = vst [vmem:[#allocation62_spill] sm:$0xff] %v11324_v40 }
 0x479   : > { %7976 = vmatmul.msk.f32.gmra.mxu1 %vm1020_vm0, %v10603_v22 }
 0x47e   : > { %v11310_v12 = vpop.f32.mrf.mxu1  ;;  %8189 = vmatmul.msk.f32.gmra.mxu0 %vm1020_vm0, %v15275_v9  ;;  %v11335_v9 = vpop.f32.mrf.mxu0 }
 0x47f   : > { %15280 = vst [vmem:[#allocation65_spill] sm:$0xff] %v11335_v9  ;;  %v15284_v9 = vld [vmem:[#allocation8_spill] sm:$0xff] }
 0x481   : > { %7977 = vmatmul.msk.f32.gmra.mxu1 %vm1020_vm0, %v10620_v16  ;;  %v6242_v16 = vld [vmem:[%s14782_s11 + $0x10] sm:$0xff] }
 0x482   : > { %6357 = vmatpush.msra.mxu1 %v6242_v16 }
 0x486   : > { %v11318_v48 = vpop.f32.mrf.mxu1  ;;  %8190 = vmatmul.msk.f32.gmra.mxu0 %vm1020_vm0, %v15277_v31 }
 0x489   : > { %7978 = vmatmul.msk.f32.gmra.mxu1 %vm1020_vm0, %v10637_v58  ;;  %v15281_v58 = vld [vmem:[#allocation6_spill] sm:$0xff] }
 0x48e   : > { %v11326_v22 = vpop.f32.mrf.mxu1  ;;  %8191 = vmatmul.msk.f32.gmra.mxu0 %vm1020_vm0, %v15279_v7  ;;  %v15282_v7 = vld [vmem:[#allocation7_spill] sm:$0xff] }
 0x491   : > { %7979 = vmatmul.msk.f32.gmra.mxu1 %vm1020_vm0, %v10654_v2  ;;  %v11347_v2 = vpop.f32.mrf.mxu0 }
 0x492   : > { %15283 = vst [vmem:[#allocation3_spill] sm:$0xff] %v11347_v2  ;;  %v15288_v2 = vld [vmem:[#allocation10_spill] sm:$0xff] }
 0x496   : > { %v11337_v31 = vpop.f32.mrf.mxu1  ;;  %8192 = vmatmul.msk.f32.gmra.mxu0 %vm1020_vm0, %v15281_v58 }
 0x499   : > { %7980 = vmatmul.msk.f32.gmra.mxu1 %vm1020_vm0, %v10671_v30  ;;  %v11357_v58 = vpop.f32.mrf.mxu0 }
 0x49a   : > { %15285 = vst [vmem:[#allocation4_spill] sm:$0xff] %v11357_v58  ;;  %v15290_v58 = vld [vmem:[#allocation11_spill] sm:$0xff] }
 0x49e   : > { %v11343_v40 = vpop.f32.mrf.mxu1  ;;  %8193 = vmatmul.msk.f32.gmra.mxu0 %vm1020_vm0, %v15282_v7 }
 0x4a1   : > { %7981 = vmatmul.msk.f32.gmra.mxu1 %vm1020_vm0, %v10688_v15  ;;  %v11365_v7 = vpop.f32.mrf.mxu0 }
 0x4a2   : > { %15287 = vst [vmem:[#allocation5_spill] sm:$0xff] %v11365_v7 }
 0x4a6   : > { %v11351_v16 = vpop.f32.mrf.mxu1  ;;  %8194 = vmatmul.msk.f32.gmra.mxu0 %vm1020_vm0, %v15284_v9 }
 0x4a9   : > { %7982 = vmatmul.msk.f32.gmra.mxu1 %vm1020_vm0, %v10705_v63  ;;  %v11373_v63 = vpop.f32.mrf.mxu0 }
 0x4aa   : > { %15289 = vst [vmem:[#allocation6_spill] sm:$0xff] %v11373_v63  ;;  %v15297_v63 = vld [vmem:[#allocation14_spill] sm:$0xff] }
 0x4ae   : > { %v11359_v30 = vpop.f32.mrf.mxu1  ;;  %8195 = vmatmul.msk.f32.gmra.mxu0 %vm1020_vm0, %v15286_v39  ;;  %v15291_v39 = vld [vmem:[#allocation12_spill] sm:$0xff] }
 0x4b1   : > { %7983 = vmatmul.msk.f32.gmra.mxu1 %vm1020_vm0, %v10722_v5  ;;  %v11385_v7 = vpop.f32.mrf.mxu0 }
 0x4b2   : > { %15292 = vst [vmem:[#allocation7_spill] sm:$0xff] %v11385_v7  ;;  %v15300_v7 = vld [vmem:[#allocation15_spill] sm:$0xff] }
 0x4b6   : > { %v11367_v15 = vpop.f32.mrf.mxu1  ;;  %8196 = vmatmul.msk.f32.gmra.mxu0 %vm1020_vm0, %v15288_v2  ;;  %v15294_v2 = vld [vmem:[#allocation13_spill] sm:$0xff] }
 0x4b9   : > { %7984 = vmatmul.msk.f32.gmra.mxu1 %vm1020_vm0, %v10737_v4 }
 0x4be   : > { %v11375_v9 = vpop.f32.mrf.mxu1  ;;  %8197 = vmatmul.msk.f32.gmra.mxu0 %vm1020_vm0, %v15290_v58  ;;  %v11395_v58 = vpop.f32.mrf.mxu0 }
 0x4bf   : > { %15295 = vst [vmem:[#allocation9_spill] sm:$0xff] %v11395_v58  ;;  %v15303_v58 = vld [vmem:[#allocation16_spill] sm:$0xff] }
 0x4c1   : > { %7985 = vmatmul.msk.f32.gmra.mxu1 %vm1020_vm0, %v10750_v57 }
 0x4c6   : > { %v11381_v5 = vpop.f32.mrf.mxu1  ;;  %8198 = vmatmul.msk.f32.gmra.mxu0 %vm1020_vm0, %v15291_v39  ;;  %v11403_v39 = vpop.f32.mrf.mxu0 }
 0x4c7   : > { %15298 = vst [vmem:[#allocation11_spill] sm:$0xff] %v11403_v39  ;;  %v11423_v39 = vpop.f32.mrf.mxu2 }
 0x4c9   : > { %7986 = vmatmul.msk.f32.gmra.mxu1 %vm1020_vm0, %v10765_v42 }
 0x4ce   : > { %v11389_v4 = vpop.f32.mrf.mxu1  ;;  %8199 = vmatmul.msk.f32.gmra.mxu0 %vm1020_vm0, %v15294_v2 }
 0x4cf   : > { %15293 = vst [vmem:[#allocation8_spill] sm:$0xff] %v11389_v4 }
 0x4d1   : > { %7987 = vmatmul.msk.f32.gmra.mxu1 %vm1020_vm0, %v10784_v45  ;;  %v11411_v45 = vpop.f32.mrf.mxu0 }
 0x4d2   : > { %15301 = vst [vmem:[#allocation13_spill] sm:$0xff] %v11411_v45  ;;  %v15308_v45 = vld [vmem:[#allocation19_spill] sm:$0xff] }
 0x4d6   : > { %v11397_v57 = vpop.f32.mrf.mxu1  ;;  %8200 = vmatmul.msk.f32.gmra.mxu0 %vm1020_vm0, %v15297_v63  ;;  %v15305_v63 = vld [vmem:[#allocation17_spill] sm:$0xff] }
 0x4d7   : > { %15296 = vst [vmem:[#allocation10_spill] sm:$0xff] %v11397_v57 }
 0x4d9   : > { %7988 = vmatmul.msk.f32.gmra.mxu1 %vm1020_vm0, %v10799_v0 }
 0x4de   : > { %v11405_v42 = vpop.f32.mrf.mxu1  ;;  %8201 = vmatmul.msk.f32.gmra.mxu0 %vm1020_vm0, %v15300_v7  ;;  %v11425_v7 = vpop.f32.mrf.mxu0 }
 0x4df   : > { %15299 = vst [vmem:[#allocation12_spill] sm:$0xff] %v11405_v42 }
 0x4e0   : > { %15306 = vst [vmem:[#allocation16_spill] sm:$0xff] %v11425_v7 }
 0x4e1   : > { %7989 = vmatmul.msk.f32.gmra.mxu1 %vm1020_vm0, %v10814_v43 }
 0x4e6   : > { %v11413_v2 = vpop.f32.mrf.mxu1  ;;  %8202 = vmatmul.msk.f32.gmra.mxu0 %vm1020_vm0, %v15303_v58  ;;  %v11433_v58 = vpop.f32.mrf.mxu2 }
 0x4e7   : > { %15302 = vst [vmem:[#allocation14_spill] sm:$0xff] %v11413_v2 }
 0x4e9   : > { %7990 = vmatmul.msk.f32.gmra.mxu1 %vm1020_vm0, %v10827_v46  ;;  %v11437_v46 = vpop.f32.mrf.mxu0 }
 0x4ea   : > { %15309 = vst [vmem:[#allocation19_spill] sm:$0xff] %v11437_v46 }
 0x4ee   : > { %v11419_v0 = vpop.f32.mrf.mxu1  ;;  %8203 = vmatmul.msk.f32.gmra.mxu0 %vm1020_vm0, %v15305_v63 }
 0x4ef   : > { %15304 = vst [vmem:[#allocation15_spill] sm:$0xff] %v11419_v0  ;;  %v15311_v0 = vld [vmem:[#allocation21_spill] sm:$0xff] }
 0x4f1   : > { %7991 = vmatmul.msk.f32.gmra.mxu1 %vm1020_vm0, %v10840_v36  ;;  %v11445_v36 = vpop.f32.mrf.mxu2  ;;  %v11447_v7 = vpop.f32.mrf.mxu0 }
 0x4f2   : > { %15312 = vst [vmem:[#allocation21_spill] sm:$0xff] %v11447_v7 }
 0x4f6   : > { %v11429_v43 = vpop.f32.mrf.mxu1  ;;  %8204 = vmatmul.msk.f32.gmra.mxu0 %vm1020_vm0, %v15308_v45 }
 0x4f7   : > { %15307 = vst [vmem:[#allocation17_spill] sm:$0xff] %v11429_v43  ;;  %v15314_v43 = vld [vmem:[#allocation23_spill] sm:$0xff] }
 0x4f9   : > { %7992 = vmatmul.msk.f32.gmra.mxu1 %vm1020_vm0, %v10855_v56  ;;  %v11453_v56 = vpop.f32.mrf.mxu3  ;;  %v11457_v46 = vpop.f32.mrf.mxu2 }
 0x4fe   : > { %v11439_v63 = vpop.f32.mrf.mxu1  ;;  %8205 = vmatmul.msk.f32.gmra.mxu0 %vm1020_vm0, %v15311_v0  ;;  %v11459_v0 = vpop.f32.mrf.mxu0 }
 0x4ff   : > { %15310 = vst [vmem:[#allocation209_spill] sm:$0xff] %v11439_v63 }
 0x500   : > { %15315 = vst [vmem:[#allocation23_spill] sm:$0xff] %v11459_v0 }
 0x501   : > { %7993 = vmatmul.msk.f32.gmra.mxu1 %vm1020_vm0, %v10870_v60  ;;  %v15317_v60 = vld [vmem:[#allocation25_spill] sm:$0xff]  ;;  %v11467_v7 = vpop.f32.mrf.mxu3 }
 0x506   : > { %v11449_v45 = vpop.f32.mrf.mxu1  ;;  %8206 = vmatmul.msk.f32.gmra.mxu0 %vm1020_vm0, %v15314_v43  ;;  %v11475_v2 = vpop.f32.mrf.mxu0 }
 0x507   : > { %15313 = vst [vmem:[#allocation210_spill] sm:$0xff] %v11449_v45  ;;  %v15319_v45 = vld [vmem:[#allocation27_spill] sm:$0xff] }
 0x508   : > { %15320 = vst [vmem:[#allocation27_spill] sm:$0xff] %v11475_v2  ;;  %v15325_v2 = vld [vmem:[#allocation33_spill] sm:$0xff] }
 0x509   : > { %7994 = vmatmul.msk.f32.gmra.mxu1 %vm1020_vm0, %v10885_v55  ;;  %v11473_v55 = vpop.f32.mrf.mxu2  ;;  %v11479_v0 = vpop.f32.mrf.mxu3 }
 0x50e   : > { %v11461_v63 = vpop.f32.mrf.mxu1  ;;  %8207 = vmatmul.msk.f32.gmra.mxu0 %vm1020_vm0, %v15317_v60 }
 0x50f   : > { %15316 = vst [vmem:[#allocation211_spill] sm:$0xff] %v11461_v63  ;;  %v15322_v63 = vld [vmem:[#allocation30_spill] sm:$0xff] }
 0x511   : > { %7995 = vmatmul.msk.f32.gmra.mxu1 %vm1020_vm0, %v10898_v61  ;;  %v11485_v61 = vpop.f32.mrf.mxu2 }
 0x516   : > { %v11469_v43 = vpop.f32.mrf.mxu1  ;;  %8208 = vmatmul.msk.f32.gmra.mxu0 %vm1020_vm0, %v15319_v45  ;;  %v11489_v45 = vpop.f32.mrf.mxu0 }
 0x517   : > { %15318 = vst [vmem:[#allocation25_spill] sm:$0xff] %v11469_v43 }
 0x518   : > { %15323 = vst [vmem:[#allocation30_spill] sm:$0xff] %v11489_v45 }
 0x519   : > { %7996 = vmatmul.msk.f32.gmra.mxu1 %vm1020_vm0, %v10913_v32  ;;  %v11495_v32 = vpop.f32.mrf.mxu3 }
 0x51e   : > { %v11481_v60 = vpop.f32.mrf.mxu1  ;;  %8209 = vmatmul.msk.f32.gmra.mxu0 %vm1020_vm0, %v15322_v63  ;;  %v11501_v63 = vpop.f32.mrf.mxu0 }
 0x51f   : > { %15321 = vst [vmem:[#allocation212_spill] sm:$0xff] %v11481_v60  ;;  %v11499_v60 = vpop.f32.mrf.mxu2 }
 0x520   : > { %15326 = vst [vmem:[#allocation33_spill] sm:$0xff] %v11501_v63 }
 0x521   : > { %7997 = vmatmul.msk.f32.gmra.mxu1 %vm1020_vm0, %v10928_v41  ;;  %v11507_v41 = vpop.f32.mrf.mxu3 }
 0x526   : > { %v11491_v43 = vpop.f32.mrf.mxu1  ;;  %8210 = vmatmul.msk.f32.gmra.mxu0 %vm1020_vm0, %v15325_v2  ;;  %v11513_v45 = vpop.f32.mrf.mxu0 }
 0x527   : > { %15324 = vst [vmem:[#allocation213_spill] sm:$0xff] %v11491_v43  ;;  %v11511_v2 = vpop.f32.mrf.mxu2 }
 0x528   : > { %15329 = vst [vmem:[#allocation35_spill] sm:$0xff] %v11513_v45 }
 0x529   : > { %7998 = vmatmul.msk.f32.gmra.mxu1 %vm1020_vm0, %v10943_v44  ;;  %v15331_v44 = vld [vmem:[#allocation38_spill] sm:$0xff]  ;;  %v11521_v63 = vpop.f32.mrf.mxu3 }
 0x52e   : > { %v11503_v42 = vpop.f32.mrf.mxu1  ;;  %8211 = vmatmul.msk.f32.gmra.mxu0 %vm1020_vm0, %v15328_v62 }
 0x52f   : > { %15327 = vst [vmem:[#allocation214_spill] sm:$0xff] %v11503_v42  ;;  %v11525_v42 = vpop.f32.mrf.mxu2 }
 0x531   : > { %7999 = vmatmul.msk.f32.gmra.mxu1 %vm1020_vm0, %v10958_v6  ;;  %v11529_v6 = vpop.f32.mrf.mxu3 }
 0x536   : > { %v11515_v43 = vpop.f32.mrf.mxu1  ;;  %8212 = vmatmul.msk.f32.gmra.mxu0 %vm1020_vm0, %v15331_v44 }
 0x537   : > { %15330 = vst [vmem:[#allocation215_spill] sm:$0xff] %v11515_v43  ;;  %v11535_v44 = vpop.f32.mrf.mxu2 }
 0x538   : > { %15334 = vst [vmem:[#allocation217_spill] sm:$0xff] %v11535_v44  ;;  %v3331_v44 = vmul.f32 %v11272_v18, %v11128_v20 }
 0x539   : > { %8000 = vmatmul.msk.f32.gmra.mxu1 %vm1020_vm0, %v10971_v28  ;;  %v11539_v28 = vpop.f32.mrf.mxu3 }
 0x53a   : > { %15336 = vst [vmem:[#allocation219_spill] sm:$0xff] %v11539_v28 }
 0x53e   : > { %v11523_v62 = vpop.f32.mrf.mxu1 }
 0x53f   : > { %15332 = vst [vmem:[#allocation38_spill] sm:$0xff] %v11523_v62  ;;  %v11543_v62 = vpop.f32.mrf.mxu2 }
 0x540   : > { %15337 = vst [vmem:[#allocation220_spill] sm:$0xff] %v11543_v62 }
 0x541   : > { %8001 = vmatmul.msk.f32.gmra.mxu1 %vm1020_vm0, %v10986_v33  ;;  %v3491_v33 = vmul.f32 %v11272_v18, %v15338_v38 }
 0x546   : > { %v11531_v45 = vpop.f32.mrf.mxu1 }
 0x547   : > { %15333 = vst [vmem:[#allocation216_spill] sm:$0xff] %v11531_v45  ;;  %v3523_v45 = vmul.f32 %v10844_v50, %v10534_v54 }
 0x549   : > { %8002 = vmatmul.msk.f32.gmra.mxu1 %vm1020_vm0, %v11001_v52  ;;  %v3395_v52 = vmul.f32 %v10844_v50, %v11128_v20  ;;  %v11557_v62 = vsub.f32 %v3491_v33, %v3523_v45  ;;  %v6241_v50 = vld [vmem:[%s14782_s11 + $0x8] sm:$0xff]  ;;  %v3396_v45 = vmul.f32 %v10859_v29, %v11145_v11  ;;  %v3332_v33 = vmul.f32 %v11280_v26, %v11145_v11 }
 0x54a   : > { %6358 = vmatpush.msra.mxu1 %v6241_v50 }
 0x54b   : > { %15339 = vst [vmem:[#allocation41_spill] sm:$0xff] %v11557_v62 }
 0x54e   : > { %v11537_v43 = vpop.f32.mrf.mxu1 }
 0x54f   : > { %15335 = vst [vmem:[#allocation218_spill] sm:$0xff] %v11537_v43 }
 0x551   : > { %8003 = vmatmul.msk.f32.gmra.mxu1 %vm1020_vm0, %v11016_v51  ;;  %v11555_v51 = vpop.f32.mrf.mxu3 }
 0x556   : > { %v3203_v37 = vpop.f32.mrf.mxu1 }
 0x557   : > { %v3299_v43 = vmul.f32 %v3203_v37, %v10534_v54  ;;  %v3427_v57 = vmul.f32 %v3203_v37, %v15338_v38  ;;  %v4875_v37 = vmul.f32 %v11557_v62, %v11557_v62  ;;  %v15341_v38 = vld [vmem:[#allocation43_spill] sm:$0xff] }
 0x558   : > { %v3492_v18 = vmul.f32 %v11280_v26, %v15341_v38  ;;  %v15345_v26 = vld [vmem:[#allocation45_spill] sm:$0xff] }
 0x559   : > { %v3363_v4 = vsub.f32 %v3299_v43, %v3331_v44  ;;  %v11559_v28 = vsub.f32 %v3395_v52, %v3427_v57  ;;  %8004 = vmatmul.msk.f32.gmra.mxu1 %vm1020_vm0, %v11031_v19  ;;  %v11573_v43 = vpop.f32.mrf.mxu2  ;;  %v3524_v19 = vmul.f32 %v10859_v29, %v10556_v17  ;;  %v11591_v29 = vpop.f32.mrf.mxu3 }
 0x55a   : > { %15342 = vst [vmem:[#allocation43_spill] sm:$0xff] %v11573_v43 }
 0x55b   : > { %15340 = vst [vmem:[#allocation221_spill] sm:$0xff] %v11559_v28  ;;  %v4779_v20 = vmul.f32 %v3363_v4, %v3363_v4  ;;  %v4811_v54 = vmul.f32 %v11559_v28, %v11559_v28  ;;  %8021 = vmatmul.msk.f32.vlgmr.msrb.gmra.mxu2 %vm3588_vm10, %v3363_v4  ;;  %v11583_v62 = vsub.f32 %v3492_v18, %v3524_v19 }
 0x55c   : > { %v3397_v18 = vmul.f32 %v10874_v49, %v11160_v59  ;;  %v3333_v19 = vmul.f32 %v11288_v47, %v11160_v59 }
 0x55d   : > { %v4843_v57 = vadd.f32 %v4811_v54, %v4779_v20  ;;  %15343 = vst [vmem:[#allocation222_spill] sm:$0xff] %v11583_v62 }
 0x55e   : > { %v3206_v44 = vpop.f32.mrf.mxu1 }
 0x55f   : > { %v4907_v4 = vadd.f32 %v4875_v37, %v4843_v57  ;;  %v3300_v52 = vmul.f32 %v3206_v44, %v10556_v17  ;;  %v3428_v50 = vmul.f32 %v3206_v44, %v15341_v38  ;;  %v4876_v17 = vmul.f32 %v11583_v62, %v11583_v62 }
 0x560   : > { %v3493_v37 = vmul.f32 %v11288_v47, %v15345_v26  ;;  %v15349_v47 = vld [vmem:[#allocation46_spill] sm:$0xff] }
 0x561   : > { %v11585_v20 = vmax.f32 %v4907_v4, 1e-08  ;;  %v3364_v54 = vsub.f32 %v3300_v52, %v3332_v33  ;;  %v11587_v43 = vsub.f32 %v3396_v45, %v3428_v50  ;;  %8005 = vmatmul.msk.f32.gmra.mxu1 %vm1020_vm0, %v11044_v10  ;;  %v3525_v10 = vmul.f32 %v10874_v49, %v10577_v27  ;;  %v11609_v4 = vpop.f32.mrf.mxu2 }
 0x562   : > { %15346 = vst [vmem:[#allocation45_spill] sm:$0xff] %v11609_v4 }
 0x563   : > { %15344 = vst [vmem:[#allocation223_spill] sm:$0xff] %v11587_v43  ;;  %v4780_v28 = vmul.f32 %v3364_v54, %v3364_v54  ;;  %v4812_v11 = vmul.f32 %v11587_v43, %v11587_v43  ;;  %8022 = vmatmul.msk.f32.gmra.mxu2 %vm3588_vm10, %v3364_v54  ;;  %8445 = vrsqrt.f32 %v11585_v20  ;;  %v11611_v50 = vsub.f32 %v3493_v37, %v3525_v10  ;;  %v11626_v37 = vpop.f32.mrf.mxu3 }
 0x564   : > { %v3526_v10 = vmul.f32 %v10889_v13, %v10594_v23  ;;  %vm4978_vm11 = vcmp.eq.f32.partialorder %v11585_v20, inf  ;;  %vm4980_vm12 = vcmp.eq.f32.partialorder %v11585_v20, 0.0 }
 0x565   : > { %v4844_v38 = vadd.f32 %v4812_v11, %v4780_v28  ;;  %15347 = vst [vmem:[#allocation224_spill] sm:$0xff] %v11611_v50 }
 0x566   : > { %v3209_v57 = vpop.f32.mrf.mxu1 }
 0x567   : > { %v4908_v45 = vadd.f32 %v4876_v17, %v4844_v38  ;;  %v3301_v44 = vmul.f32 %v3209_v57, %v10577_v27  ;;  %v3429_v33 = vmul.f32 %v3209_v57, %v15345_v26  ;;  %v3494_v17 = vmul.f32 %v11296_v34, %v15349_v47 }
 0x568   : > { %v4877_v38 = vmul.f32 %v11611_v50, %v11611_v50 }
 0x569   : > { %v8446_v52 = vpop.eup %8445  ;;  %v11613_v28 = vmax.f32 %v4908_v45, 1e-08  ;;  %v3365_v54 = vsub.f32 %v3301_v44, %v3333_v19  ;;  %v11615_v11 = vsub.f32 %v3397_v18, %v3429_v33  ;;  %8006 = vmatmul.msk.f32.gmra.mxu1 %vm1020_vm0, %v11059_v14  ;;  %v3398_v18 = vmul.f32 %v10889_v13, %v11175_v1  ;;  %v11646_v13 = vpop.f32.mrf.mxu2 }
 0x56a   : > { %v4972_v49 = vmul.f32 %v8446_v52, %v11585_v20  ;;  %v3334_v45 = vmul.f32 %v11296_v34, %v11175_v1  ;;  %15352 = vst [vmem:[#allocation227_spill] sm:$0xff] %v11646_v13 }
 0x56b   : > { %15348 = vst [vmem:[#allocation225_spill] sm:$0xff] %v11615_v11  ;;  %v4781_v59 = vmul.f32 %v3365_v54, %v3365_v54  ;;  %v4813_v27 = vmul.f32 %v11615_v11, %v11615_v11  ;;  %8023 = vmatmul.msk.f32.gmra.mxu2 %vm3588_vm10, %v3365_v54  ;;  %8447 = vrsqrt.f32 %v11613_v28  ;;  %vm4990_vm13 = vcmp.eq.f32.partialorder %v11613_v28, inf }
 0x56c   : > { %v4973_v26 = vmul.f32 %v8446_v52, %v4972_v49  ;;  %v11638_v49 = vsub.f32 %v3494_v17, %v3526_v10  ;;  %vm4992_vm14 = vcmp.eq.f32.partialorder %v11613_v28, 0.0 }
 0x56d   : > { %v4845_v14 = vadd.f32 %v4813_v27, %v4781_v59 }
 0x56e   : > { %v3212_v57 = vpop.f32.mrf.mxu1  ;;  %v4974_v19 = vmul.f32 0.5, %v4973_v26  ;;  %15350 = vst [vmem:[#allocation46_spill] sm:$0xff] %v11638_v49 }
 0x56f   : > { %v4909_v44 = vadd.f32 %v4877_v38, %v4845_v14  ;;  %v3302_v33 = vmul.f32 %v3212_v57, %v10594_v23  ;;  %v3430_v54 = vmul.f32 %v3212_v57, %v15349_v47  ;;  %v15353_v23 = vld [vmem:[#allocation145_spill] sm:$0xff]  ;;  %v15354_v14 = vld [vmem:[#allocation47_spill] sm:$0xff]  ;;  %v4981_v57 = vand.u32 2147483648, %v11585_v20 }
 0x570   : > { %v4975_v50 = vsub.f32 1.5, %v4974_v19  ;;  %v3527_v47 = vmul.f32 %v15353_v23, %v10611_v25  ;;  %v3399_v38 = vmul.f32 %v15353_v23, %v11196_v24  ;;  %v3495_v10 = vmul.f32 %v11302_v8, %v15354_v14 }
 0x571   : > { %v8448_v59 = vpop.eup %8447  ;;  %v11640_v27 = vmax.f32 %v4909_v44, 1e-08  ;;  %v3366_v62 = vsub.f32 %v3302_v33, %v3334_v45  ;;  %v11642_v4 = vsub.f32 %v3398_v18, %v3430_v54  ;;  %8007 = vmatmul.msk.f32.gmra.mxu1 %vm1020_vm0, %v11077_v53  ;;  %v4878_v53 = vmul.f32 %v11638_v49, %v11638_v49  ;;  %v11668_v33 = vpop.f32.mrf.mxu3 }
 0x572   : > { %v4976_v1 = vmul.f32 %v8446_v52, %v4975_v50  ;;  %v4984_v34 = vmul.f32 %v8448_v59, %v11613_v28  ;;  %v11673_v49 = vsub.f32 %v3495_v10, %v3527_v47  ;;  %v11688_v47 = vpop.f32.mrf.mxu2  ;;  %v15361_v10 = vld [vmem:[#allocation48_spill] sm:$0xff] }
 0x573   : > { %15351 = vst [vmem:[#allocation226_spill] sm:$0xff] %v11642_v4  ;;  %v4782_v17 = vmul.f32 %v3366_v62, %v3366_v62  ;;  %v4814_v26 = vmul.f32 %v11642_v4, %v11642_v4  ;;  %8024 = vmatmul.msk.f32.gmra.mxu2 %vm3588_vm10, %v3366_v62  ;;  %8449 = vrsqrt.f32 %v11640_v27  ;;  %v3335_v62 = vmul.f32 %v11302_v8, %v11196_v24 }
 0x574   : > { %v4977_v52 = vmul.f32 %v4976_v1, %v11585_v20  ;;  %v4985_v50 = vmul.f32 %v8448_v59, %v4984_v34  ;;  %15355 = vst [vmem:[#allocation145_spill] sm:$0xff] %v11673_v49  ;;  %vm5002_vm15 = vcmp.eq.f32.partialorder %v11640_v27, inf  ;;  %vm5004_vm1 = vcmp.eq.f32.partialorder %v11640_v27, 0.0 }
 0x575   : > { %v4846_v18 = vadd.f32 %v4814_v26, %v4782_v17 }
 0x576   : > { %v3215_v19 = vpop.f32.mrf.mxu1  ;;  %v4979_v45 = vsel %vm4978_vm11, %v11585_v20, %v4977_v52  ;;  %v4986_v44 = vmul.f32 0.5, %v4985_v50  ;;  %v15357_v20 = vld [vmem:[#allocation182_spill] sm:$0xff] }
 0x577   : > { %v4910_v54 = vadd.f32 %v4878_v53, %v4846_v18  ;;  %v3303_v1 = vmul.f32 %v3215_v19, %v10611_v25  ;;  %v3431_v34 = vmul.f32 %v3215_v19, %v15354_v14  ;;  %v4982_v23 = vsel %vm4980_vm12, %v4981_v57, %v4979_v45  ;;  %v15358_v50 = vld [vmem:[#allocation102_spill] sm:$0xff]  ;;  %v15359_v14 = vld [vmem:[#allocation148_spill] sm:$0xff]  ;;  %15360 = vst [vmem:[#allocation182_spill] sm:$0xff] %v11688_v47 }
 0x578   : > { %8214 = vmatmul.msk.f32.vlgmr.msra.gmra.mxu3 %vm3588_vm10, %v4982_v23  ;;  %v4987_v17 = vsub.f32 1.5, %v4986_v44  ;;  %v3528_v18 = vmul.f32 %v15359_v14, %v15358_v50  ;;  %v4879_v44 = vmul.f32 %v11673_v49, %v11673_v49 }
 0x579   : > { %v8450_v26 = vpop.eup %8449  ;;  %v11675_v24 = vmax.f32 %v4910_v54, 1e-08  ;;  %v3367_v8 = vsub.f32 %v3303_v1, %v3335_v62  ;;  %v11677_v52 = vsub.f32 %v3399_v38, %v3431_v34  ;;  %8008 = vmatmul.msk.f32.gmra.mxu1 %vm1020_vm0, %v15357_v20  ;;  %v3400_v38 = vmul.f32 %v15359_v14, %v11210_v21  ;;  %v11708_v47 = vpop.f32.mrf.mxu3 }
 0x57a   : > { %v4988_v53 = vmul.f32 %v8448_v59, %v4987_v17  ;;  %v4996_v25 = vmul.f32 %v8450_v26, %v11640_v27  ;;  %v3496_v59 = vmul.f32 %v11310_v12, %v15361_v10  ;;  %v4993_v1 = vand.u32 2147483648, %v11613_v28 }
 0x57b   : > { %15356 = vst [vmem:[#allocation47_spill] sm:$0xff] %v11677_v52  ;;  %v4783_v57 = vmul.f32 %v3367_v8, %v3367_v8  ;;  %v4815_v19 = vmul.f32 %v11677_v52, %v11677_v52  ;;  %8025 = vmatmul.msk.f32.gmra.mxu2 %vm3588_vm10, %v3367_v8  ;;  %8451 = vrsqrt.f32 %v11675_v24  ;;  %v3336_v34 = vmul.f32 %v11310_v12, %v11210_v21  ;;  %v15466_v52 = vld [vmem:[#allocation187_spill] sm:$0xff] }
 0x57c   : > { %v4989_v62 = vmul.f32 %v4988_v53, %v11613_v28  ;;  %v4997_v45 = vmul.f32 %v8450_v26, %v4996_v25  ;;  %vm5014_vm2 = vcmp.eq.f32.partialorder %v11675_v24, inf  ;;  %vm5016_vm4 = vcmp.eq.f32.partialorder %v11675_v24, 0.0 }
 0x57d   : > { %v4847_v54 = vadd.f32 %v4815_v19, %v4783_v57  ;;  %v11705_v57 = vsub.f32 %v3496_v59, %v3528_v18  ;;  %v15366_v18 = vld [vmem:[#allocation151_spill] sm:$0xff] }
 0x57e   : > { %v3218_v23 = vpop.f32.mrf.mxu1  ;;  %v4991_v17 = vsel %vm4990_vm13, %v11613_v28, %v4989_v62  ;;  %v4998_v8 = vmul.f32 0.5, %v4997_v45  ;;  %v15364_v28 = vld [vmem:[#allocation186_spill] sm:$0xff]  ;;  %v15365_v45 = vld [vmem:[#allocation105_spill] sm:$0xff] }
 0x57f   : > { %v4911_v20 = vadd.f32 %v4879_v44, %v4847_v54  ;;  %v3304_v53 = vmul.f32 %v3218_v23, %v15358_v50  ;;  %v3432_v25 = vmul.f32 %v3218_v23, %v15361_v10  ;;  %v4994_v14 = vsel %vm4992_vm14, %v4993_v1, %v4991_v17  ;;  %15362 = vst [vmem:[#allocation102_spill] sm:$0xff] %v11705_v57  ;;  %v15367_v23 = vld [vmem:[#allocation50_spill] sm:$0xff] }
 0x580   : > { %8215 = vmatmul.msk.f32.gmra.mxu3 %vm3588_vm10, %v4994_v14  ;;  %v4999_v19 = vsub.f32 1.5, %v4998_v8  ;;  %v3529_v59 = vmul.f32 %v15366_v18, %v15365_v45  ;;  %v4880_v1 = vmul.f32 %v11705_v57, %v11705_v57  ;;  %v3497_v17 = vmul.f32 %v11318_v48, %v15367_v23 }
 0x581   : > { %v8452_v49 = vpop.eup %8451  ;;  %v11710_v21 = vmax.f32 %v4911_v20, 1e-08  ;;  %v3368_v12 = vsub.f32 %v3304_v53, %v3336_v34  ;;  %v11712_v62 = vsub.f32 %v3400_v38, %v3432_v25  ;;  %8009 = vmatmul.msk.f32.gmra.mxu1 %vm1020_vm0, %v15364_v28  ;;  %v3401_v38 = vmul.f32 %v15366_v18, %v11222_v35  ;;  %v11732_v53 = vpop.f32.mrf.mxu2 }
 0x582   : > { %v5000_v50 = vmul.f32 %v8450_v26, %v4999_v19  ;;  %v5008_v10 = vmul.f32 %v8452_v49, %v11675_v24  ;;  %v5005_v20 = vand.u32 2147483648, %v11640_v27  ;;  %15368 = vst [vmem:[#allocation48_spill] sm:$0xff] %v11732_v53  ;;  %v3337_v25 = vmul.f32 %v11318_v48, %v11222_v35 }
 0x583   : > { %15363 = vst [vmem:[#allocation148_spill] sm:$0xff] %v11712_v62  ;;  %v4784_v44 = vmul.f32 %v3368_v12, %v3368_v12  ;;  %v4816_v54 = vmul.f32 %v11712_v62, %v11712_v62  ;;  %8026 = vmatmul.msk.f32.gmra.mxu2 %vm3588_vm10, %v3368_v12  ;;  %8453 = vrsqrt.f32 %v11710_v21  ;;  %v11741_v57 = vsub.f32 %v3497_v17, %v3529_v59  ;;  %v15374_v17 = vld [vmem:[#allocation52_spill] sm:$0xff] }
 0x584   : > { %v5001_v26 = vmul.f32 %v5000_v50, %v11640_v27  ;;  %v5009_v34 = vmul.f32 %v8452_v49, %v5008_v10  ;;  %vm5026_vm5 = vcmp.eq.f32.partialorder %v11710_v21, inf  ;;  %vm5028_vm6 = vcmp.eq.f32.partialorder %v11710_v21, 0.0 }
 0x585   : > { %v4848_v8 = vadd.f32 %v4816_v54, %v4784_v44  ;;  %15369 = vst [vmem:[#allocation186_spill] sm:$0xff] %v11741_v57 }
 0x586   : > { %v3221_v14 = vpop.f32.mrf.mxu1  ;;  %v5003_v19 = vsel %vm5002_vm15, %v11640_v27, %v5001_v26  ;;  %v5010_v12 = vmul.f32 0.5, %v5009_v34  ;;  %v15371_v26 = vld [vmem:[#allocation189_spill] sm:$0xff]  ;;  %v15373_v34 = vld [vmem:[#allocation154_spill] sm:$0xff] }
 0x587   : > { %v4912_v28 = vadd.f32 %v4880_v1, %v4848_v8  ;;  %v3305_v50 = vmul.f32 %v3221_v14, %v15365_v45  ;;  %v3433_v10 = vmul.f32 %v3221_v14, %v15367_v23  ;;  %v5006_v18 = vsel %vm5004_vm1, %v5005_v20, %v5003_v19  ;;  %v15372_v1 = vld [vmem:[#allocation108_spill] sm:$0xff]  ;;  %v11752_v8 = vpop.f32.mrf.mxu3 }
 0x588   : > { %8216 = vmatmul.msk.f32.gmra.mxu3 %vm3588_vm10, %v5006_v18  ;;  %v5011_v44 = vsub.f32 1.5, %v5010_v12  ;;  %v3530_v23 = vmul.f32 %v15373_v34, %v15372_v1  ;;  %v4881_v19 = vmul.f32 %v11741_v57, %v11741_v57 }
 0x589   : > { %v8454_v54 = vpop.eup %8453  ;;  %v11743_v53 = vmax.f32 %v4912_v28, 1e-08  ;;  %v3369_v35 = vsub.f32 %v3305_v50, %v3337_v25  ;;  %v11745_v48 = vsub.f32 %v3401_v38, %v3433_v10  ;;  %8010 = vmatmul.msk.f32.gmra.mxu1 %vm1020_vm0, %v15371_v26  ;;  %v3402_v38 = vmul.f32 %v15373_v34, %v11234_v3  ;;  %v11773_v34 = vpop.f32.mrf.mxu2 }
 0x58a   : > { %v5012_v27 = vmul.f32 %v8452_v49, %v5011_v44  ;;  %v5020_v45 = vmul.f32 %v8454_v54, %v11710_v21  ;;  %v3498_v49 = vmul.f32 %v11326_v22, %v15374_v17  ;;  %v5017_v28 = vand.u32 2147483648, %v11675_v24  ;;  %15375 = vst [vmem:[#allocation151_spill] sm:$0xff] %v11773_v34 }
 0x58b   : > { %15370 = vst [vmem:[#allocation105_spill] sm:$0xff] %v11745_v48  ;;  %v4785_v20 = vmul.f32 %v3369_v35, %v3369_v35  ;;  %v4817_v59 = vmul.f32 %v11745_v48, %v11745_v48  ;;  %8027 = vmatmul.msk.f32.gmra.mxu2 %vm3588_vm10, %v3369_v35  ;;  %8455 = vrsqrt.f32 %v11743_v53  ;;  %v3338_v50 = vmul.f32 %v11326_v22, %v11234_v3  ;;  %v15427_v48 = vld [vmem:[#allocation104_spill] sm:$0xff] }
 0x58c   : > { %v5013_v25 = vmul.f32 %v5012_v27, %v11675_v24  ;;  %v5021_v14 = vmul.f32 %v8454_v54, %v5020_v45  ;;  %vm5038_vm7 = vcmp.eq.f32.partialorder %v11743_v53, inf  ;;  %vm5040_vm8 = vcmp.eq.f32.partialorder %v11743_v53, 0.0 }
 0x58d   : > { %v4849_v12 = vadd.f32 %v4817_v59, %v4785_v20  ;;  %v11775_v20 = vsub.f32 %v3498_v49, %v3530_v23  ;;  %v2587_v62 = vadd.f32 %v11457_v46, %v15427_v48  ;;  %v15432_v46 = vld [vmem:[#allocation107_spill] sm:$0xff] }
 0x58e   : > { %v3224_v10 = vpop.f32.mrf.mxu1  ;;  %v5015_v18 = vsel %vm5014_vm2, %v11675_v24, %v5013_v25  ;;  %v5022_v44 = vmul.f32 0.5, %v5021_v14  ;;  %v15378_v24 = vld [vmem:[#allocation192_spill] sm:$0xff]  ;;  %v15379_v14 = vld [vmem:[#allocation39_spill] sm:$0xff]  ;;  %v2590_v48 = vadd.f32 %v11473_v55, %v15432_v46 }
 0x58f   : > { %v4913_v35 = vadd.f32 %v4881_v19, %v4849_v12  ;;  %v3306_v26 = vmul.f32 %v3224_v10, %v15372_v1  ;;  %v3434_v27 = vmul.f32 %v3224_v10, %v15374_v17  ;;  %v5018_v45 = vsel %vm5016_vm4, %v5017_v28, %v5015_v18  ;;  %15376 = vst [vmem:[#allocation50_spill] sm:$0xff] %v11775_v20  ;;  %v15380_v19 = vld [vmem:[#allocation157_spill] sm:$0xff]  ;;  %v11796_v10 = vpop.f32.mrf.mxu3  ;;  %v15381_v18 = vld [vmem:[#allocation54_spill] sm:$0xff] }
 0x590   : > { %8217 = vmatmul.msk.f32.gmra.mxu3 %vm3588_vm10, %v5018_v45  ;;  %v5023_v59 = vsub.f32 1.5, %v5022_v44  ;;  %v3531_v12 = vmul.f32 %v15380_v19, %v15379_v14  ;;  %v4882_v28 = vmul.f32 %v11775_v20, %v11775_v20  ;;  %v3499_v44 = vmul.f32 %v11337_v31, %v15381_v18 }
 0x591   : > { %v8456_v3 = vpop.eup %8455  ;;  %v11778_v22 = vmax.f32 %v4913_v35, 1e-08  ;;  %v3370_v25 = vsub.f32 %v3306_v26, %v3338_v50  ;;  %v11780_v57 = vsub.f32 %v3402_v38, %v3434_v27  ;;  %8011 = vmatmul.msk.f32.gmra.mxu1 %vm1020_vm0, %v15378_v24  ;;  %v3403_v38 = vmul.f32 %v15380_v19, %v11453_v56 }
 0x592   : > { %v5024_v1 = vmul.f32 %v8454_v54, %v5023_v59  ;;  %v5032_v17 = vmul.f32 %v8456_v3, %v11743_v53  ;;  %v5029_v26 = vand.u32 2147483648, %v11710_v21  ;;  %v3339_v27 = vmul.f32 %v11337_v31, %v11453_v56 }
 0x593   : > { %15377 = vst [vmem:[#allocation189_spill] sm:$0xff] %v11780_v57  ;;  %v4786_v23 = vmul.f32 %v3370_v25, %v3370_v25  ;;  %v4818_v49 = vmul.f32 %v11780_v57, %v11780_v57  ;;  %8028 = vmatmul.msk.f32.gmra.mxu2 %vm3588_vm10, %v3370_v25  ;;  %8457 = vrsqrt.f32 %v11778_v22  ;;  %v11809_v20 = vsub.f32 %v3499_v44, %v3531_v12  ;;  %v15388_v44 = vld [vmem:[#allocation55_spill] sm:$0xff] }
 0x594   : > { %v5025_v54 = vmul.f32 %v5024_v1, %v11710_v21  ;;  %v5033_v50 = vmul.f32 %v8456_v3, %v5032_v17  ;;  %vm5050_vm9 = vcmp.eq.f32.partialorder %v11778_v22, inf  ;;  %vm5052_vm11 = vcmp.eq.f32.partialorder %v11778_v22, 0.0 }
 0x595   : > { %v4850_v35 = vadd.f32 %v4818_v49, %v4786_v23  ;;  %15382 = vst [vmem:[#allocation108_spill] sm:$0xff] %v11809_v20 }
 0x596   : > { %v3227_v45 = vpop.f32.mrf.mxu1  ;;  %v5027_v59 = vsel %vm5026_vm5, %v11710_v21, %v5025_v54  ;;  %v5034_v25 = vmul.f32 0.5, %v5033_v50  ;;  %v15384_v54 = vld [vmem:[#allocation194_spill] sm:$0xff]  ;;  %v11817_v21 = vpop.f32.mrf.mxu2 }
 0x597   : > { %v4914_v24 = vadd.f32 %v4882_v28, %v4850_v35  ;;  %v3307_v1 = vmul.f32 %v3227_v45, %v15379_v14  ;;  %v3435_v17 = vmul.f32 %v3227_v45, %v15381_v18  ;;  %v5030_v19 = vsel %vm5028_vm6, %v5029_v26, %v5027_v59  ;;  %15385 = vst [vmem:[#allocation52_spill] sm:$0xff] %v11817_v21  ;;  %v15386_v50 = vld [vmem:[#allocation42_spill] sm:$0xff]  ;;  %v15387_v18 = vld [vmem:[#allocation159_spill] sm:$0xff] }
 0x598   : > { %8218 = vmatmul.msk.f32.gmra.mxu3 %vm3588_vm10, %v5030_v19  ;;  %v5035_v23 = vsub.f32 1.5, %v5034_v25  ;;  %v3532_v35 = vmul.f32 %v15387_v18, %v15386_v50  ;;  %v4883_v59 = vmul.f32 %v11809_v20, %v11809_v20  ;;  %v15391_v20 = vld [vmem:[#allocation196_spill] sm:$0xff] }
 0x599   : > { %v8458_v49 = vpop.eup %8457  ;;  %v11811_v34 = vmax.f32 %v4914_v24, 1e-08  ;;  %v3371_v31 = vsub.f32 %v3307_v1, %v3339_v27  ;;  %v11813_v56 = vsub.f32 %v3403_v38, %v3435_v17  ;;  %8012 = vmatmul.msk.f32.gmra.mxu1 %vm1020_vm0, %v15384_v54  ;;  %v3404_v38 = vmul.f32 %v15387_v18, %v11467_v7  ;;  %v11844_v54 = vpop.f32.mrf.mxu3 }
 0x59a   : > { %v5036_v14 = vmul.f32 %v8456_v3, %v5035_v23  ;;  %v5044_v28 = vmul.f32 %v8458_v49, %v11778_v22  ;;  %v3500_v27 = vmul.f32 %v11343_v40, %v15388_v44  ;;  %v5041_v24 = vand.u32 2147483648, %v11743_v53 }
 0x59b   : > { %15383 = vst [vmem:[#allocation154_spill] sm:$0xff] %v11813_v56  ;;  %v4787_v26 = vmul.f32 %v3371_v31, %v3371_v31  ;;  %v4819_v12 = vmul.f32 %v11813_v56, %v11813_v56  ;;  %8029 = vmatmul.msk.f32.gmra.mxu2 %vm3588_vm10, %v3371_v31  ;;  %8459 = vrsqrt.f32 %v11811_v34  ;;  %v3340_v1 = vmul.f32 %v11343_v40, %v11467_v7  ;;  %v11842_v31 = vld [vmem:[%s14781_s10] ss:$0 sm:$0xff]  ;;  %v15414_v56 = vld [vmem:[#allocation92_spill] sm:$0xff] }
 0x59c   : > { %v5037_v3 = vmul.f32 %v5036_v14, %v11743_v53  ;;  %v5045_v45 = vmul.f32 %v8458_v49, %v5044_v28  ;;  %v11848_v40 = vsub.f32 %v3500_v27, %v3532_v35  ;;  %v15393_v35 = vld [vmem:[#allocation115_spill] sm:$0xff]  ;;  %v15394_v27 = vld [vmem:[#allocation162_spill] sm:$0xff]  ;;  %vm5062_vm12 = vcmp.eq.f32.partialorder %v11811_v34, inf }
 0x59d   : > { %v4851_v25 = vadd.f32 %v4819_v12, %v4787_v26  ;;  %vm5064_vm13 = vcmp.eq.f32.partialorder %v11811_v34, 0.0 }
 0x59e   : > { %v3230_v17 = vpop.f32.mrf.mxu1  ;;  %v5039_v19 = vsel %vm5038_vm7, %v11743_v53, %v5037_v3  ;;  %v5046_v23 = vmul.f32 0.5, %v5045_v45  ;;  %15389 = vst [vmem:[#allocation192_spill] sm:$0xff] %v11848_v40 }
 0x59f   : > { %v4915_v14 = vadd.f32 %v4883_v59, %v4851_v25  ;;  %v3308_v28 = vmul.f32 %v3230_v17, %v15386_v50  ;;  %v3436_v18 = vmul.f32 %v3230_v17, %v15388_v44  ;;  %v5042_v26 = vsel %vm5040_vm8, %v5041_v24, %v5039_v19  ;;  %v15392_v25 = vld [vmem:[#allocation28_spill] sm:$0xff] }
 0x5a0   : > { %8219 = vmatmul.msk.f32.gmra.mxu3 %vm3588_vm10, %v5042_v26  ;;  %v5047_v7 = vsub.f32 1.5, %v5046_v23  ;;  %v11860_v44 = vadd.f32 %v11842_v31, %v15392_v25  ;;  %v3533_v24 = vmul.f32 %v15394_v27, %v15393_v35  ;;  %v5053_v26 = vand.u32 2147483648, %v11778_v22 }
 0x5a1   : > { %v8460_v53 = vpop.eup %8459  ;;  %v11851_v12 = vmax.f32 %v4915_v14, 1e-08  ;;  %v3372_v3 = vsub.f32 %v3308_v28, %v3340_v1  ;;  %v11853_v45 = vsub.f32 %v3404_v38, %v3436_v18  ;;  %8013 = vmatmul.msk.f32.gmra.mxu1 %vm1020_vm0, %v15391_v20  ;;  %v11868_v38 = vpop.f32.mrf.mxu2  ;;  %v3405_v20 = vmul.f32 %v15394_v27, %v11479_v0  ;;  %v15396_v14 = vld [vmem:[#allocation57_spill] sm:$0xff] }
 0x5a2   : > { %v5048_v59 = vmul.f32 %v8458_v49, %v5047_v7  ;;  %v5056_v50 = vmul.f32 %v8460_v53, %v11811_v34  ;;  %15395 = vst [vmem:[#allocation157_spill] sm:$0xff] %v11868_v38  ;;  %v4884_v49 = vmul.f32 %v11848_v40, %v11848_v40  ;;  %v3501_v28 = vmul.f32 %v11351_v16, %v15396_v14 }
 0x5a3   : > { %15390 = vst [vmem:[#allocation39_spill] sm:$0xff] %v11853_v45  ;;  %v4788_v17 = vmul.f32 %v3372_v3, %v3372_v3  ;;  %v4820_v19 = vmul.f32 %v11853_v45, %v11853_v45  ;;  %8030 = vmatmul.msk.f32.gmra.mxu2 %vm3588_vm10, %v3372_v3  ;;  %8461 = vrsqrt.f32 %v11851_v12  ;;  %v3341_v7 = vmul.f32 %v11351_v16, %v11479_v0  ;;  %v15399_v16 = vld [vmem:[#allocation34_spill] sm:$0xff] }
 0x5a4   : > { %v5049_v1 = vmul.f32 %v5048_v59, %v11778_v22  ;;  %v5057_v23 = vmul.f32 %v8460_v53, %v5056_v50  ;;  %v11892_v0 = vadd.f32 %v11842_v31, %v15399_v16  ;;  %v15407_v16 = vld [vmem:[#allocation90_spill] sm:$0xff]  ;;  %vm5074_vm14 = vcmp.eq.f32.partialorder %v11851_v12, inf }
 0x5a5   : > { %v4852_v18 = vadd.f32 %v4820_v19, %v4788_v17  ;;  %v15397_v19 = vld [vmem:[#allocation31_spill] sm:$0xff]  ;;  %vm5076_vm15 = vcmp.eq.f32.partialorder %v11851_v12, 0.0 }
 0x5a6   : > { %v3233_v3 = vpop.f32.mrf.mxu1  ;;  %v5051_v25 = vsel %vm5050_vm9, %v11778_v22, %v5049_v1  ;;  %v5058_v27 = vmul.f32 0.5, %v5057_v23  ;;  %v11888_v21 = vadd.f32 %v11842_v31, %v15397_v19  ;;  %15400 = vst [vmem:[#allocation194_spill] sm:$0xff] %v11892_v0  ;;  %v15401_v1 = vld [vmem:[#allocation37_spill] sm:$0xff]  ;;  %v11900_v23 = vsub.f32 %v3501_v28, %v3533_v24  ;;  %v15409_v24 = vld [vmem:[#allocation118_spill] sm:$0xff] }
 0x5a7   : > { %v4916_v40 = vadd.f32 %v4884_v49, %v4852_v18  ;;  %v3309_v59 = vmul.f32 %v3233_v3, %v15393_v35  ;;  %v3437_v50 = vmul.f32 %v3233_v3, %v15396_v14  ;;  %v5054_v38 = vsel %vm5052_vm11, %v5053_v26, %v5051_v25  ;;  %v11898_v35 = vpop.f32.mrf.mxu3  ;;  %v15405_v26 = vld [vmem:[#allocation198_spill] sm:$0xff]  ;;  %v15406_v3 = vld [vmem:[#allocation97_spill] sm:$0xff] }
 0x5a8   : > { %8220 = vmatmul.msk.f32.gmra.mxu3 %vm3588_vm10, %v5054_v38  ;;  %v5059_v17 = vsub.f32 1.5, %v5058_v27  ;;  %15398 = vst [vmem:[#allocation54_spill] sm:$0xff] %v11888_v21  ;;  %v11896_v22 = vadd.f32 %v11842_v31, %v15401_v1  ;;  %v2578_v25 = vadd.f32 %v11423_v39, %v15406_v3  ;;  %v11913_v1 = vadd.f32 %v11842_v31, %v15407_v16  ;;  %v15410_v28 = vld [vmem:[#allocation165_spill] sm:$0xff] }
 0x5a9   : > { %v8462_v49 = vpop.eup %8461  ;;  %15403 = vst [vmem:[#allocation159_spill] sm:$0xff] %v11900_v23  ;;  %v11902_v14 = vmax.f32 %v4916_v40, 1e-08  ;;  %v3373_v38 = vsub.f32 %v3309_v59, %v3341_v7  ;;  %v11904_v18 = vsub.f32 %v3405_v20, %v3437_v50  ;;  %8014 = vmatmul.msk.f32.gmra.mxu1 %vm1020_vm0, %v15405_v26  ;;  %v3534_v40 = vmul.f32 %v15410_v28, %v15409_v24 }
 0x5aa   : > { %15402 = vst [vmem:[#allocation42_spill] sm:$0xff] %v11896_v22  ;;  %v5060_v27 = vmul.f32 %v8460_v53, %v5059_v17  ;;  %v5068_v19 = vmul.f32 %v8462_v49, %v11851_v12  ;;  %v3406_v39 = vmul.f32 %v15410_v28, %v11495_v32  ;;  %v15411_v53 = vld [vmem:[#allocation59_spill] sm:$0xff]  ;;  %v4885_v17 = vmul.f32 %v11900_v23, %v11900_v23 }
 0x5ab   : > { %15404 = vst [vmem:[#allocation55_spill] sm:$0xff] %v11904_v18  ;;  %v4789_v45 = vmul.f32 %v3373_v38, %v3373_v38  ;;  %v4821_v20 = vmul.f32 %v11904_v18, %v11904_v18  ;;  %8031 = vmatmul.msk.f32.gmra.mxu2 %vm3588_vm10, %v3373_v38  ;;  %8463 = vrsqrt.f32 %v11902_v14  ;;  %v3502_v7 = vmul.f32 %v11359_v30, %v15411_v53  ;;  %v11930_v38 = vpop.f32.mrf.mxu2 }
 0x5ac   : > { %15408 = vst [vmem:[#allocation196_spill] sm:$0xff] %v11913_v1  ;;  %v5061_v59 = vmul.f32 %v5060_v27, %v11811_v34  ;;  %v5069_v50 = vmul.f32 %v8462_v49, %v5068_v19  ;;  %v5065_v3 = vand.u32 2147483648, %v11811_v34  ;;  %v3342_v16 = vmul.f32 %v11359_v30, %v11495_v32  ;;  %v15416_v32 = vld [vmem:[#allocation94_spill] sm:$0xff]  ;;  %v15483_v1 = vld [vmem:[#allocation200_spill] sm:$0xff] }
 0x5ad   : > { %v4853_v26 = vadd.f32 %v4821_v20, %v4789_v45  ;;  %15412 = vst [vmem:[#allocation28_spill] sm:$0xff] %v11930_v38  ;;  %v11938_v13 = vsub.f32 %v3502_v7, %v3534_v40  ;;  %v11943_v30 = vadd.f32 %v11842_v31, %v15414_v56  ;;  %v15419_v40 = vld [vmem:[#allocation96_spill] sm:$0xff]  ;;  %v15421_v7 = vld [vmem:[#allocation99_spill] sm:$0xff]  ;;  %vm5086_vm1 = vcmp.eq.f32.partialorder %v11902_v14, inf }
 0x5ae   : > { %v3236_v28 = vpop.f32.mrf.mxu1  ;;  %v5063_v18 = vsel %vm5062_vm12, %v11811_v34, %v5061_v59  ;;  %v5070_v27 = vmul.f32 0.5, %v5069_v50  ;;  %v11947_v59 = vadd.f32 %v11842_v31, %v15416_v32  ;;  %v2581_v56 = vadd.f32 %v11433_v58, %v15421_v7 }
 0x5af   : > { %v4917_v19 = vadd.f32 %v4885_v17, %v4853_v26  ;;  %v3310_v23 = vmul.f32 %v3236_v28, %v15409_v24  ;;  %v3438_v45 = vmul.f32 %v3236_v28, %v15411_v53  ;;  %v5066_v20 = vsel %vm5064_vm13, %v5065_v3, %v5063_v18  ;;  %15413 = vst [vmem:[#allocation115_spill] sm:$0xff] %v11938_v13  ;;  %v8868_v18 = vld [vmem:[%s9217_s24 + $0x2d8] sm:$0xff] }
 0x5b0   : > { %8221 = vmatmul.msk.f32.gmra.mxu3 %vm3588_vm10, %v5066_v20  ;;  %v5071_v38 = vsub.f32 1.5, %v5070_v27  ;;  %15415 = vst [vmem:[#allocation162_spill] sm:$0xff] %v11943_v30  ;;  %v11957_v53 = vadd.f32 %v11842_v31, %v15419_v40  ;;  %v11963_v28 = vadd.f32 %v11842_v31, %v2578_v25  ;;  %v15423_v27 = vld [vmem:[#allocation122_spill] sm:$0xff]  ;;  %v15425_v20 = vld [vmem:[#allocation61_spill] sm:$0xff]  ;;  %v5077_v40 = vand.u32 2147483648, %v11851_v12  ;;  %v15482_v30 = vld [vmem:[#allocation160_spill] sm:$0xff] }
 0x5b1   : > { %15417 = vst [vmem:[#allocation57_spill] sm:$0xff] %v11947_v59  ;;  %v8464_v34 = vpop.eup %8463  ;;  %v11949_v50 = vmax.f32 %v4917_v19, 1e-08  ;;  %v3374_v24 = vsub.f32 %v3310_v23, %v3342_v16  ;;  %v11951_v17 = vsub.f32 %v3406_v39, %v3438_v45  ;;  %8015 = vmatmul.msk.f32.gmra.mxu1 %vm1020_vm0, %v8868_v18  ;;  %v15424_v23 = vld [vmem:[#allocation168_spill] sm:$0xff]  ;;  %v11967_v16 = vpop.f32.mrf.mxu3  ;;  %v3503_v32 = vmul.f32 %v11367_v15, %v15425_v20 }
 0x5b2   : > { %15420 = vst [vmem:[#allocation34_spill] sm:$0xff] %v11957_v53  ;;  %v5072_v26 = vmul.f32 %v8462_v49, %v5071_v38  ;;  %v5080_v3 = vmul.f32 %v8464_v34, %v11902_v14  ;;  %v3535_v39 = vmul.f32 %v15424_v23, %v15423_v27  ;;  %v3407_v58 = vmul.f32 %v15424_v23, %v11507_v41 }
 0x5b3   : > { %15418 = vst [vmem:[#allocation31_spill] sm:$0xff] %v11951_v17  ;;  %v4790_v19 = vmul.f32 %v3374_v24, %v3374_v24  ;;  %v4822_v45 = vmul.f32 %v11951_v17, %v11951_v17  ;;  %8032 = vmatmul.msk.f32.gmra.mxu2 %vm3588_vm10, %v3374_v24  ;;  %8465 = vrsqrt.f32 %v11949_v50  ;;  %v4886_v49 = vmul.f32 %v11938_v13, %v11938_v13 }
 0x5b4   : > { %15422 = vst [vmem:[#allocation37_spill] sm:$0xff] %v11963_v28  ;;  %v5073_v25 = vmul.f32 %v5072_v26, %v11851_v12  ;;  %v5081_v38 = vmul.f32 %v8464_v34, %v5080_v3  ;;  %v3343_v24 = vmul.f32 %v11367_v15, %v11507_v41  ;;  %v11992_v15 = vpop.f32.mrf.mxu2  ;;  %vm5088_vm2 = vcmp.eq.f32.partialorder %v11902_v14, 0.0 }
 0x5b5   : > { %v4854_v18 = vadd.f32 %v4822_v45, %v4790_v19  ;;  %v15426_v45 = vld [vmem:[#allocation101_spill] sm:$0xff]  ;;  %15428 = vst [vmem:[#allocation198_spill] sm:$0xff] %v11992_v15  ;;  %vm5098_vm4 = vcmp.eq.f32.partialorder %v11949_v50, inf  ;;  %vm5100_vm5 = vcmp.eq.f32.partialorder %v11949_v50, 0.0  ;;  %v12194_v22 = vmul.f32 %v15483_v1, %v15482_v30  ;;  %v15496_v30 = vld [vmem:[#allocation206_spill] sm:$0xff] }
 0x5b6   : > { %v3239_v7 = vpop.f32.mrf.mxu1  ;;  %v5075_v23 = vsel %vm5074_vm14, %v11851_v12, %v5073_v25  ;;  %v5082_v13 = vmul.f32 0.5, %v5081_v38  ;;  %v2584_v57 = vadd.f32 %v11445_v36, %v15426_v45  ;;  %v11996_v12 = vadd.f32 %v11842_v31, %v2581_v56  ;;  %v8869_v36 = vld [vmem:[%s9217_s24 + $0x2e0] sm:$0xff] }
 0x5b7   : > { %v4918_v26 = vadd.f32 %v4886_v49, %v4854_v18  ;;  %v3311_v3 = vmul.f32 %v3239_v7, %v15423_v27  ;;  %v3439_v17 = vmul.f32 %v3239_v7, %v15425_v20  ;;  %v5078_v19 = vsel %vm5076_vm15, %v5077_v40, %v5075_v23  ;;  %v15433_v18 = vld [vmem:[#allocation110_spill] sm:$0xff]  ;;  %v15434_v7 = vld [vmem:[#allocation125_spill] sm:$0xff] }
 0x5b8   : > { %8222 = vmatmul.msk.f32.gmra.mxu3 %vm3588_vm10, %v5078_v19  ;;  %v5083_v41 = vsub.f32 1.5, %v5082_v13  ;;  %15429 = vst [vmem:[#allocation97_spill] sm:$0xff] %v11996_v12  ;;  %v11998_v25 = vsub.f32 %v3503_v32, %v3535_v39  ;;  %v2593_v13 = vadd.f32 %v11485_v61, %v15433_v18  ;;  %v15435_v39 = vld [vmem:[#allocation171_spill] sm:$0xff]  ;;  %v5089_v45 = vand.u32 2147483648, %v11902_v14 }
 0x5b9   : > { %v8466_v49 = vpop.eup %8465  ;;  %v12000_v27 = vmax.f32 %v4918_v26, 1e-08  ;;  %v3375_v38 = vsub.f32 %v3311_v3, %v3343_v24  ;;  %v12002_v20 = vsub.f32 %v3407_v58, %v3439_v17  ;;  %8016 = vmatmul.msk.f32.gmra.mxu1 %vm1020_vm0, %v8869_v36  ;;  %v3536_v32 = vmul.f32 %v15435_v39, %v15434_v7  ;;  %v15436_v58 = vld [vmem:[#allocation63_spill] sm:$0xff]  ;;  %v12022_v26 = vpop.f32.mrf.mxu3 }
 0x5ba   : > { %15430 = vst [vmem:[#allocation90_spill] sm:$0xff] %v11998_v25  ;;  %v5084_v40 = vmul.f32 %v8464_v34, %v5083_v41  ;;  %v5092_v56 = vmul.f32 %v8466_v49, %v11949_v50  ;;  %v3408_v55 = vmul.f32 %v15435_v39, %v11521_v63  ;;  %v3504_v61 = vmul.f32 %v11375_v9, %v15436_v58 }
 0x5bb   : > { %15431 = vst [vmem:[#allocation118_spill] sm:$0xff] %v12002_v20  ;;  %v4791_v23 = vmul.f32 %v3375_v38, %v3375_v38  ;;  %v4823_v17 = vmul.f32 %v12002_v20, %v12002_v20  ;;  %8033 = vmatmul.msk.f32.gmra.mxu2 %vm3588_vm10, %v3375_v38  ;;  %8467 = vrsqrt.f32 %v12000_v27  ;;  %v4887_v3 = vmul.f32 %v11998_v25, %v11998_v25 }
 0x5bc   : > { %v5085_v34 = vmul.f32 %v5084_v40, %v11902_v14  ;;  %v5093_v24 = vmul.f32 %v8466_v49, %v5092_v56  ;;  %v3344_v41 = vmul.f32 %v11375_v9, %v11521_v63  ;;  %v12038_v9 = vadd.f32 %v11842_v31, %v2584_v57  ;;  %v12054_v57 = vpop.f32.mrf.mxu2 }
 0x5bd   : > { %v4855_v19 = vadd.f32 %v4823_v17, %v4791_v23  ;;  %v12034_v23 = vsub.f32 %v3504_v61, %v3536_v32  ;;  %v12041_v63 = vadd.f32 %v11842_v31, %v2587_v62  ;;  %v12050_v32 = vadd.f32 %v11842_v31, %v2590_v48  ;;  %15443 = vst [vmem:[#allocation99_spill] sm:$0xff] %v12054_v57 }
 0x5be   : > { %v3242_v38 = vpop.f32.mrf.mxu1  ;;  %v5087_v36 = vsel %vm5086_vm1, %v11902_v14, %v5085_v34  ;;  %v5094_v46 = vmul.f32 0.5, %v5093_v24  ;;  %15438 = vst [vmem:[#allocation59_spill] sm:$0xff] %v12038_v9  ;;  %vm5110_vm6 = vcmp.eq.f32.partialorder %v12000_v27, inf  ;;  %vm5112_vm7 = vcmp.eq.f32.partialorder %v12000_v27, 0.0  ;;  %v15480_v9 = vld [vmem:[#allocation10_spill] sm:$0xff] }
 0x5bf   : > { %v4919_v18 = vadd.f32 %v4887_v3, %v4855_v19  ;;  %v3312_v40 = vmul.f32 %v3242_v38, %v15434_v7  ;;  %v3440_v56 = vmul.f32 %v3242_v38, %v15436_v58  ;;  %v5090_v39 = vsel %vm5088_vm2, %v5089_v45, %v5087_v36  ;;  %15437 = vst [vmem:[#allocation165_spill] sm:$0xff] %v12034_v23  ;;  %v8870_v7 = vld [vmem:[%s9217_s24 + $0x2e8] sm:$0xff] }
 0x5c0   : > { %8223 = vmatmul.msk.f32.gmra.mxu3 %vm3588_vm10, %v5090_v39  ;;  %v5095_v17 = vsub.f32 1.5, %v5094_v46  ;;  %15439 = vst [vmem:[#allocation92_spill] sm:$0xff] %v12041_v63  ;;  %v15442_v58 = vld [vmem:[#allocation112_spill] sm:$0xff]  ;;  %v12058_v45 = vadd.f32 %v11842_v31, %v2593_v13  ;;  %v5101_v39 = vand.u32 2147483648, %v11949_v50  ;;  %v3347_v53 = vmul.f32 %v15480_v9, %v11555_v51 }
 0x5c1   : > { %v8468_v34 = vpop.eup %8467  ;;  %v12043_v14 = vmax.f32 %v4919_v18, 1e-08  ;;  %v3376_v24 = vsub.f32 %v3312_v40, %v3344_v41  ;;  %v12045_v3 = vsub.f32 %v3408_v55, %v3440_v56  ;;  %8017 = vmatmul.msk.f32.gmra.mxu1 %vm1020_vm0, %v8870_v7  ;;  %15441 = vst [vmem:[#allocation96_spill] sm:$0xff] %v12050_v32  ;;  %v2596_v61 = vadd.f32 %v11499_v60, %v15442_v58  ;;  %v15445_v41 = vld [vmem:[#allocation129_spill] sm:$0xff]  ;;  %v15447_v18 = vld [vmem:[#allocation64_spill] sm:$0xff] }
 0x5c2   : > { %v5096_v19 = vmul.f32 %v8466_v49, %v5095_v17  ;;  %v5104_v62 = vmul.f32 %v8468_v34, %v12000_v27  ;;  %15444 = vst [vmem:[#allocation122_spill] sm:$0xff] %v12058_v45  ;;  %v15446_v55 = vld [vmem:[#allocation173_spill] sm:$0xff]  ;;  %v4888_v49 = vmul.f32 %v12034_v23, %v12034_v23  ;;  %v3505_v40 = vmul.f32 %v11381_v5, %v15447_v18  ;;  %v15448_v23 = vld [vmem:[#allocation114_spill] sm:$0xff]  ;;  %v15477_v32 = vld [vmem:[#allocation156_spill] sm:$0xff] }
 0x5c3   : > { %15440 = vst [vmem:[#allocation94_spill] sm:$0xff] %v12045_v3  ;;  %v3537_v38 = vmul.f32 %v15446_v55, %v15445_v41  ;;  %v4792_v36 = vmul.f32 %v3376_v24, %v3376_v24  ;;  %v4824_v46 = vmul.f32 %v12045_v3, %v12045_v3  ;;  %8034 = vmatmul.msk.f32.gmra.mxu2 %vm3588_vm10, %v3376_v24  ;;  %8469 = vrsqrt.f32 %v12043_v14 }
 0x5c4   : > { %v3409_v60 = vmul.f32 %v15446_v55, %v11529_v6  ;;  %v5097_v48 = vmul.f32 %v5096_v19, %v11949_v50  ;;  %v5105_v13 = vmul.f32 %v8468_v34, %v5104_v62  ;;  %v3345_v17 = vmul.f32 %v11381_v5, %v11529_v6  ;;  %v12079_v19 = vpop.f32.mrf.mxu3  ;;  %v15450_v5 = vld [vmem:[#allocation116_spill] sm:$0xff] }
 0x5c5   : > { %v4856_v56 = vadd.f32 %v4824_v46, %v4792_v36  ;;  %v12085_v25 = vadd.f32 %v11511_v2, %v15448_v23  ;;  %v12089_v6 = vadd.f32 %v11525_v42, %v15450_v5  ;;  %v8871_v2 = vld [vmem:[%s9217_s24 + $0x2f0] sm:$0xff]  ;;  %v15455_v23 = vld [vmem:[#allocation132_spill] sm:$0xff]  ;;  %vm5122_vm8 = vcmp.eq.f32.partialorder %v12043_v14, inf }
 0x5c6   : > { %v3245_v24 = vpop.f32.mrf.mxu1  ;;  %v5099_v7 = vsel %vm5098_vm4, %v11949_v50, %v5097_v48  ;;  %v5106_v58 = vmul.f32 0.5, %v5105_v13  ;;  %v12093_v48 = vadd.f32 %v11842_v31, %v2596_v61  ;;  %v12095_v13 = vsub.f32 %v3505_v40, %v3537_v38  ;;  %v15456_v42 = vld [vmem:[#allocation176_spill] sm:$0xff]  ;;  %v15459_v38 = vld [vmem:[#allocation138_spill] sm:$0xff]  ;;  %v15460_v40 = vld [vmem:[#allocation183_spill] sm:$0xff] }
 0x5c7   : > { %v4920_v62 = vadd.f32 %v4888_v49, %v4856_v56  ;;  %v3313_v55 = vmul.f32 %v3245_v24, %v15445_v41  ;;  %v3441_v36 = vmul.f32 %v3245_v24, %v15447_v18  ;;  %v5102_v46 = vsel %vm5100_vm5, %v5101_v39, %v5099_v7  ;;  %15449 = vst [vmem:[#allocation168_spill] sm:$0xff] %v12085_v25  ;;  %v15457_v24 = vld [vmem:[#allocation136_spill] sm:$0xff]  ;;  %v15458_v7 = vld [vmem:[#allocation179_spill] sm:$0xff]  ;;  %v15468_v25 = vld [vmem:[#allocation190_spill] sm:$0xff] }
 0x5c8   : > { %15451 = vst [vmem:[#allocation61_spill] sm:$0xff] %v12089_v6  ;;  %8224 = vmatmul.msk.f32.gmra.mxu3 %vm3588_vm10, %v5102_v46  ;;  %v5107_v50 = vsub.f32 1.5, %v5106_v58  ;;  %v3538_v39 = vmul.f32 %v15456_v42, %v15455_v23  ;;  %v12107_v58 = vmul.f32 %v15458_v7, %v15457_v24  ;;  %v15464_v5 = vld [vmem:[#allocation8_spill] sm:$0xff]  ;;  %v4889_v20 = vmul.f32 %v12095_v13, %v12095_v13  ;;  %v15467_v6 = vld [vmem:[#allocation143_spill] sm:$0xff] }
 0x5c9   : > { %15452 = vst [vmem:[#allocation101_spill] sm:$0xff] %v12093_v48  ;;  %v8470_v49 = vpop.eup %8469  ;;  %v12097_v41 = vmax.f32 %v4920_v62, 1e-08  ;;  %v3377_v18 = vsub.f32 %v3313_v55, %v3345_v17  ;;  %v12099_v56 = vsub.f32 %v3409_v60, %v3441_v36  ;;  %8018 = vmatmul.msk.f32.gmra.mxu1 %vm1020_vm0, %v8871_v2  ;;  %v12112_v62 = vmul.f32 %v15460_v40, %v15459_v38  ;;  %v12118_v55 = vpop.f32.mrf.mxu2  ;;  %v15462_v36 = vld [vmem:[#allocation219_spill] sm:$0xff] }
 0x5ca   : > { %15453 = vst [vmem:[#allocation104_spill] sm:$0xff] %v12095_v13  ;;  %v5108_v31 = vmul.f32 %v8468_v34, %v5107_v50  ;;  %v5116_v61 = vmul.f32 %v8470_v49, %v12043_v14  ;;  %v3410_v46 = vmul.f32 %v15456_v42, %v15462_v36  ;;  %v15463_v34 = vld [vmem:[#allocation66_spill] sm:$0xff]  ;;  %vm5124_vm9 = vcmp.eq.f32.partialorder %v12043_v14, 0.0 }
 0x5cb   : > { %15454 = vst [vmem:[#allocation107_spill] sm:$0xff] %v12099_v56  ;;  %v4793_v17 = vmul.f32 %v3377_v18, %v3377_v18  ;;  %v4825_v60 = vmul.f32 %v12099_v56, %v12099_v56  ;;  %8035 = vmatmul.msk.f32.gmra.mxu2 %vm3588_vm10, %v3377_v18  ;;  %8471 = vrsqrt.f32 %v12097_v41  ;;  %v3506_v50 = vmul.f32 %v15464_v5, %v15463_v34 }
 0x5cc   : > { %15461 = vst [vmem:[#allocation110_spill] sm:$0xff] %v12118_v55  ;;  %v5109_v2 = vmul.f32 %v5108_v31, %v12000_v27  ;;  %v5117_v3 = vmul.f32 %v8470_v49, %v5116_v61  ;;  %v5113_v18 = vand.u32 2147483648, %v12000_v27  ;;  %v3346_v55 = vmul.f32 %v15464_v5, %v15462_v36 }
 0x5cd   : > { %v4857_v57 = vadd.f32 %v4825_v60, %v4793_v17  ;;  %v15465_v60 = vld [vmem:[#allocation141_spill] sm:$0xff]  ;;  %v12141_v36 = vmul.f32 %v15468_v25, %v15467_v6  ;;  %v12143_v5 = vsub.f32 %v3506_v50, %v3538_v39  ;;  %v15474_v50 = vld [vmem:[#allocation195_spill] sm:$0xff]  ;;  %vm5134_vm11 = vcmp.eq.f32.partialorder %v12097_v41, inf }
 0x5ce   : > { %v3248_v56 = vpop.f32.mrf.mxu1  ;;  %v5111_v42 = vsel %vm5110_vm6, %v12000_v27, %v5109_v2  ;;  %v5118_v15 = vmul.f32 0.5, %v5117_v3  ;;  %v12137_v4 = vmul.f32 %v15466_v52, %v15465_v60  ;;  %v15473_v39 = vld [vmem:[#allocation149_spill] sm:$0xff]  ;;  %vm5136_vm12 = vcmp.eq.f32.partialorder %v12097_v41, 0.0 }
 0x5cf   : > { %v4921_v31 = vadd.f32 %v4889_v20, %v4857_v57  ;;  %v3314_v61 = vmul.f32 %v3248_v56, %v15455_v23  ;;  %v3442_v13 = vmul.f32 %v3248_v56, %v15463_v34  ;;  %v5114_v17 = vsel %vm5112_vm7, %v5113_v18, %v5111_v42  ;;  %15469 = vst [vmem:[#allocation125_spill] sm:$0xff] %v12143_v5  ;;  %v15470_v20 = vld [vmem:[#allocation146_spill] sm:$0xff]  ;;  %v15471_v57 = vld [vmem:[#allocation193_spill] sm:$0xff]  ;;  %v12150_v56 = vpop.f32.mrf.mxu3 }
 0x5d0   : > { %8225 = vmatmul.msk.f32.gmra.mxu3 %vm3588_vm10, %v5114_v17  ;;  %v5119_v27 = vsub.f32 1.5, %v5118_v15  ;;  %v12148_v23 = vmul.f32 %v15471_v57, %v15470_v20  ;;  %v8872_v42 = vld [vmem:[%s9217_s24 + $0x2f8] sm:$0xff]  ;;  %v12160_v11 = vmul.f32 %v15474_v50, %v15473_v39  ;;  %v15475_v15 = vld [vmem:[#allocation153_spill] sm:$0xff] }
 0x5d1   : > { %v8472_v3 = vpop.eup %8471  ;;  %v12152_v34 = vmax.f32 %v4921_v31, 1e-08  ;;  %v3378_v2 = vsub.f32 %v3314_v61, %v3346_v55  ;;  %v12154_v18 = vsub.f32 %v3410_v46, %v3442_v13  ;;  %8019 = vmatmul.msk.f32.gmra.mxu1 %vm1020_vm0, %v8872_v42  ;;  %v15476_v17 = vld [vmem:[#allocation197_spill] sm:$0xff]  ;;  %v15478_v31 = vld [vmem:[#allocation199_spill] sm:$0xff]  ;;  %v3411_v46 = vmul.f32 %v15458_v7, %v11555_v51 }
 0x5d2   : > { %v12164_v48 = vmul.f32 %v15476_v17, %v15475_v15  ;;  %v5120_v43 = vmul.f32 %v8470_v49, %v5119_v27  ;;  %v5128_v45 = vmul.f32 %v8472_v3, %v12097_v41  ;;  %v12169_v63 = vmul.f32 %v15478_v31, %v15477_v32  ;;  %v15479_v42 = vld [vmem:[#allocation67_spill] sm:$0xff]  ;;  %v15485_v32 = vld [vmem:[#allocation201_spill] sm:$0xff] }
 0x5d3   : > { %15472 = vst [vmem:[#allocation171_spill] sm:$0xff] %v12154_v18  ;;  %v4794_v13 = vmul.f32 %v3378_v2, %v3378_v2  ;;  %v4826_v55 = vmul.f32 %v12154_v18, %v12154_v18  ;;  %8036 = vmatmul.msk.f32.gmra.mxu2 %vm3588_vm10, %v3378_v2  ;;  %8473 = vrsqrt.f32 %v12152_v34  ;;  %v4890_v49 = vmul.f32 %v12143_v5, %v12143_v5  ;;  %v12184_v2 = vpop.f32.mrf.mxu2  ;;  %v15487_v51 = vld [vmem:[#allocation167_spill] sm:$0xff] }
 0x5d4   : > { %v5121_v61 = vmul.f32 %v5120_v43, %v12043_v14  ;;  %v5129_v27 = vmul.f32 %v8472_v3, %v5128_v45  ;;  %v3507_v12 = vmul.f32 %v15480_v9, %v15479_v42  ;;  %v5125_v18 = vand.u32 2147483648, %v12043_v14  ;;  %15481 = vst [vmem:[#allocation63_spill] sm:$0xff] %v12184_v2  ;;  %v15484_v2 = vld [vmem:[#allocation163_spill] sm:$0xff]  ;;  %v15488_v9 = vld [vmem:[#allocation202_spill] sm:$0xff] }
 0x5d5   : > { %v4858_v28 = vadd.f32 %v4826_v55, %v4794_v13  ;;  %v12198_v0 = vmul.f32 %v15485_v32, %v15484_v2  ;;  %v15495_v2 = vld [vmem:[#allocation174_spill] sm:$0xff]  ;;  %vm5146_vm13 = vcmp.eq.f32.partialorder %v12152_v34, inf  ;;  %vm5148_vm14 = vcmp.eq.f32.partialorder %v12152_v34, 0.0 }
 0x5d6   : > { %v3251_v7 = vpop.f32.mrf.mxu1  ;;  %v5123_v59 = vsel %vm5122_vm8, %v12043_v14, %v5121_v61  ;;  %v5130_v43 = vmul.f32 0.5, %v5129_v27  ;;  %v12202_v61 = vmul.f32 %v15488_v9, %v15487_v51  ;;  %v15492_v27 = vld [vmem:[#allocation170_spill] sm:$0xff]  ;;  %v12218_v51 = vmul.f32 %v15496_v30, %v15495_v2 }
 0x5d7   : > { %v4922_v45 = vadd.f32 %v4890_v49, %v4858_v28  ;;  %v3315_v5 = vmul.f32 %v3251_v7, %v15457_v24  ;;  %v3443_v13 = vmul.f32 %v3251_v7, %v15479_v42  ;;  %v5126_v55 = vsel %vm5124_vm9, %v5125_v18, %v5123_v59  ;;  %15486 = vst [vmem:[#allocation112_spill] sm:$0xff] %v12198_v0  ;;  %v15493_v42 = vld [vmem:[#allocation204_spill] sm:$0xff] }
 0x5d8   : > { %15489 = vst [vmem:[#allocation129_spill] sm:$0xff] %v12202_v61  ;;  %8226 = vmatmul.msk.f32.gmra.mxu3 %vm3588_vm10, %v5126_v55  ;;  %v5131_v28 = vsub.f32 1.5, %v5130_v43  ;;  %v12206_v24 = vsub.f32 %v3507_v12, %v12107_v58  ;;  %v12214_v7 = vmul.f32 %v15493_v42, %v15492_v27  ;;  %v15498_v55 = vld [vmem:[#allocation177_spill] sm:$0xff]  ;;  %v15499_v61 = vld [vmem:[#allocation208_spill] sm:$0xff]  ;;  %v12225_v58 = vpop.f32.mrf.mxu3 }
 0x5d9   : > { %v8474_v14 = vpop.eup %8473  ;;  %v12208_v59 = vmax.f32 %v4922_v45, 1e-08  ;;  %v3379_v18 = vsub.f32 %v3315_v5, %v3347_v53  ;;  %v12210_v49 = vsub.f32 %v3411_v46, %v3443_v13  ;;  %15497 = vst [vmem:[#allocation116_spill] sm:$0xff] %v12218_v51  ;;  %v12223_v12 = vmul.f32 %v15499_v61, %v15498_v55  ;;  %v15501_v46 = vld [vmem:[#allocation181_spill] sm:$0xff]  ;;  %v15502_v45 = vld [vmem:[#allocation83_spill] sm:$0xff]  ;;  %v15504_v27 = vld [vmem:[#allocation68_spill] sm:$0xff] }
 0x5da   : > { %15490 = vst [vmem:[#allocation173_spill] sm:$0xff] %v12206_v24  ;;  %v5132_v15 = vmul.f32 %v8472_v3, %v5131_v28  ;;  %v5140_v43 = vmul.f32 %v8474_v14, %v12152_v34  ;;  %v12233_v13 = vmul.f32 %v15502_v45, %v15501_v46  ;;  %v3412_v3 = vmul.f32 %v15460_v40, %v11591_v29 }
 0x5db   : > { %15491 = vst [vmem:[#allocation64_spill] sm:$0xff] %v12210_v49  ;;  %v4795_v53 = vmul.f32 %v3379_v18, %v3379_v18  ;;  %v4827_v5 = vmul.f32 %v12210_v49, %v12210_v49  ;;  %8037 = vmatmul.msk.f32.gmra.mxu2 %vm3588_vm10, %v3379_v18  ;;  %8475 = vrsqrt.f32 %v12208_v59  ;;  %v4891_v2 = vmul.f32 %v12206_v24, %v12206_v24 }
 0x5dc   : > { %15494 = vst [vmem:[#allocation114_spill] sm:$0xff] %v12214_v7  ;;  %v5133_v28 = vmul.f32 %v5132_v15, %v12097_v41  ;;  %v5141_v55 = vmul.f32 %v8474_v14, %v5140_v43  ;;  %v5137_v15 = vand.u32 2147483648, %v12097_v41  ;;  %vm5158_vm15 = vcmp.eq.f32.partialorder %v12208_v59, inf }
 0x5dd   : > { %15500 = vst [vmem:[#allocation132_spill] sm:$0xff] %v12223_v12  ;;  %v15505_v12 = vld [vmem:[#allocation12_spill] sm:$0xff]  ;;  %v4859_v51 = vadd.f32 %v4827_v5, %v4795_v53  ;;  %v15507_v53 = vld [vmem:[#allocation185_spill] sm:$0xff]  ;;  %v15508_v5 = vld [vmem:[#allocation51_spill] sm:$0xff]  ;;  %vm5160_vm1 = vcmp.eq.f32.partialorder %v12208_v59, 0.0 }
 0x5de   : > { %15503 = vst [vmem:[#allocation176_spill] sm:$0xff] %v12233_v13  ;;  %v3508_v49 = vmul.f32 %v15505_v12, %v15504_v27  ;;  %v3348_v18 = vmul.f32 %v15505_v12, %v11591_v29  ;;  %v3254_v46 = vpop.f32.mrf.mxu1  ;;  %v12245_v13 = vpop.f32.mrf.mxu2  ;;  %v5135_v40 = vsel %vm5134_vm11, %v12097_v41, %v5133_v28  ;;  %v5142_v43 = vmul.f32 0.5, %v5141_v55 }
 0x5df   : > { %15506 = vst [vmem:[#allocation136_spill] sm:$0xff] %v12245_v13  ;;  %v4923_v7 = vadd.f32 %v4891_v2, %v4859_v51  ;;  %v3316_v24 = vmul.f32 %v3254_v46, %v15459_v38  ;;  %v3444_v0 = vmul.f32 %v3254_v46, %v15504_v27  ;;  %v12254_v21 = vmul.f32 %v15508_v5, %v15507_v53  ;;  %v15511_v46 = vld [vmem:[#allocation69_spill] sm:$0xff] }
 0x5e0   : > { %v3413_v29 = vmul.f32 %v15466_v52, %v11626_v37  ;;  %v5138_v12 = vsel %vm5136_vm12, %v5137_v15, %v5135_v40  ;;  %v5143_v13 = vsub.f32 1.5, %v5142_v43  ;;  %v12259_v39 = vsub.f32 %v3508_v49, %v12112_v62  ;;  %v12292_v49 = vpop.f32.mrf.mxu3 }
 0x5e1   : > { %v8476_v28 = vpop.eup %8475  ;;  %v12261_v2 = vmax.f32 %v4923_v7, 1e-08  ;;  %v3380_v38 = vsub.f32 %v3316_v24, %v3348_v18  ;;  %v12263_v51 = vsub.f32 %v3412_v3, %v3444_v0  ;;  %8227 = vmatmul.msk.f32.gmra.mxu3 %vm3588_vm10, %v5138_v12  ;;  %v12268_v41 = vmul.f32 %v15468_v25, %v11668_v33 }
 0x5e2   : > { %15509 = vst [vmem:[#allocation179_spill] sm:$0xff] %v12259_v39  ;;  %v12272_v52 = vmul.f32 %v15471_v57, %v11708_v47  ;;  %v5144_v27 = vmul.f32 %v8474_v14, %v5143_v13  ;;  %v5152_v55 = vmul.f32 %v8476_v28, %v12208_v59  ;;  %v12277_v62 = vmul.f32 %v15474_v50, %v11752_v8  ;;  %v15512_v13 = vld [vmem:[#allocation14_spill] sm:$0xff] }
 0x5e3   : > { %15510 = vst [vmem:[#allocation138_spill] sm:$0xff] %v12263_v51  ;;  %v4796_v24 = vmul.f32 %v3380_v38, %v3380_v38  ;;  %v4828_v0 = vmul.f32 %v12263_v51, %v12263_v51  ;;  %8038 = vmatmul.msk.f32.gmra.mxu2 %vm3588_vm10, %v3380_v38  ;;  %8477 = vrsqrt.f32 %v12261_v2  ;;  %v12285_v25 = vmul.f32 %v15476_v17, %v11796_v10  ;;  %v15523_v51 = vld [vmem:[#allocation74_spill] sm:$0xff] }
 0x5e4   : > { %v12289_v57 = vmul.f32 %v15478_v31, %v11844_v54  ;;  %v5145_v14 = vmul.f32 %v5144_v27, %v12152_v34  ;;  %v5153_v50 = vmul.f32 %v8476_v28, %v5152_v55  ;;  %v4892_v7 = vmul.f32 %v12259_v39, %v12259_v39 }
 0x5e5   : > { %v3509_v3 = vmul.f32 %v15512_v13, %v15511_v46  ;;  %v4860_v18 = vadd.f32 %v4828_v0, %v4796_v24  ;;  %v3349_v17 = vmul.f32 %v15512_v13, %v11626_v37  ;;  %v5149_v43 = vand.u32 2147483648, %v12152_v34 }
 0x5e6   : > { %v3257_v40 = vpop.f32.mrf.mxu1  ;;  %v12301_v31 = vpop.f32.mrf.mxu2  ;;  %v5147_v15 = vsel %vm5146_vm13, %v12152_v34, %v5145_v14  ;;  %v5154_v12 = vmul.f32 0.5, %v5153_v50  ;;  %v12310_v24 = vmul.f32 %v15483_v1, %v11898_v35  ;;  %v12314_v37 = vmul.f32 %v15485_v32, %v11967_v16 }
 0x5e7   : > { %15513 = vst [vmem:[#allocation183_spill] sm:$0xff] %v12301_v31  ;;  %v4924_v38 = vadd.f32 %v4892_v7, %v4860_v18  ;;  %v3317_v27 = vmul.f32 %v3257_v40, %v15465_v60  ;;  %v3445_v55 = vmul.f32 %v3257_v40, %v15511_v46  ;;  %v5150_v0 = vsel %vm5148_vm14, %v5149_v43, %v5147_v15  ;;  %v15519_v15 = vld [vmem:[#allocation17_spill] sm:$0xff]  ;;  %v15561_v31 = vld [vmem:[#allocation38_spill] sm:$0xff] }
 0x5e8   : > { %v5155_v14 = vsub.f32 1.5, %v5154_v12  ;;  %v12317_v50 = vsub.f32 %v3509_v3, %v12137_v4  ;;  %v12326_v1 = vmul.f32 %v15488_v9, %v12022_v26  ;;  %v12330_v32 = vmul.f32 %v15493_v42, %v12079_v19  ;;  %v15516_v9 = vld [vmem:[#allocation70_spill] sm:$0xff]  ;;  %v15518_v42 = vld [vmem:[#allocation72_spill] sm:$0xff] }
 0x5e9   : > { %v8478_v13 = vpop.eup %8477  ;;  %v12319_v7 = vmax.f32 %v4924_v38, 1e-08  ;;  %v3381_v60 = vsub.f32 %v3317_v27, %v3349_v17  ;;  %v12321_v46 = vsub.f32 %v3413_v29, %v3445_v55  ;;  %8228 = vmatmul.msk.f32.gmra.mxu3 %vm3588_vm10, %v5150_v0  ;;  %v12335_v4 = vmul.f32 %v15496_v30, %v12150_v56  ;;  %v15517_v17 = vld [vmem:[#allocation15_spill] sm:$0xff] }
 0x5ea   : > { %15514 = vst [vmem:[#allocation219_spill] sm:$0xff] %v12317_v50  ;;  %v5156_v34 = vmul.f32 %v8476_v28, %v5155_v14  ;;  %v5164_v18 = vmul.f32 %v8478_v13, %v12261_v2  ;;  %v3510_v40 = vmul.f32 %v15517_v17, %v15516_v9  ;;  %v3511_v28 = vmul.f32 %v15519_v15, %v15518_v42 }
 0x5eb   : > { %15515 = vst [vmem:[#allocation66_spill] sm:$0xff] %v12321_v46  ;;  %v4797_v3 = vmul.f32 %v3381_v60, %v3381_v60  ;;  %v4829_v29 = vmul.f32 %v12321_v46, %v12321_v46  ;;  %8039 = vmatmul.msk.f32.gmra.mxu2 %vm3588_vm10, %v3381_v60  ;;  %8479 = vrsqrt.f32 %v12319_v7  ;;  %v12348_v30 = vmul.f32 %v15499_v61, %v12225_v58 }
 0x5ec   : > { %v5157_v43 = vmul.f32 %v5156_v34, %v12208_v59  ;;  %v5165_v12 = vmul.f32 %v8478_v13, %v5164_v18  ;;  %v4893_v38 = vmul.f32 %v12317_v50, %v12317_v50  ;;  %v3350_v55 = vmul.f32 %v15517_v17, %v11668_v33 }
 0x5ed   : > { %v4861_v27 = vadd.f32 %v4829_v29, %v4797_v3  ;;  %v5161_v34 = vand.u32 2147483648, %v12208_v59  ;;  %v12362_v3 = vpop.f32.mrf.mxu3  ;;  %v12365_v29 = vsub.f32 %v3510_v40, %v12141_v36  ;;  %v12368_v33 = vsub.f32 %v3511_v28, %v12148_v23  ;;  %v15527_v23 = vld [vmem:[#allocation76_spill] sm:$0xff] }
 0x5ee   : > { %v3260_v0 = vpop.f32.mrf.mxu1  ;;  %v12355_v14 = vpop.f32.mrf.mxu2  ;;  %v5159_v60 = vsel %vm5158_vm15, %v12208_v59, %v5157_v43  ;;  %v5166_v18 = vmul.f32 0.5, %v5165_v12  ;;  %v15524_v12 = vld [vmem:[#allocation209_spill] sm:$0xff]  ;;  %v12380_v36 = vmul.f32 %v15502_v45, %v12292_v49  ;;  %v15528_v59 = vld [vmem:[#allocation210_spill] sm:$0xff]  ;;  %vm5170_vm2 = vcmp.eq.f32.partialorder %v12261_v2, inf }
 0x5ef   : > { %15520 = vst [vmem:[#allocation8_spill] sm:$0xff] %v12355_v14  ;;  %v4925_v39 = vadd.f32 %v4893_v38, %v4861_v27  ;;  %v3318_v61 = vmul.f32 %v3260_v0, %v15467_v6  ;;  %v3446_v46 = vmul.f32 %v3260_v0, %v15516_v9  ;;  %v5162_v17 = vsel %vm5160_vm1, %v5161_v34, %v5159_v60 }
 0x5f0   : > { %15521 = vst [vmem:[#allocation141_spill] sm:$0xff] %v12365_v29  ;;  %v5167_v43 = vsub.f32 1.5, %v5166_v18  ;;  %v3512_v38 = vmul.f32 %v15524_v12, %v15523_v51  ;;  %v3513_v40 = vmul.f32 %v15528_v59, %v15527_v23  ;;  %v4894_v45 = vmul.f32 %v12365_v29, %v12365_v29 }
 0x5f1   : > { %15522 = vst [vmem:[#allocation187_spill] sm:$0xff] %v12368_v33  ;;  %v8480_v50 = vpop.eup %8479  ;;  %v12372_v27 = vmax.f32 %v4925_v39, 1e-08  ;;  %v3382_v6 = vsub.f32 %v3318_v61, %v3350_v55  ;;  %v12375_v9 = vsub.f32 %v12268_v41, %v3446_v46  ;;  %8229 = vmatmul.msk.f32.gmra.mxu3 %vm3588_vm10, %v5162_v17  ;;  %v12387_v39 = vmul.f32 %v15508_v5, %v12362_v3 }
 0x5f2   : > { %15526 = vst [vmem:[#allocation190_spill] sm:$0xff] %v12380_v36  ;;  %v5168_v28 = vmul.f32 %v8478_v13, %v5167_v43  ;;  %v5176_v0 = vmul.f32 %v8480_v50, %v12319_v7  ;;  %v3351_v13 = vmul.f32 %v15519_v15, %v11708_v47  ;;  %v4895_v5 = vmul.f32 %v12368_v33, %v12368_v33 }
 0x5f3   : > { %15525 = vst [vmem:[#allocation143_spill] sm:$0xff] %v12375_v9  ;;  %v4798_v55 = vmul.f32 %v3382_v6, %v3382_v6  ;;  %v4830_v41 = vmul.f32 %v12375_v9, %v12375_v9  ;;  %8040 = vmatmul.msk.f32.gmra.mxu2 %vm3588_vm10, %v3382_v6  ;;  %8481 = vrsqrt.f32 %v12372_v27  ;;  %v12401_v34 = vsub.f32 %v3512_v38, %v12160_v11  ;;  %v15536_v9 = vld [vmem:[#allocation25_spill] sm:$0xff] }
 0x5f4   : > { %15529 = vst [vmem:[#allocation146_spill] sm:$0xff] %v12387_v39  ;;  %v5169_v46 = vmul.f32 %v5168_v28, %v12261_v2  ;;  %v5177_v60 = vmul.f32 %v8480_v50, %v5176_v0  ;;  %v12405_v61 = vsub.f32 %v3513_v40, %v12164_v48  ;;  %v5173_v15 = vand.u32 2147483648, %v12261_v2  ;;  %v15533_v48 = vld [vmem:[#allocation77_spill] sm:$0xff]  ;;  %v15534_v40 = vld [vmem:[#allocation211_spill] sm:$0xff] }
 0x5f5   : > { %15530 = vst [vmem:[#allocation193_spill] sm:$0xff] %v12401_v34  ;;  %v4862_v18 = vadd.f32 %v4830_v41, %v4798_v55  ;;  %vm5172_vm4 = vcmp.eq.f32.partialorder %v12261_v2, 0.0  ;;  %v3352_v38 = vmul.f32 %v15524_v12, %v11752_v8  ;;  %v3514_v55 = vmul.f32 %v15534_v40, %v15533_v48 }
 0x5f6   : > { %15531 = vst [vmem:[#allocation195_spill] sm:$0xff] %v12405_v61  ;;  %v3263_v17 = vpop.f32.mrf.mxu1  ;;  %v12407_v43 = vpop.f32.mrf.mxu2  ;;  %v5171_v47 = vsel %vm5170_vm2, %v12261_v2, %v5169_v46  ;;  %v5178_v6 = vmul.f32 0.5, %v5177_v60  ;;  %v15535_v46 = vld [vmem:[#allocation78_spill] sm:$0xff]  ;;  %v12428_v8 = vmul.f32 %v12401_v34, %v12401_v34  ;;  %v12432_v2 = vmul.f32 %v15528_v59, %v11796_v10 }
 0x5f7   : > { %15532 = vst [vmem:[#allocation197_spill] sm:$0xff] %v12407_v43  ;;  %v4926_v28 = vadd.f32 %v4894_v45, %v4862_v18  ;;  %v3319_v0 = vmul.f32 %v3263_v17, %v15470_v20  ;;  %v3447_v11 = vmul.f32 %v3263_v17, %v15518_v42  ;;  %v5174_v41 = vsel %vm5172_vm4, %v5173_v15, %v5171_v47 }
 0x5f8   : > { %v5179_v33 = vsub.f32 1.5, %v5178_v6  ;;  %v3515_v43 = vmul.f32 %v15536_v9, %v15535_v46  ;;  %v12437_v18 = vmul.f32 %v12405_v61, %v12405_v61  ;;  %v12445_v10 = vmul.f32 %v15534_v40, %v11844_v54  ;;  %v15545_v61 = vld [vmem:[#allocation213_spill] sm:$0xff] }
 0x5f9   : > { %v8482_v29 = vpop.eup %8481  ;;  %v12420_v60 = vmax.f32 %v4926_v28, 1e-08  ;;  %v3383_v45 = vsub.f32 %v3319_v0, %v3351_v13  ;;  %v12423_v20 = vsub.f32 %v12272_v52, %v3447_v11  ;;  %8230 = vmatmul.msk.f32.gmra.mxu3 %vm3588_vm10, %v5174_v41  ;;  %v12452_v47 = vsub.f32 %v3514_v55, %v12169_v63 }
 0x5fa   : > { %v5180_v42 = vmul.f32 %v8480_v50, %v5179_v33  ;;  %v5188_v12 = vmul.f32 %v8482_v29, %v12372_v27  ;;  %v12455_v15 = vsub.f32 %v3515_v43, %v12194_v22  ;;  %vm5182_vm5 = vcmp.eq.f32.partialorder %v12319_v7, inf  ;;  %v15542_v22 = vld [vmem:[#allocation79_spill] sm:$0xff]  ;;  %v15543_v43 = vld [vmem:[#allocation212_spill] sm:$0xff] }
 0x5fb   : > { %15537 = vst [vmem:[#allocation199_spill] sm:$0xff] %v12423_v20  ;;  %v4799_v13 = vmul.f32 %v3383_v45, %v3383_v45  ;;  %v4831_v52 = vmul.f32 %v12423_v20, %v12423_v20  ;;  %8041 = vmatmul.msk.f32.gmra.mxu2 %vm3588_vm10, %v3383_v45  ;;  %v5472_v17 = vpop.f32.mrf.mxu3  ;;  %8483 = vrsqrt.f32 %v12420_v60  ;;  %v5185_v11 = vand.u32 2147483648, %v12319_v7  ;;  %v15541_v45 = vld [vmem:[#allocation149_spill] sm:$0xff] }
 0x5fc   : > { %v12448_v50 = vadd.f32 %v5472_v17, %v11860_v44  ;;  %v5181_v33 = vmul.f32 %v5180_v42, %v12319_v7  ;;  %v5189_v59 = vmul.f32 %v8482_v29, %v5188_v12  ;;  %15538 = vst [vmem:[#allocation67_spill] sm:$0xff] %v12452_v47  ;;  %vm5184_vm6 = vcmp.eq.f32.partialorder %v12319_v7, 0.0  ;;  %v15544_v17 = vld [vmem:[#allocation80_spill] sm:$0xff] }
 0x5fd   : > { %15539 = vst [vmem:[#allocation10_spill] sm:$0xff] %v12455_v15  ;;  %v4863_v6 = vadd.f32 %v4831_v52, %v4799_v13  ;;  %v3516_v42 = vmul.f32 %v15543_v43, %v15542_v22  ;;  %vm5194_vm7 = vcmp.eq.f32.partialorder %v12372_v27, inf  ;;  %vm5196_vm8 = vcmp.eq.f32.partialorder %v12372_v27, 0.0 }
 0x5fe   : > { %v8246_v28 = vmul.f32 -1.442695, %v12448_v50  ;;  %v3266_v0 = vpop.f32.mrf.mxu1  ;;  %v12459_v54 = vpop.f32.mrf.mxu2  ;;  %v5183_v44 = vsel %vm5182_vm5, %v12319_v7, %v5181_v33  ;;  %v5190_v40 = vmul.f32 0.5, %v5189_v59  ;;  %v3517_v33 = vmul.f32 %v15545_v61, %v15544_v17 }
 0x5ff   : > { %15540 = vst [vmem:[#allocation200_spill] sm:$0xff] %v12459_v54  ;;  %v4927_v41 = vadd.f32 %v4895_v5, %v4863_v6  ;;  %v3320_v63 = vmul.f32 %v3266_v0, %v15541_v45  ;;  %v3448_v55 = vmul.f32 %v3266_v0, %v15523_v51  ;;  %v5186_v12 = vsel %vm5184_vm6, %v5185_v11, %v5183_v44  ;;  %v15547_v11 = vld [vmem:[#allocation81_spill] sm:$0xff]  ;;  %v15556_v54 = vld [vmem:[#allocation114_spill] sm:$0xff] }
 0x600   : > { %8485 = vpow2.f32 %v8246_v28  ;;  %v5191_v13 = vsub.f32 1.5, %v5190_v40  ;;  %v12478_v51 = vmul.f32 %v12452_v47, %v12452_v47  ;;  %v12482_v7 = vmul.f32 %v15536_v9, %v11898_v35  ;;  %v15548_v40 = vld [vmem:[#allocation214_spill] sm:$0xff] }
 0x601   : > { %v8484_v52 = vpop.eup %8483  ;;  %v12470_v34 = vmax.f32 %v4927_v41, 1e-08  ;;  %v3384_v59 = vsub.f32 %v3320_v63, %v3352_v38  ;;  %v12473_v5 = vsub.f32 %v12277_v62, %v3448_v55  ;;  %8231 = vmatmul.msk.f32.gmra.mxu3 %vm3588_vm10, %v5186_v12  ;;  %v12487_v0 = vmul.f32 %v12455_v15, %v12455_v15  ;;  %v15549_v9 = vld [vmem:[#allocation54_spill] sm:$0xff]  ;;  %v6240_v63 = vld [vmem:[%s14782_s11] sm:$0xff]  ;;  %v15550_v55 = vld [vmem:[#allocation112_spill] sm:$0xff] }
 0x602   : > { %v5192_v6 = vmul.f32 %v8482_v29, %v5191_v13  ;;  %v5200_v28 = vmul.f32 %v8484_v52, %v12420_v60  ;;  %v3518_v35 = vmul.f32 %v15548_v40, %v15547_v11  ;;  %v12503_v12 = vsub.f32 %v3516_v42, %v15550_v55  ;;  %v15552_v13 = vld [vmem:[#allocation129_spill] sm:$0xff]  ;;  %6359 = vmatpush.msra.mxu1 %v6240_v63 }
 0x603   : > { %15546 = vst [vmem:[#allocation201_spill] sm:$0xff] %v12473_v5  ;;  %v4800_v38 = vmul.f32 %v3384_v59, %v3384_v59  ;;  %v4832_v62 = vmul.f32 %v12473_v5, %v12473_v5  ;;  %8042 = vmatmul.msk.f32.gmra.mxu2 %vm3588_vm10, %v3384_v59  ;;  %v5475_v44 = vpop.f32.mrf.mxu3  ;;  %8487 = vrsqrt.f32 %v12470_v34  ;;  %v12506_v59 = vsub.f32 %v3517_v33, %v15552_v13  ;;  %v15555_v55 = vld [vmem:[#allocation153_spill] sm:$0xff] }
 0x604   : > { %v12496_v29 = vadd.f32 %v5475_v44, %v15549_v9  ;;  %v5193_v41 = vmul.f32 %v5192_v6, %v12372_v27  ;;  %v5201_v45 = vmul.f32 %v8484_v52, %v5200_v28  ;;  %15551 = vst [vmem:[#allocation202_spill] sm:$0xff] %v12503_v12  ;;  %v5197_v15 = vand.u32 2147483648, %v12372_v27 }
 0x605   : > { %15553 = vst [vmem:[#allocation204_spill] sm:$0xff] %v12506_v59  ;;  %v4864_v9 = vadd.f32 %v4832_v62, %v4800_v38  ;;  %v12520_v63 = vsub.f32 %v3518_v35, %v15556_v54  ;;  %vm5206_vm9 = vcmp.eq.f32.partialorder %v12420_v60, inf  ;;  %vm5208_vm11 = vcmp.eq.f32.partialorder %v12420_v60, 0.0 }
 0x606   : > { %v8486_v44 = vpop.eup %8485  ;;  %v8247_v6 = vmul.f32 -1.442695, %v12496_v29  ;;  %v3269_v28 = vpop.f32.mrf.mxu1  ;;  %v5195_v5 = vsel %vm5194_vm7, %v12372_v27, %v5193_v41  ;;  %v5202_v20 = vmul.f32 0.5, %v5201_v45  ;;  %v12526_v41 = vmul.f32 %v15543_v43, %v11967_v16  ;;  %v15558_v45 = vld [vmem:[#allocation82_spill] sm:$0xff] }
 0x607   : > { %v12511_v47 = vpop.f32.mrf.mxu2  ;;  %v12514_v42 = vadd.f32 1.0, %v8486_v44  ;;  %v3321_v33 = vmul.f32 %v3269_v28, %v15555_v55  ;;  %v3449_v13 = vmul.f32 %v3269_v28, %v15527_v23  ;;  %15557 = vst [vmem:[#allocation208_spill] sm:$0xff] %v12520_v63  ;;  %v5198_v38 = vsel %vm5196_vm8, %v5197_v15, %v5195_v5  ;;  %v15559_v44 = vld [vmem:[#allocation215_spill] sm:$0xff]  ;;  %v15560_v55 = vld [vmem:[#allocation84_spill] sm:$0xff] }
 0x608   : > { %15554 = vst [vmem:[#allocation206_spill] sm:$0xff] %v12511_v47  ;;  %8489 = vpow2.f32 %v8247_v6  ;;  %v5203_v62 = vsub.f32 1.5, %v5202_v20  ;;  %v3519_v47 = vmul.f32 %v15559_v44, %v15558_v45  ;;  %v3520_v23 = vmul.f32 %v15561_v31, %v15560_v55  ;;  %v15566_v28 = vld [vmem:[#allocation132_spill] sm:$0xff] }
 0x609   : > { %v12522_v14 = vpop.eup %8487  ;;  %8491 = vrcp.f32 %v12514_v42  ;;  %8232 = vmatmul.msk.f32.gmra.mxu3 %vm3588_vm10, %v5198_v38  ;;  %v4928_v27 = vadd.f32 %v12428_v8, %v4864_v9  ;;  %v3385_v20 = vsub.f32 %v3321_v33, %v12432_v2  ;;  %v12537_v15 = vsub.f32 %v12285_v25, %v3449_v13  ;;  %v15564_v9 = vld [vmem:[#allocation116_spill] sm:$0xff]  ;;  %v15568_v38 = vld [vmem:[#allocation86_spill] sm:$0xff] }
 0x60a   : > { %v5204_v54 = vmul.f32 %v8484_v52, %v5203_v62  ;;  %v12541_v16 = vmul.f32 %v12503_v12, %v12503_v12  ;;  %v12545_v43 = vmul.f32 %v15545_v61, %v12022_v26  ;;  %v12549_v5 = vmul.f32 %v12506_v59, %v12506_v59  ;;  %v15563_v26 = vld [vmem:[#allocation194_spill] sm:$0xff]  ;;  %v15569_v62 = vld [vmem:[#allocation216_spill] sm:$0xff] }
 0x60b   : > { %15562 = vst [vmem:[#allocation83_spill] sm:$0xff] %v12537_v15  ;;  %v5478_v35 = vpop.f32.mrf.mxu3  ;;  %v5212_v8 = vmul.f32 %v12522_v14, %v12470_v34  ;;  %v12555_v25 = vmul.f32 %v15548_v40, %v12079_v19  ;;  %v12559_v2 = vmul.f32 %v12520_v63, %v12520_v63  ;;  %8043 = vmatmul.msk.f32.gmra.mxu2 %vm3588_vm10, %v3385_v20  ;;  %v12576_v59 = vmax.f32 %v4928_v27, 1e-08 }
 0x60c   : > { %v12563_v61 = vadd.f32 %v5478_v35, %v15563_v26  ;;  %v5205_v52 = vmul.f32 %v5204_v54, %v12420_v60  ;;  %v12567_v6 = vsub.f32 %v3519_v47, %v15564_v9  ;;  %v12570_v33 = vsub.f32 %v3520_v23, %v15566_v28 }
 0x60d   : > { %v4801_v13 = vmul.f32 %v3385_v20, %v3385_v20  ;;  %v4833_v19 = vmul.f32 %v12537_v15, %v12537_v15  ;;  %v3521_v63 = vmul.f32 %v15569_v62, %v15568_v38  ;;  %v15571_v20 = vld [vmem:[#allocation156_spill] sm:$0xff]  ;;  %v5213_v28 = vmul.f32 %v12522_v14, %v5212_v8 }
 0x60e   : > { %15565 = vst [vmem:[#allocation68_spill] sm:$0xff] %v12567_v6  ;;  %v8490_v40 = vpop.eup %8489  ;;  %v8248_v35 = vmul.f32 -1.442695, %v12563_v61  ;;  %v3272_v26 = vpop.f32.mrf.mxu1  ;;  %v5207_v15 = vsel %vm5206_vm9, %v12420_v60, %v5205_v52  ;;  %v12598_v8 = vmul.f32 %v15559_v44, %v12150_v56  ;;  %v12606_v52 = vmul.f32 %v15561_v31, %v12225_v58  ;;  %v15572_v58 = vld [vmem:[#allocation176_spill] sm:$0xff] }
 0x60f   : > { %15567 = vst [vmem:[#allocation12_spill] sm:$0xff] %v12570_v33  ;;  %v12579_v54 = vpop.f32.mrf.mxu2  ;;  %v8492_v47 = vpop.eup %8491  ;;  %v12582_v23 = vadd.f32 1.0, %v8490_v40  ;;  %v3322_v9 = vmul.f32 %v3272_v26, %v15571_v20  ;;  %v3450_v27 = vmul.f32 %v3272_v26, %v15533_v48  ;;  %v4865_v39 = vadd.f32 %v4833_v19, %v4801_v13 }
 0x610   : > { %15570 = vst [vmem:[#allocation51_spill] sm:$0xff] %v12579_v54  ;;  %v5729_v12 = vmul.f32 %v8492_v47, %v12514_v42  ;;  %8493 = vpow2.f32 %v8248_v35  ;;  %v5737_v54 = vand.u32 2147483647, %v12514_v42  ;;  %v5209_v40 = vand.u32 2147483648, %v12420_v60 }
 0x611   : > { %8495 = vrcp.f32 %v12582_v23  ;;  %v5739_v20 = vand.u32 2147483648, %v12514_v42  ;;  %v3386_v36 = vsub.f32 %v3322_v9, %v12445_v10  ;;  %v12602_v48 = vmul.f32 %v12567_v6, %v12567_v6 }
 0x612   : > { %v5730_v53 = vsub.f32 1.0, %v5729_v12  ;;  %8497 = vrsqrt.f32 %v12576_v59  ;;  %v5210_v12 = vsel %vm5208_vm11, %v5209_v40, %v5207_v15  ;;  %vm5734_vm12 = vweird.f32 %v8492_v47  ;;  %v15574_v15 = vld [vmem:[#allocation42_spill] sm:$0xff] }
 0x613   : > { %v5481_v13 = vpop.f32.mrf.mxu3  ;;  %v12611_v10 = vsub.f32 %v12289_v57, %v3450_v27  ;;  %8233 = vmatmul.msk.f32.gmra.mxu3 %vm3588_vm10, %v5210_v12  ;;  %8044 = vmatmul.msk.f32.gmra.mxu2 %vm3588_vm10, %v3386_v36  ;;  %v5214_v56 = vmul.f32 0.5, %v5213_v28  ;;  %v12617_v44 = vmul.f32 %v12570_v33, %v12570_v33  ;;  %v12620_v31 = vsub.f32 %v3521_v63, %v15572_v58  ;;  %v15577_v12 = vld [vmem:[#allocation160_spill] sm:$0xff] }
 0x614   : > { %v5731_v19 = vmul.f32 %v8492_v47, %v5730_v53  ;;  %v4929_v60 = vadd.f32 %v12437_v18, %v4865_v39  ;;  %v12624_v53 = vadd.f32 %v5481_v13, %v15574_v15  ;;  %vm5733_vm13 = vweird.f32 %v12514_v42 }
 0x615   : > { %15573 = vst [vmem:[#allocation69_spill] sm:$0xff] %v12620_v31  ;;  %vm12627_vm14 = vcmp.eq.f32.partialorder %v5737_v54, 8.507059e+37  ;;  %v5740_v9 = vor.u32 1.1754944e-38, %v5739_v20  ;;  %vm5735_vm15 = vmor %vm5733_vm13, %vm5734_vm12  ;;  %v4802_v18 = vmul.f32 %v3386_v36, %v3386_v36  ;;  %v4834_v20 = vmul.f32 %v12611_v10, %v12611_v10 }
 0x616   : > { %v8494_v35 = vpop.eup %8493  ;;  %v5732_v57 = vadd.f32 %v8492_v47, %v5731_v19  ;;  %v3275_v28 = vpop.f32.mrf.mxu1  ;;  %v8249_v40 = vmul.f32 -1.442695, %v12624_v53  ;;  %v5215_v58 = vsub.f32 1.5, %v5214_v56  ;;  %v12651_v15 = vmax.f32 %v4929_v60, 1e-08 }
 0x617   : > { %v12631_v27 = vpop.f32.mrf.mxu2  ;;  %v8496_v63 = vpop.eup %8495  ;;  %v12634_v39 = vadd.f32 1.0, %v8494_v35  ;;  %v3323_v13 = vmul.f32 %v3275_v28, %v15577_v12  ;;  %vm5218_vm1 = vcmp.eq.f32.partialorder %v12470_v34, inf  ;;  %v5752_v56 = vand.u32 2147483647, %v12582_v23 }
 0x618   : > { %v12638_v42 = vpop.eup %8497  ;;  %v5736_v54 = vsel %vm5735_vm15, %v8492_v47, %v5732_v57  ;;  %v5744_v19 = vmul.f32 %v8496_v63, %v12582_v23  ;;  %v5754_v57 = vand.u32 2147483648, %v12582_v23  ;;  %vm5220_vm2 = vcmp.eq.f32.partialorder %v12470_v34, 0.0 }
 0x619   : > { %v5741_v36 = vsel %vm12627_vm14, %v5740_v9, %v5736_v54  ;;  %8499 = vrcp.f32 %v12634_v39  ;;  %v12659_v12 = vsub.f32 %v3323_v13, %v12482_v7  ;;  %v5224_v60 = vmul.f32 %v12638_v42, %v12576_v59 }
 0x61a   : > { %v6208_v47 = vmul.f32 %v5741_v36, %v12448_v50  ;;  %v5745_v35 = vsub.f32 1.0, %v5744_v19  ;;  %8501 = vpow2.f32 %v8249_v40  ;;  %vm5749_vm4 = vweird.f32 %v8496_v63  ;;  %v15578_v40 = vld [vmem:[#allocation196_spill] sm:$0xff] }
 0x61b   : > { %v5484_v26 = vpop.f32.mrf.mxu3  ;;  %v4866_v50 = vadd.f32 %v4834_v20, %v4802_v18  ;;  %v5216_v54 = vmul.f32 %v12522_v14, %v5215_v58  ;;  %vm5748_vm5 = vweird.f32 %v12582_v23  ;;  %v5221_v7 = vand.u32 2147483648, %v12470_v34  ;;  %8045 = vmatmul.msk.f32.gmra.mxu2 %vm3588_vm10, %v12659_v12 }
 0x61c   : > { %7065 = vst.msk [vmem:[%s12647_s29] sm:$0xff] %vm2439_vm3, %v6208_v47  ;;  %v5746_v9 = vmul.f32 %v8496_v63, %v5745_v35  ;;  %8278 = vmatmul.msk.f32.vlgmr.msra.gmra.mxu1 %vm2439_vm3, %v6208_v47  ;;  %v12673_v13 = vadd.f32 %v5484_v26, %v15578_v40  ;;  %8503 = vrsqrt.f32 %v12651_v15  ;;  %vm12676_vm6 = vcmp.eq.f32.partialorder %v5752_v56, 8.507059e+37  ;;  %vm5750_vm7 = vmor %vm5748_vm5, %vm5749_vm4  ;;  %v15581_v26 = vld [vmem:[#allocation163_spill] sm:$0xff] }
 0x61d   : > { %v5755_v14 = vor.u32 1.1754944e-38, %v5754_v57  ;;  %v5217_v18 = vmul.f32 %v5216_v54, %v12470_v34  ;;  %v3451_v47 = vmul.f32 %v3275_v28, %v15535_v46  ;;  %v5225_v56 = vmul.f32 %v12638_v42, %v5224_v60 }
 0x61e   : > { %v5747_v19 = vadd.f32 %v8496_v63, %v5746_v9  ;;  %v3278_v20 = vpop.f32.mrf.mxu1  ;;  %v8250_v35 = vmul.f32 -1.442695, %v12673_v13  ;;  %v4930_v57 = vadd.f32 %v12478_v51, %v4866_v50  ;;  %v5767_v28 = vand.u32 2147483647, %v12634_v39 }
 0x61f   : > { %v12681_v23 = vpop.f32.mrf.mxu2  ;;  %v8500_v58 = vpop.eup %8499  ;;  %v3324_v40 = vmul.f32 %v3278_v20, %v15581_v26  ;;  %v5219_v54 = vsel %vm5218_vm1, %v12470_v34, %v5217_v18  ;;  %v12707_v36 = vmul.f32 %v15569_v62, %v12292_v49  ;;  %v12711_v34 = vmul.f32 %v12620_v31, %v12620_v31 }
 0x620   : > { %v5751_v9 = vsel %vm5750_vm7, %v8496_v63, %v5747_v19  ;;  %v5759_v33 = vmul.f32 %v8500_v58, %v12634_v39  ;;  %v8502_v6 = vpop.eup %8501  ;;  %v5222_v26 = vsel %vm5220_vm2, %v5221_v7, %v5219_v54  ;;  %8505 = vpow2.f32 %v8250_v35 }
 0x621   : > { %v5756_v46 = vsel %vm12676_vm6, %v5755_v14, %v5751_v9  ;;  %v12699_v19 = vadd.f32 1.0, %v8502_v6  ;;  %8234 = vmatmul.msk.f32.gmra.mxu3 %vm3588_vm10, %v5222_v26  ;;  %v3388_v51 = vsub.f32 %v3324_v40, %v12526_v41  ;;  %v5769_v7 = vand.u32 2147483648, %v12634_v39  ;;  %v15584_v40 = vld [vmem:[#allocation162_spill] sm:$0xff] }
 0x622   : > { %v6209_v63 = vmul.f32 %v5756_v46, %v12496_v29  ;;  %v5760_v60 = vsub.f32 1.0, %v5759_v33  ;;  %v12703_v50 = vpop.eup %8503  ;;  %v5226_v29 = vmul.f32 0.5, %v5225_v56  ;;  %vm5764_vm8 = vweird.f32 %v8500_v58 }
 0x623   : > { %v5487_v33 = vpop.f32.mrf.mxu3  ;;  %8507 = vrcp.f32 %v12699_v19  ;;  %v12718_v41 = vsub.f32 %v12310_v24, %v3451_v47  ;;  %vm5763_vm9 = vweird.f32 %v12634_v39  ;;  %vm12722_vm11 = vcmp.eq.f32.partialorder %v5767_v28, 8.507059e+37  ;;  %8046 = vmatmul.msk.f32.gmra.mxu2 %vm3588_vm10, %v3388_v51  ;;  %v15585_v28 = vld [vmem:[#allocation167_spill] sm:$0xff] }
 0x624   : > { %7066 = vst.msk [vmem:[%s12647_s29 + $0x8] sm:$0xff] %vm2439_vm3, %v6209_v63  ;;  %v5761_v6 = vmul.f32 %v8500_v58, %v5760_v60  ;;  %8279 = vmatmul.msk.f32.gmra.mxu1 %vm2439_vm3, %v6209_v63  ;;  %v12726_v62 = vmax.f32 %v4930_v57, 1e-08  ;;  %v5227_v14 = vsub.f32 1.5, %v5226_v29  ;;  %v3452_v35 = vmul.f32 %v3278_v20, %v15542_v22  ;;  %vm5765_vm12 = vmor %vm5763_vm9, %vm5764_vm8 }
 0x625   : > { %v12731_v56 = vadd.f32 %v5487_v33, %v15584_v40  ;;  %v5236_v39 = vmul.f32 %v12703_v50, %v12651_v15  ;;  %v5770_v57 = vor.u32 1.1754944e-38, %v5769_v7  ;;  %v4803_v54 = vmul.f32 %v12659_v12, %v12659_v12 }
 0x626   : > { %v5762_v18 = vadd.f32 %v8500_v58, %v5761_v6  ;;  %v3281_v24 = vpop.f32.mrf.mxu1  ;;  %v8506_v9 = vpop.eup %8505  ;;  %v5228_v46 = vmul.f32 %v12638_v42, %v5227_v14  ;;  %v4835_v26 = vmul.f32 %v12718_v41, %v12718_v41  ;;  %8509 = vrsqrt.f32 %v12726_v62 }
 0x627   : > { %v12733_v47 = vpop.f32.mrf.mxu2  ;;  %v3325_v22 = vmul.f32 %v3281_v24, %v15585_v28  ;;  %v12744_v63 = vadd.f32 1.0, %v8506_v9  ;;  %v8251_v60 = vmul.f32 -1.442695, %v12731_v56  ;;  %v12757_v33 = vsub.f32 %v12314_v37, %v3452_v35  ;;  %v15587_v28 = vld [vmem:[#allocation57_spill] sm:$0xff] }
 0x628   : > { %v5766_v20 = vsel %vm5765_vm12, %v8500_v58, %v5762_v18  ;;  %v5229_v7 = vmul.f32 %v5228_v46, %v12576_v59  ;;  %v5237_v6 = vmul.f32 %v12703_v50, %v5236_v39  ;;  %vm5230_vm13 = vcmp.eq.f32.partialorder %v12576_v59, inf }
 0x629   : > { %v5771_v29 = vsel %vm12722_vm11, %v5770_v57, %v5766_v20  ;;  %v12751_v12 = vsub.f32 %v3325_v22, %v12545_v43  ;;  %v8508_v42 = vpop.eup %8507  ;;  %8511 = vrcp.f32 %v12744_v63  ;;  %15586 = vst [vmem:[#allocation14_spill] sm:$0xff] %v12757_v33  ;;  %vm5232_vm14 = vcmp.eq.f32.partialorder %v12576_v59, 0.0 }
 0x62a   : > { %v6210_v58 = vmul.f32 %v5771_v29, %v12563_v61  ;;  %v5774_v49 = vmul.f32 %v8508_v42, %v12699_v19  ;;  %v5233_v43 = vand.u32 2147483648, %v12576_v59  ;;  %v5782_v61 = vand.u32 2147483647, %v12699_v19  ;;  %v15588_v29 = vld [vmem:[#allocation170_spill] sm:$0xff] }
 0x62b   : > { %v5490_v14 = vpop.f32.mrf.mxu3  ;;  %v5231_v18 = vsel %vm5230_vm13, %v12576_v59, %v5229_v7  ;;  %8513 = vpow2.f32 %v8251_v60  ;;  %v5245_v37 = vand.u32 2147483648, %v12651_v15  ;;  %v5784_v40 = vand.u32 2147483648, %v12699_v19  ;;  %8047 = vmatmul.msk.f32.gmra.mxu2 %vm3588_vm10, %v12751_v12 }
 0x62c   : > { %7067 = vst.msk [vmem:[%s12647_s29 + $0x10] sm:$0xff] %vm2439_vm3, %v6210_v58  ;;  %8280 = vmatmul.msk.f32.gmra.mxu1 %vm2439_vm3, %v6210_v58  ;;  %v5775_v35 = vsub.f32 1.0, %v5774_v49  ;;  %v4867_v39 = vadd.f32 %v4835_v26, %v4803_v54  ;;  %v5234_v9 = vsel %vm5232_vm14, %v5233_v43, %v5231_v18  ;;  %vm5242_vm15 = vcmp.eq.f32.partialorder %v12651_v15, inf  ;;  %v12782_v54 = vpop.eup %8509 }
 0x62d   : > { %v4804_v57 = vmul.f32 %v3388_v51, %v3388_v51  ;;  %v4836_v46 = vmul.f32 %v12757_v33, %v12757_v33  ;;  %8235 = vmatmul.msk.f32.gmra.mxu3 %vm3588_vm10, %v5234_v9  ;;  %v5238_v59 = vmul.f32 0.5, %v5237_v6  ;;  %v12778_v22 = vadd.f32 %v5490_v14, %v15587_v28 }
 0x62e   : > { %v3284_v20 = vpop.f32.mrf.mxu1  ;;  %v5776_v26 = vmul.f32 %v8508_v42, %v5775_v35  ;;  %vm5778_vm1 = vweird.f32 %v12699_v19  ;;  %vm5779_vm2 = vweird.f32 %v8508_v42  ;;  %vm12786_vm4 = vcmp.eq.f32.partialorder %v5782_v61, 8.507059e+37 }
 0x62f   : > { %v12780_v60 = vpop.f32.mrf.mxu2  ;;  %v3326_v51 = vmul.f32 %v3284_v20, %v15588_v29  ;;  %v8512_v7 = vpop.eup %8511  ;;  %v3453_v6 = vmul.f32 %v3281_v24, %v15544_v17  ;;  %v5239_v49 = vsub.f32 1.5, %v5238_v59  ;;  %v8252_v43 = vmul.f32 -1.442695, %v12778_v22  ;;  %vm5780_vm5 = vmor %vm5778_vm1, %vm5779_vm2 }
 0x630   : > { %v5777_v14 = vadd.f32 %v8508_v42, %v5776_v26  ;;  %v5785_v18 = vor.u32 1.1754944e-38, %v5784_v40  ;;  %v5789_v9 = vmul.f32 %v8512_v7, %v12744_v63  ;;  %v5797_v28 = vand.u32 2147483647, %v12744_v63 }
 0x631   : > { %v3390_v35 = vsub.f32 %v3326_v51, %v12555_v25  ;;  %v8514_v19 = vpop.eup %8513  ;;  %v4868_v29 = vadd.f32 %v4836_v46, %v4804_v57  ;;  %v5240_v61 = vmul.f32 %v12703_v50, %v5239_v49  ;;  %8515 = vpow2.f32 %v8252_v43 }
 0x632   : > { %v5781_v31 = vsel %vm5780_vm5, %v8508_v42, %v5777_v14  ;;  %v5790_v33 = vsub.f32 1.0, %v5789_v9  ;;  %v12796_v17 = vadd.f32 1.0, %v8514_v19  ;;  %v5248_v24 = vmul.f32 %v12782_v54, %v12726_v62  ;;  %v15592_v9 = vld [vmem:[#allocation174_spill] sm:$0xff] }
 0x633   : > { %v5493_v40 = vpop.f32.mrf.mxu3  ;;  %v5786_v25 = vsel %vm12786_vm4, %v5785_v18, %v5781_v31  ;;  %v5799_v59 = vand.u32 2147483648, %v12744_v63  ;;  %v12804_v26 = vsub.f32 %v12326_v1, %v3453_v6  ;;  %v5241_v50 = vmul.f32 %v5240_v61, %v12651_v15  ;;  %8048 = vmatmul.msk.f32.gmra.mxu2 %vm3588_vm10, %v3390_v35  ;;  %v15591_v18 = vld [vmem:[#allocation34_spill] sm:$0xff] }
 0x634   : > { %v6211_v42 = vmul.f32 %v5786_v25, %v12624_v53  ;;  %v5791_v57 = vmul.f32 %v8512_v7, %v5790_v33  ;;  %vm5794_vm6 = vweird.f32 %v8512_v7  ;;  %8517 = vrcp.f32 %v12796_v17  ;;  %v15594_v61 = vld [vmem:[#allocation218_spill] sm:$0xff] }
 0x635   : > { %v4931_v46 = vadd.f32 %v12487_v0, %v4867_v39  ;;  %v5243_v31 = vsel %vm5242_vm15, %v12651_v15, %v5241_v50  ;;  %vm5244_vm7 = vcmp.eq.f32.partialorder %v12651_v15, 0.0  ;;  %v3454_v1 = vmul.f32 %v3284_v20, %v15547_v11 }
 0x636   : > { %v3287_v51 = vpop.f32.mrf.mxu1  ;;  %7068 = vst.msk [vmem:[%s12647_s29 + $0x18] sm:$0xff] %vm2439_vm3, %v6211_v42  ;;  %v5792_v53 = vadd.f32 %v8512_v7, %v5791_v57  ;;  %vm5793_vm8 = vweird.f32 %v12744_v63  ;;  %v5246_v33 = vsel %vm5244_vm7, %v5245_v37, %v5243_v31  ;;  %v5249_v6 = vmul.f32 %v12782_v54, %v5248_v24  ;;  %8281 = vmatmul.msk.f32.gmra.mxu1 %vm2439_vm3, %v6211_v42 }
 0x637   : > { %v12816_v58 = vpop.f32.mrf.mxu2  ;;  %v8516_v0 = vpop.eup %8515  ;;  %vm5795_vm9 = vmor %vm5793_vm8, %vm5794_vm6  ;;  %v5800_v39 = vor.u32 1.1754944e-38, %v5799_v59  ;;  %v4932_v15 = vadd.f32 %v12541_v16, %v4868_v29  ;;  %v4805_v11 = vmul.f32 %v12751_v12, %v12751_v12  ;;  %v4837_v20 = vmul.f32 %v12804_v26, %v12804_v26  ;;  %8236 = vmatmul.msk.f32.gmra.mxu3 %vm3588_vm10, %v5246_v33  ;;  %v15593_v29 = vld [vmem:[#allocation88_spill] sm:$0xff] }
 0x638   : > { %v5796_v63 = vsel %vm5795_vm9, %v8512_v7, %v5792_v53  ;;  %vm5798_vm11 = vcmp.eq.f32.partialorder %v5797_v28, 8.507059e+37  ;;  %v12830_v37 = vadd.f32 1.0, %v8516_v0  ;;  %v5250_v49 = vmul.f32 0.5, %v5249_v6 }
 0x639   : > { %v5801_v43 = vsel %vm5798_vm11, %v5800_v39, %v5796_v63  ;;  %v12833_v14 = vsub.f32 %v12330_v32, %v3454_v1  ;;  %v12836_v16 = vadd.f32 %v5493_v40, %v15591_v18  ;;  %v3327_v12 = vmul.f32 %v3287_v51, %v15592_v9 }
 0x63a   : > { %v8518_v19 = vpop.eup %8517  ;;  %v12841_v24 = vmul.f32 %v15594_v61, %v15593_v29  ;;  %v12843_v7 = vmax.f32 %v4931_v46, 1e-08  ;;  %v6212_v28 = vmul.f32 %v5801_v43, %v12673_v13  ;;  %8519 = vrcp.f32 %v12830_v37 }
 0x63b   : > { %v5496_v25 = vpop.f32.mrf.mxu3  ;;  %v12847_v59 = vmax.f32 %v4932_v15, 1e-08  ;;  %v5804_v32 = vmul.f32 %v8518_v19, %v12796_v17  ;;  %v4869_v40 = vadd.f32 %v4837_v20, %v4805_v11  ;;  %v5251_v50 = vsub.f32 1.5, %v5250_v49  ;;  %v15595_v20 = vld [vmem:[#allocation37_spill] sm:$0xff] }
 0x63c   : > { %7069 = vst.msk [vmem:[%s12647_s29 + $0x20] sm:$0xff] %vm2439_vm3, %v6212_v28  ;;  %v5814_v42 = vand.u32 2147483648, %v12796_v17  ;;  %v4806_v57 = vmul.f32 %v3390_v35, %v3390_v35  ;;  %v8253_v31 = vmul.f32 -1.442695, %v12836_v16  ;;  %v3391_v46 = vsub.f32 %v3327_v12, %v12598_v8  ;;  %v15596_v49 = vld [vmem:[#allocation177_spill] sm:$0xff] }
 0x63d   : > { %v5805_v1 = vsub.f32 1.0, %v5804_v32  ;;  %vm5808_vm12 = vweird.f32 %v12796_v17  ;;  %v4838_v13 = vmul.f32 %v12833_v14, %v12833_v14  ;;  %v5252_v53 = vmul.f32 %v12782_v54, %v5251_v50 }
 0x63e   : > { %v3290_v33 = vpop.f32.mrf.mxu1  ;;  %v5812_v0 = vand.u32 2147483647, %v12796_v17  ;;  %vm5254_vm13 = vcmp.eq.f32.partialorder %v12726_v62, inf  ;;  %8521 = vpow2.f32 %v8253_v31  ;;  %v3455_v35 = vmul.f32 %v3287_v51, %v15558_v45  ;;  %8049 = vmatmul.msk.f32.gmra.mxu2 %vm3588_vm10, %v3391_v46  ;;  %8282 = vmatmul.msk.f32.gmra.mxu1 %vm2439_vm3, %v6212_v28 }
 0x63f   : > { %v12859_v6 = vpop.f32.mrf.mxu2  ;;  %v5806_v8 = vmul.f32 %v8518_v19, %v5805_v1  ;;  %vm5809_vm14 = vweird.f32 %v8518_v19  ;;  %v5253_v39 = vmul.f32 %v5252_v53, %v12726_v62  ;;  %8523 = vrsqrt.f32 %v12843_v7 }
 0x640   : > { %v8520_v54 = vpop.eup %8519  ;;  %v5815_v15 = vor.u32 1.1754944e-38, %v5814_v42  ;;  %v5257_v11 = vand.u32 2147483648, %v12726_v62  ;;  %v12870_v63 = vadd.f32 %v5496_v25, %v15595_v20  ;;  %v3328_v43 = vmul.f32 %v3290_v33, %v15596_v49  ;;  %vm5810_vm1 = vmor %vm5808_vm12, %vm5809_vm14 }
 0x641   : > { %v5807_v45 = vadd.f32 %v8518_v19, %v5806_v8  ;;  %v5819_v51 = vmul.f32 %v8520_v54, %v12830_v37  ;;  %v5255_v18 = vsel %vm5254_vm13, %v12726_v62, %v5253_v39  ;;  %vm5256_vm15 = vcmp.eq.f32.partialorder %v12726_v62, 0.0 }
 0x642   : > { %v5258_v9 = vsel %vm5256_vm15, %v5257_v11, %v5255_v18  ;;  %v12881_v12 = vsub.f32 %v12335_v4, %v3455_v35  ;;  %v8254_v28 = vmul.f32 -1.442695, %v12870_v63  ;;  %v12885_v25 = vsub.f32 %v3328_v43, %v12606_v52 }
 0x643   : > { %v5499_v32 = vpop.f32.mrf.mxu3  ;;  %v5811_v50 = vsel %vm5810_vm1, %v8518_v19, %v5807_v45  ;;  %vm5813_vm2 = vcmp.eq.f32.partialorder %v5812_v0, 8.507059e+37  ;;  %v5820_v42 = vsub.f32 1.0, %v5819_v51  ;;  %v4870_v31 = vadd.f32 %v4838_v13, %v4806_v57  ;;  %8237 = vmatmul.msk.f32.gmra.mxu3 %vm3588_vm10, %v5258_v9 }
 0x644   : > { %v8522_v62 = vpop.eup %8521  ;;  %v5816_v17 = vsel %vm5813_vm2, %v5815_v15, %v5811_v50  ;;  %v5827_v1 = vand.u32 2147483647, %v12830_v37  ;;  %v5829_v4 = vand.u32 2147483648, %v12830_v37  ;;  %8525 = vpow2.f32 %v8254_v28 }
 0x645   : > { %v8524_v53 = vpop.eup %8523  ;;  %v6213_v35 = vmul.f32 %v5816_v17, %v12731_v56  ;;  %v5821_v52 = vmul.f32 %v8520_v54, %v5820_v42  ;;  %vm5824_vm4 = vweird.f32 %v8520_v54  ;;  %v12891_v8 = vadd.f32 1.0, %v8522_v62 }
 0x646   : > { %v4807_v19 = vmul.f32 %v3391_v46, %v3391_v46  ;;  %v4839_v57 = vmul.f32 %v12881_v12, %v12881_v12  ;;  %v5260_v13 = vmul.f32 %v8524_v53, %v12843_v7  ;;  %8527 = vrsqrt.f32 %v12847_v59  ;;  %8050 = vmatmul.msk.f32.gmra.mxu2 %vm3588_vm10, %v12885_v25  ;;  %v3293_v49 = vpop.f32.mrf.mxu1 }
 0x647   : > { %v12899_v0 = vpop.f32.mrf.mxu2  ;;  %7070 = vst.msk [vmem:[%s12647_s29 + $0x28] sm:$0xff] %vm2439_vm3, %v6213_v35  ;;  %v4933_v56 = vadd.f32 %v12549_v5, %v4869_v40  ;;  %v5822_v39 = vadd.f32 %v8520_v54, %v5821_v52  ;;  %vm5823_vm5 = vweird.f32 %v12830_v37  ;;  %8529 = vrcp.f32 %v12891_v8  ;;  %8283 = vmatmul.msk.f32.gmra.mxu1 %vm2439_vm3, %v6213_v35  ;;  %v15597_v40 = vld [vmem:[#allocation97_spill] sm:$0xff] }
 0x648   : > { %vm5825_vm6 = vmor %vm5823_vm5, %vm5824_vm4  ;;  %v5830_v46 = vor.u32 1.1754944e-38, %v5829_v4  ;;  %v4934_v15 = vadd.f32 %v12559_v2, %v4870_v31  ;;  %v5261_v11 = vmul.f32 %v8524_v53, %v5260_v13  ;;  %v3456_v20 = vmul.f32 %v3290_v33, %v15560_v55 }
 0x649   : > { %v12911_v43 = vmul.f32 %v15594_v61, %v12362_v3  ;;  %v5826_v5 = vsel %vm5825_vm6, %v8520_v54, %v5822_v39  ;;  %vm5828_vm7 = vcmp.eq.f32.partialorder %v5827_v1, 8.507059e+37  ;;  %v12914_v37 = vadd.f32 %v5499_v32, %v15597_v40 }
 0x64a   : > { %v8526_v45 = vpop.eup %8525  ;;  %v12918_v51 = vsub.f32 %v12841_v24, %v12254_v21  ;;  %v5831_v2 = vsel %vm5828_vm7, %v5830_v46, %v5826_v5  ;;  %v4871_v18 = vadd.f32 %v4839_v57, %v4807_v19  ;;  %v5262_v9 = vmul.f32 0.5, %v5261_v11  ;;  %v15599_v21 = vld [vmem:[#allocation181_spill] sm:$0xff]  ;;  %v15602_v5 = vld [vmem:[#allocation59_spill] sm:$0xff] }
 0x64b   : > { %v12920_v55 = vmax.f32 %v4933_v56, 1e-08  ;;  %v6214_v33 = vmul.f32 %v5831_v2, %v12778_v22  ;;  %v12923_v3 = vadd.f32 1.0, %v8526_v45  ;;  %v8255_v61 = vmul.f32 -1.442695, %v12914_v37  ;;  %v5502_v54 = vpop.f32.mrf.mxu3 }
 0x64c   : > { %15598 = vst [vmem:[#allocation70_spill] sm:$0xff] %v12918_v51  ;;  %v8528_v28 = vpop.eup %8527  ;;  %v12926_v32 = vmax.f32 %v4934_v15, 1e-08  ;;  %v5263_v50 = vsub.f32 1.5, %v5262_v9  ;;  %v12929_v42 = vsub.f32 %v12348_v30, %v3456_v20  ;;  %v3329_v24 = vmul.f32 %v3293_v49, %v15599_v21  ;;  %v15604_v21 = vld [vmem:[#allocation185_spill] sm:$0xff] }
 0x64d   : > { %v8530_v31 = vpop.eup %8529  ;;  %7071 = vst.msk [vmem:[%s12647_s29 + $0x30] sm:$0xff] %vm2439_vm3, %v6214_v33  ;;  %vm5266_vm8 = vcmp.eq.f32.partialorder %v12843_v7, inf  ;;  %vm5268_vm9 = vcmp.eq.f32.partialorder %v12843_v7, 0.0  ;;  %v5269_v22 = vand.u32 2147483648, %v12843_v7  ;;  %8531 = vrcp.f32 %v12923_v3 }
 0x64e   : > { %v5834_v62 = vmul.f32 %v8530_v31, %v12891_v8  ;;  %v5842_v17 = vand.u32 2147483647, %v12891_v8  ;;  %v12941_v30 = vadd.f32 %v12602_v48, %v4871_v18  ;;  %v5264_v1 = vmul.f32 %v8524_v53, %v5263_v50 }
 0x64f   : > { %v5844_v4 = vand.u32 2147483648, %v12891_v8  ;;  %v4808_v35 = vmul.f32 %v12885_v25, %v12885_v25  ;;  %v5272_v52 = vmul.f32 %v8528_v28, %v12847_v59  ;;  %8533 = vpow2.f32 %v8255_v61  ;;  %8284 = vmatmul.msk.f32.gmra.mxu1 %vm2439_vm3, %v6214_v33  ;;  %v12952_v56 = vpop.f32.mrf.mxu2 }
 0x650   : > { %v5835_v19 = vsub.f32 1.0, %v5834_v62  ;;  %v5265_v57 = vmul.f32 %v5264_v1, %v12843_v7  ;;  %v4840_v13 = vmul.f32 %v12929_v42, %v12929_v42  ;;  %v3393_v48 = vsub.f32 %v3329_v24, %v12707_v36  ;;  %v3296_v36 = vpop.f32.mrf.mxu1 }
 0x651   : > { %vm5838_vm11 = vweird.f32 %v12891_v8  ;;  %v5273_v53 = vmul.f32 %v8528_v28, %v5272_v52  ;;  %v3457_v25 = vmul.f32 %v3293_v49, %v15568_v38  ;;  %8535 = vrsqrt.f32 %v12920_v55 }
 0x652   : > { %v5836_v39 = vmul.f32 %v8530_v31, %v5835_v19  ;;  %vm5839_vm12 = vweird.f32 %v8530_v31  ;;  %vm12957_vm13 = vcmp.eq.f32.partialorder %v5842_v17, 8.507059e+37  ;;  %v5267_v15 = vsel %vm5266_vm8, %v12843_v7, %v5265_v57  ;;  %8051 = vmatmul.msk.f32.gmra.mxu2 %vm3588_vm10, %v3393_v48  ;;  %v15603_v7 = vld [vmem:[#allocation190_spill] sm:$0xff] }
 0x653   : > { %vm5278_vm14 = vcmp.eq.f32.partialorder %v12847_v59, inf  ;;  %v8532_v11 = vpop.eup %8531  ;;  %v5845_v20 = vor.u32 1.1754944e-38, %v5844_v4  ;;  %v5270_v38 = vsel %vm5268_vm9, %v5269_v22, %v5267_v15  ;;  %v5274_v49 = vmul.f32 0.5, %v5273_v53  ;;  %vm5840_vm15 = vmor %vm5838_vm11, %vm5839_vm12  ;;  %v5505_v22 = vpop.f32.mrf.mxu3 }
 0x654   : > { %v12969_v40 = vadd.f32 %v5502_v54, %v15602_v5  ;;  %v5837_v45 = vadd.f32 %v8530_v31, %v5836_v39  ;;  %8238 = vmatmul.msk.f32.gmra.mxu3 %vm3588_vm10, %v5270_v38  ;;  %v5849_v2 = vmul.f32 %v8532_v11, %v12923_v3  ;;  %v5857_v18 = vand.u32 2147483647, %v12923_v3 }
 0x655   : > { %v4872_v9 = vadd.f32 %v4840_v13, %v4808_v35  ;;  %v8534_v33 = vpop.eup %8533  ;;  %v5275_v61 = vsub.f32 1.5, %v5274_v49  ;;  %v12978_v50 = vsub.f32 %v15603_v7, %v3457_v25  ;;  %v3330_v24 = vmul.f32 %v3296_v36, %v15604_v21 }
 0x656   : > { %v8256_v54 = vmul.f32 -1.442695, %v12969_v40  ;;  %v5841_v62 = vsel %vm5840_vm15, %v8530_v31, %v5837_v45  ;;  %v5850_v17 = vsub.f32 1.0, %v5849_v2  ;;  %v5859_v1 = vand.u32 2147483648, %v12923_v3 }
 0x657   : > { %v12983_v4 = vadd.f32 1.0, %v8534_v33  ;;  %v8536_v35 = vpop.eup %8535  ;;  %v5846_v8 = vsel %vm12957_vm13, %v5845_v20, %v5841_v62  ;;  %v5276_v52 = vmul.f32 %v8528_v28, %v5275_v61  ;;  %v12988_v19 = vsub.f32 %v3330_v24, %v12911_v43  ;;  %v13001_v39 = vpop.f32.mrf.mxu2  ;;  %v15605_v61 = vld [vmem:[#allocation92_spill] sm:$0xff] }
 0x658   : > { %8537 = vpow2.f32 %v8256_v54  ;;  %v6215_v57 = vmul.f32 %v5846_v8, %v12836_v16  ;;  %v5851_v13 = vmul.f32 %v8532_v11, %v5850_v17  ;;  %vm5854_vm1 = vweird.f32 %v8532_v11 }
 0x659   : > { %8539 = vrcp.f32 %v12983_v4  ;;  %v5277_v31 = vmul.f32 %v5276_v52, %v12847_v59  ;;  %vm5280_vm2 = vcmp.eq.f32.partialorder %v12847_v59, 0.0  ;;  %v4809_v53 = vmul.f32 %v3393_v48, %v3393_v48 }
 0x65a   : > { %v4841_v25 = vmul.f32 %v12978_v50, %v12978_v50  ;;  %7072 = vst.msk [vmem:[%s12647_s29 + $0x38] sm:$0xff] %vm2439_vm3, %v6215_v57  ;;  %v5852_v28 = vadd.f32 %v8532_v11, %v5851_v13  ;;  %vm5853_vm4 = vweird.f32 %v12923_v3  ;;  %v5281_v43 = vand.u32 2147483648, %v12847_v59  ;;  %8052 = vmatmul.msk.f32.gmra.mxu2 %vm3588_vm10, %v12988_v19  ;;  %8285 = vmatmul.msk.f32.gmra.mxu1 %vm2439_vm3, %v6215_v57 }
 0x65b   : > { %v5284_v16 = vmul.f32 %v8536_v35, %v12920_v55  ;;  %vm5855_vm5 = vmor %vm5853_vm4, %vm5854_vm1  ;;  %vm5858_vm6 = vcmp.eq.f32.partialorder %v5857_v18, 8.507059e+37  ;;  %v5860_v46 = vor.u32 1.1754944e-38, %v5859_v1  ;;  %v4936_v15 = vadd.f32 %v12617_v44, %v4872_v9  ;;  %v5508_v54 = vpop.f32.mrf.mxu3 }
 0x65c   : > { %v5279_v48 = vsel %vm5278_vm14, %v12847_v59, %v5277_v31  ;;  %v5856_v3 = vsel %vm5855_vm5, %v8532_v11, %v5852_v28  ;;  %v3458_v49 = vmul.f32 %v3296_v36, %v15593_v29  ;;  %v13015_v44 = vmul.f32 %v12918_v51, %v12918_v51 }
 0x65d   : > { %v5282_v20 = vsel %vm5280_vm2, %v5281_v43, %v5279_v48  ;;  %v5285_v38 = vmul.f32 %v8536_v35, %v5284_v16  ;;  %v5861_v45 = vsel %vm5858_vm6, %v5860_v46, %v5856_v3  ;;  %v4873_v2 = vadd.f32 %v4841_v25, %v4809_v53  ;;  %v15607_v53 = vld [vmem:[#allocation221_spill] sm:$0xff]  ;;  %v15608_v16 = vld [vmem:[#allocation96_spill] sm:$0xff] }
 0x65e   : > { %v8538_v5 = vpop.eup %8537  ;;  %8239 = vmatmul.msk.f32.gmra.mxu3 %vm3588_vm10, %v5282_v20  ;;  %8541 = vrsqrt.f32 %v12926_v32  ;;  %v13020_v11 = vmax.f32 %v12941_v30, 1e-08  ;;  %v6216_v59 = vmul.f32 %v5861_v45, %v12870_v63  ;;  %v13025_v36 = vmax.f32 %v4936_v15, 1e-08  ;;  %v15606_v63 = vld [vmem:[#allocation146_spill] sm:$0xff] }
 0x65f   : > { %v8540_v18 = vpop.eup %8539  ;;  %v5286_v9 = vmul.f32 0.5, %v5285_v38  ;;  %v13023_v29 = vadd.f32 1.0, %v8538_v5  ;;  %vm5290_vm7 = vcmp.eq.f32.partialorder %v12920_v55, inf  ;;  %v13030_v7 = vadd.f32 %v5505_v22, %v15605_v61  ;;  %v13045_v57 = vpop.f32.mrf.mxu2 }
 0x660   : > { %v5864_v33 = vmul.f32 %v8540_v18, %v12983_v4  ;;  %7073 = vst.msk [vmem:[%s12647_s29 + $0x40] sm:$0xff] %vm2439_vm3, %v6216_v59  ;;  %vm5292_vm8 = vcmp.eq.f32.partialorder %v12920_v55, 0.0  ;;  %v13037_v30 = vsub.f32 %v15606_v63, %v3458_v49  ;;  %v5872_v62 = vand.u32 2147483647, %v12983_v4 }
 0x661   : > { %v5287_v21 = vsub.f32 1.5, %v5286_v9  ;;  %8543 = vrcp.f32 %v13023_v29  ;;  %v4937_v17 = vadd.f32 %v12711_v34, %v4873_v2  ;;  %v8257_v1 = vmul.f32 -1.442695, %v13030_v7 }
 0x662   : > { %v5865_v24 = vsub.f32 1.0, %v5864_v33  ;;  %v5874_v22 = vand.u32 2147483648, %v12983_v4  ;;  %v5293_v52 = vand.u32 2147483648, %v12920_v55  ;;  %8545 = vrsqrt.f32 %v13020_v11  ;;  %8053 = vmatmul.msk.f32.gmra.mxu2 %vm3588_vm10, %v15607_v53  ;;  %8286 = vmatmul.msk.f32.gmra.mxu1 %vm2439_vm3, %v6216_v59 }
 0x663   : > { %v5288_v8 = vmul.f32 %v8536_v35, %v5287_v21  ;;  %vm5868_vm9 = vweird.f32 %v12983_v4  ;;  %vm5869_vm11 = vweird.f32 %v8540_v18  ;;  %8547 = vpow2.f32 %v8257_v1 }
 0x664   : > { %v8542_v13 = vpop.eup %8541  ;;  %v5866_v31 = vmul.f32 %v8540_v18, %v5865_v24  ;;  %v4810_v35 = vmul.f32 %v12988_v19, %v12988_v19  ;;  %v4842_v25 = vmul.f32 %v13037_v30, %v13037_v30  ;;  %vm5873_vm12 = vcmp.eq.f32.partialorder %v5872_v62, 8.507059e+37  ;;  %vm5870_vm13 = vmor %vm5868_vm9, %vm5869_vm11  ;;  %v5511_v5 = vpop.f32.mrf.mxu3  ;;  %v15609_v62 = vld [vmem:[#allocation122_spill] sm:$0xff] }
 0x665   : > { %v5289_v34 = vmul.f32 %v5288_v8, %v12920_v55  ;;  %v5296_v28 = vmul.f32 %v8542_v13, %v12926_v32  ;;  %v13057_v4 = vmax.f32 %v4937_v17, 1e-08  ;;  %v13060_v46 = vadd.f32 %v5508_v54, %v15608_v16 }
 0x666   : > { %v5867_v43 = vadd.f32 %v8540_v18, %v5866_v31  ;;  %v5875_v48 = vor.u32 1.1754944e-38, %v5874_v22  ;;  %8549 = vrsqrt.f32 %v13025_v36  ;;  %vm5302_vm14 = vcmp.eq.f32.partialorder %v12926_v32, inf }
 0x667   : > { %v8544_v15 = vpop.eup %8543  ;;  %v5291_v3 = vsel %vm5290_vm7, %v12920_v55, %v5289_v34  ;;  %v5297_v19 = vmul.f32 %v8542_v13, %v5296_v28  ;;  %v4874_v59 = vadd.f32 %v4842_v25, %v4810_v35  ;;  %v8258_v33 = vmul.f32 -1.442695, %v13060_v46  ;;  %v13080_v1 = vpop.f32.mrf.mxu2 }
 0x668   : > { %v5871_v20 = vsel %vm5870_vm13, %v8540_v18, %v5867_v43  ;;  %v5294_v38 = vsel %vm5292_vm8, %v5293_v52, %v5291_v3  ;;  %v5879_v49 = vmul.f32 %v8544_v15, %v13023_v29  ;;  %v8546_v45 = vpop.eup %8545  ;;  %v5889_v55 = vand.u32 2147483648, %v13023_v29  ;;  %v15610_v52 = vld [vmem:[#allocation223_spill] sm:$0xff] }
 0x669   : > { %v5876_v2 = vsel %vm5873_vm12, %v5875_v48, %v5871_v20  ;;  %8240 = vmatmul.msk.f32.gmra.mxu3 %vm3588_vm10, %v5294_v38  ;;  %v5298_v9 = vmul.f32 0.5, %v5297_v19  ;;  %v8548_v61 = vpop.eup %8547  ;;  %v5308_v21 = vmul.f32 %v8546_v45, %v13020_v11  ;;  %8551 = vpow2.f32 %v8258_v33  ;;  %v15611_v33 = vld [vmem:[#allocation119_spill] sm:$0xff] }
 0x66a   : > { %v6217_v18 = vmul.f32 %v5876_v2, %v12914_v37  ;;  %v5880_v54 = vsub.f32 1.0, %v5879_v49  ;;  %v13075_v24 = vadd.f32 1.0, %v8548_v61  ;;  %v13078_v17 = vadd.f32 %v5511_v5, %v15609_v62  ;;  %8054 = vmatmul.msk.f32.gmra.mxu2 %vm3588_vm10, %v15610_v52  ;;  %v15612_v61 = vld [vmem:[#allocation217_spill] sm:$0xff] }
 0x66b   : > { %v5299_v63 = vsub.f32 1.5, %v5298_v9  ;;  %vm5884_vm15 = vweird.f32 %v8544_v15  ;;  %v5887_v37 = vand.u32 2147483647, %v13023_v29  ;;  %v5309_v8 = vmul.f32 %v8546_v45, %v5308_v21  ;;  %v15613_v21 = vld [vmem:[#allocation101_spill] sm:$0xff] }
 0x66c   : > { %7074 = vst.msk [vmem:[%s12647_s29 + $0x48] sm:$0xff] %vm2439_vm3, %v6217_v18  ;;  %v5881_v22 = vmul.f32 %v8544_v15, %v5880_v54  ;;  %8287 = vmatmul.msk.f32.gmra.mxu1 %vm2439_vm3, %v6217_v18  ;;  %v8550_v31 = vpop.eup %8549  ;;  %vm5883_vm1 = vweird.f32 %v13023_v29  ;;  %v5305_v34 = vand.u32 2147483648, %v12926_v32  ;;  %8553 = vrcp.f32 %v13075_v24  ;;  %v5514_v20 = vpop.f32.mrf.mxu3  ;;  %v15614_v62 = vld [vmem:[#allocation225_spill] sm:$0xff] }
 0x66d   : > { %v5300_v53 = vmul.f32 %v8542_v13, %v5299_v63  ;;  %v4938_v25 = vadd.f32 %v13015_v44, %v4874_v59  ;;  %v5310_v28 = vmul.f32 0.5, %v5309_v8  ;;  %v5320_v43 = vmul.f32 %v8550_v31, %v13025_v36  ;;  %vm5885_vm2 = vmor %vm5883_vm1, %vm5884_vm15 }
 0x66e   : > { %v5882_v35 = vadd.f32 %v8544_v15, %v5881_v22  ;;  %v5890_v16 = vor.u32 1.1754944e-38, %v5889_v55  ;;  %v8259_v3 = vmul.f32 -1.442695, %v13078_v17  ;;  %8555 = vrsqrt.f32 %v13057_v4 }
 0x66f   : > { %v5301_v48 = vmul.f32 %v5300_v53, %v12926_v32  ;;  %vm5888_vm4 = vcmp.eq.f32.partialorder %v5887_v37, 8.507059e+37  ;;  %v5311_v13 = vsub.f32 1.5, %v5310_v28  ;;  %v5321_v19 = vmul.f32 %v8550_v31, %v5320_v43  ;;  %v8552_v38 = vpop.eup %8551 }
 0x670   : > { %v5886_v29 = vsel %vm5885_vm2, %v8544_v15, %v5882_v35  ;;  %vm5304_vm5 = vcmp.eq.f32.partialorder %v12926_v32, 0.0  ;;  %8557 = vpow2.f32 %v8259_v3  ;;  %v13101_v9 = vadd.f32 1.0, %v8552_v38  ;;  %v15615_v38 = vld [vmem:[#allocation168_spill] sm:$0xff] }
 0x671   : > { %v5891_v49 = vsel %vm5888_vm4, %v5890_v16, %v5886_v29  ;;  %v5303_v44 = vsel %vm5302_vm14, %v12926_v32, %v5301_v48  ;;  %v5312_v59 = vmul.f32 %v8546_v45, %v5311_v13  ;;  %v2605_v18 = vadd.f32 %v15612_v61, %v15611_v33  ;;  %v13111_v32 = vpop.f32.mrf.mxu2 }
 0x672   : > { %v6218_v5 = vmul.f32 %v5891_v49, %v12969_v40  ;;  %v5306_v2 = vsel %vm5304_vm5, %v5305_v34, %v5303_v44  ;;  %v8554_v15 = vpop.eup %8553  ;;  %v13105_v54 = vmax.f32 %v4938_v25, 1e-08  ;;  %v5322_v55 = vmul.f32 0.5, %v5321_v19  ;;  %8055 = vmatmul.msk.f32.gmra.mxu2 %vm3588_vm10, %v15614_v62 }
 0x673   : > { %8241 = vmatmul.msk.f32.gmra.mxu3 %vm3588_vm10, %v5306_v2  ;;  %v13109_v63 = vadd.f32 %v5514_v20, %v15613_v21  ;;  %v5894_v40 = vmul.f32 %v8554_v15, %v13075_v24  ;;  %v5313_v45 = vmul.f32 %v5312_v59, %v13020_v11  ;;  %vm5314_vm6 = vcmp.eq.f32.partialorder %v13020_v11, inf }
 0x674   : > { %7075 = vst.msk [vmem:[%s12647_s29 + $0x50] sm:$0xff] %vm2439_vm3, %v6218_v5  ;;  %8559 = vrcp.f32 %v13101_v9  ;;  %8288 = vmatmul.msk.f32.gmra.mxu1 %vm2439_vm3, %v6218_v5  ;;  %v8556_v22 = vpop.eup %8555  ;;  %v5902_v37 = vand.u32 2147483647, %v13075_v24  ;;  %vm5316_vm7 = vcmp.eq.f32.partialorder %v13020_v11, 0.0  ;;  %v5317_v8 = vand.u32 2147483648, %v13020_v11  ;;  %v5517_v19 = vpop.f32.mrf.mxu3  ;;  %v15616_v5 = vld [vmem:[#allocation61_spill] sm:$0xff] }
 0x675   : > { %v5323_v52 = vsub.f32 1.5, %v5322_v55  ;;  %v5895_v53 = vsub.f32 1.0, %v5894_v40  ;;  %v5315_v34 = vsel %vm5314_vm6, %v13020_v11, %v5313_v45  ;;  %v5332_v35 = vmul.f32 %v8556_v22, %v13057_v4  ;;  %v13136_v11 = vld [vmem:[%s14781_s10] ss:$0 sm:$0xff]  ;;  %v15617_v45 = vld [vmem:[#allocation226_spill] sm:$0xff] }
 0x676   : > { %v8260_v25 = vmul.f32 -1.442695, %v13109_v63  ;;  %v8558_v28 = vpop.eup %8557  ;;  %vm5899_vm8 = vweird.f32 %v8554_v15  ;;  %v5904_v43 = vand.u32 2147483648, %v13075_v24  ;;  %v5318_v16 = vsel %vm5316_vm7, %v5317_v8, %v5315_v34 }
 0x677   : > { %v5324_v48 = vmul.f32 %v8550_v31, %v5323_v52  ;;  %v5896_v3 = vmul.f32 %v8554_v15, %v5895_v53  ;;  %v13129_v29 = vadd.f32 1.0, %v8558_v28  ;;  %v5333_v13 = vmul.f32 %v8556_v22, %v5332_v35 }
 0x678   : > { %8561 = vpow2.f32 %v8260_v25  ;;  %v2668_v49 = vadd.f32 %v13136_v11, %v15615_v38  ;;  %vm5898_vm9 = vweird.f32 %v13075_v24  ;;  %v2669_v2 = vadd.f32 %v13136_v11, %v15616_v5 }
 0x679   : > { %v5325_v20 = vmul.f32 %v5324_v48, %v13025_v36  ;;  %8563 = vrsqrt.f32 %v13105_v54  ;;  %v5897_v31 = vadd.f32 %v8554_v15, %v5896_v3  ;;  %vm5900_vm11 = vmor %vm5898_vm9, %vm5899_vm8  ;;  %v5905_v59 = vor.u32 1.1754944e-38, %v5904_v43  ;;  %v13148_v61 = vpop.f32.mrf.mxu2 }
 0x67a   : > { %v8560_v44 = vpop.eup %8559  ;;  %8565 = vrcp.f32 %v13129_v29  ;;  %vm5326_vm12 = vcmp.eq.f32.partialorder %v13025_v36, inf  ;;  %v13151_v55 = vadd.f32 %v13136_v11, %v2605_v18  ;;  %vm5903_vm13 = vcmp.eq.f32.partialorder %v5902_v37, 8.507059e+37  ;;  %8056 = vmatmul.msk.f32.gmra.mxu2 %vm3588_vm10, %v15617_v45 }
 0x67b   : > { %8242 = vmatmul.msk.f32.gmra.mxu3 %vm3588_vm10, %v5318_v16  ;;  %v5909_v33 = vmul.f32 %v8560_v44, %v13101_v9  ;;  %v5901_v24 = vsel %vm5900_vm11, %v8554_v15, %v5897_v31  ;;  %v5329_v21 = vand.u32 2147483648, %v13025_v36  ;;  %v5334_v40 = vmul.f32 0.5, %v5333_v13 }
 0x67c   : > { %v5906_v62 = vsel %vm5903_vm13, %v5905_v59, %v5901_v24  ;;  %v5917_v52 = vand.u32 2147483647, %v13101_v9  ;;  %v5327_v53 = vsel %vm5326_vm12, %v13025_v36, %v5325_v20  ;;  %v5919_v18 = vand.u32 2147483648, %v13101_v9 }
 0x67d   : > { %v5910_v8 = vsub.f32 1.0, %v5909_v33  ;;  %v6219_v35 = vmul.f32 %v5906_v62, %v13030_v7  ;;  %v5335_v15 = vsub.f32 1.5, %v5334_v40  ;;  %v13160_v37 = vadd.f32 %v5517_v19, %v2668_v49  ;;  %v5520_v19 = vpop.f32.mrf.mxu3 }
 0x67e   : > { %v8562_v34 = vpop.eup %8561  ;;  %vm5914_vm14 = vweird.f32 %v8560_v44  ;;  %vm5328_vm15 = vcmp.eq.f32.partialorder %v13025_v36, 0.0  ;;  %vm5913_vm1 = vweird.f32 %v13101_v9  ;;  %vm5918_vm4 = vcmp.eq.f32.partialorder %v5917_v52, 8.507059e+37  ;;  %v15620_v52 = vld [vmem:[#allocation220_spill] sm:$0xff] }
 0x67f   : > { %v8564_v25 = vpop.eup %8563  ;;  %v5911_v28 = vmul.f32 %v8560_v44, %v5910_v8  ;;  %v13163_v43 = vadd.f32 1.0, %v8562_v34  ;;  %7076 = vst.msk [vmem:[%s12647_s29 + $0x58] sm:$0xff] %vm2439_vm3, %v6219_v35  ;;  %v5330_v48 = vsel %vm5328_vm15, %v5329_v21, %v5327_v53  ;;  %v5336_v3 = vmul.f32 %v8556_v22, %v5335_v15  ;;  %8289 = vmatmul.msk.f32.gmra.mxu1 %vm2439_vm3, %v6219_v35  ;;  %vm5915_vm2 = vmor %vm5913_vm1, %vm5914_vm14  ;;  %v15618_v21 = vld [vmem:[#allocation47_spill] sm:$0xff]  ;;  %v15619_v8 = vld [vmem:[#allocation121_spill] sm:$0xff] }
 0x680   : > { %v8566_v16 = vpop.eup %8565  ;;  %v5344_v13 = vmul.f32 %v8564_v25, %v13105_v54  ;;  %v8261_v7 = vmul.f32 -1.442695, %v13160_v37  ;;  %v5920_v36 = vor.u32 1.1754944e-38, %v5919_v18  ;;  %vm5338_vm5 = vcmp.eq.f32.partialorder %v13057_v4, inf }
 0x681   : > { %v5912_v20 = vadd.f32 %v8560_v44, %v5911_v28  ;;  %v5924_v38 = vmul.f32 %v8566_v16, %v13129_v29  ;;  %8567 = vrcp.f32 %v13163_v43  ;;  %v5337_v22 = vmul.f32 %v5336_v3, %v13057_v4  ;;  %v13177_v9 = vpop.f32.mrf.mxu2 }
 0x682   : > { %v5345_v5 = vmul.f32 %v8564_v25, %v5344_v13  ;;  %8569 = vpow2.f32 %v8261_v7  ;;  %vm5929_vm6 = vweird.f32 %v8566_v16  ;;  %v5932_v33 = vand.u32 2147483647, %v13129_v29  ;;  %8057 = vmatmul.msk.f32.gmra.mxu2 %vm3588_vm10, %v15618_v21 }
 0x683   : > { %v5916_v49 = vsel %vm5915_vm2, %v8560_v44, %v5912_v20  ;;  %8243 = vmatmul.msk.f32.gmra.mxu3 %vm3588_vm10, %v5330_v48  ;;  %v5925_v31 = vsub.f32 1.0, %v5924_v38  ;;  %v5934_v24 = vand.u32 2147483648, %v13129_v29  ;;  %v5339_v45 = vsel %vm5338_vm5, %v13057_v4, %v5337_v22 }
 0x684   : > { %v5921_v59 = vsel %vm5918_vm4, %v5920_v36, %v5916_v49  ;;  %v5346_v62 = vmul.f32 0.5, %v5345_v5  ;;  %v2608_v53 = vadd.f32 %v15620_v52, %v15619_v8  ;;  %vm5340_vm7 = vcmp.eq.f32.partialorder %v13057_v4, 0.0 }
 0x685   : > { %v6220_v40 = vmul.f32 %v5921_v59, %v13060_v46  ;;  %v5926_v44 = vmul.f32 %v8566_v16, %v5925_v31  ;;  %v5341_v34 = vand.u32 2147483648, %v13057_v4  ;;  %v13189_v35 = vadd.f32 %v5520_v19, %v2669_v2  ;;  %v5523_v4 = vpop.f32.mrf.mxu3  ;;  %v15621_v59 = vld [vmem:[#allocation148_spill] sm:$0xff] }
 0x686   : > { %vm5928_vm8 = vweird.f32 %v13129_v29  ;;  %v5347_v46 = vsub.f32 1.5, %v5346_v62  ;;  %vm5350_vm9 = vcmp.eq.f32.partialorder %v13105_v54, inf  ;;  %v5935_v28 = vor.u32 1.1754944e-38, %v5934_v24 }
 0x687   : > { %v8568_v18 = vpop.eup %8567  ;;  %7077 = vst.msk [vmem:[%s12647_s29 + $0x60] sm:$0xff] %vm2439_vm3, %v6220_v40  ;;  %v5927_v15 = vadd.f32 %v8566_v16, %v5926_v44  ;;  %vm5930_vm11 = vmor %vm5928_vm8, %vm5929_vm6  ;;  %v5342_v48 = vsel %vm5340_vm7, %v5341_v34, %v5339_v45  ;;  %v8262_v13 = vmul.f32 -1.442695, %v13189_v35  ;;  %8290 = vmatmul.msk.f32.gmra.mxu1 %vm2439_vm3, %v6220_v40  ;;  %vm5933_vm12 = vcmp.eq.f32.partialorder %v5932_v33, 8.507059e+37 }
 0x688   : > { %v5939_v3 = vmul.f32 %v8568_v18, %v13163_v43  ;;  %v8570_v2 = vpop.eup %8569  ;;  %v5348_v19 = vmul.f32 %v8564_v25, %v5347_v46  ;;  %v13200_v29 = vadd.f32 %v5523_v4, %v13151_v55  ;;  %v5949_v49 = vand.u32 2147483648, %v13163_v43  ;;  %v15622_v46 = vld [vmem:[#allocation124_spill] sm:$0xff]  ;;  %v15625_v4 = vld [vmem:[#allocation105_spill] sm:$0xff] }
 0x689   : > { %v5931_v7 = vsel %vm5930_vm11, %v8566_v16, %v5927_v15  ;;  %v13202_v36 = vadd.f32 1.0, %v8570_v2  ;;  %8571 = vpow2.f32 %v8262_v13  ;;  %v13209_v25 = vpop.f32.mrf.mxu2  ;;  %vm5944_vm13 = vweird.f32 %v8568_v18 }
 0x68a   : > { %v5936_v20 = vsel %vm5933_vm12, %v5935_v28, %v5931_v7  ;;  %v5940_v38 = vsub.f32 1.0, %v5939_v3  ;;  %v5349_v31 = vmul.f32 %v5348_v19, %v13105_v54  ;;  %v8263_v16 = vmul.f32 -1.442695, %v13200_v29  ;;  %8058 = vmatmul.msk.f32.gmra.mxu2 %vm3588_vm10, %v15621_v59  ;;  %v15623_v28 = vld [vmem:[#allocation43_spill] sm:$0xff] }
 0x68b   : > { %v6221_v22 = vmul.f32 %v5936_v20, %v13078_v17  ;;  %8244 = vmatmul.msk.f32.gmra.mxu3 %vm3588_vm10, %v5342_v48  ;;  %v5947_v5 = vand.u32 2147483647, %v13163_v43  ;;  %8573 = vrcp.f32 %v13202_v36  ;;  %vm5943_vm14 = vweird.f32 %v13163_v43 }
 0x68c   : > { %v5941_v55 = vmul.f32 %v8568_v18, %v5940_v38  ;;  %v5351_v17 = vsel %vm5350_vm9, %v13105_v54, %v5349_v31  ;;  %8575 = vpow2.f32 %v8263_v16  ;;  %v5353_v24 = vand.u32 2147483648, %v13105_v54  ;;  %vm5945_vm15 = vmor %vm5943_vm14, %vm5944_vm13 }
 0x68d   : > { %7078 = vst.msk [vmem:[%s12647_s29 + $0x68] sm:$0xff] %vm2439_vm3, %v6221_v22  ;;  %v5950_v21 = vor.u32 1.1754944e-38, %v5949_v49  ;;  %vm5352_vm1 = vcmp.eq.f32.partialorder %v13105_v54, 0.0  ;;  %v2671_v40 = vadd.f32 %v13136_v11, %v2608_v53  ;;  %vm5948_vm2 = vcmp.eq.f32.partialorder %v5947_v5, 8.507059e+37  ;;  %v5526_v8 = vpop.f32.mrf.mxu3 }
 0x68e   : > { %v5942_v33 = vadd.f32 %v8568_v18, %v5941_v55  ;;  %v5354_v62 = vsel %vm5352_vm1, %v5353_v24, %v5351_v17  ;;  %v2611_v48 = vadd.f32 %v15623_v28, %v15622_v46  ;;  %v5962_v38 = vand.u32 2147483647, %v13202_v36  ;;  %v13255_v55 = vld [vmem:[%s14783_s12] ss:$0 sm:$0xff] }
 0x68f   : > { %v8572_v44 = vpop.eup %8571  ;;  %8291 = vmatmul.msk.f32.gmra.mxu1 %vm2439_vm3, %v6221_v22  ;;  %v13227_v43 = vadd.f32 %v5526_v8, %v2671_v40  ;;  %vm5958_vm5 = vweird.f32 %v13202_v36  ;;  %v15627_v8 = vld [vmem:[#allocation189_spill] sm:$0xff] }
 0x690   : > { %v5946_v45 = vsel %vm5945_vm15, %v8568_v18, %v5942_v33  ;;  %v13225_v34 = vadd.f32 1.0, %v8572_v44  ;;  %v2672_v19 = vadd.f32 %v13136_v11, %v2611_v48  ;;  %vm5963_vm7 = vcmp.eq.f32.partialorder %v5962_v38, 8.507059e+37 }
 0x691   : > { %v5951_v52 = vsel %vm5948_vm2, %v5950_v21, %v5946_v45  ;;  %v8574_v15 = vpop.eup %8573  ;;  %v13235_v3 = vpop.f32.mrf.mxu2  ;;  %v8264_v7 = vmul.f32 -1.442695, %v13227_v43 }
 0x692   : > { %v6222_v54 = vmul.f32 %v5951_v52, %v13109_v63  ;;  %v8576_v53 = vpop.eup %8575  ;;  %v5954_v18 = vmul.f32 %v8574_v15, %v13202_v36  ;;  %8577 = vrcp.f32 %v13225_v34  ;;  %15624 = vst [vmem:[#allocation15_spill] sm:$0xff] %v13235_v3  ;;  %8059 = vmatmul.msk.f32.gmra.mxu2 %vm3588_vm10, %v15625_v4  ;;  %v5964_v63 = vand.u32 2147483648, %v13202_v36 }
 0x693   : > { %8245 = vmatmul.msk.f32.gmra.mxu3 %vm3588_vm10, %v5354_v62  ;;  %v13239_v13 = vadd.f32 1.0, %v8576_v53  ;;  %vm5959_vm4 = vweird.f32 %v8574_v15  ;;  %v5979_v62 = vand.u32 2147483648, %v13225_v34  ;;  %vm5973_vm9 = vweird.f32 %v13225_v34 }
 0x694   : > { %7079 = vst.msk [vmem:[%s12647_s29 + $0x70] sm:$0xff] %vm2439_vm3, %v6222_v54  ;;  %v5955_v2 = vsub.f32 1.0, %v5954_v18  ;;  %vm5960_vm6 = vmor %vm5958_vm5, %vm5959_vm4  ;;  %v5965_v59 = vor.u32 1.1754944e-38, %v5964_v63 }
 0x695   : > { %8579 = vrcp.f32 %v13239_v13  ;;  %v5992_v63 = vand.u32 2147483647, %v13239_v13  ;;  %vm5988_vm14 = vweird.f32 %v13239_v13 }
 0x696   : > { %v5956_v20 = vmul.f32 %v8574_v15, %v5955_v2  ;;  %8581 = vpow2.f32 %v8264_v7  ;;  %v5529_v22 = vpop.f32.mrf.mxu3  ;;  %v5980_v2 = vor.u32 1.1754944e-38, %v5979_v62  ;;  %v5994_v7 = vand.u32 2147483648, %v13239_v13 }
 0x697   : > { %8292 = vmatmul.msk.f32.gmra.mxu1 %vm2439_vm3, %v6222_v54  ;;  %v13250_v16 = vadd.f32 %v5529_v22, %v2672_v19  ;;  %v15628_v19 = vld [vmem:[#allocation127_spill] sm:$0xff]  ;;  %vm5993_vm1 = vcmp.eq.f32.partialorder %v5992_v63, 8.507059e+37  ;;  %v15637_v63 = vld [vmem:[#allocation48_spill] sm:$0xff] }
 0x698   : > { %v8578_v49 = vpop.eup %8577  ;;  %v5957_v31 = vadd.f32 %v8574_v15, %v5956_v20  ;;  %v15629_v20 = vld [vmem:[#allocation45_spill] sm:$0xff] }
 0x699   : > { %v6361_v5 = vpop.f32.mrf.mxu1  ;;  %v5969_v17 = vmul.f32 %v8578_v49, %v13225_v34  ;;  %v8265_v24 = vmul.f32 -1.442695, %v13250_v16  ;;  %v13259_v21 = vpop.f32.mrf.mxu2  ;;  %vm5974_vm8 = vweird.f32 %v8578_v49  ;;  %v2614_v38 = vadd.f32 %v15629_v20, %v15628_v19 }
 0x69a   : > { %v5961_v33 = vsel %vm5960_vm6, %v8574_v15, %v5957_v31  ;;  %15626 = vst [vmem:[#allocation72_spill] sm:$0xff] %v13259_v21  ;;  %v6362_v36 = vadd.f32 %v13255_v55, %v6361_v5  ;;  %8060 = vmatmul.msk.f32.gmra.mxu2 %vm3588_vm10, %v15627_v8  ;;  %v5977_v15 = vand.u32 2147483647, %v13225_v34  ;;  %vm5975_vm11 = vmor %vm5973_vm9, %vm5974_vm8 }
 0x69b   : > { %v8580_v40 = vpop.eup %8579  ;;  %v5966_v44 = vsel %vm5963_vm7, %v5965_v59, %v5961_v33  ;;  %v5970_v45 = vsub.f32 1.0, %v5969_v17  ;;  %8583 = vpow2.f32 %v8265_v24  ;;  %v5995_v33 = vor.u32 1.1754944e-38, %v5994_v7 }
 0x69c   : > { %v8582_v52 = vpop.eup %8581  ;;  %v6223_v46 = vmul.f32 %v5966_v44, %v13160_v37  ;;  %v5984_v28 = vmul.f32 %v8580_v40, %v13239_v13  ;;  %v8310_v53 = vmul.f32 -1.442695, %v6362_v36  ;;  %vm5989_vm12 = vweird.f32 %v8580_v40  ;;  %v15631_v36 = vld [vmem:[#allocation154_spill] sm:$0xff] }
 0x69d   : > { %v5971_v48 = vmul.f32 %v8578_v49, %v5970_v45  ;;  %v13268_v54 = vadd.f32 1.0, %v8582_v52  ;;  %vm5978_vm13 = vcmp.eq.f32.partialorder %v5977_v15, 8.507059e+37  ;;  %vm5990_vm15 = vmor %vm5988_vm14, %vm5989_vm12  ;;  %v2673_v13 = vadd.f32 %v13136_v11, %v2614_v38 }
 0x69e   : > { %7080 = vst.msk [vmem:[%s12647_s29 + $0x78] sm:$0xff] %vm2439_vm3, %v6223_v46  ;;  %v5985_v18 = vsub.f32 1.0, %v5984_v28 }
 0x69f   : > { %v5972_v4 = vadd.f32 %v8578_v49, %v5971_v48  ;;  %8585 = vrcp.f32 %v13268_v54  ;;  %8293 = vmatmul.msk.f32.gmra.mxu1 %vm2439_vm3, %v6223_v46  ;;  %v15632_v48 = vld [vmem:[#allocation130_spill] sm:$0xff]  ;;  %v6009_v20 = vand.u32 2147483648, %v13268_v54  ;;  %vm6003_vm4 = vweird.f32 %v13268_v54 }
 0x6a0   : > { %v5986_v37 = vmul.f32 %v8580_v40, %v5985_v18  ;;  %8587 = vpow2.f32 %v8310_v53  ;;  %v15633_v53 = vld [vmem:[#allocation227_spill] sm:$0xff] }
 0x6a1   : > { %v5976_v22 = vsel %vm5975_vm11, %v8578_v49, %v5972_v4  ;;  %v8584_v34 = vpop.eup %8583  ;;  %v13280_v59 = vpop.f32.mrf.mxu2  ;;  %v2617_v18 = vadd.f32 %v15633_v53, %v15632_v48  ;;  %v15634_v4 = vld [vmem:[#allocation133_spill] sm:$0xff] }
 0x6a2   : > { %v5981_v31 = vsel %vm5978_vm13, %v5980_v2, %v5976_v22  ;;  %v5987_v5 = vadd.f32 %v8580_v40, %v5986_v37  ;;  %15630 = vst [vmem:[#allocation17_spill] sm:$0xff] %v13280_v59  ;;  %v13283_v24 = vadd.f32 1.0, %v8584_v34  ;;  %8061 = vmatmul.msk.f32.gmra.mxu2 %vm3588_vm10, %v15631_v36  ;;  %v15635_v2 = vld [vmem:[#allocation182_spill] sm:$0xff]  ;;  %v15636_v37 = vld [vmem:[#allocation135_spill] sm:$0xff] }
 0x6a3   : > { %v6224_v17 = vmul.f32 %v5981_v31, %v13189_v35  ;;  %v6364_v35 = vpop.f32.mrf.mxu1  ;;  %v2620_v7 = vadd.f32 %v15635_v2, %v15634_v4  ;;  %v2623_v19 = vadd.f32 %v15637_v63, %v15636_v37  ;;  %v6007_v31 = vand.u32 2147483647, %v13268_v54  ;;  %v15640_v36 = vld [vmem:[#allocation151_spill] sm:$0xff] }
 0x6a4   : > { %v5991_v44 = vsel %vm5990_vm15, %v8580_v40, %v5987_v5  ;;  %v5532_v49 = vpop.f32.mrf.mxu3  ;;  %8589 = vrcp.f32 %v13283_v24  ;;  %v6365_v28 = vadd.f32 %v13255_v55, %v6364_v35  ;;  %v6010_v35 = vor.u32 1.1754944e-38, %v6009_v20 }
 0x6a5   : > { %v8586_v45 = vpop.eup %8585  ;;  %7081 = vst.msk [vmem:[%s12647_s29 + $0x80] sm:$0xff] %vm2439_vm3, %v6224_v17  ;;  %v5996_v62 = vsel %vm5993_vm1, %v5995_v33, %v5991_v44  ;;  %v13295_v40 = vadd.f32 %v5532_v49, %v2673_v13  ;;  %v15639_v33 = vld [vmem:[#allocation71_spill] sm:$0xff]  ;;  %v13324_v48 = vadd.f32 %v13136_v11, %v2623_v19  ;;  %vm6008_vm6 = vcmp.eq.f32.partialorder %v6007_v31, 8.507059e+37 }
 0x6a6   : > { %v8588_v8 = vpop.eup %8587  ;;  %v6225_v52 = vmul.f32 %v5996_v62, %v13200_v29  ;;  %v5999_v46 = vmul.f32 %v8586_v45, %v13268_v54  ;;  %v8311_v22 = vmul.f32 -1.442695, %v6365_v28  ;;  %vm6004_vm2 = vweird.f32 %v8586_v45  ;;  %v15641_v49 = vld [vmem:[#allocation39_spill] sm:$0xff] }
 0x6a7   : > { %v13293_v15 = vadd.f32 1.0, %v8588_v8  ;;  %8294 = vmatmul.msk.f32.gmra.mxu1 %vm2439_vm3, %v6224_v17  ;;  %v8266_v38 = vmul.f32 -1.442695, %v13295_v40  ;;  %v2626_v44 = vadd.f32 %v15640_v36, %v15639_v33  ;;  %vm6005_vm5 = vmor %vm6003_vm4, %vm6004_vm2  ;;  %v2674_v8 = vadd.f32 %v13136_v11, %v2617_v18  ;;  %v15644_v33 = vld [vmem:[#allocation75_spill] sm:$0xff]  ;;  %v15645_v36 = vld [vmem:[#allocation157_spill] sm:$0xff] }
 0x6a8   : > { %7082 = vst.msk [vmem:[%s12647_s29 + $0x88] sm:$0xff] %vm2439_vm3, %v6225_v52  ;;  %v6000_v29 = vsub.f32 1.0, %v5999_v46  ;;  %v13321_v28 = vadd.f32 %v13136_v11, %v2620_v7  ;;  %v6022_v63 = vand.u32 2147483647, %v13283_v24  ;;  %v6024_v18 = vand.u32 2147483648, %v13283_v24 }
 0x6a9   : > { %8591 = vrcp.f32 %v13293_v15  ;;  %v13311_v5 = vpop.f32.mrf.mxu2  ;;  %v13333_v7 = vadd.f32 %v13136_v11, %v2626_v44  ;;  %vm6018_vm8 = vweird.f32 %v13283_v24  ;;  %vm6590_vm13 = vweird.f32 %v13293_v15 }
 0x6aa   : > { %v6001_v34 = vmul.f32 %v8586_v45, %v6000_v29  ;;  %15638 = vst [vmem:[#allocation74_spill] sm:$0xff] %v13311_v5  ;;  %v8590_v17 = vpop.eup %8589  ;;  %8593 = vpow2.f32 %v8266_v38  ;;  %8062 = vmatmul.msk.f32.gmra.mxu2 %vm3588_vm10, %v15641_v49  ;;  %v2632_v49 = vadd.f32 %v15645_v36, %v15644_v33  ;;  %vm6023_vm11 = vcmp.eq.f32.partialorder %v6022_v63, 8.507059e+37 }
 0x6ab   : > { %v6014_v13 = vmul.f32 %v8590_v17, %v13283_v24  ;;  %8595 = vpow2.f32 %v8311_v22  ;;  %v6367_v46 = vpop.f32.mrf.mxu1  ;;  %vm6019_vm7 = vweird.f32 %v8590_v17  ;;  %v15642_v22 = vld [vmem:[#allocation73_spill] sm:$0xff]  ;;  %v6025_v24 = vor.u32 1.1754944e-38, %v6024_v18 }
 0x6ac   : > { %v6002_v62 = vadd.f32 %v8586_v45, %v6001_v34  ;;  %v6368_v2 = vadd.f32 %v13255_v55, %v6367_v46  ;;  %v15643_v34 = vld [vmem:[#allocation52_spill] sm:$0xff]  ;;  %v15647_v46 = vld [vmem:[#allocation18_spill] sm:$0xff]  ;;  %vm6020_vm9 = vmor %vm6018_vm8, %vm6019_vm7  ;;  %v13373_v63 = vadd.f32 %v13136_v11, %v2632_v49 }
 0x6ad   : > { %v6015_v4 = vsub.f32 1.0, %v6014_v13  ;;  %v2629_v31 = vadd.f32 %v15643_v34, %v15642_v22  ;;  %v15652_v22 = vld [vmem:[#allocation22_spill] sm:$0xff]  ;;  %v15653_v34 = vld [vmem:[#allocation99_spill] sm:$0xff] }
 0x6ae   : > { %v6006_v53 = vsel %vm6005_vm5, %v8586_v45, %v6002_v62  ;;  %v8312_v20 = vmul.f32 -1.442695, %v6368_v2  ;;  %v2641_v33 = vadd.f32 %v15653_v34, %v15652_v22 }
 0x6af   : > { %v13327_v54 = vpop.eup %8591  ;;  %v6011_v37 = vsel %vm6008_vm6, %v6010_v35, %v6006_v53  ;;  %8295 = vmatmul.msk.f32.gmra.mxu1 %vm2439_vm3, %v6225_v52  ;;  %v6016_v45 = vmul.f32 %v8590_v17, %v6015_v4  ;;  %v15648_v53 = vld [vmem:[#allocation28_spill] sm:$0xff] }
 0x6b0   : > { %v6226_v19 = vmul.f32 %v6011_v37, %v13227_v43  ;;  %v5535_v29 = vpop.f32.mrf.mxu3  ;;  %v8594_v38 = vpop.eup %8593  ;;  %8597 = vpow2.f32 %v8312_v20  ;;  %v6586_v35 = vmul.f32 %v13327_v54, %v13293_v15  ;;  %v2635_v4 = vadd.f32 %v15648_v53, %v15647_v46  ;;  %v15649_v37 = vld [vmem:[#allocation55_spill] sm:$0xff] }
 0x6b1   : > { %v13341_v62 = vadd.f32 %v5535_v29, %v2674_v8  ;;  %v8596_v52 = vpop.eup %8595  ;;  %v6017_v44 = vadd.f32 %v8590_v17, %v6016_v45  ;;  %v13345_v43 = vadd.f32 1.0, %v8594_v38  ;;  %v13347_v13 = vpop.f32.mrf.mxu2  ;;  %v15650_v45 = vld [vmem:[#allocation20_spill] sm:$0xff]  ;;  %v15651_v29 = vld [vmem:[#allocation198_spill] sm:$0xff]  ;;  %vm6591_vm12 = vweird.f32 %v13327_v54 }
 0x6b2   : > { %7083 = vst.msk [vmem:[%s12647_s29 + $0x90] sm:$0xff] %vm2439_vm3, %v6226_v19  ;;  %v13354_v8 = vadd.f32 1.0, %v8596_v52  ;;  %8063 = vmatmul.msk.f32.gmra.mxu2 %vm3588_vm10, %v15649_v37  ;;  %v2638_v20 = vadd.f32 %v15651_v29, %v15650_v45  ;;  %v6587_v52 = vsub.f32 1.0, %v6586_v35  ;;  %v6594_v37 = vand.u32 2147483647, %v13293_v15  ;;  %vm6592_vm15 = vmor %vm6590_vm13, %vm6591_vm12 }
 0x6b3   : > { %15646 = vst [vmem:[#allocation209_spill] sm:$0xff] %v13347_v13  ;;  %v8267_v2 = vmul.f32 -1.442695, %v13341_v62  ;;  %v6021_v38 = vsel %vm6020_vm9, %v8590_v17, %v6017_v44  ;;  %8599 = vrcp.f32 %v13345_v43  ;;  %v6370_v18 = vpop.f32.mrf.mxu1  ;;  %v13370_v17 = vadd.f32 %v13136_v11, %v2629_v31  ;;  %v15655_v31 = vld [vmem:[#allocation89_spill] sm:$0xff] }
 0x6b4   : > { %v6026_v36 = vsel %vm6023_vm11, %v6025_v24, %v6021_v38  ;;  %8601 = vrcp.f32 %v13354_v8  ;;  %v6371_v53 = vadd.f32 %v13255_v55, %v6370_v18  ;;  %v6588_v44 = vmul.f32 %v13327_v54, %v6587_v52  ;;  %v15657_v18 = vld [vmem:[#allocation91_spill] sm:$0xff] }
 0x6b5   : > { %v6227_v46 = vmul.f32 %v6026_v36, %v13250_v16  ;;  %8603 = vpow2.f32 %v8267_v2  ;;  %v6596_v24 = vand.u32 2147483648, %v13293_v15  ;;  %v13380_v2 = vadd.f32 %v13136_v11, %v2635_v4  ;;  %v15656_v36 = vld [vmem:[#allocation183_spill] sm:$0xff] }
 0x6b6   : > { %v8598_v35 = vpop.eup %8597  ;;  %v8313_v16 = vmul.f32 -1.442695, %v6371_v53  ;;  %v13383_v45 = vadd.f32 %v13136_v11, %v2638_v20  ;;  %v13391_v38 = vadd.f32 %v13136_v11, %v2641_v33  ;;  %v6589_v22 = vadd.f32 %v13327_v54, %v6588_v44  ;;  %v15661_v44 = vld [vmem:[#allocation31_spill] sm:$0xff] }
 0x6b7   : > { %8296 = vmatmul.msk.f32.gmra.mxu1 %vm2439_vm3, %v6226_v19  ;;  %7084 = vst.msk [vmem:[%s12647_s29 + $0x98] sm:$0xff] %vm2439_vm3, %v6227_v46  ;;  %v15654_v19 = vld [vmem:[#allocation136_spill] sm:$0xff]  ;;  %v13388_v29 = vadd.f32 1.0, %v8598_v35  ;;  %v13396_v4 = vadd.f32 %v15657_v18, %v15656_v36  ;;  %vm13401_vm14 = vcmp.eq.f32.partialorder %v6594_v37, 8.507059e+37  ;;  %v6597_v15 = vor.u32 1.1754944e-38, %v6596_v24 }
 0x6b8   : > { %v4492_v49 = vadd.f32 %v15655_v31, %v15654_v19  ;;  %8605 = vpow2.f32 %v8313_v16  ;;  %v6037_v16 = vand.u32 2147483647, %v13345_v43  ;;  %v6039_v19 = vand.u32 2147483648, %v13345_v43 }
 0x6b9   : > { %v8600_v34 = vpop.eup %8599  ;;  %v13398_v20 = vpop.f32.mrf.mxu2  ;;  %8607 = vrcp.f32 %v13388_v29  ;;  %v6593_v36 = vsel %vm6592_vm15, %v13327_v54, %v6589_v22  ;;  %v6611_v53 = vand.u32 2147483648, %v13354_v8  ;;  %vm6033_vm4 = vweird.f32 %v13345_v43 }
 0x6ba   : > { %v5538_v52 = vpop.f32.mrf.mxu3  ;;  %15658 = vst [vmem:[#allocation76_spill] sm:$0xff] %v13398_v20  ;;  %v8602_v35 = vpop.eup %8601  ;;  %v6029_v11 = vmul.f32 %v8600_v34, %v13345_v43  ;;  %8064 = vmatmul.msk.f32.gmra.mxu2 %vm3588_vm10, %v15661_v44  ;;  %v13423_v44 = vsel %vm13401_vm14, %v6597_v15, %v6593_v36  ;;  %vm6034_vm1 = vweird.f32 %v8600_v34  ;;  %vm6605_vm6 = vweird.f32 %v13354_v8 }
 0x6bb   : > { %v13408_v33 = vadd.f32 %v5538_v52, %v13321_v28  ;;  %v8604_v37 = vpop.eup %8603  ;;  %v6601_v31 = vmul.f32 %v8602_v35, %v13354_v8  ;;  %v6373_v52 = vpop.f32.mrf.mxu1  ;;  %15662 = vst [vmem:[#allocation210_spill] sm:$0xff] %v13423_v44  ;;  %v7097_v54 = vmul.f32 %v13423_v44, %v4492_v49  ;;  %vm6606_vm2 = vweird.f32 %v8602_v35  ;;  %vm6035_vm5 = vmor %vm6033_vm4, %vm6034_vm1 }
 0x6bc   : > { %v6030_v18 = vsub.f32 1.0, %v6029_v11  ;;  %v13418_v51 = vadd.f32 1.0, %v8604_v37  ;;  %v6374_v24 = vadd.f32 %v13255_v55, %v6373_v52  ;;  %v6609_v11 = vand.u32 2147483647, %v13354_v8  ;;  %vm6607_vm8 = vmor %vm6605_vm6, %vm6606_vm2  ;;  %v15665_v8 = vld [vmem:[#allocation8_spill] sm:$0xff] }
 0x6bd   : > { %v8268_v28 = vmul.f32 -1.442695, %v13408_v33  ;;  %v6602_v22 = vsub.f32 1.0, %v6601_v31  ;;  %7129 = vst.msk [vmem:[%s13429_s21] sm:$0xff] %vm1020_vm0, %v7097_v54  ;;  %v6040_v31 = vor.u32 1.1754944e-38, %v6039_v19  ;;  %vm6038_vm7 = vcmp.eq.f32.partialorder %v6037_v16, 8.507059e+37 }
 0x6be   : > { %v6031_v37 = vmul.f32 %v8600_v34, %v6030_v18  ;;  %8609 = vrcp.f32 %v13418_v51  ;;  %v8606_v15 = vpop.eup %8605  ;;  %v8314_v36 = vmul.f32 -1.442695, %v6374_v24  ;;  %v15664_v54 = vld [vmem:[#allocation118_spill] sm:$0xff]  ;;  %v6612_v43 = vor.u32 1.1754944e-38, %v6611_v53  ;;  %v15668_v16 = vld [vmem:[#allocation95_spill] sm:$0xff] }
 0x6bf   : > { %8297 = vmatmul.msk.f32.gmra.mxu1 %vm2439_vm3, %v6227_v46  ;;  %8611 = vpow2.f32 %v8268_v28  ;;  %v6603_v20 = vmul.f32 %v8602_v35, %v6602_v22  ;;  %v13439_v52 = vpop.eup %8607  ;;  %v13442_v18 = vadd.f32 1.0, %v8606_v15  ;;  %vm6610_vm9 = vcmp.eq.f32.partialorder %v6609_v11, 8.507059e+37  ;;  %v15666_v15 = vld [vmem:[#allocation93_spill] sm:$0xff] }
 0x6c0   : > { %v6032_v49 = vadd.f32 %v8600_v34, %v6031_v37  ;;  %8613 = vpow2.f32 %v8314_v36  ;;  %v6616_v28 = vmul.f32 %v13439_v52, %v13388_v29  ;;  %v13456_v36 = vadd.f32 %v15666_v15, %v15665_v8 }
 0x6c1   : > { %v13445_v46 = vpop.f32.mrf.mxu2  ;;  %v6604_v13 = vadd.f32 %v8602_v35, %v6603_v20  ;;  %8615 = vrcp.f32 %v13442_v18  ;;  %vm6620_vm11 = vweird.f32 %v13388_v29  ;;  %v6624_v15 = vand.u32 2147483647, %v13388_v29 }
 0x6c2   : > { %15663 = vst [vmem:[#allocation77_spill] sm:$0xff] %v13445_v46  ;;  %v6036_v24 = vsel %vm6035_vm5, %v8600_v34, %v6032_v49  ;;  %8065 = vmatmul.msk.f32.gmra.mxu2 %vm3588_vm10, %v15664_v54  ;;  %v6617_v20 = vsub.f32 1.0, %v6616_v28  ;;  %v15667_v34 = vld [vmem:[#allocation197_spill] sm:$0xff]  ;;  %v6052_v28 = vand.u32 2147483647, %v13418_v51  ;;  %vm6621_vm13 = vweird.f32 %v13439_v52 }
 0x6c3   : > { %v6041_v19 = vsel %vm6038_vm7, %v6040_v31, %v6036_v24  ;;  %v6608_v22 = vsel %vm6607_vm8, %v8602_v35, %v6604_v13  ;;  %v13460_v49 = vadd.f32 %v15668_v16, %v15667_v34  ;;  %v6626_v16 = vand.u32 2147483648, %v13388_v29  ;;  %vm6622_vm1 = vmor %vm6620_vm11, %vm6621_vm13 }
 0x6c4   : > { %v8610_v37 = vpop.eup %8609  ;;  %v6228_v46 = vmul.f32 %v6041_v19, %v13295_v40  ;;  %v6376_v54 = vpop.f32.mrf.mxu1  ;;  %v13463_v5 = vsel %vm6610_vm9, %v6612_v43, %v6608_v22  ;;  %v6054_v40 = vand.u32 2147483648, %v13418_v51  ;;  %vm6048_vm14 = vweird.f32 %v13418_v51 }
 0x6c5   : > { %15669 = vst [vmem:[#allocation211_spill] sm:$0xff] %v13463_v5  ;;  %v8612_v53 = vpop.eup %8611  ;;  %v6044_v31 = vmul.f32 %v8610_v37, %v13418_v51  ;;  %v6377_v35 = vadd.f32 %v13255_v55, %v6376_v54  ;;  %v7098_v11 = vmul.f32 %v13463_v5, %v13396_v4  ;;  %v6618_v4 = vmul.f32 %v13439_v52, %v6617_v20 }
 0x6c6   : > { %v5541_v13 = vpop.f32.mrf.mxu3  ;;  %7085 = vst.msk [vmem:[%s12647_s29 + $0xa0] sm:$0xff] %vm2439_vm3, %v6228_v46  ;;  %v13474_v24 = vadd.f32 1.0, %v8612_v53  ;;  %v8614_v19 = vpop.eup %8613  ;;  %vm6049_vm12 = vweird.f32 %v8610_v37  ;;  %vm13495_vm15 = vcmp.eq.f32.partialorder %v6052_v28, 8.507059e+37  ;;  %vm6625_vm4 = vcmp.eq.f32.partialorder %v6624_v15, 8.507059e+37 }
 0x6c7   : > { %v13477_v43 = vadd.f32 %v5541_v13, %v13324_v48  ;;  %8298 = vmatmul.msk.f32.gmra.mxu1 %vm2439_vm3, %v6228_v46  ;;  %v6045_v22 = vsub.f32 1.0, %v6044_v31  ;;  %v8315_v8 = vmul.f32 -1.442695, %v6377_v35  ;;  %v13482_v34 = vpop.eup %8615  ;;  %7130 = vst.msk [vmem:[%s13429_s21 + $0x8] sm:$0xff] %vm1020_vm0, %v7098_v11  ;;  %v13492_v20 = vadd.f32 1.0, %v8614_v19  ;;  %v15672_v13 = vld [vmem:[#allocation94_spill] sm:$0xff]  ;;  %vm6050_vm2 = vmor %vm6048_vm14, %vm6049_vm12 }
 0x6c8   : > { %8617 = vrcp.f32 %v13474_v24  ;;  %v6631_v46 = vmul.f32 %v13482_v34, %v13442_v18  ;;  %v6055_v31 = vor.u32 1.1754944e-38, %v6054_v40  ;;  %v6627_v40 = vor.u32 1.1754944e-38, %v6626_v16 }
 0x6c9   : > { %v6046_v48 = vmul.f32 %v8610_v37, %v6045_v22  ;;  %v8269_v54 = vmul.f32 -1.442695, %v13477_v43  ;;  %8619 = vpow2.f32 %v8315_v8  ;;  %v13501_v35 = vpop.f32.mrf.mxu2  ;;  %v6619_v22 = vadd.f32 %v13439_v52, %v6618_v4 }
 0x6ca   : > { %8066 = vmatmul.msk.f32.gmra.mxu2 %vm3588_vm10, %v15672_v13  ;;  %15673 = vst [vmem:[#allocation78_spill] sm:$0xff] %v13501_v35  ;;  %v6632_v51 = vsub.f32 1.0, %v6631_v46  ;;  %v6641_v19 = vand.u32 2147483648, %v13442_v18  ;;  %vm6636_vm5 = vweird.f32 %v13482_v34  ;;  %v6639_v15 = vand.u32 2147483647, %v13442_v18 }
 0x6cb   : > { %v6047_v11 = vadd.f32 %v8610_v37, %v6046_v48  ;;  %8621 = vpow2.f32 %v8269_v54  ;;  %v6623_v4 = vsel %vm6622_vm1, %v13439_v52, %v6619_v22  ;;  %vm6635_vm6 = vweird.f32 %v13442_v18 }
 0x6cc   : > { %8623 = vrcp.f32 %v13492_v20  ;;  %v6379_v28 = vpop.f32.mrf.mxu1  ;;  %v6633_v54 = vmul.f32 %v13482_v34, %v6632_v51  ;;  %v13516_v13 = vsel %vm6625_vm4, %v6627_v40, %v6623_v4  ;;  %v6067_v22 = vand.u32 2147483647, %v13474_v24  ;;  %vm6637_vm7 = vmor %vm6635_vm6, %vm6636_vm5 }
 0x6cd   : > { %v6051_v8 = vsel %vm6050_vm2, %v8610_v37, %v6047_v11  ;;  %v6380_v48 = vadd.f32 %v13255_v55, %v6379_v28  ;;  %15674 = vst [vmem:[#allocation25_spill] sm:$0xff] %v13516_v13  ;;  %v6069_v51 = vand.u32 2147483648, %v13474_v24  ;;  %v7099_v53 = vmul.f32 %v13516_v13, %v13456_v36  ;;  %v15675_v36 = vld [vmem:[#allocation107_spill] sm:$0xff] }
 0x6ce   : > { %v8618_v29 = vpop.eup %8617  ;;  %v6056_v46 = vsel %vm13495_vm15, %v6055_v31, %v6051_v8  ;;  %v6634_v31 = vadd.f32 %v13482_v34, %v6633_v54  ;;  %v6642_v18 = vor.u32 1.1754944e-38, %v6641_v19  ;;  %vm6640_vm9 = vcmp.eq.f32.partialorder %v6639_v15, 8.507059e+37  ;;  %v15677_v19 = vld [vmem:[#allocation24_spill] sm:$0xff] }
 0x6cf   : > { %v6229_v16 = vmul.f32 %v6056_v46, %v13341_v62  ;;  %v6059_v37 = vmul.f32 %v8618_v29, %v13474_v24  ;;  %v8316_v11 = vmul.f32 -1.442695, %v6380_v48  ;;  %v8620_v52 = vpop.eup %8619  ;;  %vm6064_vm8 = vweird.f32 %v8618_v29  ;;  %7131 = vst.msk [vmem:[%s13429_s21 + $0x10] sm:$0xff] %vm1020_vm0, %v7099_v53 }
 0x6d0   : > { %v13530_v40 = vadd.f32 1.0, %v8620_v52  ;;  %v6638_v4 = vsel %vm6637_vm7, %v13482_v34, %v6634_v31  ;;  %vm6063_vm11 = vweird.f32 %v13474_v24  ;;  %v6654_v34 = vand.u32 2147483647, %v13492_v20 }
 0x6d1   : > { %v8622_v28 = vpop.eup %8621  ;;  %7086 = vst.msk [vmem:[%s12647_s29 + $0xa8] sm:$0xff] %vm2439_vm3, %v6229_v16  ;;  %v6060_v62 = vsub.f32 1.0, %v6059_v37  ;;  %8299 = vmatmul.msk.f32.gmra.mxu1 %vm2439_vm3, %v6229_v16  ;;  %8625 = vpow2.f32 %v8316_v11  ;;  %v13543_v46 = vsel %vm6640_vm9, %v6642_v18, %v6638_v4  ;;  %v15678_v37 = vld [vmem:[#allocation110_spill] sm:$0xff]  ;;  %vm6065_vm12 = vmor %vm6063_vm11, %vm6064_vm8  ;;  %vm6068_vm13 = vcmp.eq.f32.partialorder %v6067_v22, 8.507059e+37 }
 0x6d2   : > { %v8624_v8 = vpop.eup %8623  ;;  %v13535_v48 = vadd.f32 1.0, %v8622_v28  ;;  %8067 = vmatmul.msk.f32.gmra.mxu2 %vm3588_vm10, %v15675_v36  ;;  %8627 = vrcp.f32 %v13530_v40  ;;  %15676 = vst [vmem:[#allocation149_spill] sm:$0xff] %v13543_v46  ;;  %v13548_v11 = vadd.f32 %v15678_v37, %v15677_v19  ;;  %v7100_v53 = vmul.f32 %v13543_v46, %v13460_v49  ;;  %v15681_v18 = vld [vmem:[#allocation98_spill] sm:$0xff] }
 0x6d3   : > { %v6061_v54 = vmul.f32 %v8618_v29, %v6060_v62  ;;  %v6646_v16 = vmul.f32 %v8624_v8, %v13492_v20  ;;  %v6656_v28 = vand.u32 2147483648, %v13492_v20  ;;  %v15680_v62 = vld [vmem:[#allocation200_spill] sm:$0xff]  ;;  %v6070_v24 = vor.u32 1.1754944e-38, %v6069_v51 }
 0x6d4   : > { %8629 = vrcp.f32 %v13535_v48  ;;  %v4504_v36 = vadd.f32 %v15681_v18, %v15680_v62  ;;  %vm6650_vm14 = vweird.f32 %v13492_v20  ;;  %vm6651_vm15 = vweird.f32 %v8624_v8  ;;  %7132 = vst.msk [vmem:[%s13429_s21 + $0x18] sm:$0xff] %vm1020_vm0, %v7100_v53 }
 0x6d5   : > { %v13552_v52 = vpop.f32.mrf.mxu2  ;;  %v6062_v15 = vadd.f32 %v8618_v29, %v6061_v54  ;;  %v6647_v31 = vsub.f32 1.0, %v6646_v16  ;;  %vm13570_vm1 = vcmp.eq.f32.partialorder %v6654_v34, 8.507059e+37  ;;  %v6082_v53 = vand.u32 2147483647, %v13535_v48  ;;  %vm6652_vm2 = vmor %vm6650_vm14, %vm6651_vm15 }
 0x6d6   : > { %15679 = vst [vmem:[#allocation79_spill] sm:$0xff] %v13552_v52  ;;  %v6084_v34 = vand.u32 2147483648, %v13535_v48  ;;  %vm6078_vm4 = vweird.f32 %v13535_v48  ;;  %vm6665_vm8 = vweird.f32 %v13530_v40 }
 0x6d7   : > { %v5544_v4 = vpop.f32.mrf.mxu3  ;;  %v8626_v19 = vpop.eup %8625  ;;  %v6066_v37 = vsel %vm6065_vm12, %v8618_v29, %v6062_v15  ;;  %v6648_v49 = vmul.f32 %v8624_v8, %v6647_v31  ;;  %v6657_v31 = vor.u32 1.1754944e-38, %v6656_v28  ;;  %vm13603_vm7 = vcmp.eq.f32.partialorder %v6082_v53, 8.507059e+37 }
 0x6d8   : > { %v13563_v54 = vadd.f32 %v5544_v4, %v13333_v7  ;;  %v6382_v52 = vpop.f32.mrf.mxu1  ;;  %v6071_v16 = vsel %vm6068_vm13, %v6070_v24, %v6066_v37  ;;  %v13567_v62 = vadd.f32 1.0, %v8626_v19  ;;  %v8628_v18 = vpop.eup %8627  ;;  %v15685_v37 = vld [vmem:[#allocation26_spill] sm:$0xff] }
 0x6d9   : > { %v6383_v22 = vadd.f32 %v13255_v55, %v6382_v52  ;;  %v6230_v29 = vmul.f32 %v6071_v16, %v13408_v33  ;;  %v6649_v15 = vadd.f32 %v8624_v8, %v6648_v49  ;;  %v6661_v24 = vmul.f32 %v8628_v18, %v13530_v40  ;;  %v15684_v52 = vld [vmem:[#allocation171_spill] sm:$0xff] }
 0x6da   : > { %v8270_v7 = vmul.f32 -1.442695, %v13563_v54  ;;  %v8630_v4 = vpop.eup %8629  ;;  %8631 = vrcp.f32 %v13567_v62  ;;  %8068 = vmatmul.msk.f32.gmra.mxu2 %vm3588_vm10, %v15684_v52  ;;  %v15686_v49 = vld [vmem:[#allocation63_spill] sm:$0xff]  ;;  %vm6666_vm5 = vweird.f32 %v8628_v18  ;;  %vm6680_vm14 = vweird.f32 %v13567_v62 }
 0x6db   : > { %v8317_v19 = vmul.f32 -1.442695, %v6383_v22  ;;  %7087 = vst.msk [vmem:[%s12647_s29 + $0xb0] sm:$0xff] %vm2439_vm3, %v6230_v29  ;;  %v6074_v33 = vmul.f32 %v8630_v4, %v13535_v48  ;;  %8300 = vmatmul.msk.f32.gmra.mxu1 %vm2439_vm3, %v6230_v29  ;;  %v6653_v28 = vsel %vm6652_vm2, %v8624_v8, %v6649_v15  ;;  %v2647_v16 = vadd.f32 %v15686_v49, %v15685_v37  ;;  %v15688_v8 = vld [vmem:[#allocation206_spill] sm:$0xff]  ;;  %v15689_v15 = vld [vmem:[#allocation100_spill] sm:$0xff]  ;;  %vm6667_vm9 = vmor %vm6665_vm8, %vm6666_vm5 }
 0x6dc   : > { %8633 = vpow2.f32 %v8270_v7  ;;  %v13593_v22 = vsel %vm13570_vm1, %v6657_v31, %v6653_v28  ;;  %v6662_v20 = vsub.f32 1.0, %v6661_v24  ;;  %v6669_v7 = vand.u32 2147483647, %v13530_v40  ;;  %v8874_v48 = vld [vmem:[%s14781_s10] ss:$0 sm:$0xff] }
 0x6dd   : > { %8635 = vpow2.f32 %v8317_v19  ;;  %v6075_v52 = vsub.f32 1.0, %v6074_v33  ;;  %v13595_v35 = vpop.f32.mrf.mxu2  ;;  %v7101_v59 = vmul.f32 %v13593_v22, %v4504_v36  ;;  %v6671_v29 = vand.u32 2147483648, %v13530_v40  ;;  %v15692_v40 = vld [vmem:[#allocation64_spill] sm:$0xff] }
 0x6de   : > { %15687 = vst [vmem:[#allocation212_spill] sm:$0xff] %v13595_v35  ;;  %v4507_v21 = vadd.f32 %v15689_v15, %v15688_v8  ;;  %v6663_v19 = vmul.f32 %v8628_v18, %v6662_v20  ;;  %vm6079_vm6 = vweird.f32 %v8630_v4  ;;  %v6085_v24 = vor.u32 1.1754944e-38, %v6084_v34 }
 0x6df   : > { %v6076_v51 = vmul.f32 %v8630_v4, %v6075_v52  ;;  %7133 = vst.msk [vmem:[%s13429_s21 + $0x20] sm:$0xff] %vm1020_vm0, %v7101_v59  ;;  %vm6670_vm11 = vcmp.eq.f32.partialorder %v6669_v7, 8.507059e+37  ;;  %v6672_v34 = vor.u32 1.1754944e-38, %v6671_v29  ;;  %vm6080_vm12 = vmor %vm6078_vm4, %vm6079_vm6  ;;  %v6686_v31 = vand.u32 2147483648, %v13567_v62 }
 0x6e0   : > { %v6385_v36 = vpop.f32.mrf.mxu1  ;;  %v13609_v28 = vpop.eup %8631  ;;  %v6664_v20 = vadd.f32 %v8628_v18, %v6663_v19 }
 0x6e1   : > { %v5547_v33 = vpop.f32.mrf.mxu3  ;;  %v6386_v49 = vadd.f32 %v13255_v55, %v6385_v36  ;;  %v6077_v53 = vadd.f32 %v8630_v4, %v6076_v51  ;;  %v6676_v8 = vmul.f32 %v13609_v28, %v13567_v62  ;;  %vm6681_vm13 = vweird.f32 %v13609_v28 }
 0x6e2   : > { %v13612_v37 = vadd.f32 %v5547_v33, %v13370_v17  ;;  %v8634_v52 = vpop.eup %8633  ;;  %8069 = vmatmul.msk.f32.gmra.mxu2 %vm3588_vm10, %v15692_v40  ;;  %v6668_v51 = vsel %vm6667_vm9, %v8628_v18, %v6664_v20  ;;  %v6684_v18 = vand.u32 2147483647, %v13567_v62  ;;  %v13657_v40 = vadd.f32 %v8874_v48, %v2647_v16  ;;  %v15699_v16 = vld [vmem:[#allocation113_spill] sm:$0xff]  ;;  %vm13679_vm15 = vmor %vm6680_vm14, %vm6681_vm13 }
 0x6e3   : > { %v8636_v59 = vpop.eup %8635  ;;  %v13622_v17 = vadd.f32 1.0, %v8634_v52  ;;  %v8318_v19 = vmul.f32 -1.442695, %v6386_v49  ;;  %v6081_v33 = vsel %vm6080_vm12, %v8630_v4, %v6077_v53  ;;  %v13629_v35 = vsel %vm6670_vm11, %v6672_v34, %v6668_v51  ;;  %v15695_v34 = vld [vmem:[#allocation103_spill] sm:$0xff] }
 0x6e4   : > { %v8271_v15 = vmul.f32 -1.442695, %v13612_v37  ;;  %v13627_v36 = vadd.f32 1.0, %v8636_v59  ;;  %v6677_v7 = vsub.f32 1.0, %v6676_v8  ;;  %v6086_v29 = vsel %vm13603_vm7, %v6085_v24, %v6081_v33  ;;  %v15693_v24 = vld [vmem:[#allocation169_spill] sm:$0xff] }
 0x6e5   : > { %8637 = vrcp.f32 %v13622_v17  ;;  %v13638_v49 = vadd.f32 %v8874_v48, %v13548_v11  ;;  %v6231_v4 = vmul.f32 %v6086_v29, %v13477_v43  ;;  %v3994_v20 = vpop.f32.mrf.mxu2  ;;  %v7102_v52 = vmul.f32 %v13629_v35, %v4507_v21  ;;  %v15694_v11 = vld [vmem:[#allocation51_spill] sm:$0xff]  ;;  %v15696_v43 = vld [vmem:[#allocation106_spill] sm:$0xff] }
 0x6e6   : > { %8639 = vpow2.f32 %v8271_v15  ;;  %v4588_v53 = vadd.f32 %v15693_v24, %v3994_v20  ;;  %v6678_v8 = vmul.f32 %v13609_v28, %v6677_v7  ;;  %v4510_v59 = vadd.f32 %v15695_v34, %v15694_v11  ;;  %v15702_v24 = vld [vmem:[#allocation44_spill] sm:$0xff] }
 0x6e7   : > { %8641 = vrcp.f32 %v13627_v36  ;;  %v13652_v15 = vadd.f32 %v15696_v43, %v12631_v27  ;;  %7088 = vst.msk [vmem:[%s12647_s29 + $0xb8] sm:$0xff] %vm2439_vm3, %v6231_v4  ;;  %8301 = vmatmul.msk.f32.gmra.mxu1 %vm2439_vm3, %v6231_v4  ;;  %v15697_v27 = vld [vmem:[#allocation109_spill] sm:$0xff]  ;;  %v15698_v4 = vld [vmem:[#allocation111_spill] sm:$0xff]  ;;  %v13675_v48 = vadd.f32 %v15699_v16, %v12780_v60  ;;  %v6687_v62 = vor.u32 1.1754944e-38, %v6686_v31 }
 0x6e8   : > { %8643 = vpow2.f32 %v8318_v19  ;;  %v7161_v33 = vmul.f32 %v13423_v44, %v4588_v53  ;;  %v6679_v7 = vadd.f32 %v13609_v28, %v6678_v8  ;;  %7134 = vst.msk [vmem:[%s13429_s21 + $0x28] sm:$0xff] %vm1020_vm0, %v7102_v52  ;;  %v13667_v29 = vadd.f32 %v15697_v27, %v12681_v23  ;;  %v15704_v31 = vld [vmem:[#allocation117_spill] sm:$0xff] }
 0x6e9   : > { %v6388_v21 = vpop.f32.mrf.mxu1  ;;  %v13671_v19 = vadd.f32 %v15698_v4, %v12733_v47  ;;  %v13685_v23 = vadd.f32 %v15702_v24, %v12816_v58  ;;  %v15703_v47 = vld [vmem:[#allocation138_spill] sm:$0xff]  ;;  %vm6685_vm1 = vcmp.eq.f32.partialorder %v6684_v18, 8.507059e+37  ;;  %v13695_v34 = vadd.f32 %v15704_v31, %v12859_v6 }
 0x6ea   : > { %v6389_v51 = vadd.f32 %v13255_v55, %v6388_v21  ;;  %8070 = vmatmul.msk.f32.gmra.mxu2 %vm3588_vm10, %v15703_v47  ;;  %7225 = vrot.lane.b32.xlu0 %v7161_v33, %s8901_s22  ;;  %v6683_v60 = vsel %vm13679_vm15, %v13609_v28, %v6679_v7  ;;  %v6097_v33 = vand.u32 2147483647, %v13622_v17  ;;  %v6099_v7 = vand.u32 2147483648, %v13622_v17 }
 0x6eb   : > { %v8638_v52 = vpop.eup %8637  ;;  %v13701_v21 = vsel %vm6685_vm1, %v6687_v62, %v6683_v60  ;;  %v6699_v20 = vand.u32 2147483647, %v13627_v36  ;;  %v6701_v62 = vand.u32 2147483648, %v13627_v36  ;;  %vm6093_vm4 = vweird.f32 %v13622_v17  ;;  %v15711_v60 = vld [vmem:[#allocation175_spill] sm:$0xff] }
 0x6ec   : > { %v5550_v53 = vpop.f32.mrf.mxu3  ;;  %v8319_v8 = vmul.f32 -1.442695, %v6389_v51  ;;  %v8640_v11 = vpop.eup %8639  ;;  %v6089_v58 = vmul.f32 %v8638_v52, %v13622_v17  ;;  %v7103_v28 = vmul.f32 %v13701_v21, %v4510_v59  ;;  %vm6094_vm2 = vweird.f32 %v8638_v52 }
 0x6ed   : > { %v13699_v43 = vadd.f32 %v5550_v53, %v13373_v63  ;;  %v13703_v51 = vpop.eup %8641  ;;  %v13706_v27 = vadd.f32 1.0, %v8640_v11  ;;  %v3997_v16 = vpop.f32.mrf.mxu2  ;;  %v15705_v53 = vld [vmem:[#allocation172_spill] sm:$0xff]  ;;  %vm13722_vm5 = vcmp.eq.f32.partialorder %v6097_v33, 8.507059e+37  ;;  %v6100_v44 = vor.u32 1.1754944e-38, %v6099_v7  ;;  %vm6095_vm6 = vmor %vm6093_vm4, %vm6094_vm2 }
 0x6ee   : > { %8645 = vpow2.f32 %v8319_v8  ;;  %v8644_v18 = vpop.eup %8643  ;;  %v6090_v6 = vsub.f32 1.0, %v6089_v58  ;;  %v6691_v63 = vmul.f32 %v13703_v51, %v13627_v36  ;;  %7135 = vst.msk [vmem:[%s13429_s21 + $0x30] sm:$0xff] %vm1020_vm0, %v7103_v28  ;;  %v4591_v8 = vadd.f32 %v15705_v53, %v3997_v16 }
 0x6ef   : > { %v8272_v4 = vmul.f32 -1.442695, %v13699_v43  ;;  %8647 = vrcp.f32 %v13706_v27  ;;  %v13718_v24 = vadd.f32 1.0, %v8644_v18  ;;  %vm6695_vm7 = vweird.f32 %v13627_v36 }
 0x6f0   : > { %v6091_v59 = vmul.f32 %v8638_v52, %v6090_v6  ;;  %v6692_v31 = vsub.f32 1.0, %v6691_v63  ;;  %v7162_v28 = vmul.f32 %v13463_v5, %v4591_v8  ;;  %vm6696_vm8 = vweird.f32 %v13703_v51 }
 0x6f1   : > { %8649 = vpow2.f32 %v8272_v4  ;;  %v6391_v47 = vpop.f32.mrf.mxu1  ;;  %v15708_v4 = vld [vmem:[#allocation66_spill] sm:$0xff]  ;;  %vm13738_vm9 = vcmp.eq.f32.partialorder %v6699_v20, 8.507059e+37  ;;  %v6702_v63 = vor.u32 1.1754944e-38, %v6701_v62  ;;  %v6112_v53 = vand.u32 2147483647, %v13706_v27  ;;  %vm6697_vm11 = vmor %vm6695_vm7, %vm6696_vm8 }
 0x6f2   : > { %v6392_v11 = vadd.f32 %v13255_v55, %v6391_v47  ;;  %v6092_v58 = vadd.f32 %v8638_v52, %v6091_v59  ;;  %8651 = vrcp.f32 %v13718_v24  ;;  %8071 = vmatmul.msk.f32.gmra.mxu2 %vm3588_vm10, %v15708_v4  ;;  %v6693_v17 = vmul.f32 %v13703_v51, %v6692_v31  ;;  %7227 = vrot.lane.b32.xlu0 %v7162_v28, %s8901_s22 }
 0x6f3   : > { %v6114_v31 = vand.u32 2147483648, %v13706_v27  ;;  %vm6108_vm12 = vweird.f32 %v13706_v27  ;;  %v6716_v4 = vand.u32 2147483648, %v13718_v24  ;;  %vm13778_vm14 = vcmp.eq.f32.partialorder %v6112_v53, 8.507059e+37 }
 0x6f4   : > { %v8646_v18 = vpop.eup %8645  ;;  %v8320_v6 = vmul.f32 -1.442695, %v6392_v11  ;;  %v6096_v55 = vsel %vm6095_vm6, %v8638_v52, %v6092_v58  ;;  %v6694_v52 = vadd.f32 %v13703_v51, %v6693_v17  ;;  %vm6710_vm15 = vweird.f32 %v13718_v24 }
 0x6f5   : > { %v13735_v33 = vadd.f32 1.0, %v8646_v18  ;;  %v8648_v16 = vpop.eup %8647  ;;  %v6101_v59 = vsel %vm13722_vm5, %v6100_v44, %v6096_v55  ;;  %v4000_v58 = vpop.f32.mrf.mxu2  ;;  %v6115_v7 = vor.u32 1.1754944e-38, %v6114_v31 }
 0x6f6   : > { %v5553_v8 = vpop.f32.mrf.mxu3  ;;  %8653 = vpow2.f32 %v8320_v6  ;;  %v6232_v11 = vmul.f32 %v6101_v59, %v13563_v54  ;;  %v6104_v20 = vmul.f32 %v8648_v16, %v13706_v27  ;;  %v4594_v28 = vadd.f32 %v15711_v60, %v4000_v58 }
 0x6f7   : > { %v8650_v47 = vpop.eup %8649  ;;  %v13750_v62 = vadd.f32 %v5553_v8, %v13380_v2  ;;  %8655 = vrcp.f32 %v13735_v33  ;;  %v6698_v54 = vsel %vm6697_vm11, %v13703_v51, %v6694_v52  ;;  %vm6109_vm13 = vweird.f32 %v8648_v16 }
 0x6f8   : > { %v13756_v44 = vadd.f32 1.0, %v8650_v47  ;;  %v13761_v18 = vpop.eup %8651  ;;  %7089 = vst.msk [vmem:[%s12647_s29 + $0xc0] sm:$0xff] %vm2439_vm3, %v6232_v11  ;;  %v6105_v2 = vsub.f32 1.0, %v6104_v20  ;;  %8302 = vmatmul.msk.f32.gmra.mxu1 %vm2439_vm3, %v6232_v11  ;;  %v13770_v36 = vsel %vm13738_vm9, %v6702_v63, %v6698_v54  ;;  %v6714_v51 = vand.u32 2147483647, %v13718_v24  ;;  %v15714_v63 = vld [vmem:[#allocation143_spill] sm:$0xff]  ;;  %vm13796_vm1 = vmor %vm6108_vm12, %vm6109_vm13 }
 0x6f9   : > { %v8273_v6 = vmul.f32 -1.442695, %v13750_v62  ;;  %v6706_v55 = vmul.f32 %v13761_v18, %v13718_v24  ;;  %v7163_v59 = vmul.f32 %v13516_v13, %v4594_v28  ;;  %v7104_v47 = vmul.f32 %v13770_v36, %v13652_v15 }
 0x6fa   : > { %8657 = vrcp.f32 %v13756_v44  ;;  %v6106_v17 = vmul.f32 %v8648_v16, %v6105_v2  ;;  %8072 = vmatmul.msk.f32.gmra.mxu2 %vm3588_vm10, %v15714_v63  ;;  %v6127_v20 = vand.u32 2147483647, %v13756_v44  ;;  %v6129_v15 = vand.u32 2147483648, %v13756_v44  ;;  %v13804_v2 = vld [vmem:[%s14783_s12] ss:$0 sm:$0xff] }
 0x6fb   : > { %8659 = vpow2.f32 %v8273_v6  ;;  %v6707_v58 = vsub.f32 1.0, %v6706_v55  ;;  %7229 = vrot.lane.b32.xlu1 %v7163_v59, %s8901_s22  ;;  %vm13807_vm2 = vcmp.eq.f32.partialorder %v6714_v51, 8.507059e+37  ;;  %v6717_v55 = vor.u32 1.1754944e-38, %v6716_v4  ;;  %7136 = vst.msk [vmem:[%s13429_s21 + $0x38] sm:$0xff] %vm1020_vm0, %v7104_v47 }
 0x6fc   : > { %v8654_v8 = vpop.eup %8653  ;;  %v6107_v11 = vadd.f32 %v8648_v16, %v6106_v17  ;;  %v6394_v53 = vpop.f32.mrf.mxu1  ;;  %vm6123_vm4 = vweird.f32 %v13756_v44  ;;  %vm13828_vm5 = vcmp.eq.f32.partialorder %v6127_v20, 8.507059e+37  ;;  %vm6711_vm6 = vweird.f32 %v13761_v18 }
 0x6fd   : > { %v13788_v60 = vadd.f32 1.0, %v8654_v8  ;;  %v13791_v28 = vpop.eup %8655  ;;  %v6395_v6 = vadd.f32 %v13804_v2, %v6394_v53  ;;  %v4003_v51 = vpop.f32.mrf.mxu2  ;;  %v15719_v53 = vld [vmem:[#allocation178_spill] sm:$0xff]  ;;  %vm13846_vm7 = vmor %vm6710_vm15, %vm6711_vm6  ;;  %vm6725_vm8 = vweird.f32 %v13735_v33 }
 0x6fe   : > { %v5556_v54 = vpop.f32.mrf.mxu3  ;;  %v6111_v27 = vsel %vm13796_vm1, %v8648_v16, %v6107_v11  ;;  %v6721_v8 = vmul.f32 %v13791_v28, %v13735_v33  ;;  %v4597_v31 = vadd.f32 %v15719_v53, %v4003_v51  ;;  %v6708_v16 = vmul.f32 %v13761_v18, %v6707_v58 }
 0x6ff   : > { %v13817_v59 = vadd.f32 %v5556_v54, %v13383_v45  ;;  %8661 = vrcp.f32 %v13788_v60  ;;  %v6116_v4 = vsel %vm13778_vm14, %v6115_v7, %v6111_v27  ;;  %v8321_v47 = vmul.f32 -1.442695, %v6395_v6  ;;  %v15722_v27 = vld [vmem:[#allocation199_spill] sm:$0xff] }
 0x700   : > { %v8658_v63 = vpop.eup %8657  ;;  %v6233_v45 = vmul.f32 %v6116_v4, %v13612_v37  ;;  %v6722_v7 = vsub.f32 1.0, %v6721_v8  ;;  %v7164_v6 = vmul.f32 %v13543_v46, %v4597_v31  ;;  %v6130_v37 = vor.u32 1.1754944e-38, %v6129_v15  ;;  %v15725_v8 = vld [vmem:[#allocation180_spill] sm:$0xff] }
 0x701   : > { %v8660_v11 = vpop.eup %8659  ;;  %v6119_v54 = vmul.f32 %v8658_v63, %v13756_v44  ;;  %v8274_v5 = vmul.f32 -1.442695, %v13817_v59  ;;  %8663 = vpow2.f32 %v8321_v47  ;;  %v6709_v20 = vadd.f32 %v13761_v18, %v6708_v16 }
 0x702   : > { %v13834_v52 = vadd.f32 1.0, %v8660_v11  ;;  %7090 = vst.msk [vmem:[%s12647_s29 + $0xc8] sm:$0xff] %vm2439_vm3, %v6233_v45  ;;  %8303 = vmatmul.msk.f32.gmra.mxu1 %vm2439_vm3, %v6233_v45  ;;  %8073 = vmatmul.msk.f32.gmra.mxu2 %vm3588_vm10, %v15722_v27  ;;  %v6729_v15 = vand.u32 2147483647, %v13735_v33  ;;  %vm6124_vm9 = vweird.f32 %v8658_v63  ;;  %v6723_v53 = vmul.f32 %v13791_v28, %v6722_v7 }
 0x703   : > { %v6120_v58 = vsub.f32 1.0, %v6119_v54  ;;  %8665 = vpow2.f32 %v8274_v5  ;;  %v6731_v5 = vand.u32 2147483648, %v13735_v33  ;;  %7231 = vrot.lane.b32.xlu1 %v7164_v6, %s8901_s22  ;;  %v6713_v24 = vsel %vm13846_vm7, %v13761_v18, %v6709_v20  ;;  %vm6125_vm12 = vmor %vm6123_vm4, %vm6124_vm9 }
 0x704   : > { %8667 = vrcp.f32 %v13834_v52  ;;  %v6397_v47 = vpop.f32.mrf.mxu1  ;;  %v6142_v31 = vand.u32 2147483647, %v13834_v52  ;;  %vm6726_vm11 = vweird.f32 %v13791_v28  ;;  %v13871_v18 = vsel %vm13807_vm2, %v6717_v55, %v6713_v24 }
 0x705   : > { %v13853_v51 = vpop.eup %8661  ;;  %v6121_v4 = vmul.f32 %v8658_v63, %v6120_v58  ;;  %v6398_v45 = vadd.f32 %v13804_v2, %v6397_v47  ;;  %v6144_v58 = vand.u32 2147483648, %v13834_v52  ;;  %v4006_v27 = vpop.f32.mrf.mxu2  ;;  %vm13900_vm13 = vmor %vm6725_vm8, %vm6726_vm11  ;;  %vm6138_vm14 = vweird.f32 %v13834_v52 }
 0x706   : > { %v5559_v16 = vpop.f32.mrf.mxu3  ;;  %v6736_v11 = vmul.f32 %v13853_v51, %v13788_v60  ;;  %v4600_v47 = vadd.f32 %v15725_v8, %v4006_v27  ;;  %vm13912_vm15 = vcmp.eq.f32.partialorder %v6729_v15, 8.507059e+37  ;;  %vm13921_vm2 = vcmp.eq.f32.partialorder %v6142_v31, 8.507059e+37 }
 0x707   : > { %v6122_v54 = vadd.f32 %v8658_v63, %v6121_v4  ;;  %v13867_v6 = vadd.f32 %v5559_v16, %v13391_v38  ;;  %v8664_v7 = vpop.eup %8663  ;;  %v8322_v20 = vmul.f32 -1.442695, %v6398_v45  ;;  %v7105_v4 = vmul.f32 %v13871_v18, %v13667_v29  ;;  %v15726_v29 = vld [vmem:[#allocation120_spill] sm:$0xff] }
 0x708   : > { %v6724_v38 = vadd.f32 %v13791_v28, %v6723_v53  ;;  %v6737_v55 = vsub.f32 1.0, %v6736_v11  ;;  %v13881_v24 = vadd.f32 1.0, %v8664_v7  ;;  %v7165_v27 = vmul.f32 %v13593_v22, %v4600_v47 }
 0x709   : > { %v8666_v16 = vpop.eup %8665  ;;  %v6126_v46 = vsel %vm6125_vm12, %v8658_v63, %v6122_v54  ;;  %v8275_v17 = vmul.f32 -1.442695, %v13867_v6  ;;  %8669 = vpow2.f32 %v8322_v20  ;;  %7137 = vst.msk [vmem:[%s13429_s21 + $0x40] sm:$0xff] %vm1020_vm0, %v7105_v4  ;;  %v13892_v63 = vadd.f32 %v15726_v29, %v12899_v0 }
 0x70a   : > { %v8668_v3 = vpop.eup %8667  ;;  %v6131_v44 = vsel %vm13828_vm5, %v6130_v37, %v6126_v46  ;;  %v13885_v45 = vadd.f32 1.0, %v8666_v16  ;;  %v15729_v46 = vld [vmem:[#allocation201_spill] sm:$0xff]  ;;  %7233 = vrot.lane.b32.xlu2 %v7165_v27, %s8901_s22  ;;  %v6728_v0 = vsel %vm13900_vm13, %v13791_v28, %v6724_v38  ;;  %v6732_v54 = vor.u32 1.1754944e-38, %v6731_v5 }
 0x70b   : > { %v6234_v53 = vmul.f32 %v6131_v44, %v13699_v43  ;;  %v6134_v11 = vmul.f32 %v8668_v3, %v13834_v52  ;;  %8671 = vpow2.f32 %v8275_v17  ;;  %8074 = vmatmul.msk.f32.gmra.mxu2 %vm3588_vm10, %v15729_v46  ;;  %v6738_v7 = vmul.f32 %v13853_v51, %v6737_v55 }
 0x70c   : > { %8673 = vrcp.f32 %v13885_v45  ;;  %v6400_v37 = vpop.f32.mrf.mxu1  ;;  %vm6139_vm1 = vweird.f32 %v8668_v3  ;;  %v6145_v28 = vor.u32 1.1754944e-38, %v6144_v58  ;;  %v6157_v4 = vand.u32 2147483647, %v13885_v45  ;;  %v15734_v58 = vld [vmem:[#allocation184_spill] sm:$0xff] }
 0x70d   : > { %7091 = vst.msk [vmem:[%s12647_s29 + $0xd0] sm:$0xff] %vm2439_vm3, %v6234_v53  ;;  %v6135_v33 = vsub.f32 1.0, %v6134_v11  ;;  %8304 = vmatmul.msk.f32.gmra.mxu1 %vm2439_vm3, %v6234_v53  ;;  %8675 = vrcp.f32 %v13881_v24  ;;  %v6401_v8 = vadd.f32 %v13804_v2, %v6400_v37  ;;  %v4009_v16 = vpop.f32.mrf.mxu2  ;;  %v13932_v5 = vsel %vm13912_vm15, %v6732_v54, %v6728_v0  ;;  %vm6140_vm6 = vmor %vm6138_vm14, %vm6139_vm1 }
 0x70e   : > { %v5562_v15 = vpop.f32.mrf.mxu3  ;;  %v6159_v31 = vand.u32 2147483648, %v13885_v45  ;;  %v4603_v44 = vadd.f32 %v15734_v58, %v4009_v16  ;;  %v7106_v27 = vmul.f32 %v13932_v5, %v13671_v19  ;;  %vm6153_vm4 = vweird.f32 %v13885_v45 }
 0x70f   : > { %v6136_v47 = vmul.f32 %v8668_v3, %v6135_v33  ;;  %v13928_v38 = vadd.f32 %v5562_v15, %v13638_v49  ;;  %v8670_v17 = vpop.eup %8669  ;;  %v8323_v55 = vmul.f32 -1.442695, %v6401_v8  ;;  %v13941_v11 = vadd.f32 %v13853_v51, %v6738_v7  ;;  %v15737_v15 = vld [vmem:[#allocation83_spill] sm:$0xff] }
 0x710   : > { %vm6741_vm5 = vweird.f32 %v13853_v51  ;;  %v13949_v0 = vadd.f32 1.0, %v8670_v17  ;;  %v7166_v19 = vmul.f32 %v13629_v35, %v4603_v44  ;;  %7138 = vst.msk [vmem:[%s13429_s21 + $0x48] sm:$0xff] %vm1020_vm0, %v7106_v27  ;;  %vm13957_vm7 = vcmp.eq.f32.partialorder %v6157_v4, 8.507059e+37 }
 0x711   : > { %v8672_v29 = vpop.eup %8671  ;;  %v6137_v53 = vadd.f32 %v8668_v3, %v6136_v47  ;;  %v8276_v49 = vmul.f32 -1.442695, %v13928_v38  ;;  %8677 = vpow2.f32 %v8323_v55  ;;  %v6160_v7 = vor.u32 1.1754944e-38, %v6159_v31 }
 0x712   : > { %v8674_v13 = vpop.eup %8673  ;;  %v13947_v46 = vadd.f32 1.0, %v8672_v29  ;;  %7235 = vrot.lane.b32.xlu2 %v7166_v19, %s8901_s22  ;;  %vm6740_vm8 = vweird.f32 %v13788_v60  ;;  %v15740_v19 = vld [vmem:[#allocation188_spill] sm:$0xff]  ;;  %vm6755_vm1 = vweird.f32 %v13881_v24 }
 0x713   : > { %v13954_v43 = vpop.eup %8675  ;;  %v6141_v33 = vsel %vm6140_vm6, %v8668_v3, %v6137_v53  ;;  %v6149_v37 = vmul.f32 %v8674_v13, %v13885_v45  ;;  %8679 = vpow2.f32 %v8276_v49  ;;  %8075 = vmatmul.msk.f32.gmra.mxu2 %vm3588_vm10, %v15737_v15  ;;  %vm13973_vm9 = vmor %vm6740_vm8, %vm6741_vm5  ;;  %vm6154_vm11 = vweird.f32 %v8674_v13 }
 0x714   : > { %v6146_v52 = vsel %vm13921_vm2, %v6145_v28, %v6141_v33  ;;  %8681 = vrcp.f32 %v13947_v46  ;;  %v6751_v47 = vmul.f32 %v13954_v43, %v13881_v24  ;;  %v6403_v4 = vpop.f32.mrf.mxu1  ;;  %v6744_v28 = vand.u32 2147483647, %v13788_v60  ;;  %vm6155_vm14 = vmor %vm6153_vm4, %vm6154_vm11 }
 0x715   : > { %v6235_v3 = vmul.f32 %v6146_v52, %v13750_v62  ;;  %v6150_v8 = vsub.f32 1.0, %v6149_v37  ;;  %8683 = vrcp.f32 %v13949_v0  ;;  %v6404_v17 = vadd.f32 %v13804_v2, %v6403_v4  ;;  %v4012_v27 = vpop.f32.mrf.mxu2 }
 0x716   : > { %v5565_v16 = vpop.f32.mrf.mxu3  ;;  %v6743_v62 = vsel %vm13973_vm9, %v13853_v51, %v13941_v11  ;;  %v6172_v55 = vand.u32 2147483647, %v13947_v46  ;;  %v6174_v58 = vand.u32 2147483648, %v13947_v46  ;;  %v6752_v53 = vsub.f32 1.0, %v6751_v47 }
 0x717   : > { %7092 = vst.msk [vmem:[%s12647_s29 + $0xd8] sm:$0xff] %vm2439_vm3, %v6235_v3  ;;  %v6151_v31 = vmul.f32 %v8674_v13, %v6150_v8  ;;  %v13989_v44 = vadd.f32 %v5565_v16, %v13657_v40  ;;  %8305 = vmatmul.msk.f32.gmra.mxu1 %vm2439_vm3, %v6235_v3  ;;  %v8678_v29 = vpop.eup %8677  ;;  %v8324_v49 = vmul.f32 -1.442695, %v6404_v17  ;;  %v4606_v33 = vadd.f32 %v15740_v19, %v4012_v27 }
 0x718   : > { %v6746_v51 = vand.u32 2147483648, %v13788_v60  ;;  %vm6168_vm12 = vweird.f32 %v13947_v46  ;;  %vm13996_vm13 = vcmp.eq.f32.partialorder %v6744_v28, 8.507059e+37  ;;  %v14005_v8 = vadd.f32 1.0, %v8678_v29 }
 0x719   : > { %v8680_v11 = vpop.eup %8679  ;;  %v6152_v37 = vadd.f32 %v8674_v13, %v6151_v31  ;;  %v8277_v52 = vmul.f32 -1.442695, %v13989_v44  ;;  %8685 = vpow2.f32 %v8324_v49  ;;  %v7167_v60 = vmul.f32 %v13701_v21, %v4606_v33 }
 0x71a   : > { %v8682_v40 = vpop.eup %8681  ;;  %v14003_v3 = vadd.f32 1.0, %v8680_v11  ;;  %vm14009_vm15 = vcmp.eq.f32.partialorder %v6172_v55, 8.507059e+37  ;;  %v6175_v28 = vor.u32 1.1754944e-38, %v6174_v58  ;;  %v6753_v17 = vmul.f32 %v13954_v43, %v6752_v53 }
 0x71b   : > { %v6156_v47 = vsel %vm6155_vm14, %v8674_v13, %v6152_v37  ;;  %v6164_v4 = vmul.f32 %v8682_v40, %v13947_v46  ;;  %8687 = vpow2.f32 %v8277_v52  ;;  %v14013_v16 = vpop.eup %8683  ;;  %8076 = vmatmul.msk.f32.gmra.mxu2 %vm3588_vm10, %v12611_v10  ;;  %7237 = vrot.lane.b32.xlu0 %v7167_v60, %s8901_s22  ;;  %v6747_v13 = vor.u32 1.1754944e-38, %v6746_v51  ;;  %v15745_v51 = vld [vmem:[#allocation191_spill] sm:$0xff] }
 0x71c   : > { %v6161_v45 = vsel %vm13957_vm7, %v6160_v7, %v6156_v47  ;;  %8689 = vrcp.f32 %v14003_v3  ;;  %v6189_v58 = vand.u32 2147483648, %v14003_v3  ;;  %v6406_v27 = vpop.f32.mrf.mxu1  ;;  %vm6169_vm2 = vweird.f32 %v8682_v40 }
 0x71d   : > { %v6236_v31 = vmul.f32 %v6161_v45, %v13817_v59  ;;  %v6165_v55 = vsub.f32 1.0, %v6164_v4  ;;  %8691 = vrcp.f32 %v14005_v8  ;;  %v6407_v54 = vadd.f32 %v13804_v2, %v6406_v27  ;;  %v4015_v53 = vpop.f32.mrf.mxu2  ;;  %vm6170_vm6 = vmor %vm6168_vm12, %vm6169_vm2 }
 0x71e   : > { %v14029_v10 = vsel %vm13996_vm13, %v6747_v13, %v6743_v62  ;;  %v6187_v59 = vand.u32 2147483647, %v14003_v3  ;;  %v6766_v29 = vmul.f32 %v14013_v16, %v13949_v0  ;;  %v4609_v62 = vadd.f32 %v15745_v51, %v4015_v53 }
 0x71f   : > { %7093 = vst.msk [vmem:[%s12647_s29 + $0xe0] sm:$0xff] %vm2439_vm3, %v6236_v31  ;;  %v6166_v7 = vmul.f32 %v8682_v40, %v6165_v55  ;;  %8306 = vmatmul.msk.f32.gmra.mxu1 %vm2439_vm3, %v6236_v31  ;;  %v7107_v49 = vmul.f32 %v14029_v10, %v13675_v48  ;;  %v8686_v19 = vpop.eup %8685  ;;  %v8325_v33 = vmul.f32 -1.442695, %v6407_v54  ;;  %v6754_v11 = vadd.f32 %v13954_v43, %v6753_v17 }
 0x720   : > { %vm6756_vm4 = vweird.f32 %v13954_v43  ;;  %vm6183_vm5 = vweird.f32 %v14003_v3  ;;  %v14043_v15 = vor.u32 1.1754944e-38, %v6189_v58  ;;  %v14045_v60 = vadd.f32 1.0, %v8686_v19 }
 0x721   : > { %v8688_v37 = vpop.eup %8687  ;;  %v6167_v52 = vadd.f32 %v8682_v40, %v6166_v7  ;;  %v6759_v47 = vand.u32 2147483647, %v13881_v24  ;;  %7139 = vst.msk [vmem:[%s13429_s21 + $0x50] sm:$0xff] %vm1020_vm0, %v7107_v49  ;;  %8693 = vpow2.f32 %v8325_v33  ;;  %v7168_v45 = vmul.f32 %v13770_v36, %v4609_v62  ;;  %vm14067_vm8 = vmor %vm6755_vm1, %vm6756_vm4 }
 0x722   : > { %v8690_v48 = vpop.eup %8689  ;;  %v14053_v4 = vadd.f32 1.0, %v8688_v37  ;;  %v6761_v13 = vand.u32 2147483648, %v13881_v24  ;;  %vm14058_vm7 = vcmp.eq.f32.partialorder %v6187_v59, 8.507059e+37  ;;  %v6767_v58 = vsub.f32 1.0, %v6766_v29 }
 0x723   : > { %v6171_v17 = vsel %vm6170_vm6, %v8682_v40, %v6167_v52  ;;  %v6179_v31 = vmul.f32 %v8690_v48, %v14003_v3  ;;  %8695 = vrcp.f32 %v14045_v60  ;;  %v14071_v27 = vpop.eup %8691  ;;  %vm6184_vm9 = vweird.f32 %v8690_v48  ;;  %8077 = vmatmul.msk.f32.gmra.mxu2 %vm3588_vm10, %v12718_v41  ;;  %7239 = vrot.lane.b32.xlu1 %v7168_v45, %s8901_s22 }
 0x724   : > { %v6176_v40 = vsel %vm14009_vm15, %v6175_v28, %v6171_v17  ;;  %8697 = vrcp.f32 %v14053_v4  ;;  %v6758_v24 = vsel %vm14067_vm8, %v13954_v43, %v6754_v11  ;;  %v6204_v59 = vand.u32 2147483648, %v14053_v4  ;;  %v6409_v28 = vpop.f32.mrf.mxu1  ;;  %v15750_v11 = vld [vmem:[#allocation29_spill] sm:$0xff]  ;;  %vm6185_vm14 = vmor %vm6183_vm5, %vm6184_vm9 }
 0x725   : > { %v6237_v54 = vmul.f32 %v6176_v40, %v13867_v6  ;;  %v6180_v7 = vsub.f32 1.0, %v6179_v31  ;;  %v6781_v20 = vmul.f32 %v14071_v27, %v14005_v8  ;;  %v6202_v29 = vand.u32 2147483647, %v14053_v4  ;;  %v4018_v6 = vpop.f32.mrf.mxu2 }
 0x726   : > { %v6410_v53 = vadd.f32 %v13804_v2, %v6409_v28  ;;  %vm6760_vm11 = vcmp.eq.f32.partialorder %v6759_v47, 8.507059e+37  ;;  %v6762_v41 = vor.u32 1.1754944e-38, %v6761_v13  ;;  %v14090_v19 = vor.u32 1.1754944e-38, %v6204_v59  ;;  %v15755_v59 = vld [vmem:[#allocation14_spill] sm:$0xff] }
 0x727   : > { %7094 = vst.msk [vmem:[%s12647_s29 + $0xe8] sm:$0xff] %vm2439_vm3, %v6237_v54  ;;  %v6181_v49 = vmul.f32 %v8690_v48, %v6180_v7  ;;  %v6782_v43 = vsub.f32 1.0, %v6781_v20  ;;  %8307 = vmatmul.msk.f32.gmra.mxu1 %vm2439_vm3, %v6237_v54  ;;  %v6768_v33 = vmul.f32 %v14013_v16, %v6767_v58  ;;  %v8694_v51 = vpop.eup %8693  ;;  %v4612_v37 = vadd.f32 %v15750_v11, %v4018_v6  ;;  %v15758_v11 = vld [vmem:[#allocation32_spill] sm:$0xff] }
 0x728   : > { %v8326_v62 = vmul.f32 -1.442695, %v6410_v53  ;;  %v14095_v52 = vsel %vm6760_vm11, %v6762_v41, %v6758_v24  ;;  %vm6770_vm12 = vweird.f32 %v13949_v0  ;;  %vm6198_vm13 = vweird.f32 %v14053_v4 }
 0x729   : > { %v14098_v47 = vpop.eup %8695  ;;  %v6182_v45 = vadd.f32 %v8690_v48, %v6181_v49  ;;  %v14101_v13 = vadd.f32 1.0, %v8694_v51  ;;  %v7108_v17 = vmul.f32 %v14095_v52, %v13685_v23  ;;  %v6769_v31 = vadd.f32 %v14013_v16, %v6768_v33 }
 0x72a   : > { %v8698_v58 = vpop.eup %8697  ;;  %v6796_v46 = vmul.f32 %v14098_v47, %v14045_v60  ;;  %8699 = vpow2.f32 %v8326_v62  ;;  %v7169_v40 = vmul.f32 %v13871_v18, %v4612_v37  ;;  %vm6771_vm15 = vweird.f32 %v14013_v16 }
 0x72b   : > { %v6186_v24 = vsel %vm6185_vm14, %v8690_v48, %v6182_v45  ;;  %v6194_v54 = vmul.f32 %v8698_v58, %v14053_v4  ;;  %vm6199_vm1 = vweird.f32 %v8698_v58  ;;  %vm14114_vm2 = vcmp.eq.f32.partialorder %v6202_v29, 8.507059e+37  ;;  %vm14121_vm4 = vmor %vm6770_vm12, %vm6771_vm15  ;;  %7140 = vst.msk [vmem:[%s13429_s21 + $0x58] sm:$0xff] %vm1020_vm0, %v7108_v17  ;;  %8078 = vmatmul.msk.f32.gmra.mxu2 %vm3588_vm10, %v15755_v59 }
 0x72c   : > { %8701 = vrcp.f32 %v14101_v13  ;;  %v6191_v48 = vsel %vm14058_vm7, %v14043_v15, %v6186_v24  ;;  %v6797_v7 = vsub.f32 1.0, %v6796_v46  ;;  %7241 = vrot.lane.b32.xlu2 %v7169_v40, %s8901_s22  ;;  %v6773_v20 = vsel %vm14121_vm4, %v14013_v16, %v6769_v31  ;;  %v6412_v41 = vpop.f32.mrf.mxu1  ;;  %vm6200_vm9 = vmor %vm6198_vm13, %vm6199_vm1 }
 0x72d   : > { %v6774_v28 = vand.u32 2147483647, %v13949_v0  ;;  %v6238_v29 = vmul.f32 %v6191_v48, %v13928_v38  ;;  %v6195_v53 = vsub.f32 1.0, %v6194_v54  ;;  %v6776_v55 = vand.u32 2147483648, %v13949_v0  ;;  %v4021_v38 = vpop.f32.mrf.mxu2 }
 0x72e   : > { %v6783_v15 = vmul.f32 %v14071_v27, %v6782_v43  ;;  %v6413_v49 = vadd.f32 %v13804_v2, %v6412_v41  ;;  %vm6785_vm6 = vweird.f32 %v14005_v8  ;;  %vm6786_vm7 = vweird.f32 %v14071_v27 }
 0x72f   : > { %vm14141_vm5 = vcmp.eq.f32.partialorder %v6774_v28, 8.507059e+37  ;;  %7095 = vst.msk [vmem:[%s12647_s29 + $0xf0] sm:$0xff] %vm2439_vm3, %v6238_v29  ;;  %v6196_v16 = vmul.f32 %v8698_v58, %v6195_v53  ;;  %8308 = vmatmul.msk.f32.gmra.mxu1 %vm2439_vm3, %v6238_v29  ;;  %v6777_v33 = vor.u32 1.1754944e-38, %v6776_v55  ;;  %v6789_v43 = vand.u32 2147483647, %v14005_v8  ;;  %vm14153_vm8 = vmor %vm6785_vm6, %vm6786_vm7  ;;  %v15763_v55 = vld [vmem:[#allocation123_spill] sm:$0xff] }
 0x730   : > { %v6784_v0 = vadd.f32 %v14071_v27, %v6783_v15  ;;  %v8700_v51 = vpop.eup %8699  ;;  %v8327_v62 = vmul.f32 -1.442695, %v6413_v49  ;;  %v4615_v37 = vadd.f32 %v15758_v11, %v4021_v38  ;;  %v6791_v17 = vand.u32 2147483648, %v14005_v8  ;;  %v15766_v38 = vld [vmem:[#allocation36_spill] sm:$0xff] }
 0x731   : > { %v6798_v31 = vmul.f32 %v14098_v47, %v6797_v7  ;;  %v6197_v40 = vadd.f32 %v8698_v58, %v6196_v16  ;;  %v14161_v24 = vadd.f32 1.0, %v8700_v51  ;;  %v14165_v54 = vsel %vm14141_vm5, %v6777_v33, %v6773_v20  ;;  %v15771_v53 = vld [vmem:[#allocation128_spill] sm:$0xff] }
 0x732   : > { %v14159_v46 = vpop.eup %8701  ;;  %v6788_v3 = vsel %vm14153_vm8, %v14071_v27, %v6784_v0  ;;  %8703 = vpow2.f32 %v8327_v62  ;;  %v7170_v48 = vmul.f32 %v13932_v5, %v4615_v37  ;;  %v7109_v7 = vmul.f32 %v14165_v54, %v13695_v34 }
 0x733   : > { %v6811_v8 = vmul.f32 %v14159_v46, %v14101_v13  ;;  %v6201_v59 = vsel %vm6200_vm9, %v8698_v58, %v6197_v40  ;;  %8705 = vrcp.f32 %v14161_v24  ;;  %vm6790_vm11 = vcmp.eq.f32.partialorder %v6789_v43, 8.507059e+37  ;;  %8079 = vmatmul.msk.f32.gmra.mxu2 %vm3588_vm10, %v12804_v26 }
 0x734   : > { %v6792_v20 = vor.u32 1.1754944e-38, %v6791_v17  ;;  %v6206_v4 = vsel %vm14114_vm2, %v14090_v19, %v6201_v59  ;;  %7243 = vrot.lane.b32.xlu0 %v7170_v48, %s8901_s22  ;;  %v6799_v28 = vadd.f32 %v14098_v47, %v6798_v31  ;;  %vm6800_vm12 = vweird.f32 %v14045_v60  ;;  %7141 = vst.msk [vmem:[%s13429_s21 + $0x60] sm:$0xff] %vm1020_vm0, %v7109_v7  ;;  %v6415_v58 = vpop.f32.mrf.mxu1  ;;  %v15773_v17 = vld [vmem:[#allocation131_spill] sm:$0xff] }
 0x735   : > { %v6812_v27 = vsub.f32 1.0, %v6811_v8  ;;  %v6239_v34 = vmul.f32 %v6206_v4, %v13989_v44  ;;  %vm6801_vm13 = vweird.f32 %v14098_v47  ;;  %v6804_v19 = vand.u32 2147483647, %v14045_v60  ;;  %v4024_v49 = vpop.f32.mrf.mxu2  ;;  %v15769_v8 = vld [vmem:[#allocation126_spill] sm:$0xff] }
 0x736   : > { %v14190_v29 = vsel %vm6790_vm11, %v6792_v20, %v6788_v3  ;;  %v6416_v26 = vadd.f32 %v13804_v2, %v6415_v58  ;;  %vm14197_vm14 = vmor %vm6800_vm12, %vm6801_vm13  ;;  %v6806_v41 = vand.u32 2147483648, %v14045_v60  ;;  %v4534_v15 = vadd.f32 %v15763_v55, %v12952_v56  ;;  %v15770_v58 = vld [vmem:[#allocation40_spill] sm:$0xff] }
 0x737   : > { %v7110_v23 = vmul.f32 %v14190_v29, %v13892_v63  ;;  %v6813_v44 = vmul.f32 %v14159_v46, %v6812_v27  ;;  %7096 = vst.msk [vmem:[%s12647_s29 + $0xf8] sm:$0xff] %vm2439_vm3, %v6239_v34  ;;  %8309 = vmatmul.msk.f32.gmra.mxu1 %vm2439_vm3, %v6239_v34  ;;  %v6803_v63 = vsel %vm14197_vm14, %v14098_v47, %v6799_v28  ;;  %vm14211_vm15 = vcmp.eq.f32.partialorder %v6804_v19, 8.507059e+37 }
 0x738   : > { %vm6816_vm1 = vweird.f32 %v14159_v46  ;;  %v8704_v60 = vpop.eup %8703  ;;  %v8328_v16 = vmul.f32 -1.442695, %v6416_v26  ;;  %v4618_v33 = vadd.f32 %v15766_v38, %v4024_v49  ;;  %v6807_v56 = vor.u32 1.1754944e-38, %v6806_v41 }
 0x739   : > { %7142 = vst.msk [vmem:[%s13429_s21 + $0x68] sm:$0xff] %vm1020_vm0, %v7110_v23  ;;  %v6814_v0 = vadd.f32 %v14159_v46, %v6813_v44  ;;  %v8706_v43 = vpop.eup %8705  ;;  %v14220_v51 = vadd.f32 1.0, %v8704_v60  ;;  %vm6815_vm3 = vweird.f32 %v14101_v13  ;;  %v6819_v47 = vand.u32 2147483647, %v14101_v13 }
 0x73a   : > { %v6821_v62 = vand.u32 2147483648, %v14101_v13  ;;  %v6826_v11 = vmul.f32 %v8706_v43, %v14161_v24  ;;  %8707 = vpow2.f32 %v8328_v16  ;;  %v7171_v37 = vmul.f32 %v14029_v10, %v4618_v33  ;;  %vm14233_vm2 = vmor %vm6815_vm3, %vm6816_vm1 }
 0x73b   : > { %v14229_v45 = vsel %vm14211_vm15, %v6807_v56, %v6803_v63  ;;  %8709 = vrcp.f32 %v14220_v51  ;;  %v6818_v13 = vsel %vm14233_vm2, %v14159_v46, %v6814_v0  ;;  %8080 = vmatmul.msk.f32.gmra.mxu2 %vm3588_vm10, %v12833_v14  ;;  %v4537_v48 = vadd.f32 %v15769_v8, %v13001_v39 }
 0x73c   : > { %v7111_v31 = vmul.f32 %v14229_v45, %v4534_v15  ;;  %v6827_v40 = vsub.f32 1.0, %v6826_v11  ;;  %7245 = vrot.lane.b32.xlu1 %v7171_v37, %s8901_s22  ;;  %v6822_v3 = vor.u32 1.1754944e-38, %v6821_v62  ;;  %v6418_v7 = vpop.f32.mrf.mxu1  ;;  %vm6820_vm4 = vcmp.eq.f32.partialorder %v6819_v47, 8.507059e+37  ;;  %v15772_v62 = vld [vmem:[#allocation203_spill] sm:$0xff] }
 0x73d   : > { %v6834_v59 = vand.u32 2147483647, %v14161_v24  ;;  %v6836_v20 = vand.u32 2147483648, %v14161_v24  ;;  %v6419_v46 = vadd.f32 %v13804_v2, %v6418_v7  ;;  %vm6831_vm5 = vweird.f32 %v8706_v43  ;;  %v4027_v27 = vpop.f32.mrf.mxu2 }
 0x73e   : > { %7143 = vst.msk [vmem:[%s13429_s21 + $0x70] sm:$0xff] %vm1020_vm0, %v7111_v31  ;;  %v14252_v4 = vsel %vm6820_vm4, %v6822_v3, %v6818_v13  ;;  %v6828_v14 = vmul.f32 %v8706_v43, %v6827_v40  ;;  %v4621_v19 = vadd.f32 %v15770_v58, %v4027_v27  ;;  %vm6830_vm6 = vweird.f32 %v14161_v24 }
 0x73f   : > { %v7112_v28 = vmul.f32 %v14252_v4, %v4537_v48  ;;  %v8329_v39 = vmul.f32 -1.442695, %v6419_v46  ;;  %v4540_v41 = vadd.f32 %v15771_v53, %v13045_v57  ;;  %vm6832_vm7 = vmor %vm6830_vm6, %vm6831_vm5  ;;  %vm6835_vm8 = vcmp.eq.f32.partialorder %v6834_v59, 8.507059e+37 }
 0x740   : > { %v8708_v34 = vpop.eup %8707  ;;  %v6829_v26 = vadd.f32 %v8706_v43, %v6828_v14  ;;  %v6837_v55 = vor.u32 1.1754944e-38, %v6836_v20  ;;  %v7172_v49 = vmul.f32 %v14095_v52, %v4621_v19  ;;  %v6849_v16 = vand.u32 2147483647, %v14220_v51  ;;  %v15775_v19 = vld [vmem:[#allocation134_spill] sm:$0xff] }
 0x741   : > { %v8710_v23 = vpop.eup %8709  ;;  %v14259_v44 = vadd.f32 1.0, %v8708_v34  ;;  %7144 = vst.msk [vmem:[%s13429_s21 + $0x78] sm:$0xff] %vm1020_vm0, %v7112_v28  ;;  %8711 = vpow2.f32 %v8329_v39  ;;  %v6851_v38 = vand.u32 2147483648, %v14220_v51  ;;  %vm6845_vm11 = vweird.f32 %v14220_v51  ;;  %v15774_v34 = vld [vmem:[#allocation205_spill] sm:$0xff] }
 0x742   : > { %v6841_v15 = vmul.f32 %v8710_v23, %v14220_v51  ;;  %v6833_v63 = vsel %vm6832_vm7, %v8706_v43, %v6829_v26  ;;  %7247 = vrot.lane.b32.xlu2 %v7172_v49, %s8901_s22  ;;  %vm6846_vm9 = vweird.f32 %v8710_v23  ;;  %v4543_v31 = vadd.f32 %v15773_v17, %v13080_v1 }
 0x743   : > { %8713 = vrcp.f32 %v14259_v44  ;;  %v14266_v24 = vsel %vm6835_vm8, %v6837_v55, %v6833_v63  ;;  %8081 = vmatmul.msk.f32.gmra.mxu2 %vm3588_vm10, %v12881_v12  ;;  %vm6847_vm12 = vmor %vm6845_vm11, %vm6846_vm9  ;;  %vm6850_vm13 = vcmp.eq.f32.partialorder %v6849_v16, 8.507059e+37  ;;  %v6852_v40 = vor.u32 1.1754944e-38, %v6851_v38 }
 0x744   : > { %v6842_v6 = vsub.f32 1.0, %v6841_v15  ;;  %v7113_v57 = vmul.f32 %v14266_v24, %v4540_v41  ;;  %v6421_v60 = vpop.f32.mrf.mxu1  ;;  %v6866_v51 = vand.u32 2147483648, %v14259_v44  ;;  %v6864_v46 = vand.u32 2147483647, %v14259_v44 }
 0x745   : > { %v6422_v33 = vadd.f32 %v13804_v2, %v6421_v60  ;;  %v4030_v0 = vpop.f32.mrf.mxu2  ;;  %vm6860_vm15 = vweird.f32 %v14259_v44  ;;  %v4546_v26 = vadd.f32 %v15775_v19, %v13111_v32  ;;  %vm7321_vm7 = vcmask 261248  }
 0x746   : > { %7145 = vst.msk [vmem:[%s13429_s21 + $0x80] sm:$0xff] %vm1020_vm0, %v7113_v57  ;;  %v6843_v56 = vmul.f32 %v8710_v23, %v6842_v6  ;;  %v4624_v12 = vadd.f32 %v15772_v62, %v4030_v0  ;;  %v6867_v41 = vor.u32 1.1754944e-38, %v6866_v51  ;;  %vm6865_vm3 = vcmp.eq.f32.partialorder %v6864_v46, 8.507059e+37  ;;  %v15778_v46 = vld [vmem:[#allocation49_spill] sm:$0xff] }
 0x747   : > { %v8712_v43 = vpop.eup %8711  ;;  %v8330_v47 = vmul.f32 -1.442695, %v6422_v33  ;;  %v15776_v33 = vld [vmem:[#allocation207_spill] sm:$0xff] }
 0x748   : > { %v6844_v11 = vadd.f32 %v8710_v23, %v6843_v56  ;;  %v6572_v13 = vadd.f32 1.0, %v8712_v43  ;;  %v7173_v8 = vmul.f32 %v14165_v54, %v4624_v12 }
 0x749   : > { %v8714_v37 = vpop.eup %8713  ;;  %8715 = vpow2.f32 %v8330_v47  ;;  %v15777_v47 = vld [vmem:[#allocation137_spill] sm:$0xff] }
 0x74a   : > { %v6856_v3 = vmul.f32 %v8714_v37, %v14259_v44  ;;  %v6848_v48 = vsel %vm6847_vm12, %v8710_v23, %v6844_v11  ;;  %8717 = vrcp.f32 %v6572_v13  ;;  %7249 = vrot.lane.b32.xlu0 %v7173_v8, %s8901_s22  ;;  %vm6861_vm14 = vweird.f32 %v8714_v37 }
 0x74b   : > { %v14283_v7 = vsel %vm6850_vm13, %v6852_v40, %v6848_v48  ;;  %8082 = vmatmul.msk.f32.gmra.mxu2 %vm3588_vm10, %v12929_v42  ;;  %vm6862_vm1 = vmor %vm6860_vm15, %vm6861_vm14  ;;  %v6881_v57 = vand.u32 2147483648, %v6572_v13  ;;  %v6879_v16 = vand.u32 2147483647, %v6572_v13  ;;  %vm6875_vm4 = vweird.f32 %v6572_v13 }
 0x74c   : > { %v6857_v59 = vsub.f32 1.0, %v6856_v3  ;;  %v7114_v1 = vmul.f32 %v14283_v7, %v4543_v31 }
 0x74d   : > { %v4033_v14 = vpop.f32.mrf.mxu2  ;;  %v6882_v62 = vor.u32 1.1754944e-38, %v6881_v57  ;;  %vm6880_vm6 = vcmp.eq.f32.partialorder %v6879_v16, 8.507059e+37 }
 0x74e   : > { %7146 = vst.msk [vmem:[%s13429_s21 + $0x88] sm:$0xff] %vm1020_vm0, %v7114_v1  ;;  %v6858_v20 = vmul.f32 %v8714_v37, %v6857_v59  ;;  %v6424_v28 = vpop.f32.mrf.mxu1  ;;  %v4627_v39 = vadd.f32 %v15774_v34, %v4033_v14  ;;  %v15779_v34 = vld [vmem:[#allocation139_spill] sm:$0xff] }
 0x74f   : > { %v8716_v27 = vpop.eup %8715  ;;  %v6425_v53 = vadd.f32 %v13804_v2, %v6424_v28 }
 0x750   : > { %v6859_v58 = vadd.f32 %v8714_v37, %v6858_v20  ;;  %v8718_v42 = vpop.eup %8717  ;;  %v14297_v23 = vadd.f32 1.0, %v8716_v27  ;;  %v7174_v15 = vmul.f32 %v14190_v29, %v4627_v39  ;;  %v4552_v39 = vadd.f32 %v15779_v34, %v13177_v9 }
 0x751   : > { %v6871_v55 = vmul.f32 %v8718_v42, %v6572_v13  ;;  %v8331_v63 = vmul.f32 -1.442695, %v6425_v53  ;;  %vm6876_vm2 = vweird.f32 %v8718_v42  ;;  %v15780_v53 = vld [vmem:[#allocation41_spill] sm:$0xff] }
 0x752   : > { %v6863_v49 = vsel %vm6862_vm1, %v8714_v37, %v6859_v58  ;;  %8719 = vrcp.f32 %v14297_v23  ;;  %7251 = vrot.lane.b32.xlu1 %v7174_v15, %s8901_s22  ;;  %vm6877_vm5 = vmor %vm6875_vm4, %vm6876_vm2  ;;  %v6896_v59 = vand.u32 2147483648, %v14297_v23  ;;  %v6894_v20 = vand.u32 2147483647, %v14297_v23 }
 0x753   : > { %v14302_v44 = vsel %vm6865_vm3, %v6867_v41, %v6863_v49  ;;  %v6872_v6 = vsub.f32 1.0, %v6871_v55  ;;  %8083 = vmatmul.msk.f32.gmra.mxu2 %vm3588_vm10, %v12978_v50  ;;  %8721 = vpow2.f32 %v8331_v63  ;;  %v4549_v50 = vadd.f32 %v15777_v47, %v13148_v61 }
 0x754   : > { %v7115_v32 = vmul.f32 %v14302_v44, %v4546_v26  ;;  %vm6890_vm9 = vweird.f32 %v14297_v23  ;;  %v6897_v28 = vor.u32 1.1754944e-38, %v6896_v59  ;;  %vm6895_vm12 = vcmp.eq.f32.partialorder %v6894_v20, 8.507059e+37 }
 0x755   : > { %v6873_v60 = vmul.f32 %v8718_v42, %v6872_v6  ;;  %v4036_v38 = vpop.f32.mrf.mxu2 }
 0x756   : > { %7147 = vst.msk [vmem:[%s13429_s21 + $0x90] sm:$0xff] %vm1020_vm0, %v7115_v32  ;;  %v4630_v56 = vadd.f32 %v15776_v33, %v4036_v38 }
 0x757   : > { %v6874_v0 = vadd.f32 %v8718_v42, %v6873_v60  ;;  %v15781_v60 = vld [vmem:[#allocation85_spill] sm:$0xff] }
 0x758   : > { %v8720_v43 = vpop.eup %8719  ;;  %v6427_v11 = vpop.f32.mrf.mxu1  ;;  %v7175_v37 = vmul.f32 %v14229_v45, %v4630_v56 }
 0x759   : > { %v6886_v12 = vmul.f32 %v8720_v43, %v14297_v23  ;;  %v6878_v17 = vsel %vm6877_vm5, %v8718_v42, %v6874_v0  ;;  %v8722_v31 = vpop.eup %8721  ;;  %v6428_v40 = vadd.f32 %v13804_v2, %v6427_v11  ;;  %vm6891_vm8 = vweird.f32 %v8720_v43 }
 0x75a   : > { %v14316_v3 = vsel %vm6880_vm6, %v6882_v62, %v6878_v17  ;;  %v6574_v8 = vadd.f32 1.0, %v8722_v31  ;;  %7253 = vrot.lane.b32.xlu2 %v7175_v37, %s8901_s22  ;;  %vm6892_vm11 = vmor %vm6890_vm9, %vm6891_vm8  ;;  %v15783_v62 = vld [vmem:[#allocation140_spill] sm:$0xff] }
 0x75b   : > { %v6887_v13 = vsub.f32 1.0, %v6886_v12  ;;  %8084 = vmatmul.msk.f32.gmra.mxu2 %vm3588_vm10, %v13037_v30  ;;  %v7116_v61 = vmul.f32 %v14316_v3, %v4549_v50  ;;  %v8332_v48 = vmul.f32 -1.442695, %v6428_v40  ;;  %v4555_v12 = vadd.f32 %v15783_v62, %v13209_v25 }
 0x75c   : > { %8723 = vrcp.f32 %v6574_v8  ;;  %v7226_v1 = vpop.permute.xlu0 %7225  ;;  %v6911_v38 = vand.u32 2147483648, %v6574_v8  ;;  %v6909_v0 = vand.u32 2147483647, %v6574_v8  ;;  %vm6905_vm14 = vweird.f32 %v6574_v8 }
 0x75d   : > { %7148 = vst.msk [vmem:[%s13429_s21 + $0x98] sm:$0xff] %vm1020_vm0, %v7116_v61  ;;  %v6888_v51 = vmul.f32 %v8720_v43, %v6887_v13  ;;  %8725 = vpow2.f32 %v8332_v48  ;;  %v4039_v30 = vpop.f32.mrf.mxu2  ;;  %v15784_v48 = vld [vmem:[#allocation53_spill] sm:$0xff] }
 0x75e   : > { %7322 = vst.msk [vmem:[%s13429_s21] sm:$0xff] %vm7321_vm7, %v7226_v1  ;;  %v4633_v14 = vadd.f32 %v15778_v46, %v4039_v30  ;;  %v6912_v50 = vor.u32 1.1754944e-38, %v6911_v38  ;;  %vm6910_vm1 = vcmp.eq.f32.partialorder %v6909_v0, 8.507059e+37  ;;  %v15789_v38 = vld [vmem:[#allocation46_spill] sm:$0xff] }
 0x75f   : > { %v6889_v27 = vadd.f32 %v8720_v43, %v6888_v51 }
 0x760   : > { %v7176_v58 = vmul.f32 %v14252_v4, %v4633_v14 }
 0x761   : > { %v6893_v42 = vsel %vm6892_vm11, %v8720_v43, %v6889_v27  ;;  %v15785_v27 = vld [vmem:[#allocation224_spill] sm:$0xff] }
 0x762   : > { %v14333_v19 = vsel %vm6895_vm12, %v6897_v28, %v6893_v42  ;;  %v8724_v26 = vpop.eup %8723  ;;  %7255 = vrot.lane.b32.xlu0 %v7176_v58, %s8901_s22  ;;  %v15786_v58 = vld [vmem:[#allocation15_spill] sm:$0xff]  ;;  %v15787_v42 = vld [vmem:[#allocation142_spill] sm:$0xff] }
 0x763   : > { %8085 = vmatmul.msk.f32.gmra.mxu2 %vm3588_vm10, %v15780_v53  ;;  %v7117_v23 = vmul.f32 %v14333_v19, %v4552_v39  ;;  %v8726_v41 = vpop.eup %8725  ;;  %v6901_v55 = vmul.f32 %v8724_v26, %v6574_v8  ;;  %vm6906_vm13 = vweird.f32 %v8724_v26  ;;  %v14372_v53 = vld [vmem:[%s14783_s12] ss:$0 sm:$0xff] }
 0x764   : > { %v6575_v15 = vadd.f32 1.0, %v8726_v41  ;;  %v6430_v9 = vpop.f32.mrf.mxu1  ;;  %v7234_v49 = vpop.permute.xlu2 %7233  ;;  %vm6907_vm15 = vmor %vm6905_vm14, %vm6906_vm13 }
 0x765   : > { %7149 = vst.msk [vmem:[%s13429_s21 + $0xa0] sm:$0xff] %vm1020_vm0, %v7117_v23  ;;  %v6902_v63 = vsub.f32 1.0, %v6901_v55  ;;  %v6431_v6 = vadd.f32 %v13804_v2, %v6430_v9  ;;  %v7228_v32 = vpop.permute.xlu0 %7227  ;;  %v4042_v57 = vpop.f32.mrf.mxu2  ;;  %v15782_v2 = vld [vmem:[#allocation222_spill] sm:$0xff] }
 0x766   : > { %7326 = vst.msk [vmem:[%s13429_s21 + $0x20] sm:$0xff] %vm7321_vm7, %v7234_v49  ;;  %8727 = vrcp.f32 %v6575_v15  ;;  %v4636_v16 = vadd.f32 %v15781_v60, %v4042_v57  ;;  %v6926_v30 = vand.u32 2147483648, %v6575_v15  ;;  %v6924_v14 = vand.u32 2147483647, %v6575_v15 }
 0x767   : > { %7323 = vst.msk [vmem:[%s13429_s21 + $0x8] sm:$0xff] %vm7321_vm7, %v7228_v32  ;;  %v8333_v33 = vmul.f32 -1.442695, %v6431_v6  ;;  %v6903_v56 = vmul.f32 %v8724_v26, %v6902_v63  ;;  %vm6920_vm2 = vweird.f32 %v6575_v15 }
 0x768   : > { %v7177_v43 = vmul.f32 %v14266_v24, %v4636_v16  ;;  %v6927_v39 = vor.u32 1.1754944e-38, %v6926_v30  ;;  %vm6925_vm5 = vcmp.eq.f32.partialorder %v6924_v14, 8.507059e+37  ;;  %v15794_v14 = vld [vmem:[#allocation58_spill] sm:$0xff] }
 0x769   : > { %8729 = vpow2.f32 %v8333_v33  ;;  %v6904_v47 = vadd.f32 %v8724_v26, %v6903_v56 }
 0x76a   : > { %7257 = vrot.lane.b32.xlu1 %v7177_v43, %s8901_s22 }
 0x76b   : > { %8086 = vmatmul.msk.f32.gmra.mxu2 %vm3588_vm10, %v15782_v2  ;;  %v6908_v11 = vsel %vm6907_vm15, %v8724_v26, %v6904_v47  ;;  %v4558_v26 = vadd.f32 %v15787_v42, %v15786_v58 }
 0x76c   : > { %v8728_v37 = vpop.eup %8727  ;;  %v7236_v17 = vpop.permute.xlu2 %7235  ;;  %v14353_v31 = vsel %vm6910_vm1, %v6912_v50, %v6908_v11  ;;  %v15790_v50 = vld [vmem:[#allocation56_spill] sm:$0xff] }
 0x76d   : > { %v6916_v40 = vmul.f32 %v8728_v37, %v6575_v15  ;;  %v7230_v13 = vpop.permute.xlu1 %7229  ;;  %7327 = vst.msk [vmem:[%s13429_s21 + $0x28] sm:$0xff] %vm7321_vm7, %v7236_v17  ;;  %v4045_v8 = vpop.f32.mrf.mxu2  ;;  %v7118_v61 = vmul.f32 %v14353_v31, %v4555_v12  ;;  %vm6921_vm3 = vweird.f32 %v8728_v37  ;;  %v15788_v15 = vld [vmem:[#allocation87_spill] sm:$0xff] }
 0x76e   : > { %7324 = vst.msk [vmem:[%s13429_s21 + $0x10] sm:$0xff] %vm7321_vm7, %v7230_v13  ;;  %v4639_v59 = vadd.f32 %v15784_v48, %v4045_v8  ;;  %vm6922_vm4 = vmor %vm6920_vm2, %vm6921_vm3  ;;  %v15791_v8 = vld [vmem:[#allocation72_spill] sm:$0xff] }
 0x76f   : > { %v8730_v1 = vpop.eup %8729  ;;  %v6917_v51 = vsub.f32 1.0, %v6916_v40  ;;  %7150 = vst.msk [vmem:[%s13429_s21 + $0xa8] sm:$0xff] %vm1020_vm0, %v7118_v61  ;;  %v15792_v61 = vld [vmem:[#allocation144_spill] sm:$0xff] }
 0x770   : > { %v6576_v25 = vadd.f32 1.0, %v8730_v1  ;;  %v7178_v20 = vmul.f32 %v14283_v7, %v4639_v59  ;;  %v4561_v48 = vadd.f32 %v15792_v61, %v15791_v8 }
 0x771   : > { %v6918_v46 = vmul.f32 %v8728_v37, %v6917_v51  ;;  %v15793_v51 = vld [vmem:[#allocation145_spill] sm:$0xff] }
 0x772   : > { %8731 = vrcp.f32 %v6576_v25  ;;  %7259 = vrot.lane.b32.xlu2 %v7178_v20, %s8901_s22  ;;  %v6941_v56 = vand.u32 2147483648, %v6576_v25  ;;  %v6939_v47 = vand.u32 2147483647, %v6576_v25  ;;  %vm6935_vm8 = vweird.f32 %v6576_v25 }
 0x773   : > { %8087 = vmatmul.msk.f32.gmra.mxu2 %vm3588_vm10, %v15785_v27  ;;  %v6919_v28 = vadd.f32 %v8728_v37, %v6918_v46 }
 0x774   : > { %v6942_v13 = vor.u32 1.1754944e-38, %v6941_v56  ;;  %vm6940_vm11 = vcmp.eq.f32.partialorder %v6939_v47, 8.507059e+37 }
 0x775   : > { %v6433_v34 = vpop.f32.mrf.mxu1  ;;  %v7232_v41 = vpop.permute.xlu1 %7231  ;;  %v6923_v9 = vsel %vm6922_vm4, %v8728_v37, %v6919_v28 }
 0x776   : > { %v6434_v23 = vadd.f32 %v14372_v53, %v6433_v34  ;;  %v4048_v55 = vpop.f32.mrf.mxu2  ;;  %7325 = vst.msk [vmem:[%s13429_s21 + $0x18] sm:$0xff] %vm7321_vm7, %v7232_v41  ;;  %v14378_v63 = vsel %vm6925_vm5, %v6927_v39, %v6923_v9  ;;  %v15795_v41 = vld [vmem:[#allocation102_spill] sm:$0xff] }
 0x777   : > { %v4642_v49 = vadd.f32 %v15788_v15, %v4048_v55  ;;  %v7119_v32 = vmul.f32 %v14378_v63, %v4558_v26 }
 0x778   : > { %v8334_v6 = vmul.f32 -1.442695, %v6434_v23  ;;  %v8732_v57 = vpop.eup %8731 }
 0x779   : > { %v7179_v60 = vmul.f32 %v14302_v44, %v4642_v49  ;;  %v6931_v16 = vmul.f32 %v8732_v57, %v6576_v25  ;;  %7151 = vst.msk [vmem:[%s13429_s21 + $0xb0] sm:$0xff] %vm1020_vm0, %v7119_v32  ;;  %vm6936_vm6 = vweird.f32 %v8732_v57 }
 0x77a   : > { %8733 = vpow2.f32 %v8334_v6  ;;  %vm6937_vm9 = vmor %vm6935_vm8, %vm6936_vm6 }
 0x77b   : > { %8088 = vmatmul.msk.f32.gmra.mxu2 %vm3588_vm10, %v15789_v38  ;;  %7261 = vrot.lane.b32.xlu0 %v7179_v60, %s8901_s22  ;;  %v6932_v33 = vsub.f32 1.0, %v6931_v16  ;;  %v15796_v60 = vld [vmem:[#allocation60_spill] sm:$0xff] }
 0x77d   : > { %v6933_v43 = vmul.f32 %v8732_v57, %v6932_v33 }
 0x77e   : > { %v4051_v0 = vpop.f32.mrf.mxu2 }
 0x77f   : > { %v6436_v2 = vpop.f32.mrf.mxu1  ;;  %v4645_v62 = vadd.f32 %v15790_v50, %v4051_v0  ;;  %v6934_v37 = vadd.f32 %v8732_v57, %v6933_v43  ;;  %v15797_v0 = vld [vmem:[#allocation17_spill] sm:$0xff]  ;;  %v15798_v43 = vld [vmem:[#allocation147_spill] sm:$0xff] }
 0x780   : > { %v8734_v12 = vpop.eup %8733  ;;  %v6437_v11 = vadd.f32 %v14372_v53, %v6436_v2  ;;  %v4564_v47 = vadd.f32 %v15798_v43, %v15797_v0 }
 0x781   : > { %v6577_v17 = vadd.f32 1.0, %v8734_v12  ;;  %v7180_v40 = vmul.f32 %v14316_v3, %v4645_v62  ;;  %v6938_v1 = vsel %vm6937_vm9, %v8732_v57, %v6934_v37  ;;  %v15799_v12 = vld [vmem:[#allocation186_spill] sm:$0xff] }
 0x782   : > { %v8335_v59 = vmul.f32 -1.442695, %v6437_v11  ;;  %v14395_v25 = vsel %vm6940_vm11, %v6942_v13, %v6938_v1 }
 0x783   : > { %8735 = vrcp.f32 %v6577_v17  ;;  %8089 = vmatmul.msk.f32.gmra.mxu2 %vm3588_vm10, %v15793_v51  ;;  %7263 = vrot.lane.b32.xlu1 %v7180_v40, %s8901_s22  ;;  %v7120_v20 = vmul.f32 %v14395_v25, %v4561_v48  ;;  %v6956_v49 = vand.u32 2147483648, %v6577_v17  ;;  %v6954_v57 = vand.u32 2147483647, %v6577_v17  ;;  %v15800_v51 = vld [vmem:[#allocation62_spill] sm:$0xff] }
 0x784   : > { %8737 = vpow2.f32 %v8335_v59  ;;  %vm6950_vm13 = vweird.f32 %v6577_v17 }
 0x785   : > { %7152 = vst.msk [vmem:[%s13429_s21 + $0xb8] sm:$0xff] %vm1020_vm0, %v7120_v20  ;;  %v6957_v56 = vor.u32 1.1754944e-38, %v6956_v49  ;;  %vm6955_vm15 = vcmp.eq.f32.partialorder %v6954_v57, 8.507059e+37 }
 0x786   : > { %v7242_v30 = vpop.permute.xlu2 %7241  ;;  %v4054_v46 = vpop.f32.mrf.mxu2 }
 0x787   : > { %7330 = vst.msk [vmem:[%s13429_s21 + $0x40] sm:$0xff] %vm7321_vm7, %v7242_v30  ;;  %v4648_v27 = vadd.f32 %v15794_v14, %v4054_v46 }
 0x789   : > { %v8736_v28 = vpop.eup %8735  ;;  %v7181_v39 = vmul.f32 %v14333_v19, %v4648_v27 }
 0x78a   : > { %v6439_v34 = vpop.f32.mrf.mxu1  ;;  %v8738_v58 = vpop.eup %8737  ;;  %v6946_v42 = vmul.f32 %v8736_v28, %v6577_v17  ;;  %vm6951_vm12 = vweird.f32 %v8736_v28 }
 0x78b   : > { %v6440_v26 = vadd.f32 %v14372_v53, %v6439_v34  ;;  %v6578_v23 = vadd.f32 1.0, %v8738_v58  ;;  %8090 = vmatmul.msk.f32.gmra.mxu2 %vm3588_vm10, %v15795_v41  ;;  %7265 = vrot.lane.b32.xlu2 %v7181_v39, %s8901_s22  ;;  %vm6952_vm14 = vmor %vm6950_vm13, %vm6951_vm12  ;;  %v15801_v39 = vld [vmem:[#allocation50_spill] sm:$0xff] }
 0x78c   : > { %v6947_v55 = vsub.f32 1.0, %v6946_v42  ;;  %v15802_v42 = vld [vmem:[#allocation74_spill] sm:$0xff] }
 0x78d   : > { %v8336_v9 = vmul.f32 -1.442695, %v6440_v26  ;;  %8739 = vrcp.f32 %v6578_v23  ;;  %v7238_v15 = vpop.permute.xlu0 %7237  ;;  %v6971_v30 = vand.u32 2147483648, %v6578_v23  ;;  %v6969_v14 = vand.u32 2147483647, %v6578_v23  ;;  %v15803_v26 = vld [vmem:[#allocation150_spill] sm:$0xff] }
 0x78e   : > { %7328 = vst.msk [vmem:[%s13429_s21 + $0x30] sm:$0xff] %vm7321_vm7, %v7238_v15  ;;  %v4057_v6 = vpop.f32.mrf.mxu2  ;;  %v6948_v32 = vmul.f32 %v8736_v28, %v6947_v55  ;;  %vm6965_vm3 = vweird.f32 %v6578_v23  ;;  %v4567_v41 = vadd.f32 %v15803_v26, %v15802_v42 }
 0x78f   : > { %8741 = vpow2.f32 %v8336_v9  ;;  %v4651_v16 = vadd.f32 %v15796_v60, %v4057_v6  ;;  %v6972_v58 = vor.u32 1.1754944e-38, %v6971_v30  ;;  %vm6970_vm4 = vcmp.eq.f32.partialorder %v6969_v14, 8.507059e+37 }
 0x790   : > { %v6949_v38 = vadd.f32 %v8736_v28, %v6948_v32 }
 0x791   : > { %v7182_v33 = vmul.f32 %v14353_v31, %v4651_v16 }
 0x792   : > { %v6953_v2 = vsel %vm6952_vm14, %v8736_v28, %v6949_v38 }
 0x793   : > { %v8740_v50 = vpop.eup %8739  ;;  %8091 = vmatmul.msk.f32.gmra.mxu2 %vm3588_vm10, %v15799_v12  ;;  %7267 = vrot.lane.b32.xlu0 %v7182_v33, %s8901_s22  ;;  %v14417_v11 = vsel %vm6955_vm15, %v6957_v56, %v6953_v2  ;;  %v15804_v33 = vld [vmem:[#allocation65_spill] sm:$0xff]  ;;  %v15805_v12 = vld [vmem:[#allocation108_spill] sm:$0xff] }
 0x794   : > { %v6442_v62 = vpop.f32.mrf.mxu1  ;;  %v6961_v17 = vmul.f32 %v8740_v50, %v6578_v23  ;;  %v7121_v13 = vmul.f32 %v14417_v11, %v4564_v47  ;;  %vm6966_vm1 = vweird.f32 %v8740_v50 }
 0x795   : > { %v8742_v37 = vpop.eup %8741  ;;  %v6443_v40 = vadd.f32 %v14372_v53, %v6442_v62  ;;  %v7240_v61 = vpop.permute.xlu1 %7239  ;;  %vm6967_vm2 = vmor %vm6965_vm3, %vm6966_vm1 }
 0x796   : > { %v6579_v8 = vadd.f32 1.0, %v8742_v37  ;;  %v6962_v48 = vsub.f32 1.0, %v6961_v17  ;;  %7329 = vst.msk [vmem:[%s13429_s21 + $0x38] sm:$0xff] %vm7321_vm7, %v7240_v61  ;;  %v4060_v1 = vpop.f32.mrf.mxu2 }
 0x797   : > { %v8337_v59 = vmul.f32 -1.442695, %v6443_v40  ;;  %v4654_v20 = vadd.f32 %v15800_v51, %v4060_v1  ;;  %7153 = vst.msk [vmem:[%s13429_s21 + $0xc0] sm:$0xff] %vm1020_vm0, %v7121_v13 }
 0x798   : > { %8743 = vrcp.f32 %v6579_v8  ;;  %v6963_v46 = vmul.f32 %v8740_v50, %v6962_v48  ;;  %v6986_v47 = vand.u32 2147483648, %v6579_v8  ;;  %vm6980_vm6 = vweird.f32 %v6579_v8  ;;  %v15806_v48 = vld [vmem:[#allocation209_spill] sm:$0xff] }
 0x799   : > { %8745 = vpow2.f32 %v8337_v59  ;;  %v7183_v27 = vmul.f32 %v14378_v63, %v4654_v20  ;;  %v15807_v59 = vld [vmem:[#allocation152_spill] sm:$0xff] }
 0x79a   : > { %v6964_v28 = vadd.f32 %v8740_v50, %v6963_v46  ;;  %v6987_v13 = vor.u32 1.1754944e-38, %v6986_v47  ;;  %v4570_v1 = vadd.f32 %v15807_v59, %v15806_v48  ;;  %v15813_v48 = vld [vmem:[#allocation159_spill] sm:$0xff] }
 0x79b   : > { %8092 = vmatmul.msk.f32.gmra.mxu2 %vm3588_vm10, %v15801_v39  ;;  %7269 = vrot.lane.b32.xlu1 %v7183_v27, %s8901_s22  ;;  %v15808_v27 = vld [vmem:[#allocation3_spill] sm:$0xff] }
 0x79c   : > { %v6445_v34 = vpop.f32.mrf.mxu1  ;;  %v6968_v9 = vsel %vm6967_vm2, %v8740_v50, %v6964_v28  ;;  %v7248_v49 = vpop.permute.xlu2 %7247  ;;  %v6984_v50 = vand.u32 2147483647, %v6579_v8 }
 0x79d   : > { %v6446_v55 = vadd.f32 %v14372_v53, %v6445_v34  ;;  %v14433_v23 = vsel %vm6970_vm4, %v6972_v58, %v6968_v9  ;;  %7333 = vst.msk [vmem:[%s13429_s21 + $0x58] sm:$0xff] %vm7321_vm7, %v7248_v49 }
 0x79e   : > { %v8744_v15 = vpop.eup %8743  ;;  %v4063_v60 = vpop.f32.mrf.mxu2  ;;  %v7122_v16 = vmul.f32 %v14433_v23, %v4567_v41  ;;  %vm6985_vm9 = vcmp.eq.f32.partialorder %v6984_v50, 8.507059e+37  ;;  %v15809_v41 = vld [vmem:[#allocation192_spill] sm:$0xff] }
 0x79f   : > { %v8746_v6 = vpop.eup %8745  ;;  %v6976_v32 = vmul.f32 %v8744_v15, %v6579_v8  ;;  %v8338_v57 = vmul.f32 -1.442695, %v6446_v55  ;;  %v4657_v56 = vadd.f32 %v15804_v33, %v4063_v60  ;;  %vm6981_vm5 = vweird.f32 %v8744_v15 }
 0x7a0   : > { %v14438_v38 = vadd.f32 1.0, %v8746_v6  ;;  %7154 = vst.msk [vmem:[%s13429_s21 + $0xc8] sm:$0xff] %vm1020_vm0, %v7122_v16  ;;  %vm6982_vm8 = vmor %vm6980_vm6, %vm6981_vm5 }
 0x7a1   : > { %v6977_v0 = vsub.f32 1.0, %v6976_v32  ;;  %8747 = vpow2.f32 %v8338_v57  ;;  %v7184_v43 = vmul.f32 %v14395_v25, %v4657_v56  ;;  %v15810_v56 = vld [vmem:[#allocation76_spill] sm:$0xff] }
 0x7a2   : > { %8749 = vrcp.f32 %v14438_v38  ;;  %v7001_v55 = vand.u32 2147483648, %v14438_v38  ;;  %v6999_v49 = vand.u32 2147483647, %v14438_v38  ;;  %vm6995_vm12 = vweird.f32 %v14438_v38 }
 0x7a3   : > { %v6978_v2 = vmul.f32 %v8744_v15, %v6977_v0  ;;  %8093 = vmatmul.msk.f32.gmra.mxu2 %vm3588_vm10, %v15805_v12  ;;  %7271 = vrot.lane.b32.xlu2 %v7184_v43, %s8901_s22  ;;  %v15811_v0 = vld [vmem:[#allocation155_spill] sm:$0xff] }
 0x7a4   : > { %v6448_v62 = vpop.f32.mrf.mxu1  ;;  %v4573_v43 = vadd.f32 %v15811_v0, %v15810_v56  ;;  %vm7000_vm14 = vcmp.eq.f32.partialorder %v6999_v49, 8.507059e+37 }
 0x7a5   : > { %v6449_v37 = vadd.f32 %v14372_v53, %v6448_v62  ;;  %v6979_v17 = vadd.f32 %v8744_v15, %v6978_v2  ;;  %v15812_v2 = vld [vmem:[#allocation4_spill] sm:$0xff]  ;;  %v7002_v62 = vor.u32 1.1754944e-38, %v7001_v55 }
 0x7a6   : > { %v7244_v40 = vpop.permute.xlu0 %7243  ;;  %v4066_v20 = vpop.f32.mrf.mxu2 }
 0x7a7   : > { %v8748_v61 = vpop.eup %8747  ;;  %v8339_v51 = vmul.f32 -1.442695, %v6449_v37  ;;  %7331 = vst.msk [vmem:[%s13429_s21 + $0x48] sm:$0xff] %vm7321_vm7, %v7244_v40  ;;  %v6983_v30 = vsel %vm6982_vm8, %v8744_v15, %v6979_v17  ;;  %v4660_v28 = vadd.f32 %v15808_v27, %v4066_v20 }
 0x7a8   : > { %v8750_v46 = vpop.eup %8749  ;;  %v14453_v14 = vadd.f32 1.0, %v8748_v61  ;;  %v14456_v8 = vsel %vm6985_vm9, %v6987_v13, %v6983_v30 }
 0x7a9   : > { %v6991_v34 = vmul.f32 %v8750_v46, %v14438_v38  ;;  %8751 = vpow2.f32 %v8339_v51  ;;  %v7123_v39 = vmul.f32 %v14456_v8, %v4570_v1  ;;  %v7185_v58 = vmul.f32 %v14417_v11, %v4660_v28 }
 0x7aa   : > { %8753 = vrcp.f32 %v14453_v14  ;;  %vm6996_vm11 = vweird.f32 %v8750_v46  ;;  %v7016_v59 = vand.u32 2147483648, %v14453_v14  ;;  %v7014_v20 = vand.u32 2147483647, %v14453_v14 }
 0x7ab   : > { %v6992_v42 = vsub.f32 1.0, %v6991_v34  ;;  %7155 = vst.msk [vmem:[%s13429_s21 + $0xd0] sm:$0xff] %vm1020_vm0, %v7123_v39  ;;  %8094 = vmatmul.msk.f32.gmra.mxu2 %vm3588_vm10, %v15809_v41  ;;  %7273 = vrot.lane.b32.xlu0 %v7185_v58, %s8901_s22  ;;  %vm6997_vm13 = vmor %vm6995_vm12, %vm6996_vm11  ;;  %vm7010_vm1 = vweird.f32 %v14453_v14  ;;  %v15814_v58 = vld [vmem:[#allocation77_spill] sm:$0xff] }
 0x7ac   : > { %v6451_v26 = vpop.f32.mrf.mxu1  ;;  %v15816_v41 = vld [vmem:[#allocation5_spill] sm:$0xff]  ;;  %vm7015_vm2 = vcmp.eq.f32.partialorder %v7014_v20, 8.507059e+37 }
 0x7ad   : > { %v6452_v9 = vadd.f32 %v14372_v53, %v6451_v26  ;;  %v6993_v15 = vmul.f32 %v8750_v46, %v6992_v42  ;;  %v15815_v42 = vld [vmem:[#allocation158_spill] sm:$0xff] }
 0x7ae   : > { %v7246_v6 = vpop.permute.xlu1 %7245  ;;  %v4069_v60 = vpop.f32.mrf.mxu2  ;;  %v4576_v26 = vadd.f32 %v15815_v42, %v15814_v58 }
 0x7af   : > { %v8752_v32 = vpop.eup %8751  ;;  %v8340_v57 = vmul.f32 -1.442695, %v6452_v9  ;;  %7332 = vst.msk [vmem:[%s13429_s21 + $0x50] sm:$0xff] %vm7321_vm7, %v7246_v6  ;;  %v6994_v16 = vadd.f32 %v8750_v46, %v6993_v15  ;;  %v4663_v50 = vadd.f32 %v15812_v2, %v4069_v60  ;;  %v7017_v9 = vor.u32 1.1754944e-38, %v7016_v59  ;;  %v15817_v60 = vld [vmem:[#allocation115_spill] sm:$0xff] }
 0x7b0   : > { %v8754_v33 = vpop.eup %8753  ;;  %v14475_v47 = vadd.f32 1.0, %v8752_v32 }
 0x7b1   : > { %v7006_v12 = vmul.f32 %v8754_v33, %v14453_v14  ;;  %8755 = vpow2.f32 %v8340_v57  ;;  %v6998_v37 = vsel %vm6997_vm13, %v8750_v46, %v6994_v16  ;;  %v7186_v38 = vmul.f32 %v14433_v23, %v4663_v50 }
 0x7b2   : > { %8757 = vrcp.f32 %v14475_v47  ;;  %v14481_v17 = vsel %vm7000_vm14, %v7002_v62, %v6998_v37  ;;  %vm7011_vm15 = vweird.f32 %v8754_v33  ;;  %v7031_v16 = vand.u32 2147483648, %v14475_v47  ;;  %v15818_v37 = vld [vmem:[#allocation6_spill] sm:$0xff] }
 0x7b3   : > { %v7007_v40 = vsub.f32 1.0, %v7006_v12  ;;  %v7124_v13 = vmul.f32 %v14481_v17, %v4573_v43  ;;  %8095 = vmatmul.msk.f32.gmra.mxu2 %vm3588_vm10, %v15813_v48  ;;  %7275 = vrot.lane.b32.xlu1 %v7186_v38, %s8901_s22  ;;  %vm7012_vm3 = vmor %vm7010_vm1, %vm7011_vm15  ;;  %v7029_v56 = vand.u32 2147483647, %v14475_v47  ;;  %vm7025_vm5 = vweird.f32 %v14475_v47 }
 0x7b4   : > { %v6454_v61 = vpop.f32.mrf.mxu1  ;;  %v7254_v30 = vpop.permute.xlu2 %7253 }
 0x7b5   : > { %v6455_v1 = vadd.f32 %v14372_v53, %v6454_v61  ;;  %7156 = vst.msk [vmem:[%s13429_s21 + $0xd8] sm:$0xff] %vm1020_vm0, %v7124_v13  ;;  %v7008_v51 = vmul.f32 %v8754_v33, %v7007_v40  ;;  %v7032_v40 = vor.u32 1.1754944e-38, %v7031_v16  ;;  %v15819_v13 = vld [vmem:[#allocation78_spill] sm:$0xff]  ;;  %v15820_v61 = vld [vmem:[#allocation161_spill] sm:$0xff]  ;;  %vm7030_vm8 = vcmp.eq.f32.partialorder %v7029_v56, 8.507059e+37 }
 0x7b6   : > { %7336 = vst.msk [vmem:[%s13429_s21 + $0x70] sm:$0xff] %vm7321_vm7, %v7254_v30  ;;  %v4072_v28 = vpop.f32.mrf.mxu2  ;;  %v4579_v48 = vadd.f32 %v15820_v61, %v15819_v13  ;;  %v15825_v56 = vld [vmem:[#allocation165_spill] sm:$0xff]  ;;  %v15827_v61 = vld [vmem:[#allocation212_spill] sm:$0xff] }
 0x7b7   : > { %v8756_v46 = vpop.eup %8755  ;;  %v8341_v27 = vmul.f32 -1.442695, %v6455_v1  ;;  %v7009_v34 = vadd.f32 %v8754_v33, %v7008_v51  ;;  %v4666_v55 = vadd.f32 %v15816_v41, %v4072_v28  ;;  %v15822_v41 = vld [vmem:[#allocation7_spill] sm:$0xff] }
 0x7b8   : > { %v8758_v39 = vpop.eup %8757  ;;  %v6583_v53 = vadd.f32 1.0, %v8756_v46  ;;  %v15821_v46 = vld [vmem:[#allocation90_spill] sm:$0xff] }
 0x7b9   : > { %v7021_v15 = vmul.f32 %v8758_v39, %v14475_v47  ;;  %8759 = vpow2.f32 %v8341_v27  ;;  %v7013_v49 = vsel %vm7012_vm3, %v8754_v33, %v7009_v34  ;;  %v7187_v6 = vmul.f32 %v14456_v8, %v4666_v55 }
 0x7ba   : > { %8761 = vrcp.f32 %v6583_v53  ;;  %v14500_v14 = vsel %vm7015_vm2, %v7017_v9, %v7013_v49  ;;  %vm7026_vm4 = vweird.f32 %v8758_v39  ;;  %v7046_v27 = vand.u32 2147483648, %v6583_v53  ;;  %v15824_v49 = vld [vmem:[#allocation164_spill] sm:$0xff] }
 0x7bb   : > { %v7022_v32 = vsub.f32 1.0, %v7021_v15  ;;  %v7125_v57 = vmul.f32 %v14500_v14, %v4576_v26  ;;  %8096 = vmatmul.msk.f32.gmra.mxu2 %vm3588_vm10, %v15817_v60  ;;  %7277 = vrot.lane.b32.xlu2 %v7187_v6, %s8901_s22  ;;  %vm7027_vm6 = vmor %vm7025_vm5, %vm7026_vm4  ;;  %v7044_v34 = vand.u32 2147483647, %v6583_v53  ;;  %vm7040_vm11 = vweird.f32 %v6583_v53  ;;  %v15823_v15 = vld [vmem:[#allocation79_spill] sm:$0xff] }
 0x7bc   : > { %v7250_v0 = vpop.permute.xlu0 %7249  ;;  %v7047_v9 = vor.u32 1.1754944e-38, %v7046_v27  ;;  %v4582_v6 = vadd.f32 %v15824_v49, %v15823_v15  ;;  %v15833_v15 = vld [vmem:[#allocation173_spill] sm:$0xff] }
 0x7bd   : > { %7157 = vst.msk [vmem:[%s13429_s21 + $0xe0] sm:$0xff] %vm1020_vm0, %v7125_v57  ;;  %v7023_v33 = vmul.f32 %v8758_v39, %v7022_v32  ;;  %vm7045_vm13 = vcmp.eq.f32.partialorder %v7044_v34, 8.507059e+37 }
 0x7be   : > { %7334 = vst.msk [vmem:[%s13429_s21 + $0x60] sm:$0xff] %vm7321_vm7, %v7250_v0  ;;  %v4075_v2 = vpop.f32.mrf.mxu2 }
 0x7bf   : > { %v8760_v43 = vpop.eup %8759  ;;  %v7024_v50 = vadd.f32 %v8758_v39, %v7023_v33  ;;  %v4669_v38 = vadd.f32 %v15818_v37, %v4075_v2 }
 0x7c0   : > { %v8762_v62 = vpop.eup %8761  ;;  %v6584_v12 = vadd.f32 1.0, %v8760_v43 }
 0x7c1   : > { %v7036_v59 = vmul.f32 %v8762_v62, %v6583_v53  ;;  %v7028_v1 = vsel %vm7027_vm6, %v8758_v39, %v7024_v50  ;;  %v7188_v51 = vmul.f32 %v14481_v17, %v4669_v38  ;;  %vm7041_vm9 = vweird.f32 %v8762_v62  ;;  %v15826_v38 = vld [vmem:[#allocation9_spill] sm:$0xff] }
 0x7c2   : > { %8763 = vrcp.f32 %v6584_v12  ;;  %v14517_v20 = vsel %vm7030_vm8, %v7032_v40, %v7028_v1  ;;  %vm7042_vm12 = vmor %vm7040_vm11, %vm7041_vm9  ;;  %v7061_v0 = vand.u32 2147483648, %v6584_v12  ;;  %v7059_v2 = vand.u32 2147483647, %v6584_v12 }
 0x7c3   : > { %v7037_v47 = vsub.f32 1.0, %v7036_v59  ;;  %v7126_v30 = vmul.f32 %v14517_v20, %v4579_v48  ;;  %8097 = vmatmul.msk.f32.gmra.mxu2 %vm3588_vm10, %v15821_v46  ;;  %7279 = vrot.lane.b32.xlu0 %v7188_v51, %s8901_s22  ;;  %vm7055_vm15 = vweird.f32 %v6584_v12  ;;  %v15828_v48 = vld [vmem:[#allocation166_spill] sm:$0xff]  ;;  %v15829_v46 = vld [vmem:[#allocation104_spill] sm:$0xff] }
 0x7c4   : > { %v7252_v39 = vpop.permute.xlu1 %7251  ;;  %v7062_v13 = vor.u32 1.1754944e-38, %v7061_v0  ;;  %v4585_v59 = vadd.f32 %v15828_v48, %v15827_v61  ;;  %vm7060_vm3 = vcmp.eq.f32.partialorder %v7059_v2, 8.507059e+37  ;;  %v4707_v48 = vpop.f32.mrf.mxu0 }
 0x7c5   : > { %7158 = vst.msk [vmem:[%s13429_s21 + $0xe8] sm:$0xff] %vm1020_vm0, %v7126_v30  ;;  %v7038_v28 = vmul.f32 %v8762_v62, %v7037_v47 }
 0x7c6   : > { %7335 = vst.msk [vmem:[%s13429_s21 + $0x68] sm:$0xff] %vm7321_vm7, %v7252_v39  ;;  %v4078_v58 = vpop.f32.mrf.mxu2 }
 0x7c7   : > { %v7039_v42 = vadd.f32 %v8762_v62, %v7038_v28  ;;  %v4672_v55 = vadd.f32 %v15822_v41, %v4078_v58  ;;  %v15830_v28 = vld [vmem:[#allocation11_spill] sm:$0xff]  ;;  %v15831_v58 = vld [vmem:[#allocation125_spill] sm:$0xff] }
 0x7c8   : > { %v8764_v26 = vpop.eup %8763  ;;  %v15832_v41 = vld [vmem:[#allocation13_spill] sm:$0xff] }
 0x7c9   : > { %v7051_v32 = vmul.f32 %v8764_v26, %v6584_v12  ;;  %v7043_v57 = vsel %vm7042_vm12, %v8762_v62, %v7039_v42  ;;  %v7189_v60 = vmul.f32 %v14500_v14, %v4672_v55  ;;  %vm7056_vm14 = vweird.f32 %v8764_v26 }
 0x7ca   : > { %v14531_v16 = vsel %vm7045_vm13, %v7047_v9, %v7043_v57  ;;  %vm7057_vm1 = vmor %vm7055_vm15, %vm7056_vm14 }
 0x7cb   : > { %v7052_v33 = vsub.f32 1.0, %v7051_v32  ;;  %v7127_v53 = vmul.f32 %v14531_v16, %v4582_v6  ;;  %8098 = vmatmul.msk.f32.gmra.mxu2 %vm3588_vm10, %v15825_v56  ;;  %7281 = vrot.lane.b32.xlu1 %v7189_v60, %s8901_s22  ;;  %v15834_v32 = vld [vmem:[#allocation16_spill] sm:$0xff]  ;;  %v15835_v60 = vld [vmem:[#allocation210_spill] sm:$0xff] }
 0x7cc   : > { %v7260_v50 = vpop.permute.xlu2 %7259 }
 0x7cd   : > { %7159 = vst.msk [vmem:[%s13429_s21 + $0xf0] sm:$0xff] %vm1020_vm0, %v7127_v53  ;;  %v7053_v43 = vmul.f32 %v8764_v26, %v7052_v33  ;;  %v15836_v53 = vld [vmem:[#allocation179_spill] sm:$0xff] }
 0x7ce   : > { %7339 = vst.msk [vmem:[%s13429_s21 + $0x88] sm:$0xff] %vm7321_vm7, %v7260_v50  ;;  %v4081_v62 = vpop.f32.mrf.mxu2  ;;  %v15838_v50 = vld [vmem:[#allocation211_spill] sm:$0xff] }
 0x7cf   : > { %v7054_v37 = vadd.f32 %v8764_v26, %v7053_v43  ;;  %v4675_v40 = vadd.f32 %v15826_v38, %v4081_v62  ;;  %v15837_v43 = vld [vmem:[#allocation19_spill] sm:$0xff] }
 0x7d1   : > { %v7058_v1 = vsel %vm7057_vm1, %v8764_v26, %v7054_v37  ;;  %v7190_v51 = vmul.f32 %v14517_v20, %v4675_v40  ;;  %v15839_v37 = vld [vmem:[#allocation219_spill] sm:$0xff] }
 0x7d2   : > { %v14545_v47 = vsel %vm7060_vm3, %v7062_v13, %v7058_v1  ;;  %v15840_v13 = vld [vmem:[#allocation21_spill] sm:$0xff] }
 0x7d3   : > { %v7128_v30 = vmul.f32 %v14545_v47, %v4585_v59  ;;  %8099 = vmatmul.msk.f32.gmra.mxu2 %vm3588_vm10, %v15829_v46  ;;  %7283 = vrot.lane.b32.xlu2 %v7190_v51, %s8901_s22  ;;  %v15841_v59 = vld [vmem:[#allocation25_spill] sm:$0xff] }
 0x7d4   : > { %v7256_v12 = vpop.permute.xlu0 %7255  ;;  %v15842_v51 = vld [vmem:[#allocation141_spill] sm:$0xff] }
 0x7d5   : > { %7160 = vst.msk [vmem:[%s13429_s21 + $0xf8] sm:$0xff] %vm1020_vm0, %v7128_v30  ;;  %vm7514_vm0 = vcmask 392448  }
 0x7d6   : > { %7337 = vst.msk [vmem:[%s13429_s21 + $0x78] sm:$0xff] %vm7321_vm7, %v7256_v12  ;;  %v4084_v27 = vpop.f32.mrf.mxu2  ;;  %v15843_v12 = vld [vmem:[#allocation23_spill] sm:$0xff] }
 0x7d7   : > { %v4678_v34 = vadd.f32 %v15830_v28, %v4084_v27  ;;  %v15844_v28 = vld [vmem:[#allocation149_spill] sm:$0xff] }
 0x7d9   : > { %v7191_v39 = vmul.f32 %v14531_v16, %v4678_v34 }
 0x7db   : > { %8100 = vmatmul.msk.f32.gmra.mxu2 %vm3588_vm10, %v15831_v58  ;;  %7285 = vrot.lane.b32.xlu0 %v7191_v39, %s8901_s22  ;;  %v4710_v39 = vpop.f32.mrf.mxu0  ;;  %v15845_v58 = vld [vmem:[#allocation187_spill] sm:$0xff] }
 0x7dc   : > { %v7258_v42 = vpop.permute.xlu1 %7257 }
 0x7dd   : > { %7338 = vst.msk [vmem:[%s13429_s21 + $0x80] sm:$0xff] %vm7321_vm7, %v7258_v42 }
 0x7de   : > { %v4087_v26 = vpop.f32.mrf.mxu2 }
 0x7df   : > { %v4681_v55 = vadd.f32 %v15832_v41, %v4087_v26  ;;  %v15846_v41 = vld [vmem:[#allocation27_spill] sm:$0xff] }
 0x7e1   : > { %v7192_v9 = vmul.f32 %v14545_v47, %v4681_v55 }
 0x7e3   : > { %8101 = vmatmul.msk.f32.gmra.mxu2 %vm3588_vm10, %v15833_v15  ;;  %7287 = vrot.lane.b32.xlu1 %v7192_v9, %s8901_s22  ;;  %v15847_v15 = vld [vmem:[#allocation193_spill] sm:$0xff] }
 0x7e5   : > { %v7266_v49 = vpop.permute.xlu2 %7265 }
 0x7e6   : > { %7342 = vst.msk [vmem:[%s13429_s21 + $0xa0] sm:$0xff] %vm7321_vm7, %v7266_v49  ;;  %v4090_v6 = vpop.f32.mrf.mxu2  ;;  %v4713_v49 = vpop.f32.mrf.mxu0 }
 0x7e7   : > { %v4684_v57 = vadd.f32 %v15834_v32, %v4090_v6 }
 0x7e9   : > { %v7354_v33 = vmul.f32 %v15835_v60, %v4684_v57  ;;  %v15848_v57 = vld [vmem:[#allocation30_spill] sm:$0xff] }
 0x7eb   : > { %8102 = vmatmul.msk.f32.gmra.mxu2 %vm3588_vm10, %v15836_v53  ;;  %7418 = vrot.lane.b32.xlu2 %v7354_v33, %s8902_s26  ;;  %v15849_v53 = vld [vmem:[#allocation195_spill] sm:$0xff] }
 0x7ed   : > { %v7262_v56 = vpop.permute.xlu0 %7261 }
 0x7ee   : > { %7340 = vst.msk [vmem:[%s13429_s21 + $0x90] sm:$0xff] %vm7321_vm7, %v7262_v56  ;;  %v4093_v0 = vpop.f32.mrf.mxu2  ;;  %v4716_v56 = vpop.f32.mrf.mxu0 }
 0x7ef   : > { %v4687_v2 = vadd.f32 %v15837_v43, %v4093_v0  ;;  %v15850_v43 = vld [vmem:[#allocation33_spill] sm:$0xff] }
 0x7f1   : > { %v7355_v62 = vmul.f32 %v15838_v50, %v4687_v2 }
 0x7f3   : > { %8103 = vmatmul.msk.f32.gmra.mxu2 %vm3588_vm10, %v15839_v37  ;;  %7420 = vrot.lane.b32.xlu0 %v7355_v62, %s8902_s26  ;;  %v15851_v62 = vld [vmem:[#allocation67_spill] sm:$0xff] }
 0x7f5   : > { %v7264_v38 = vpop.permute.xlu1 %7263 }
 0x7f6   : > { %7341 = vst.msk [vmem:[%s13429_s21 + $0x98] sm:$0xff] %vm7321_vm7, %v7264_v38  ;;  %v4096_v40 = vpop.f32.mrf.mxu2  ;;  %v15852_v38 = vld [vmem:[#allocation35_spill] sm:$0xff] }
 0x7f7   : > { %v4690_v61 = vadd.f32 %v15840_v13, %v4096_v40  ;;  %v4719_v13 = vpop.f32.mrf.mxu0 }
 0x7f9   : > { %v7356_v1 = vmul.f32 %v15841_v59, %v4690_v61  ;;  %v15853_v59 = vld [vmem:[#allocation10_spill] sm:$0xff] }
 0x7fb   : > { %8104 = vmatmul.msk.f32.gmra.mxu2 %vm3588_vm10, %v15842_v51  ;;  %7422 = vrot.lane.b32.xlu1 %v7356_v1, %s8902_s26 }
 0x7fd   : > { %v7272_v30 = vpop.permute.xlu2 %7271 }
 0x7fe   : > { %7345 = vst.msk [vmem:[%s13429_s21 + $0xb8] sm:$0xff] %vm7321_vm7, %v7272_v30  ;;  %v4099_v46 = vpop.f32.mrf.mxu2 }
 0x7ff   : > { %v4693_v27 = vadd.f32 %v15843_v12, %v4099_v46  ;;  %v4722_v46 = vpop.f32.mrf.mxu0  ;;  %v15854_v12 = vld [vmem:[#allocation202_spill] sm:$0xff] }
 0x801   : > { %v7357_v34 = vmul.f32 %v15844_v28, %v4693_v27 }
 0x803   : > { %8105 = vmatmul.msk.f32.gmra.mxu2 %vm3588_vm10, %v15845_v58  ;;  %7424 = vrot.lane.b32.xlu2 %v7357_v34, %s8902_s26  ;;  %v15855_v58 = vld [vmem:[#allocation204_spill] sm:$0xff] }
 0x805   : > { %v7268_v42 = vpop.permute.xlu0 %7267 }
 0x806   : > { %7343 = vst.msk [vmem:[%s13429_s21 + $0xa8] sm:$0xff] %vm7321_vm7, %v7268_v42  ;;  %v4102_v26 = vpop.f32.mrf.mxu2 }
 0x807   : > { %v4696_v55 = vadd.f32 %v15846_v41, %v4102_v26 }
 0x809   : > { %v7358_v9 = vmul.f32 %v13593_v22, %v4696_v55  ;;  %v15856_v55 = vld [vmem:[#allocation208_spill] sm:$0xff] }
 0x80b   : > { %8106 = vmatmul.msk.f32.gmra.mxu2 %vm3588_vm10, %v15847_v15  ;;  %7426 = vrot.lane.b32.xlu0 %v7358_v9, %s8902_s26 }
 0x80d   : > { %v7270_v6 = vpop.permute.xlu1 %7269 }
 0x80e   : > { %7344 = vst.msk [vmem:[%s13429_s21 + $0xb0] sm:$0xff] %vm7321_vm7, %v7270_v6  ;;  %v4105_v32 = vpop.f32.mrf.mxu2 }
 0x80f   : > { %v4699_v60 = vadd.f32 %v15848_v57, %v4105_v32  ;;  %v15857_v32 = vld [vmem:[#allocation68_spill] sm:$0xff] }
 0x811   : > { %v7359_v33 = vmul.f32 %v13629_v35, %v4699_v60 }
 0x813   : > { %8107 = vmatmul.msk.f32.gmra.mxu2 %vm3588_vm10, %v15849_v53  ;;  %7428 = vrot.lane.b32.xlu1 %v7359_v33, %s8902_s26  ;;  %v15858_v53 = vld [vmem:[#allocation12_spill] sm:$0xff] }
 0x815   : > { %v7278_v22 = vpop.permute.xlu2 %7277 }
 0x816   : > { %7348 = vst.msk [vmem:[%s13429_s21 + $0xd0] sm:$0xff] %vm7321_vm7, %v7278_v22  ;;  %v4108_v0 = vpop.f32.mrf.mxu2 }
 0x817   : > { %v4702_v2 = vadd.f32 %v15850_v43, %v4108_v0 }
 0x819   : > { %v7360_v50 = vmul.f32 %v13701_v21, %v4702_v2  ;;  %v15859_v2 = vld [vmem:[#allocation69_spill] sm:$0xff] }
 0x81b   : > { %8108 = vmatmul.msk.f32.gmra.mxu2 %vm3588_vm10, %v15851_v62  ;;  %7430 = vrot.lane.b32.xlu2 %v7360_v50, %s8902_s26 }
 0x81d   : > { %v7274_v35 = vpop.permute.xlu0 %7273 }
 0x81e   : > { %7346 = vst.msk [vmem:[%s13429_s21 + $0xc0] sm:$0xff] %vm7321_vm7, %v7274_v35  ;;  %v4111_v37 = vpop.f32.mrf.mxu2 }
 0x81f   : > { %v4705_v40 = vadd.f32 %v15852_v38, %v4111_v37  ;;  %v15860_v37 = vld [vmem:[#allocation70_spill] sm:$0xff] }
 0x821   : > { %v7361_v61 = vmul.f32 %v13770_v36, %v4705_v40 }
 0x823   : > { %8109 = vmatmul.msk.f32.gmra.mxu2 %vm3588_vm10, %v15853_v59  ;;  %7432 = vrot.lane.b32.xlu0 %v7361_v61, %s8902_s26 }
 0x825   : > { %v7276_v21 = vpop.permute.xlu1 %7275 }
 0x826   : > { %7347 = vst.msk [vmem:[%s13429_s21 + $0xc8] sm:$0xff] %vm7321_vm7, %v7276_v21  ;;  %v4114_v1 = vpop.f32.mrf.mxu2 }
 0x827   : > { %v4708_v51 = vadd.f32 %v4707_v48, %v4114_v1 }
 0x829   : > { %v7362_v30 = vmul.f32 %v13871_v18, %v4708_v51  ;;  %v4725_v18 = vpop.f32.mrf.mxu0 }
 0x82b   : > { %8110 = vmatmul.msk.f32.gmra.mxu2 %vm3588_vm10, %v15854_v12  ;;  %7434 = vrot.lane.b32.xlu1 %v7362_v30, %s8902_s26 }
 0x82d   : > { %v7284_v36 = vpop.permute.xlu2 %7283 }
 0x82e   : > { %7351 = vst.msk [vmem:[%s13429_s21 + $0xe8] sm:$0xff] %vm7321_vm7, %v7284_v36  ;;  %v4117_v27 = vpop.f32.mrf.mxu2 }
 0x82f   : > { %v4711_v28 = vadd.f32 %v4710_v39, %v4117_v27 }
 0x831   : > { %v7363_v34 = vmul.f32 %v13932_v5, %v4711_v28  ;;  %v4728_v39 = vpop.f32.mrf.mxu0 }
 0x833   : > { %8111 = vmatmul.msk.f32.gmra.mxu2 %vm3588_vm10, %v15855_v58  ;;  %7436 = vrot.lane.b32.xlu2 %v7363_v34, %s8902_s26 }
 0x835   : > { %v7280_v48 = vpop.permute.xlu0 %7279 }
 0x836   : > { %7349 = vst.msk [vmem:[%s13429_s21 + $0xd8] sm:$0xff] %vm7321_vm7, %v7280_v48  ;;  %v4120_v42 = vpop.f32.mrf.mxu2 }
 0x837   : > { %v4714_v26 = vadd.f32 %v4713_v49, %v4120_v42 }
 0x839   : > { %v7364_v41 = vmul.f32 %v14029_v10, %v4714_v26  ;;  %v4731_v60 = vpop.f32.mrf.mxu0 }
 0x83b   : > { %8112 = vmatmul.msk.f32.gmra.mxu2 %vm3588_vm10, %v15856_v55  ;;  %7438 = vrot.lane.b32.xlu0 %v7364_v41, %s8902_s26 }
 0x83d   : > { %v7282_v5 = vpop.permute.xlu1 %7281 }
 0x83e   : > { %7350 = vst.msk [vmem:[%s13429_s21 + $0xe0] sm:$0xff] %vm7321_vm7, %v7282_v5  ;;  %v4123_v9 = vpop.f32.mrf.mxu2 }
 0x83f   : > { %v4717_v15 = vadd.f32 %v4716_v56, %v4123_v9 }
 0x841   : > { %v7365_v6 = vmul.f32 %v14095_v52, %v4717_v15  ;;  %v4734_v43 = vpop.f32.mrf.mxu0 }
 0x843   : > { %8113 = vmatmul.msk.f32.gmra.mxu2 %vm3588_vm10, %v15857_v32  ;;  %7440 = vrot.lane.b32.xlu1 %v7365_v6, %s8902_s26 }
 0x845   : > { %v7419_v10 = vpop.permute.xlu2 %7418 }
 0x846   : > { %7515 = vst.msk [vmem:[%s13429_s21] sm:$0xff] %vm7514_vm0, %v7419_v10  ;;  %v4126_v49 = vpop.f32.mrf.mxu2 }
 0x847   : > { %v4720_v57 = vadd.f32 %v4719_v13, %v4126_v49 }
 0x849   : > { %v7366_v33 = vmul.f32 %v14165_v54, %v4720_v57 }
 0x84b   : > { %8114 = vmatmul.msk.f32.gmra.mxu2 %vm3588_vm10, %v15858_v53  ;;  %7442 = vrot.lane.b32.xlu2 %v7366_v33, %s8902_s26 }
 0x84d   : > { %v7286_v52 = vpop.permute.xlu0 %7285 }
 0x84e   : > { %7352 = vst.msk [vmem:[%s13429_s21 + $0xf0] sm:$0xff] %vm7321_vm7, %v7286_v52  ;;  %v4129_v22 = vpop.f32.mrf.mxu2 }
 0x84f   : > { %v4723_v56 = vadd.f32 %v4722_v46, %v4129_v22 }
 0x851   : > { %v7367_v0 = vmul.f32 %v14190_v29, %v4723_v56  ;;  %v4737_v29 = vpop.f32.mrf.mxu0 }
 0x853   : > { %8115 = vmatmul.msk.f32.gmra.mxu2 %vm3588_vm10, %v15859_v2  ;;  %7444 = vrot.lane.b32.xlu0 %v7367_v0, %s8902_s26 }
 0x855   : > { %v7288_v54 = vpop.permute.xlu1 %7287 }
 0x856   : > { %7353 = vst.msk [vmem:[%s13429_s21 + $0xf8] sm:$0xff] %vm7321_vm7, %v7288_v54  ;;  %v4132_v50 = vpop.f32.mrf.mxu2 }
 0x857   : > { %v4726_v62 = vadd.f32 %v4725_v18, %v4132_v50 }
 0x859   : > { %v7368_v35 = vmul.f32 %v14229_v45, %v4726_v62  ;;  %v4740_v21 = vpop.f32.mrf.mxu0 }
 0x85b   : > { %8116 = vmatmul.msk.f32.gmra.mxu2 %vm3588_vm10, %v15860_v37  ;;  %7446 = vrot.lane.b32.xlu1 %v7368_v35, %s8902_s26 }
 0x85d   : > { %v7425_v38 = vpop.permute.xlu2 %7424 }
 0x85e   : > { %7518 = vst.msk [vmem:[%s13429_s21 + $0x18] sm:$0xff] %vm7514_vm0, %v7425_v38  ;;  %v4135_v40 = vpop.f32.mrf.mxu2 }
 0x85f   : > { %v4729_v13 = vadd.f32 %v4728_v39, %v4135_v40 }
 0x861   : > { %v7369_v61 = vmul.f32 %v14252_v4, %v4729_v13  ;;  %v4743_v4 = vpop.f32.mrf.mxu0 }
 0x863   : > { %7448 = vrot.lane.b32.xlu2 %v7369_v61, %s8902_s26 }
 0x865   : > { %v7421_v59 = vpop.permute.xlu0 %7420 }
 0x866   : > { %7516 = vst.msk [vmem:[%s13429_s21 + $0x8] sm:$0xff] %vm7514_vm0, %v7421_v59  ;;  %v4138_v45 = vpop.f32.mrf.mxu2 }
 0x867   : > { %v4732_v1 = vadd.f32 %v4731_v60, %v4138_v45 }
 0x869   : > { %v7370_v51 = vmul.f32 %v14266_v24, %v4732_v1  ;;  %v4746_v58 = vpop.f32.mrf.mxu0 }
 0x86b   : > { %7450 = vrot.lane.b32.xlu0 %v7370_v51, %s8902_s26 }
 0x86d   : > { %v7423_v30 = vpop.permute.xlu1 %7422 }
 0x86e   : > { %7517 = vst.msk [vmem:[%s13429_s21 + $0x10] sm:$0xff] %vm7514_vm0, %v7423_v30  ;;  %v4141_v46 = vpop.f32.mrf.mxu2 }
 0x86f   : > { %v4735_v12 = vadd.f32 %v4734_v43, %v4141_v46 }
 0x871   : > { %v7371_v36 = vmul.f32 %v14283_v7, %v4735_v12  ;;  %v4749_v26 = vpop.f32.mrf.mxu0 }
 0x873   : > { %7452 = vrot.lane.b32.xlu1 %v7371_v36, %s8902_s26 }
 0x875   : > { %v7431_v27 = vpop.permute.xlu2 %7430 }
 0x876   : > { %7521 = vst.msk [vmem:[%s13429_s21 + $0x30] sm:$0xff] %vm7514_vm0, %v7431_v27  ;;  %v4144_v28 = vpop.f32.mrf.mxu2 }
 0x877   : > { %v4738_v34 = vadd.f32 %v4737_v29, %v4144_v28 }
 0x879   : > { %v7372_v24 = vmul.f32 %v14302_v44, %v4738_v34  ;;  %v4752_v9 = vpop.f32.mrf.mxu0 }
 0x87b   : > { %7454 = vrot.lane.b32.xlu2 %v7372_v24, %s8902_s26 }
 0x87d   : > { %v7427_v18 = vpop.permute.xlu0 %7426 }
 0x87e   : > { %7519 = vst.msk [vmem:[%s13429_s21 + $0x20] sm:$0xff] %vm7514_vm0, %v7427_v18  ;;  %v4147_v48 = vpop.f32.mrf.mxu2 }
 0x87f   : > { %v4741_v42 = vadd.f32 %v4740_v21, %v4147_v48 }
 0x881   : > { %v7373_v7 = vmul.f32 %v14316_v3, %v4741_v42 }
 0x883   : > { %7456 = vrot.lane.b32.xlu0 %v7373_v7, %s8902_s26 }
 0x885   : > { %v7429_v41 = vpop.permute.xlu1 %7428 }
 0x886   : > { %7520 = vst.msk [vmem:[%s13429_s21 + $0x28] sm:$0xff] %vm7514_vm0, %v7429_v41  ;;  %v4150_v55 = vpop.f32.mrf.mxu2 }
 0x887   : > { %v4744_v44 = vadd.f32 %v4743_v4, %v4150_v55 }
 0x889   : > { %v7374_v5 = vmul.f32 %v14333_v19, %v4744_v44  ;;  %v4755_v19 = vpop.f32.mrf.mxu0 }
 0x88b   : > { %7458 = vrot.lane.b32.xlu1 %v7374_v5, %s8902_s26 }
 0x88d   : > { %v7437_v39 = vpop.permute.xlu2 %7436 }
 0x88e   : > { %7524 = vst.msk [vmem:[%s13429_s21 + $0x48] sm:$0xff] %vm7514_vm0, %v7437_v39  ;;  %v4153_v15 = vpop.f32.mrf.mxu2 }
 0x88f   : > { %v4747_v3 = vadd.f32 %v4746_v58, %v4153_v15 }
 0x891   : > { %v7375_v6 = vmul.f32 %v14353_v31, %v4747_v3  ;;  %v4758_v52 = vpop.f32.mrf.mxu0 }
 0x893   : > { %7460 = vrot.lane.b32.xlu2 %v7375_v6, %s8902_s26 }
 0x895   : > { %v7433_v32 = vpop.permute.xlu0 %7432 }
 0x896   : > { %7522 = vst.msk [vmem:[%s13429_s21 + $0x38] sm:$0xff] %vm7514_vm0, %v7433_v32  ;;  %v4156_v10 = vpop.f32.mrf.mxu2 }
 0x897   : > { %v4750_v49 = vadd.f32 %v4749_v26, %v4156_v10 }
 0x899   : > { %v7376_v57 = vmul.f32 %v14378_v63, %v4750_v49  ;;  %v4761_v43 = vpop.f32.mrf.mxu0 }
 0x89b   : > { %7462 = vrot.lane.b32.xlu0 %v7376_v57, %s8902_s26 }
 0x89d   : > { %v7435_v60 = vpop.permute.xlu1 %7434 }
 0x89e   : > { %7523 = vst.msk [vmem:[%s13429_s21 + $0x40] sm:$0xff] %vm7514_vm0, %v7435_v60  ;;  %v4159_v33 = vpop.f32.mrf.mxu2 }
 0x89f   : > { %v4753_v53 = vadd.f32 %v4752_v9, %v4159_v33 }
 0x8a1   : > { %v7377_v31 = vmul.f32 %v14395_v25, %v4753_v53  ;;  %v4764_v35 = vpop.f32.mrf.mxu0 }
 0x8a3   : > { %7464 = vrot.lane.b32.xlu1 %v7377_v31, %s8902_s26 }
 0x8a5   : > { %v7443_v22 = vpop.permute.xlu2 %7442 }
 0x8a6   : > { %7527 = vst.msk [vmem:[%s13429_s21 + $0x60] sm:$0xff] %vm7514_vm0, %v7443_v22  ;;  %v4162_v56 = vpop.f32.mrf.mxu2 }
 0x8a7   : > { %v4756_v0 = vadd.f32 %v4755_v19, %v4162_v56 }
 0x8a9   : > { %v7378_v63 = vmul.f32 %v14417_v11, %v4756_v0 }
 0x8ab   : > { %7466 = vrot.lane.b32.xlu2 %v7378_v63, %s8902_s26 }
 0x8ad   : > { %v7439_v2 = vpop.permute.xlu0 %7438 }
 0x8ae   : > { %7525 = vst.msk [vmem:[%s13429_s21 + $0x50] sm:$0xff] %vm7514_vm0, %v7439_v2  ;;  %v4165_v54 = vpop.f32.mrf.mxu2 }
 0x8af   : > { %v4759_v25 = vadd.f32 %v4758_v52, %v4165_v54 }
 0x8b1   : > { %v7379_v50 = vmul.f32 %v14433_v23, %v4759_v25  ;;  %v4767_v23 = vpop.f32.mrf.mxu0 }
 0x8b3   : > { %7468 = vrot.lane.b32.xlu0 %v7379_v50, %s8902_s26 }
 0x8b5   : > { %v7441_v62 = vpop.permute.xlu1 %7440 }
 0x8b6   : > { %7526 = vst.msk [vmem:[%s13429_s21 + $0x58] sm:$0xff] %vm7514_vm0, %v7441_v62  ;;  %v4168_v37 = vpop.f32.mrf.mxu2 }
 0x8b7   : > { %v4762_v11 = vadd.f32 %v4761_v43, %v4168_v37 }
 0x8b9   : > { %v7380_v29 = vmul.f32 %v14456_v8, %v4762_v11  ;;  %v4770_v1 = vpop.f32.mrf.mxu0 }
 0x8bb   : > { %7470 = vrot.lane.b32.xlu1 %v7380_v29, %s8902_s26 }
 0x8bd   : > { %v7449_v38 = vpop.permute.xlu2 %7448 }
 0x8be   : > { %7530 = vst.msk [vmem:[%s13429_s21 + $0x78] sm:$0xff] %vm7514_vm0, %v7449_v38  ;;  %v4171_v40 = vpop.f32.mrf.mxu2 }
 0x8bf   : > { %v4765_v13 = vadd.f32 %v4764_v35, %v4171_v40 }
 0x8c1   : > { %v7381_v61 = vmul.f32 %v14481_v17, %v4765_v13  ;;  %v4773_v12 = vpop.f32.mrf.mxu0 }
 0x8c3   : > { %7472 = vrot.lane.b32.xlu2 %v7381_v61, %s8902_s26 }
 0x8c5   : > { %v7445_v59 = vpop.permute.xlu0 %7444 }
 0x8c6   : > { %7528 = vst.msk [vmem:[%s13429_s21 + $0x68] sm:$0xff] %vm7514_vm0, %v7445_v59  ;;  %v4174_v21 = vpop.f32.mrf.mxu2 }
 0x8c7   : > { %v4768_v45 = vadd.f32 %v4767_v23, %v4174_v21 }
 0x8c9   : > { %v7382_v8 = vmul.f32 %v14500_v14, %v4768_v45  ;;  %v4776_v34 = vpop.f32.mrf.mxu0 }
 0x8cb   : > { %7474 = vrot.lane.b32.xlu0 %v7382_v8, %s8902_s26 }
 0x8cd   : > { %v7447_v51 = vpop.permute.xlu1 %7446 }
 0x8ce   : > { %7529 = vst.msk [vmem:[%s13429_s21 + $0x70] sm:$0xff] %vm7514_vm0, %v7447_v51  ;;  %v4177_v30 = vpop.f32.mrf.mxu2 }
 0x8cf   : > { %v4771_v46 = vadd.f32 %v4770_v1, %v4177_v30 }
 0x8d1   : > { %v7383_v17 = vmul.f32 %v14517_v20, %v4771_v46 }
 0x8d3   : > { %7476 = vrot.lane.b32.xlu1 %v7383_v17, %s8902_s26 }
 0x8d5   : > { %v7455_v4 = vpop.permute.xlu2 %7454 }
 0x8d6   : > { %7533 = vst.msk [vmem:[%s13429_s21 + $0x90] sm:$0xff] %vm7514_vm0, %v7455_v4  ;;  %v4180_v14 = vpop.f32.mrf.mxu2 }
 0x8d7   : > { %v4774_v36 = vadd.f32 %v4773_v12, %v4180_v14 }
 0x8d9   : > { %v7384_v27 = vmul.f32 %v14531_v16, %v4774_v36 }
 0x8db   : > { %7478 = vrot.lane.b32.xlu2 %v7384_v27, %s8902_s26 }
 0x8dd   : > { %v7451_v28 = vpop.permute.xlu0 %7450 }
 0x8de   : > { %7531 = vst.msk [vmem:[%s13429_s21 + $0x80] sm:$0xff] %vm7514_vm0, %v7451_v28  ;;  %v4183_v20 = vpop.f32.mrf.mxu2 }
 0x8df   : > { %v4777_v24 = vadd.f32 %v4776_v34, %v4183_v20 }
 0x8e1   : > { %v7385_v58 = vmul.f32 %v14545_v47, %v4777_v24 }
 0x8e3   : > { %7480 = vrot.lane.b32.xlu0 %v7385_v58, %s8902_s26 }
 0x8e5   : > { %v7453_v18 = vpop.permute.xlu1 %7452 }
 0x8e6   : > { %7532 = vst.msk [vmem:[%s13429_s21 + $0x88] sm:$0xff] %vm7514_vm0, %v7453_v18 }
 0x8ed   : > { %v7461_v16 = vpop.permute.xlu2 %7460 }
 0x8ee   : > { %7536 = vst.msk [vmem:[%s13429_s21 + $0xa8] sm:$0xff] %vm7514_vm0, %v7461_v16 }
 0x8f5   : > { %v7457_v48 = vpop.permute.xlu0 %7456 }
 0x8f6   : > { %7534 = vst.msk [vmem:[%s13429_s21 + $0x98] sm:$0xff] %vm7514_vm0, %v7457_v48 }
 0x8fd   : > { %v7459_v42 = vpop.permute.xlu1 %7458 }
 0x8fe   : > { %7535 = vst.msk [vmem:[%s13429_s21 + $0xa0] sm:$0xff] %vm7514_vm0, %v7459_v42 }
 0x905   : > { %v7467_v47 = vpop.permute.xlu2 %7466 }
 0x906   : > { %7539 = vst.msk [vmem:[%s13429_s21 + $0xc0] sm:$0xff] %vm7514_vm0, %v7467_v47 }
 0x90d   : > { %v7463_v7 = vpop.permute.xlu0 %7462 }
 0x90e   : > { %7537 = vst.msk [vmem:[%s13429_s21 + $0xb0] sm:$0xff] %vm7514_vm0, %v7463_v7 }
 0x915   : > { %v7465_v26 = vpop.permute.xlu1 %7464 }
 0x916   : > { %7538 = vst.msk [vmem:[%s13429_s21 + $0xb8] sm:$0xff] %vm7514_vm0, %v7465_v26 }
 0x91d   : > { %v7473_v41 = vpop.permute.xlu2 %7472 }
 0x91e   : > { %7542 = vst.msk [vmem:[%s13429_s21 + $0xd8] sm:$0xff] %vm7514_vm0, %v7473_v41 }
 0x925   : > { %v7469_v55 = vpop.permute.xlu0 %7468 }
 0x926   : > { %7540 = vst.msk [vmem:[%s13429_s21 + $0xc8] sm:$0xff] %vm7514_vm0, %v7469_v55 }
 0x92d   : > { %v7471_v44 = vpop.permute.xlu1 %7470 }
 0x92e   : > { %7541 = vst.msk [vmem:[%s13429_s21 + $0xd0] sm:$0xff] %vm7514_vm0, %v7471_v44 }
 0x935   : > { %v7479_v5 = vpop.permute.xlu2 %7478 }
 0x936   : > { %7545 = vst.msk [vmem:[%s13429_s21 + $0xf0] sm:$0xff] %vm7514_vm0, %v7479_v5 }
 0x93d   : > { %v7475_v39 = vpop.permute.xlu0 %7474 }
 0x93e   : > { %7543 = vst.msk [vmem:[%s13429_s21 + $0xe0] sm:$0xff] %vm7514_vm0, %v7475_v39 }
 0x945   : > { %v7477_v9 = vpop.permute.xlu1 %7476 }
 0x946   : > { %7544 = vst.msk [vmem:[%s13429_s21 + $0xe8] sm:$0xff] %vm7514_vm0, %v7477_v9 }
 0x955   : > { %v7481_v15 = vpop.permute.xlu0 %7480 }
 0x956   : > { %7546 = vst.msk [vmem:[%s13429_s21 + $0xf8] sm:$0xff] %vm7514_vm0, %v7481_v15 }
 0x957 PF: > { %p22_p9 = scmp.ge.s32.totalorder %s8995_s17, 4   ;;  %s15861_s29 = smov %s8895_s30 }
 0x958   : > { %s15862_s30 = smov %s9004_s20  ;;  %s15863_s15 = smov %s8995_s17 }
 0x959   :  { %24 = sbr.rel (!%p22_p9) target bundleno = 2 (0x2), region = 160 }

</bundles_post_ra>
